<compile_context>
chip_gen: v5e
topology: v5e:2x2
jax: 0.10.0
libtpu: 0.0.40
codegen_flags: <defaults>
</compile_context>

<pallas_src>
import functools

import jax
import jax.numpy as jnp
import numpy as np
from jax.experimental import pallas as pl
from jax.experimental.pallas import tpu as pltpu


# ---------------------------------------------------------------------------
# Fused SSH kernel: three chained 3x3 conv+BN+act stages, one batch elem/step
# ---------------------------------------------------------------------------
def _ssh_fused_kernel(x_ref, wA_ref, sbsA_ref, wB_ref, sbsB_ref, wC_ref,
                      sbsC_ref, o_ref, c551_ref, c772_ref,
                      *, H, W, tH, Cin, oc2, oc4, mxu_dtype):
    # x_ref:            (1, H+2, W+2, Cin)  padded NHWC image (resident per batch)
    # w*_ref:           (9, Cin_s, Cout_s)  per-tap weights, tap index = dy*3+dx
    # sbs*_ref:         (3, 1, Cout_s)      [scale; bias; leaky-slope] (folded BN)
    # o_ref:            (1, out_ch, H*W)    NCHW-native, lane-dense output block
    # c551_ref/c772_ref:(1, H+2, W+2, oc4)  f32 padded intermediates in VMEM
    R = H // tH

    def conv_stage(src_ref, w_ref, sbs_ref, cin, cout, r):
        """3x3 conv (stride 1, pad 1, no bias) + folded BN + per-channel leaky
        ReLU for output rows [r*tH, (r+1)*tH).  Returns (tH*W, cout) f32."""
        row0 = r * tH
        acc = jnp.zeros((tH * W, cout), jnp.float32)
        for dy in range(3):
            # One band load per dy; the dx taps are sliced from the register
            # value (3 loads per band instead of 9 ref loads).
            band = src_ref[0, row0 + dy:row0 + dy + tH, :, :]  # (tH, W+2, cin)
            band = band.astype(mxu_dtype)
            for dx in range(3):
                xs = band[:, dx:dx + W, :].reshape(tH * W, cin)
                # TODO(synk): merge the 3 dx taps along the contraction dim
                # (K = 3*cin) via a lane concat to cut vmatmul pushes 3x for
                # small cin, once unaligned lane concat is verified everywhere.
                acc = acc + jnp.dot(xs, w_ref[dy * 3 + dx],
                                    preferred_element_type=jnp.float32)
        y = acc * sbs_ref[0] + sbs_ref[1]           # folded-BN affine (f32)
        return jnp.where(y > 0, y, sbs_ref[2] * y)  # per-channel leaky / relu

    # Zero the intermediate scratch: the 1-pixel halo must stay zero; the
    # interior is fully overwritten below (cheap, keeps batches independent).
    c551_ref[...] = jnp.zeros_like(c551_ref)
    c772_ref[...] = jnp.zeros_like(c772_ref)

    # Stage A (from x): [conv3X3 -> terminal relu | conv5X5_1 -> leaky]
    for r in range(R):
        y = conv_stage(x_ref, wA_ref, sbsA_ref, Cin, oc2 + oc4, r)
        o_ref[0, 0:oc2, r * tH * W:(r + 1) * tH * W] = (
            jnp.transpose(y[:, :oc2]).astype(o_ref.dtype))
        c551_ref[0, 1 + r * tH:1 + (r + 1) * tH, 1:W + 1, :] = (
            y[:, oc2:].reshape(tH, W, oc4).astype(c551_ref.dtype))

    # Stage B (from c551): [conv5X5_2 -> terminal relu | conv7X7_2 -> leaky]
    for r in range(R):
        y = conv_stage(c551_ref, wB_ref, sbsB_ref, oc4, 2 * oc4, r)
        o_ref[0, oc2:oc2 + oc4, r * tH * W:(r + 1) * tH * W] = (
            jnp.transpose(y[:, :oc4]).astype(o_ref.dtype))
        c772_ref[0, 1 + r * tH:1 + (r + 1) * tH, 1:W + 1, :] = (
            y[:, oc4:].reshape(tH, W, oc4).astype(c772_ref.dtype))

    # Stage C (from c772): conv7x7_3 -> terminal relu
    for r in range(R):
        y = conv_stage(c772_ref, wC_ref, sbsC_ref, oc4, oc4, r)
        o_ref[0, oc2 + oc4:oc2 + 2 * oc4, r * tH * W:(r + 1) * tH * W] = (
            jnp.transpose(y).astype(o_ref.dtype))


# ---------------------------------------------------------------------------
# Helpers: row tiling, BN folding / branch packing, VMEM limit
# ---------------------------------------------------------------------------
def _pick_row_tile(H, W):
    """Smallest divisor tH of H with (tH*W) % 8 == 0 and tH*W >= 128: keeps the
    per-band accumulator small while making output stores lane-dense.  Falls
    back to the full image for awkward shapes (still correct)."""
    for t in range(1, H + 1):
        if H % t == 0 and (t * W) % 8 == 0 and t * W >= 128:
            return t
    return H


def _fold_bn_pack(branches, slopes, eps=1e-5, compute_dtype=jnp.bfloat16):
    """Fold eval-mode BN into per-channel scale/bias, concatenate branches that
    share an input along Cout, and pack [scale; bias; slope] into (3,1,Cout)."""
    w9s, scs, bis, sls = [], [], [], []
    for p, slope in zip(branches, slopes):
        cout, cin = p["w"].shape[0], p["w"].shape[1]
        scale = p["gamma"] / jnp.sqrt(p["var"] + eps)      # (Cout,)
        bias = p["beta"] - p["mean"] * scale               # (Cout,)
        # (Cout, Cin, 3, 3) -> (ky, kx, Cin, Cout) -> (9, Cin, Cout)
        w9 = jnp.transpose(p["w"], (2, 3, 1, 0)).reshape(9, cin, cout)
        w9s.append(w9)
        scs.append(scale)
        bis.append(bias)
        sls.append(jnp.full((cout,), slope, jnp.float32))
    w = jnp.concatenate(w9s, axis=-1).astype(compute_dtype)
    sbs = jnp.stack([jnp.concatenate(scs), jnp.concatenate(bis),
                     jnp.concatenate(sls)]).astype(jnp.float32)
    return w, sbs[:, None, :]          # (9, Cin, Cout_total), (3, 1, Cout_total)


def _vmem_limit_bytes(resident_bytes):
    """Generation-aware VMEM limit: sized from the actual resident blocks with
    headroom, clamped to 3/4 of the device's VMEM (96 MiB-class on v5e/v6e,
    48 MiB-class on v7x)."""
    try:
        cap = int(pltpu.get_tpu_info().vmem_capacity_bytes)
    except Exception:  # pragma: no cover - conservative fallback (v7x per-TC)
        cap = 64 << 20
    want = max(2 * int(resident_bytes) + (8 << 20), 32 << 20)
    return int(min(want, cap * 3 // 4))


# ---------------------------------------------------------------------------
# SSH forward (NCHW in / NCHW out, matching PyTorch)
# ---------------------------------------------------------------------------
def ssh_forward(x_nchw, params, out_channel, *, compute_dtype=jnp.bfloat16):
    leaky = 0.1 if out_channel <= 64 else 0.0
    B, Cin, H, W = x_nchw.shape
    oc2, oc4 = out_channel // 2, out_channel // 4
    tH = _pick_row_tile(H, W)

    # NCHW -> NHWC, zero-pad once (pad=1), cast to the MXU input dtype.
    # TODO(synk): for very small Cin a fully NCHW-native (W-on-lane) input
    # layout would also make the input loads lane-dense.
    x_pad = jnp.pad(jnp.transpose(x_nchw, (0, 2, 3, 1)).astype(compute_dtype),
                    ((0, 0), (1, 1), (1, 1), (0, 0)))

    # Branches sharing an input are fused along Cout (5 convs -> 3 stages).
    # Terminal branches get slope 0 (the final F.relu commutes with the channel
    # concat and those channels have no prior activation); intermediates get
    # the module's leaky slope.
    wA, sbsA = _fold_bn_pack([params["conv3X3"], params["conv5X5_1"]],
                             [0.0, leaky], compute_dtype=compute_dtype)
    wB, sbsB = _fold_bn_pack([params["conv5X5_2"], params["conv7X7_2"]],
                             [0.0, leaky], compute_dtype=compute_dtype)
    wC, sbsC = _fold_bn_pack([params["conv7x7_3"]], [0.0],
                             compute_dtype=compute_dtype)

    kernel = functools.partial(_ssh_fused_kernel, H=H, W=W, tH=tH, Cin=Cin,
                               oc2=oc2, oc4=oc4, mxu_dtype=compute_dtype)

    itemsize = jnp.dtype(compute_dtype).itemsize
    small_bytes = sum(int(a.size) * a.dtype.itemsize
                      for a in (wA, sbsA, wB, sbsB, wC, sbsC))
    resident = ((H + 2) * (W + 2) * Cin * itemsize          # input block
                + out_channel * H * W * 4                    # output block
                + 2 * (H + 2) * (W + 2) * oc4 * 4            # f32 scratch
                + small_bytes)
    flops = 2 * B * H * W * 9 * (Cin * (oc2 + oc4)
                                 + oc4 * (2 * oc4) + oc4 * oc4)
    bytes_accessed = (int(x_pad.size) * itemsize
                      + B * out_channel * H * W * 4 + small_bytes)

    out = pl.pallas_call(
        kernel,
        out_shape=jax.ShapeDtypeStruct((B, out_channel, H * W), jnp.float32),
        grid_spec=pltpu.PrefetchScalarGridSpec(
            num_scalar_prefetch=0,
            grid=(B,),
            in_specs=[
                # Whole padded image per batch element (resident for the step).
                pl.BlockSpec((1, H + 2, W + 2, Cin), lambda b: (b, 0, 0, 0)),
                pl.BlockSpec(wA.shape, lambda b: (0, 0, 0)),
                pl.BlockSpec(sbsA.shape, lambda b: (0, 0, 0)),
                pl.BlockSpec(wB.shape, lambda b: (0, 0, 0)),
                pl.BlockSpec(sbsB.shape, lambda b: (0, 0, 0)),
                pl.BlockSpec(wC.shape, lambda b: (0, 0, 0)),
                pl.BlockSpec(sbsC.shape, lambda b: (0, 0, 0)),
            ],
            out_specs=pl.BlockSpec((1, out_channel, H * W),
                                   lambda b: (b, 0, 0)),
            scratch_shapes=[
                pltpu.VMEM((1, H + 2, W + 2, oc4), jnp.float32),  # c551 (padded)
                pltpu.VMEM((1, H + 2, W + 2, oc4), jnp.float32),  # c772 (padded)
            ],
        ),
        compiler_params=pltpu.CompilerParams(
            dimension_semantics=("parallel",),
            vmem_limit_bytes=_vmem_limit_bytes(resident),
        ),
        cost_estimate=pl.CostEstimate(flops=flops, transcendentals=0,
                                      bytes_accessed=bytes_accessed),
    )(x_pad, wA, sbsA, wB, sbsB, wC, sbsC)

    return out.reshape(B, out_channel, H, W)   # already NCHW -> no transpose


# ---------------------------------------------------------------------------
# Parameter construction (deterministic, synthetic)
# ---------------------------------------------------------------------------
def _make_conv_bn_params(key, cin, cout):
    kw, kg, kb, km, kv = jax.random.split(key, 5)
    w = jax.random.normal(kw, (cout, cin, 3, 3), jnp.float32) * 0.1
    gamma = 1.0 + 0.1 * jax.random.normal(kg, (cout,), jnp.float32)
    beta = 0.1 * jax.random.normal(kb, (cout,), jnp.float32)
    mean = 0.1 * jax.random.normal(km, (cout,), jnp.float32)
    var = jnp.abs(jax.random.normal(kv, (cout,), jnp.float32)) + 0.5
    return dict(w=w, gamma=gamma, beta=beta, mean=mean, var=var)


def make_ssh_params(key, in_channel, out_channel):
    assert out_channel % 4 == 0
    keys = jax.random.split(key, 5)
    return dict(
        conv3X3=_make_conv_bn_params(keys[0], in_channel, out_channel // 2),
        conv5X5_1=_make_conv_bn_params(keys[1], in_channel, out_channel // 4),
        conv5X5_2=_make_conv_bn_params(keys[2], out_channel // 4, out_channel // 4),
        conv7X7_2=_make_conv_bn_params(keys[3], out_channel // 4, out_channel // 4),
        conv7x7_3=_make_conv_bn_params(keys[4], out_channel // 4, out_channel // 4),
    )


# ---------------------------------------------------------------------------
# Pure-JAX reference (for correctness check)
# ---------------------------------------------------------------------------
def _conv_bn_ref(x_nchw, p, eps=1e-5):
    y = jax.lax.conv_general_dilated(
        x_nchw, p["w"], window_strides=(1, 1), padding=((1, 1), (1, 1)),
        dimension_numbers=("NCHW", "OIHW", "NCHW"))
    scale = (p["gamma"] / jnp.sqrt(p["var"] + eps)).reshape(1, -1, 1, 1)
    bias = (p["beta"] - p["mean"] * p["gamma"] / jnp.sqrt(p["var"] + eps)
            ).reshape(1, -1, 1, 1)
    return y * scale + bias


def _leaky_relu(v, slope):
    return jnp.where(v > 0, v, slope * v)


def ssh_forward_ref(x_nchw, params, out_channel):
    leaky = 0.1 if out_channel <= 64 else 0.0
    conv3x3 = _conv_bn_ref(x_nchw, params["conv3X3"])
    c551 = _leaky_relu(_conv_bn_ref(x_nchw, params["conv5X5_1"]), leaky)
    conv5x5 = _conv_bn_ref(c551, params["conv5X5_2"])
    c772 = _leaky_relu(_conv_bn_ref(c551, params["conv7X7_2"]), leaky)
    conv7x7 = _conv_bn_ref(c772, params["conv7x7_3"])
    out = jnp.concatenate([conv3x3, conv5x5, conv7x7], axis=1)
    return jnp.maximum(out, 0.0)


# ---------------------------------------------------------------------------
if __name__ == "__main__":
    B, Cin, H, W = 2, 8, 16, 16
    out_channel = 16  # % 4 == 0, <= 64 -> leaky = 0.1

    key = jax.random.PRNGKey(0)
    kx, kp = jax.random.split(key)
    x = jax.random.normal(kx, (B, Cin, H, W), jnp.float32)
    params = make_ssh_params(kp, Cin, out_channel)

    ref = jax.block_until_ready(ssh_forward_ref(x, params, out_channel))

    # f32 MXU path: tight check of the fused-kernel logic.
    out_f32 = jax.block_until_ready(
        ssh_forward(x, params, out_channel, compute_dtype=jnp.float32))
    np.testing.assert_allclose(np.asarray(out_f32), np.asarray(ref),
                               rtol=1e-4, atol=1e-4)

    # Default perf path: bf16 MXU inputs, f32 accumulation / f32 intermediates.
    out = jax.block_until_ready(
        ssh_forward(x, params, out_channel, compute_dtype=jnp.bfloat16))
    np.testing.assert_allclose(np.asarray(out), np.asarray(ref),
                               rtol=5e-2, atol=5e-2)

    assert out.shape == (B, out_channel, H, W)
    print("KERNEL_OK")
</pallas_src>

<mosaic_0001>
module attributes {stable_mosaic.version = 11 : i64} {
  func.func @_ssh_fused_kernel(%arg0: i32, %arg1: memref<1x18x18x8xf32, #tpu.memory_space<vmem>>, %arg2: memref<9x8x12xf32, #tpu.memory_space<vmem>>, %arg3: memref<3x1x12xf32, #tpu.memory_space<vmem>>, %arg4: memref<9x4x8xf32, #tpu.memory_space<vmem>>, %arg5: memref<3x1x8xf32, #tpu.memory_space<vmem>>, %arg6: memref<9x4x4xf32, #tpu.memory_space<vmem>>, %arg7: memref<3x1x4xf32, #tpu.memory_space<vmem>>, %arg8: memref<1x16x256xf32, #tpu.memory_space<vmem>>, %arg9: memref<1x18x18x4xf32, #tpu.memory_space<vmem>>, %arg10: memref<1x18x18x4xf32, #tpu.memory_space<vmem>>) attributes {dimension_semantics = [#tpu.dimension_semantics<parallel>], iteration_bounds = array<i64: 2>, scalar_prefetch = 0 : i64, scratch_operands = 2 : i64, tpu.core_type = #tpu.core_type<tc>, window_params = [{transform_indices = @transform_0, window_bounds = array<i64: 1, 18, 18, 8>}, {pipeline_mode = #tpu.pipeline_mode<synchronous>, transform_indices = @transform_1, window_bounds = array<i64: 9, 8, 12>}, {pipeline_mode = #tpu.pipeline_mode<synchronous>, transform_indices = @transform_2, window_bounds = array<i64: 3, 1, 12>}, {pipeline_mode = #tpu.pipeline_mode<synchronous>, transform_indices = @transform_3, window_bounds = array<i64: 9, 4, 8>}, {pipeline_mode = #tpu.pipeline_mode<synchronous>, transform_indices = @transform_4, window_bounds = array<i64: 3, 1, 8>}, {pipeline_mode = #tpu.pipeline_mode<synchronous>, transform_indices = @transform_5, window_bounds = array<i64: 9, 4, 4>}, {pipeline_mode = #tpu.pipeline_mode<synchronous>, transform_indices = @transform_6, window_bounds = array<i64: 3, 1, 4>}, {transform_indices = @transform_7, window_bounds = array<i64: 1, 16, 256>}]} {
    %cst = arith.constant 0.000000e+00 : f32
    %0 = vector.broadcast %cst : f32 to vector<1x18x18x4xf32>
    %c0 = arith.constant 0 : index
    %c0_0 = arith.constant 0 : index
    %c0_1 = arith.constant 0 : index
    %c0_2 = arith.constant 0 : index
    %1 = vector.load %arg9[%c0, %c0_0, %c0_1, %c0_2] : memref<1x18x18x4xf32, #tpu.memory_space<vmem>>, vector<1x18x18x4xf32>
    tpu.vector_store %arg9[%c0, %c0_0, %c0_1, %c0_2], %0 {strides = array<i32>} : memref<1x18x18x4xf32, #tpu.memory_space<vmem>>, vector<1x18x18x4xf32>,
    %cst_3 = arith.constant 0.000000e+00 : f32
    %2 = vector.broadcast %cst_3 : f32 to vector<1x18x18x4xf32>
    %c0_4 = arith.constant 0 : index
    %c0_5 = arith.constant 0 : index
    %c0_6 = arith.constant 0 : index
    %c0_7 = arith.constant 0 : index
    %3 = vector.load %arg10[%c0_4, %c0_5, %c0_6, %c0_7] : memref<1x18x18x4xf32, #tpu.memory_space<vmem>>, vector<1x18x18x4xf32>
    tpu.vector_store %arg10[%c0_4, %c0_5, %c0_6, %c0_7], %2 {strides = array<i32>} : memref<1x18x18x4xf32, #tpu.memory_space<vmem>>, vector<1x18x18x4xf32>,
    %cst_8 = arith.constant 0.000000e+00 : f32
    %4 = vector.broadcast %cst_8 : f32 to vector<128x12xf32>
    %c0_9 = arith.constant 0 : index
    %c0_10 = arith.constant 0 : index
    %c0_11 = arith.constant 0 : index
    %c0_12 = arith.constant 0 : index
    %5 = vector.load %arg1[%c0_9, %c0_10, %c0_11, %c0_12] : memref<1x18x18x8xf32, #tpu.memory_space<vmem>>, vector<1x8x18x8xf32>
    %6 = vector.shape_cast %5 : vector<1x8x18x8xf32> to vector<8x18x8xf32>
    %7 = vector.extract_strided_slice %6 {offsets = [0, 0, 0], sizes = [8, 16, 8], strides = [1, 1, 1]} : vector<8x18x8xf32> to vector<8x16x8xf32>
    %8 = vector.shape_cast %7 : vector<8x16x8xf32> to vector<128x8xf32>
    %c0_13 = arith.constant 0 : index
    %c0_14 = arith.constant 0 : index
    %c0_15 = arith.constant 0 : index
    %9 = vector.load %arg2[%c0_13, %c0_14, %c0_15] : memref<9x8x12xf32, #tpu.memory_space<vmem>>, vector<1x8x12xf32>
    %10 = vector.shape_cast %9 : vector<1x8x12xf32> to vector<8x12xf32>
    %cst_16 = arith.constant dense<0.000000e+00> : vector<128x12xf32>
    %11 = tpu.matmul %8, %10, %cst_16 {dimension_numbers = #tpu.dot_dimension_numbers<[1], [0], [0], [1], [0, 0, 1, 1], [], []>} : vector<128x8xf32>, vector<8x12xf32>, vector<128x12xf32> -> vector<128x12xf32>
    %12 = arith.addf %4, %11 : vector<128x12xf32>
    %13 = vector.extract_strided_slice %6 {offsets = [0, 1, 0], sizes = [8, 16, 8], strides = [1, 1, 1]} : vector<8x18x8xf32> to vector<8x16x8xf32>
    %14 = vector.shape_cast %13 : vector<8x16x8xf32> to vector<128x8xf32>
    %c1 = arith.constant 1 : index
    %c0_17 = arith.constant 0 : index
    %c0_18 = arith.constant 0 : index
    %15 = vector.load %arg2[%c1, %c0_17, %c0_18] : memref<9x8x12xf32, #tpu.memory_space<vmem>>, vector<1x8x12xf32>
    %16 = vector.shape_cast %15 : vector<1x8x12xf32> to vector<8x12xf32>
    %cst_19 = arith.constant dense<0.000000e+00> : vector<128x12xf32>
    %17 = tpu.matmul %14, %16, %cst_19 {dimension_numbers = #tpu.dot_dimension_numbers<[1], [0], [0], [1], [0, 0, 1, 1], [], []>} : vector<128x8xf32>, vector<8x12xf32>, vector<128x12xf32> -> vector<128x12xf32>
    %18 = arith.addf %12, %17 : vector<128x12xf32>
    %19 = vector.extract_strided_slice %6 {offsets = [0, 2, 0], sizes = [8, 16, 8], strides = [1, 1, 1]} : vector<8x18x8xf32> to vector<8x16x8xf32>
    %20 = vector.shape_cast %19 : vector<8x16x8xf32> to vector<128x8xf32>
    %c2 = arith.constant 2 : index
    %c0_20 = arith.constant 0 : index
    %c0_21 = arith.constant 0 : index
    %21 = vector.load %arg2[%c2, %c0_20, %c0_21] : memref<9x8x12xf32, #tpu.memory_space<vmem>>, vector<1x8x12xf32>
    %22 = vector.shape_cast %21 : vector<1x8x12xf32> to vector<8x12xf32>
    %cst_22 = arith.constant dense<0.000000e+00> : vector<128x12xf32>
    %23 = tpu.matmul %20, %22, %cst_22 {dimension_numbers = #tpu.dot_dimension_numbers<[1], [0], [0], [1], [0, 0, 1, 1], [], []>} : vector<128x8xf32>, vector<8x12xf32>, vector<128x12xf32> -> vector<128x12xf32>
    %24 = arith.addf %18, %23 : vector<128x12xf32>
    %c0_23 = arith.constant 0 : index
    %c1_24 = arith.constant 1 : index
    %c0_25 = arith.constant 0 : index
    %c0_26 = arith.constant 0 : index
    %25 = vector.load %arg1[%c0_23, %c1_24, %c0_25, %c0_26] : memref<1x18x18x8xf32, #tpu.memory_space<vmem>>, vector<1x8x18x8xf32>
    %26 = vector.shape_cast %25 : vector<1x8x18x8xf32> to vector<8x18x8xf32>
    %27 = vector.extract_strided_slice %26 {offsets = [0, 0, 0], sizes = [8, 16, 8], strides = [1, 1, 1]} : vector<8x18x8xf32> to vector<8x16x8xf32>
    %28 = vector.shape_cast %27 : vector<8x16x8xf32> to vector<128x8xf32>
    %c3 = arith.constant 3 : index
    %c0_27 = arith.constant 0 : index
    %c0_28 = arith.constant 0 : index
    %29 = vector.load %arg2[%c3, %c0_27, %c0_28] : memref<9x8x12xf32, #tpu.memory_space<vmem>>, vector<1x8x12xf32>
    %30 = vector.shape_cast %29 : vector<1x8x12xf32> to vector<8x12xf32>
    %cst_29 = arith.constant dense<0.000000e+00> : vector<128x12xf32>
    %31 = tpu.matmul %28, %30, %cst_29 {dimension_numbers = #tpu.dot_dimension_numbers<[1], [0], [0], [1], [0, 0, 1, 1], [], []>} : vector<128x8xf32>, vector<8x12xf32>, vector<128x12xf32> -> vector<128x12xf32>
    %32 = arith.addf %24, %31 : vector<128x12xf32>
    %33 = vector.extract_strided_slice %26 {offsets = [0, 1, 0], sizes = [8, 16, 8], strides = [1, 1, 1]} : vector<8x18x8xf32> to vector<8x16x8xf32>
    %34 = vector.shape_cast %33 : vector<8x16x8xf32> to vector<128x8xf32>
    %c4 = arith.constant 4 : index
    %c0_30 = arith.constant 0 : index
    %c0_31 = arith.constant 0 : index
    %35 = vector.load %arg2[%c4, %c0_30, %c0_31] : memref<9x8x12xf32, #tpu.memory_space<vmem>>, vector<1x8x12xf32>
    %36 = vector.shape_cast %35 : vector<1x8x12xf32> to vector<8x12xf32>
    %cst_32 = arith.constant dense<0.000000e+00> : vector<128x12xf32>
    %37 = tpu.matmul %34, %36, %cst_32 {dimension_numbers = #tpu.dot_dimension_numbers<[1], [0], [0], [1], [0, 0, 1, 1], [], []>} : vector<128x8xf32>, vector<8x12xf32>, vector<128x12xf32> -> vector<128x12xf32>
    %38 = arith.addf %32, %37 : vector<128x12xf32>
    %39 = vector.extract_strided_slice %26 {offsets = [0, 2, 0], sizes = [8, 16, 8], strides = [1, 1, 1]} : vector<8x18x8xf32> to vector<8x16x8xf32>
    %40 = vector.shape_cast %39 : vector<8x16x8xf32> to vector<128x8xf32>
    %c5 = arith.constant 5 : index
    %c0_33 = arith.constant 0 : index
    %c0_34 = arith.constant 0 : index
    %41 = vector.load %arg2[%c5, %c0_33, %c0_34] : memref<9x8x12xf32, #tpu.memory_space<vmem>>, vector<1x8x12xf32>
    %42 = vector.shape_cast %41 : vector<1x8x12xf32> to vector<8x12xf32>
    %cst_35 = arith.constant dense<0.000000e+00> : vector<128x12xf32>
    %43 = tpu.matmul %40, %42, %cst_35 {dimension_numbers = #tpu.dot_dimension_numbers<[1], [0], [0], [1], [0, 0, 1, 1], [], []>} : vector<128x8xf32>, vector<8x12xf32>, vector<128x12xf32> -> vector<128x12xf32>
    %44 = arith.addf %38, %43 : vector<128x12xf32>
    %c0_36 = arith.constant 0 : index
    %c2_37 = arith.constant 2 : index
    %c0_38 = arith.constant 0 : index
    %c0_39 = arith.constant 0 : index
    %45 = vector.load %arg1[%c0_36, %c2_37, %c0_38, %c0_39] : memref<1x18x18x8xf32, #tpu.memory_space<vmem>>, vector<1x8x18x8xf32>
    %46 = vector.shape_cast %45 : vector<1x8x18x8xf32> to vector<8x18x8xf32>
    %47 = vector.extract_strided_slice %46 {offsets = [0, 0, 0], sizes = [8, 16, 8], strides = [1, 1, 1]} : vector<8x18x8xf32> to vector<8x16x8xf32>
    %48 = vector.shape_cast %47 : vector<8x16x8xf32> to vector<128x8xf32>
    %c6 = arith.constant 6 : index
    %c0_40 = arith.constant 0 : index
    %c0_41 = arith.constant 0 : index
    %49 = vector.load %arg2[%c6, %c0_40, %c0_41] : memref<9x8x12xf32, #tpu.memory_space<vmem>>, vector<1x8x12xf32>
    %50 = vector.shape_cast %49 : vector<1x8x12xf32> to vector<8x12xf32>
    %cst_42 = arith.constant dense<0.000000e+00> : vector<128x12xf32>
    %51 = tpu.matmul %48, %50, %cst_42 {dimension_numbers = #tpu.dot_dimension_numbers<[1], [0], [0], [1], [0, 0, 1, 1], [], []>} : vector<128x8xf32>, vector<8x12xf32>, vector<128x12xf32> -> vector<128x12xf32>
    %52 = arith.addf %44, %51 : vector<128x12xf32>
    %53 = vector.extract_strided_slice %46 {offsets = [0, 1, 0], sizes = [8, 16, 8], strides = [1, 1, 1]} : vector<8x18x8xf32> to vector<8x16x8xf32>
    %54 = vector.shape_cast %53 : vector<8x16x8xf32> to vector<128x8xf32>
    %c7 = arith.constant 7 : index
    %c0_43 = arith.constant 0 : index
    %c0_44 = arith.constant 0 : index
    %55 = vector.load %arg2[%c7, %c0_43, %c0_44] : memref<9x8x12xf32, #tpu.memory_space<vmem>>, vector<1x8x12xf32>
    %56 = vector.shape_cast %55 : vector<1x8x12xf32> to vector<8x12xf32>
    %cst_45 = arith.constant dense<0.000000e+00> : vector<128x12xf32>
    %57 = tpu.matmul %54, %56, %cst_45 {dimension_numbers = #tpu.dot_dimension_numbers<[1], [0], [0], [1], [0, 0, 1, 1], [], []>} : vector<128x8xf32>, vector<8x12xf32>, vector<128x12xf32> -> vector<128x12xf32>
    %58 = arith.addf %52, %57 : vector<128x12xf32>
    %59 = vector.extract_strided_slice %46 {offsets = [0, 2, 0], sizes = [8, 16, 8], strides = [1, 1, 1]} : vector<8x18x8xf32> to vector<8x16x8xf32>
    %60 = vector.shape_cast %59 : vector<8x16x8xf32> to vector<128x8xf32>
    %c8 = arith.constant 8 : index
    %c0_46 = arith.constant 0 : index
    %c0_47 = arith.constant 0 : index
    %61 = vector.load %arg2[%c8, %c0_46, %c0_47] : memref<9x8x12xf32, #tpu.memory_space<vmem>>, vector<1x8x12xf32>
    %62 = vector.shape_cast %61 : vector<1x8x12xf32> to vector<8x12xf32>
    %cst_48 = arith.constant dense<0.000000e+00> : vector<128x12xf32>
    %63 = tpu.matmul %60, %62, %cst_48 {dimension_numbers = #tpu.dot_dimension_numbers<[1], [0], [0], [1], [0, 0, 1, 1], [], []>} : vector<128x8xf32>, vector<8x12xf32>, vector<128x12xf32> -> vector<128x12xf32>
    %64 = arith.addf %58, %63 : vector<128x12xf32>
    %c0_49 = arith.constant 0 : index
    %c0_50 = arith.constant 0 : index
    %c0_51 = arith.constant 0 : index
    %65 = vector.load %arg3[%c0_49, %c0_50, %c0_51] : memref<3x1x12xf32, #tpu.memory_space<vmem>>, vector<1x1x12xf32>
    %66 = vector.shape_cast %65 : vector<1x1x12xf32> to vector<1x12xf32>
    %67 = vector.broadcast %66 : vector<1x12xf32> to vector<128x12xf32>
    %68 = arith.mulf %64, %67 : vector<128x12xf32>
    %c1_52 = arith.constant 1 : index
    %c0_53 = arith.constant 0 : index
    %c0_54 = arith.constant 0 : index
    %69 = vector.load %arg3[%c1_52, %c0_53, %c0_54] : memref<3x1x12xf32, #tpu.memory_space<vmem>>, vector<1x1x12xf32>
    %70 = vector.shape_cast %69 : vector<1x1x12xf32> to vector<1x12xf32>
    %71 = vector.broadcast %70 : vector<1x12xf32> to vector<128x12xf32>
    %72 = arith.addf %68, %71 : vector<128x12xf32>
    %cst_55 = arith.constant 0.000000e+00 : f32
    %73 = vector.broadcast %cst_55 : f32 to vector<128x12xf32>
    %74 = arith.cmpf ogt, %72, %73 : vector<128x12xf32>
    %c2_56 = arith.constant 2 : index
    %c0_57 = arith.constant 0 : index
    %c0_58 = arith.constant 0 : index
    %75 = vector.load %arg3[%c2_56, %c0_57, %c0_58] : memref<3x1x12xf32, #tpu.memory_space<vmem>>, vector<1x1x12xf32>
    %76 = vector.shape_cast %75 : vector<1x1x12xf32> to vector<1x12xf32>
    %77 = vector.broadcast %76 : vector<1x12xf32> to vector<128x12xf32>
    %78 = arith.mulf %77, %72 : vector<128x12xf32>
    %79 = arith.select %74, %72, %78 : vector<128x12xi1>, vector<128x12xf32>
    %80 = vector.extract_strided_slice %79 {offsets = [0, 0], sizes = [128, 8], strides = [1, 1]} : vector<128x12xf32> to vector<128x8xf32>
    %81 = tpu.transpose %80, [1, 0] : vector<128x8xf32> -> vector<8x128xf32>
    %c0_59 = arith.constant 0 : index
    %c0_60 = arith.constant 0 : index
    %c0_61 = arith.constant 0 : index
    %82 = vector.load %arg8[%c0_59, %c0_60, %c0_61] : memref<1x16x256xf32, #tpu.memory_space<vmem>>, vector<1x8x128xf32>
    %83 = vector.shape_cast %82 : vector<1x8x128xf32> to vector<8x128xf32>
    %84 = vector.shape_cast %81 : vector<8x128xf32> to vector<1x8x128xf32>
    tpu.vector_store %arg8[%c0_59, %c0_60, %c0_61], %84 {strides = array<i32>} : memref<1x16x256xf32, #tpu.memory_space<vmem>>, vector<1x8x128xf32>,
    %85 = vector.extract_strided_slice %79 {offsets = [0, 8], sizes = [128, 4], strides = [1, 1]} : vector<128x12xf32> to vector<128x4xf32>
    %86 = vector.shape_cast %85 : vector<128x4xf32> to vector<8x16x4xf32>
    %c0_62 = arith.constant 0 : index
    %c1_63 = arith.constant 1 : index
    %c1_64 = arith.constant 1 : index
    %c0_65 = arith.constant 0 : index
    %87 = vector.load %arg9[%c0_62, %c1_63, %c1_64, %c0_65] : memref<1x18x18x4xf32, #tpu.memory_space<vmem>>, vector<1x8x16x4xf32>
    %88 = vector.shape_cast %87 : vector<1x8x16x4xf32> to vector<8x16x4xf32>
    %89 = vector.shape_cast %86 : vector<8x16x4xf32> to vector<1x8x16x4xf32>
    tpu.vector_store %arg9[%c0_62, %c1_63, %c1_64, %c0_65], %89 {strides = array<i32>} : memref<1x18x18x4xf32, #tpu.memory_space<vmem>>, vector<1x8x16x4xf32>,
    %cst_66 = arith.constant 0.000000e+00 : f32
    %90 = vector.broadcast %cst_66 : f32 to vector<128x12xf32>
    %c0_67 = arith.constant 0 : index
    %c8_68 = arith.constant 8 : index
    %c0_69 = arith.constant 0 : index
    %c0_70 = arith.constant 0 : index
    %91 = vector.load %arg1[%c0_67, %c8_68, %c0_69, %c0_70] : memref<1x18x18x8xf32, #tpu.memory_space<vmem>>, vector<1x8x18x8xf32>
    %92 = vector.shape_cast %91 : vector<1x8x18x8xf32> to vector<8x18x8xf32>
    %93 = vector.extract_strided_slice %92 {offsets = [0, 0, 0], sizes = [8, 16, 8], strides = [1, 1, 1]} : vector<8x18x8xf32> to vector<8x16x8xf32>
    %94 = vector.shape_cast %93 : vector<8x16x8xf32> to vector<128x8xf32>
    %c0_71 = arith.constant 0 : index
    %c0_72 = arith.constant 0 : index
    %c0_73 = arith.constant 0 : index
    %95 = vector.load %arg2[%c0_71, %c0_72, %c0_73] : memref<9x8x12xf32, #tpu.memory_space<vmem>>, vector<1x8x12xf32>
    %96 = vector.shape_cast %95 : vector<1x8x12xf32> to vector<8x12xf32>
    %cst_74 = arith.constant dense<0.000000e+00> : vector<128x12xf32>
    %97 = tpu.matmul %94, %96, %cst_74 {dimension_numbers = #tpu.dot_dimension_numbers<[1], [0], [0], [1], [0, 0, 1, 1], [], []>} : vector<128x8xf32>, vector<8x12xf32>, vector<128x12xf32> -> vector<128x12xf32>
    %98 = arith.addf %90, %97 : vector<128x12xf32>
    %99 = vector.extract_strided_slice %92 {offsets = [0, 1, 0], sizes = [8, 16, 8], strides = [1, 1, 1]} : vector<8x18x8xf32> to vector<8x16x8xf32>
    %100 = vector.shape_cast %99 : vector<8x16x8xf32> to vector<128x8xf32>
    %c1_75 = arith.constant 1 : index
    %c0_76 = arith.constant 0 : index
    %c0_77 = arith.constant 0 : index
    %101 = vector.load %arg2[%c1_75, %c0_76, %c0_77] : memref<9x8x12xf32, #tpu.memory_space<vmem>>, vector<1x8x12xf32>
    %102 = vector.shape_cast %101 : vector<1x8x12xf32> to vector<8x12xf32>
    %cst_78 = arith.constant dense<0.000000e+00> : vector<128x12xf32>
    %103 = tpu.matmul %100, %102, %cst_78 {dimension_numbers = #tpu.dot_dimension_numbers<[1], [0], [0], [1], [0, 0, 1, 1], [], []>} : vector<128x8xf32>, vector<8x12xf32>, vector<128x12xf32> -> vector<128x12xf32>
    %104 = arith.addf %98, %103 : vector<128x12xf32>
    %105 = vector.extract_strided_slice %92 {offsets = [0, 2, 0], sizes = [8, 16, 8], strides = [1, 1, 1]} : vector<8x18x8xf32> to vector<8x16x8xf32>
    %106 = vector.shape_cast %105 : vector<8x16x8xf32> to vector<128x8xf32>
    %c2_79 = arith.constant 2 : index
    %c0_80 = arith.constant 0 : index
    %c0_81 = arith.constant 0 : index
    %107 = vector.load %arg2[%c2_79, %c0_80, %c0_81] : memref<9x8x12xf32, #tpu.memory_space<vmem>>, vector<1x8x12xf32>
    %108 = vector.shape_cast %107 : vector<1x8x12xf32> to vector<8x12xf32>
    %cst_82 = arith.constant dense<0.000000e+00> : vector<128x12xf32>
    %109 = tpu.matmul %106, %108, %cst_82 {dimension_numbers = #tpu.dot_dimension_numbers<[1], [0], [0], [1], [0, 0, 1, 1], [], []>} : vector<128x8xf32>, vector<8x12xf32>, vector<128x12xf32> -> vector<128x12xf32>
    %110 = arith.addf %104, %109 : vector<128x12xf32>
    %c0_83 = arith.constant 0 : index
    %c9 = arith.constant 9 : index
    %c0_84 = arith.constant 0 : index
    %c0_85 = arith.constant 0 : index
    %111 = vector.load %arg1[%c0_83, %c9, %c0_84, %c0_85] : memref<1x18x18x8xf32, #tpu.memory_space<vmem>>, vector<1x8x18x8xf32>
    %112 = vector.shape_cast %111 : vector<1x8x18x8xf32> to vector<8x18x8xf32>
    %113 = vector.extract_strided_slice %112 {offsets = [0, 0, 0], sizes = [8, 16, 8], strides = [1, 1, 1]} : vector<8x18x8xf32> to vector<8x16x8xf32>
    %114 = vector.shape_cast %113 : vector<8x16x8xf32> to vector<128x8xf32>
    %c3_86 = arith.constant 3 : index
    %c0_87 = arith.constant 0 : index
    %c0_88 = arith.constant 0 : index
    %115 = vector.load %arg2[%c3_86, %c0_87, %c0_88] : memref<9x8x12xf32, #tpu.memory_space<vmem>>, vector<1x8x12xf32>
    %116 = vector.shape_cast %115 : vector<1x8x12xf32> to vector<8x12xf32>
    %cst_89 = arith.constant dense<0.000000e+00> : vector<128x12xf32>
    %117 = tpu.matmul %114, %116, %cst_89 {dimension_numbers = #tpu.dot_dimension_numbers<[1], [0], [0], [1], [0, 0, 1, 1], [], []>} : vector<128x8xf32>, vector<8x12xf32>, vector<128x12xf32> -> vector<128x12xf32>
    %118 = arith.addf %110, %117 : vector<128x12xf32>
    %119 = vector.extract_strided_slice %112 {offsets = [0, 1, 0], sizes = [8, 16, 8], strides = [1, 1, 1]} : vector<8x18x8xf32> to vector<8x16x8xf32>
    %120 = vector.shape_cast %119 : vector<8x16x8xf32> to vector<128x8xf32>
    %c4_90 = arith.constant 4 : index
    %c0_91 = arith.constant 0 : index
    %c0_92 = arith.constant 0 : index
    %121 = vector.load %arg2[%c4_90, %c0_91, %c0_92] : memref<9x8x12xf32, #tpu.memory_space<vmem>>, vector<1x8x12xf32>
    %122 = vector.shape_cast %121 : vector<1x8x12xf32> to vector<8x12xf32>
    %cst_93 = arith.constant dense<0.000000e+00> : vector<128x12xf32>
    %123 = tpu.matmul %120, %122, %cst_93 {dimension_numbers = #tpu.dot_dimension_numbers<[1], [0], [0], [1], [0, 0, 1, 1], [], []>} : vector<128x8xf32>, vector<8x12xf32>, vector<128x12xf32> -> vector<128x12xf32>
    %124 = arith.addf %118, %123 : vector<128x12xf32>
    %125 = vector.extract_strided_slice %112 {offsets = [0, 2, 0], sizes = [8, 16, 8], strides = [1, 1, 1]} : vector<8x18x8xf32> to vector<8x16x8xf32>
    %126 = vector.shape_cast %125 : vector<8x16x8xf32> to vector<128x8xf32>
    %c5_94 = arith.constant 5 : index
    %c0_95 = arith.constant 0 : index
    %c0_96 = arith.constant 0 : index
    %127 = vector.load %arg2[%c5_94, %c0_95, %c0_96] : memref<9x8x12xf32, #tpu.memory_space<vmem>>, vector<1x8x12xf32>
    %128 = vector.shape_cast %127 : vector<1x8x12xf32> to vector<8x12xf32>
    %cst_97 = arith.constant dense<0.000000e+00> : vector<128x12xf32>
    %129 = tpu.matmul %126, %128, %cst_97 {dimension_numbers = #tpu.dot_dimension_numbers<[1], [0], [0], [1], [0, 0, 1, 1], [], []>} : vector<128x8xf32>, vector<8x12xf32>, vector<128x12xf32> -> vector<128x12xf32>
    %130 = arith.addf %124, %129 : vector<128x12xf32>
    %c0_98 = arith.constant 0 : index
    %c10 = arith.constant 10 : index
    %c0_99 = arith.constant 0 : index
    %c0_100 = arith.constant 0 : index
    %131 = vector.load %arg1[%c0_98, %c10, %c0_99, %c0_100] : memref<1x18x18x8xf32, #tpu.memory_space<vmem>>, vector<1x8x18x8xf32>
    %132 = vector.shape_cast %131 : vector<1x8x18x8xf32> to vector<8x18x8xf32>
    %133 = vector.extract_strided_slice %132 {offsets = [0, 0, 0], sizes = [8, 16, 8], strides = [1, 1, 1]} : vector<8x18x8xf32> to vector<8x16x8xf32>
    %134 = vector.shape_cast %133 : vector<8x16x8xf32> to vector<128x8xf32>
    %c6_101 = arith.constant 6 : index
    %c0_102 = arith.constant 0 : index
    %c0_103 = arith.constant 0 : index
    %135 = vector.load %arg2[%c6_101, %c0_102, %c0_103] : memref<9x8x12xf32, #tpu.memory_space<vmem>>, vector<1x8x12xf32>
    %136 = vector.shape_cast %135 : vector<1x8x12xf32> to vector<8x12xf32>
    %cst_104 = arith.constant dense<0.000000e+00> : vector<128x12xf32>
    %137 = tpu.matmul %134, %136, %cst_104 {dimension_numbers = #tpu.dot_dimension_numbers<[1], [0], [0], [1], [0, 0, 1, 1], [], []>} : vector<128x8xf32>, vector<8x12xf32>, vector<128x12xf32> -> vector<128x12xf32>
    %138 = arith.addf %130, %137 : vector<128x12xf32>
    %139 = vector.extract_strided_slice %132 {offsets = [0, 1, 0], sizes = [8, 16, 8], strides = [1, 1, 1]} : vector<8x18x8xf32> to vector<8x16x8xf32>
    %140 = vector.shape_cast %139 : vector<8x16x8xf32> to vector<128x8xf32>
    %c7_105 = arith.constant 7 : index
    %c0_106 = arith.constant 0 : index
    %c0_107 = arith.constant 0 : index
    %141 = vector.load %arg2[%c7_105, %c0_106, %c0_107] : memref<9x8x12xf32, #tpu.memory_space<vmem>>, vector<1x8x12xf32>
    %142 = vector.shape_cast %141 : vector<1x8x12xf32> to vector<8x12xf32>
    %cst_108 = arith.constant dense<0.000000e+00> : vector<128x12xf32>
    %143 = tpu.matmul %140, %142, %cst_108 {dimension_numbers = #tpu.dot_dimension_numbers<[1], [0], [0], [1], [0, 0, 1, 1], [], []>} : vector<128x8xf32>, vector<8x12xf32>, vector<128x12xf32> -> vector<128x12xf32>
    %144 = arith.addf %138, %143 : vector<128x12xf32>
    %145 = vector.extract_strided_slice %132 {offsets = [0, 2, 0], sizes = [8, 16, 8], strides = [1, 1, 1]} : vector<8x18x8xf32> to vector<8x16x8xf32>
    %146 = vector.shape_cast %145 : vector<8x16x8xf32> to vector<128x8xf32>
    %c8_109 = arith.constant 8 : index
    %c0_110 = arith.constant 0 : index
    %c0_111 = arith.constant 0 : index
    %147 = vector.load %arg2[%c8_109, %c0_110, %c0_111] : memref<9x8x12xf32, #tpu.memory_space<vmem>>, vector<1x8x12xf32>
    %148 = vector.shape_cast %147 : vector<1x8x12xf32> to vector<8x12xf32>
    %cst_112 = arith.constant dense<0.000000e+00> : vector<128x12xf32>
    %149 = tpu.matmul %146, %148, %cst_112 {dimension_numbers = #tpu.dot_dimension_numbers<[1], [0], [0], [1], [0, 0, 1, 1], [], []>} : vector<128x8xf32>, vector<8x12xf32>, vector<128x12xf32> -> vector<128x12xf32>
    %150 = arith.addf %144, %149 : vector<128x12xf32>
    %c0_113 = arith.constant 0 : index
    %c0_114 = arith.constant 0 : index
    %c0_115 = arith.constant 0 : index
    %151 = vector.load %arg3[%c0_113, %c0_114, %c0_115] : memref<3x1x12xf32, #tpu.memory_space<vmem>>, vector<1x1x12xf32>
    %152 = vector.shape_cast %151 : vector<1x1x12xf32> to vector<1x12xf32>
    %153 = vector.broadcast %152 : vector<1x12xf32> to vector<128x12xf32>
    %154 = arith.mulf %150, %153 : vector<128x12xf32>
    %c1_116 = arith.constant 1 : index
    %c0_117 = arith.constant 0 : index
    %c0_118 = arith.constant 0 : index
    %155 = vector.load %arg3[%c1_116, %c0_117, %c0_118] : memref<3x1x12xf32, #tpu.memory_space<vmem>>, vector<1x1x12xf32>
    %156 = vector.shape_cast %155 : vector<1x1x12xf32> to vector<1x12xf32>
    %157 = vector.broadcast %156 : vector<1x12xf32> to vector<128x12xf32>
    %158 = arith.addf %154, %157 : vector<128x12xf32>
    %cst_119 = arith.constant 0.000000e+00 : f32
    %159 = vector.broadcast %cst_119 : f32 to vector<128x12xf32>
    %160 = arith.cmpf ogt, %158, %159 : vector<128x12xf32>
    %c2_120 = arith.constant 2 : index
    %c0_121 = arith.constant 0 : index
    %c0_122 = arith.constant 0 : index
    %161 = vector.load %arg3[%c2_120, %c0_121, %c0_122] : memref<3x1x12xf32, #tpu.memory_space<vmem>>, vector<1x1x12xf32>
    %162 = vector.shape_cast %161 : vector<1x1x12xf32> to vector<1x12xf32>
    %163 = vector.broadcast %162 : vector<1x12xf32> to vector<128x12xf32>
    %164 = arith.mulf %163, %158 : vector<128x12xf32>
    %165 = arith.select %160, %158, %164 : vector<128x12xi1>, vector<128x12xf32>
    %166 = vector.extract_strided_slice %165 {offsets = [0, 0], sizes = [128, 8], strides = [1, 1]} : vector<128x12xf32> to vector<128x8xf32>
    %167 = tpu.transpose %166, [1, 0] : vector<128x8xf32> -> vector<8x128xf32>
    %c0_123 = arith.constant 0 : index
    %c0_124 = arith.constant 0 : index
    %c128 = arith.constant 128 : index
    %168 = vector.load %arg8[%c0_123, %c0_124, %c128] : memref<1x16x256xf32, #tpu.memory_space<vmem>>, vector<1x8x128xf32>
    %169 = vector.shape_cast %168 : vector<1x8x128xf32> to vector<8x128xf32>
    %170 = vector.shape_cast %167 : vector<8x128xf32> to vector<1x8x128xf32>
    tpu.vector_store %arg8[%c0_123, %c0_124, %c128], %170 {strides = array<i32>} : memref<1x16x256xf32, #tpu.memory_space<vmem>>, vector<1x8x128xf32>,
    %171 = vector.extract_strided_slice %165 {offsets = [0, 8], sizes = [128, 4], strides = [1, 1]} : vector<128x12xf32> to vector<128x4xf32>
    %172 = vector.shape_cast %171 : vector<128x4xf32> to vector<8x16x4xf32>
    %c0_125 = arith.constant 0 : index
    %c9_126 = arith.constant 9 : index
    %c1_127 = arith.constant 1 : index
    %c0_128 = arith.constant 0 : index
    %173 = vector.load %arg9[%c0_125, %c9_126, %c1_127, %c0_128] : memref<1x18x18x4xf32, #tpu.memory_space<vmem>>, vector<1x8x16x4xf32>
    %174 = vector.shape_cast %173 : vector<1x8x16x4xf32> to vector<8x16x4xf32>
    %175 = vector.shape_cast %172 : vector<8x16x4xf32> to vector<1x8x16x4xf32>
    tpu.vector_store %arg9[%c0_125, %c9_126, %c1_127, %c0_128], %175 {strides = array<i32>} : memref<1x18x18x4xf32, #tpu.memory_space<vmem>>, vector<1x8x16x4xf32>,
    %cst_129 = arith.constant 0.000000e+00 : f32
    %176 = vector.broadcast %cst_129 : f32 to vector<128x8xf32>
    %c0_130 = arith.constant 0 : index
    %c0_131 = arith.constant 0 : index
    %c0_132 = arith.constant 0 : index
    %c0_133 = arith.constant 0 : index
    %177 = vector.load %arg9[%c0_130, %c0_131, %c0_132, %c0_133] : memref<1x18x18x4xf32, #tpu.memory_space<vmem>>, vector<1x8x18x4xf32>
    %178 = vector.shape_cast %177 : vector<1x8x18x4xf32> to vector<8x18x4xf32>
    %179 = vector.extract_strided_slice %178 {offsets = [0, 0, 0], sizes = [8, 16, 4], strides = [1, 1, 1]} : vector<8x18x4xf32> to vector<8x16x4xf32>
    %180 = vector.shape_cast %179 : vector<8x16x4xf32> to vector<128x4xf32>
    %c0_134 = arith.constant 0 : index
    %c0_135 = arith.constant 0 : index
    %c0_136 = arith.constant 0 : index
    %181 = vector.load %arg4[%c0_134, %c0_135, %c0_136] : memref<9x4x8xf32, #tpu.memory_space<vmem>>, vector<1x4x8xf32>
    %182 = vector.shape_cast %181 : vector<1x4x8xf32> to vector<4x8xf32>
    %cst_137 = arith.constant dense<0.000000e+00> : vector<128x8xf32>
    %183 = tpu.matmul %180, %182, %cst_137 {dimension_numbers = #tpu.dot_dimension_numbers<[1], [0], [0], [1], [0, 0, 1, 1], [], []>} : vector<128x4xf32>, vector<4x8xf32>, vector<128x8xf32> -> vector<128x8xf32>
    %184 = arith.addf %176, %183 : vector<128x8xf32>
    %185 = vector.extract_strided_slice %178 {offsets = [0, 1, 0], sizes = [8, 16, 4], strides = [1, 1, 1]} : vector<8x18x4xf32> to vector<8x16x4xf32>
    %186 = vector.shape_cast %185 : vector<8x16x4xf32> to vector<128x4xf32>
    %c1_138 = arith.constant 1 : index
    %c0_139 = arith.constant 0 : index
    %c0_140 = arith.constant 0 : index
    %187 = vector.load %arg4[%c1_138, %c0_139, %c0_140] : memref<9x4x8xf32, #tpu.memory_space<vmem>>, vector<1x4x8xf32>
    %188 = vector.shape_cast %187 : vector<1x4x8xf32> to vector<4x8xf32>
    %cst_141 = arith.constant dense<0.000000e+00> : vector<128x8xf32>
    %189 = tpu.matmul %186, %188, %cst_141 {dimension_numbers = #tpu.dot_dimension_numbers<[1], [0], [0], [1], [0, 0, 1, 1], [], []>} : vector<128x4xf32>, vector<4x8xf32>, vector<128x8xf32> -> vector<128x8xf32>
    %190 = arith.addf %184, %189 : vector<128x8xf32>
    %191 = vector.extract_strided_slice %178 {offsets = [0, 2, 0], sizes = [8, 16, 4], strides = [1, 1, 1]} : vector<8x18x4xf32> to vector<8x16x4xf32>
    %192 = vector.shape_cast %191 : vector<8x16x4xf32> to vector<128x4xf32>
    %c2_142 = arith.constant 2 : index
    %c0_143 = arith.constant 0 : index
    %c0_144 = arith.constant 0 : index
    %193 = vector.load %arg4[%c2_142, %c0_143, %c0_144] : memref<9x4x8xf32, #tpu.memory_space<vmem>>, vector<1x4x8xf32>
    %194 = vector.shape_cast %193 : vector<1x4x8xf32> to vector<4x8xf32>
    %cst_145 = arith.constant dense<0.000000e+00> : vector<128x8xf32>
    %195 = tpu.matmul %192, %194, %cst_145 {dimension_numbers = #tpu.dot_dimension_numbers<[1], [0], [0], [1], [0, 0, 1, 1], [], []>} : vector<128x4xf32>, vector<4x8xf32>, vector<128x8xf32> -> vector<128x8xf32>
    %196 = arith.addf %190, %195 : vector<128x8xf32>
    %c0_146 = arith.constant 0 : index
    %c1_147 = arith.constant 1 : index
    %c0_148 = arith.constant 0 : index
    %c0_149 = arith.constant 0 : index
    %197 = vector.load %arg9[%c0_146, %c1_147, %c0_148, %c0_149] : memref<1x18x18x4xf32, #tpu.memory_space<vmem>>, vector<1x8x18x4xf32>
    %198 = vector.shape_cast %197 : vector<1x8x18x4xf32> to vector<8x18x4xf32>
    %199 = vector.extract_strided_slice %198 {offsets = [0, 0, 0], sizes = [8, 16, 4], strides = [1, 1, 1]} : vector<8x18x4xf32> to vector<8x16x4xf32>
    %200 = vector.shape_cast %199 : vector<8x16x4xf32> to vector<128x4xf32>
    %c3_150 = arith.constant 3 : index
    %c0_151 = arith.constant 0 : index
    %c0_152 = arith.constant 0 : index
    %201 = vector.load %arg4[%c3_150, %c0_151, %c0_152] : memref<9x4x8xf32, #tpu.memory_space<vmem>>, vector<1x4x8xf32>
    %202 = vector.shape_cast %201 : vector<1x4x8xf32> to vector<4x8xf32>
    %cst_153 = arith.constant dense<0.000000e+00> : vector<128x8xf32>
    %203 = tpu.matmul %200, %202, %cst_153 {dimension_numbers = #tpu.dot_dimension_numbers<[1], [0], [0], [1], [0, 0, 1, 1], [], []>} : vector<128x4xf32>, vector<4x8xf32>, vector<128x8xf32> -> vector<128x8xf32>
    %204 = arith.addf %196, %203 : vector<128x8xf32>
    %205 = vector.extract_strided_slice %198 {offsets = [0, 1, 0], sizes = [8, 16, 4], strides = [1, 1, 1]} : vector<8x18x4xf32> to vector<8x16x4xf32>
    %206 = vector.shape_cast %205 : vector<8x16x4xf32> to vector<128x4xf32>
    %c4_154 = arith.constant 4 : index
    %c0_155 = arith.constant 0 : index
    %c0_156 = arith.constant 0 : index
    %207 = vector.load %arg4[%c4_154, %c0_155, %c0_156] : memref<9x4x8xf32, #tpu.memory_space<vmem>>, vector<1x4x8xf32>
    %208 = vector.shape_cast %207 : vector<1x4x8xf32> to vector<4x8xf32>
    %cst_157 = arith.constant dense<0.000000e+00> : vector<128x8xf32>
    %209 = tpu.matmul %206, %208, %cst_157 {dimension_numbers = #tpu.dot_dimension_numbers<[1], [0], [0], [1], [0, 0, 1, 1], [], []>} : vector<128x4xf32>, vector<4x8xf32>, vector<128x8xf32> -> vector<128x8xf32>
    %210 = arith.addf %204, %209 : vector<128x8xf32>
    %211 = vector.extract_strided_slice %198 {offsets = [0, 2, 0], sizes = [8, 16, 4], strides = [1, 1, 1]} : vector<8x18x4xf32> to vector<8x16x4xf32>
    %212 = vector.shape_cast %211 : vector<8x16x4xf32> to vector<128x4xf32>
    %c5_158 = arith.constant 5 : index
    %c0_159 = arith.constant 0 : index
    %c0_160 = arith.constant 0 : index
    %213 = vector.load %arg4[%c5_158, %c0_159, %c0_160] : memref<9x4x8xf32, #tpu.memory_space<vmem>>, vector<1x4x8xf32>
    %214 = vector.shape_cast %213 : vector<1x4x8xf32> to vector<4x8xf32>
    %cst_161 = arith.constant dense<0.000000e+00> : vector<128x8xf32>
    %215 = tpu.matmul %212, %214, %cst_161 {dimension_numbers = #tpu.dot_dimension_numbers<[1], [0], [0], [1], [0, 0, 1, 1], [], []>} : vector<128x4xf32>, vector<4x8xf32>, vector<128x8xf32> -> vector<128x8xf32>
    %216 = arith.addf %210, %215 : vector<128x8xf32>
    %c0_162 = arith.constant 0 : index
    %c2_163 = arith.constant 2 : index
    %c0_164 = arith.constant 0 : index
    %c0_165 = arith.constant 0 : index
    %217 = vector.load %arg9[%c0_162, %c2_163, %c0_164, %c0_165] : memref<1x18x18x4xf32, #tpu.memory_space<vmem>>, vector<1x8x18x4xf32>
    %218 = vector.shape_cast %217 : vector<1x8x18x4xf32> to vector<8x18x4xf32>
    %219 = vector.extract_strided_slice %218 {offsets = [0, 0, 0], sizes = [8, 16, 4], strides = [1, 1, 1]} : vector<8x18x4xf32> to vector<8x16x4xf32>
    %220 = vector.shape_cast %219 : vector<8x16x4xf32> to vector<128x4xf32>
    %c6_166 = arith.constant 6 : index
    %c0_167 = arith.constant 0 : index
    %c0_168 = arith.constant 0 : index
    %221 = vector.load %arg4[%c6_166, %c0_167, %c0_168] : memref<9x4x8xf32, #tpu.memory_space<vmem>>, vector<1x4x8xf32>
    %222 = vector.shape_cast %221 : vector<1x4x8xf32> to vector<4x8xf32>
    %cst_169 = arith.constant dense<0.000000e+00> : vector<128x8xf32>
    %223 = tpu.matmul %220, %222, %cst_169 {dimension_numbers = #tpu.dot_dimension_numbers<[1], [0], [0], [1], [0, 0, 1, 1], [], []>} : vector<128x4xf32>, vector<4x8xf32>, vector<128x8xf32> -> vector<128x8xf32>
    %224 = arith.addf %216, %223 : vector<128x8xf32>
    %225 = vector.extract_strided_slice %218 {offsets = [0, 1, 0], sizes = [8, 16, 4], strides = [1, 1, 1]} : vector<8x18x4xf32> to vector<8x16x4xf32>
    %226 = vector.shape_cast %225 : vector<8x16x4xf32> to vector<128x4xf32>
    %c7_170 = arith.constant 7 : index
    %c0_171 = arith.constant 0 : index
    %c0_172 = arith.constant 0 : index
    %227 = vector.load %arg4[%c7_170, %c0_171, %c0_172] : memref<9x4x8xf32, #tpu.memory_space<vmem>>, vector<1x4x8xf32>
    %228 = vector.shape_cast %227 : vector<1x4x8xf32> to vector<4x8xf32>
    %cst_173 = arith.constant dense<0.000000e+00> : vector<128x8xf32>
    %229 = tpu.matmul %226, %228, %cst_173 {dimension_numbers = #tpu.dot_dimension_numbers<[1], [0], [0], [1], [0, 0, 1, 1], [], []>} : vector<128x4xf32>, vector<4x8xf32>, vector<128x8xf32> -> vector<128x8xf32>
    %230 = arith.addf %224, %229 : vector<128x8xf32>
    %231 = vector.extract_strided_slice %218 {offsets = [0, 2, 0], sizes = [8, 16, 4], strides = [1, 1, 1]} : vector<8x18x4xf32> to vector<8x16x4xf32>
    %232 = vector.shape_cast %231 : vector<8x16x4xf32> to vector<128x4xf32>
    %c8_174 = arith.constant 8 : index
    %c0_175 = arith.constant 0 : index
    %c0_176 = arith.constant 0 : index
    %233 = vector.load %arg4[%c8_174, %c0_175, %c0_176] : memref<9x4x8xf32, #tpu.memory_space<vmem>>, vector<1x4x8xf32>
    %234 = vector.shape_cast %233 : vector<1x4x8xf32> to vector<4x8xf32>
    %cst_177 = arith.constant dense<0.000000e+00> : vector<128x8xf32>
    %235 = tpu.matmul %232, %234, %cst_177 {dimension_numbers = #tpu.dot_dimension_numbers<[1], [0], [0], [1], [0, 0, 1, 1], [], []>} : vector<128x4xf32>, vector<4x8xf32>, vector<128x8xf32> -> vector<128x8xf32>
    %236 = arith.addf %230, %235 : vector<128x8xf32>
    %c0_178 = arith.constant 0 : index
    %c0_179 = arith.constant 0 : index
    %c0_180 = arith.constant 0 : index
    %237 = vector.load %arg5[%c0_178, %c0_179, %c0_180] : memref<3x1x8xf32, #tpu.memory_space<vmem>>, vector<1x1x8xf32>
    %238 = vector.shape_cast %237 : vector<1x1x8xf32> to vector<1x8xf32>
    %239 = vector.broadcast %238 : vector<1x8xf32> to vector<128x8xf32>
    %240 = arith.mulf %236, %239 : vector<128x8xf32>
    %c1_181 = arith.constant 1 : index
    %c0_182 = arith.constant 0 : index
    %c0_183 = arith.constant 0 : index
    %241 = vector.load %arg5[%c1_181, %c0_182, %c0_183] : memref<3x1x8xf32, #tpu.memory_space<vmem>>, vector<1x1x8xf32>
    %242 = vector.shape_cast %241 : vector<1x1x8xf32> to vector<1x8xf32>
    %243 = vector.broadcast %242 : vector<1x8xf32> to vector<128x8xf32>
    %244 = arith.addf %240, %243 : vector<128x8xf32>
    %cst_184 = arith.constant 0.000000e+00 : f32
    %245 = vector.broadcast %cst_184 : f32 to vector<128x8xf32>
    %246 = arith.cmpf ogt, %244, %245 : vector<128x8xf32>
    %c2_185 = arith.constant 2 : index
    %c0_186 = arith.constant 0 : index
    %c0_187 = arith.constant 0 : index
    %247 = vector.load %arg5[%c2_185, %c0_186, %c0_187] : memref<3x1x8xf32, #tpu.memory_space<vmem>>, vector<1x1x8xf32>
    %248 = vector.shape_cast %247 : vector<1x1x8xf32> to vector<1x8xf32>
    %249 = vector.broadcast %248 : vector<1x8xf32> to vector<128x8xf32>
    %250 = arith.mulf %249, %244 : vector<128x8xf32>
    %251 = arith.select %246, %244, %250 : vector<128x8xi1>, vector<128x8xf32>
    %252 = vector.extract_strided_slice %251 {offsets = [0, 0], sizes = [128, 4], strides = [1, 1]} : vector<128x8xf32> to vector<128x4xf32>
    %253 = tpu.transpose %252, [1, 0] : vector<128x4xf32> -> vector<4x128xf32>
    %c0_188 = arith.constant 0 : index
    %c8_189 = arith.constant 8 : index
    %c0_190 = arith.constant 0 : index
    %254 = vector.load %arg8[%c0_188, %c8_189, %c0_190] : memref<1x16x256xf32, #tpu.memory_space<vmem>>, vector<1x4x128xf32>
    %255 = vector.shape_cast %254 : vector<1x4x128xf32> to vector<4x128xf32>
    %256 = vector.shape_cast %253 : vector<4x128xf32> to vector<1x4x128xf32>
    tpu.vector_store %arg8[%c0_188, %c8_189, %c0_190], %256 {strides = array<i32>} : memref<1x16x256xf32, #tpu.memory_space<vmem>>, vector<1x4x128xf32>,
    %257 = vector.extract_strided_slice %251 {offsets = [0, 4], sizes = [128, 4], strides = [1, 1]} : vector<128x8xf32> to vector<128x4xf32>
    %258 = vector.shape_cast %257 : vector<128x4xf32> to vector<8x16x4xf32>
    %c0_191 = arith.constant 0 : index
    %c1_192 = arith.constant 1 : index
    %c1_193 = arith.constant 1 : index
    %c0_194 = arith.constant 0 : index
    %259 = vector.load %arg10[%c0_191, %c1_192, %c1_193, %c0_194] : memref<1x18x18x4xf32, #tpu.memory_space<vmem>>, vector<1x8x16x4xf32>
    %260 = vector.shape_cast %259 : vector<1x8x16x4xf32> to vector<8x16x4xf32>
    %261 = vector.shape_cast %258 : vector<8x16x4xf32> to vector<1x8x16x4xf32>
    tpu.vector_store %arg10[%c0_191, %c1_192, %c1_193, %c0_194], %261 {strides = array<i32>} : memref<1x18x18x4xf32, #tpu.memory_space<vmem>>, vector<1x8x16x4xf32>,
    %cst_195 = arith.constant 0.000000e+00 : f32
    %262 = vector.broadcast %cst_195 : f32 to vector<128x8xf32>
    %c0_196 = arith.constant 0 : index
    %c8_197 = arith.constant 8 : index
    %c0_198 = arith.constant 0 : index
    %c0_199 = arith.constant 0 : index
    %263 = vector.load %arg9[%c0_196, %c8_197, %c0_198, %c0_199] : memref<1x18x18x4xf32, #tpu.memory_space<vmem>>, vector<1x8x18x4xf32>
    %264 = vector.shape_cast %263 : vector<1x8x18x4xf32> to vector<8x18x4xf32>
    %265 = vector.extract_strided_slice %264 {offsets = [0, 0, 0], sizes = [8, 16, 4], strides = [1, 1, 1]} : vector<8x18x4xf32> to vector<8x16x4xf32>
    %266 = vector.shape_cast %265 : vector<8x16x4xf32> to vector<128x4xf32>
    %c0_200 = arith.constant 0 : index
    %c0_201 = arith.constant 0 : index
    %c0_202 = arith.constant 0 : index
    %267 = vector.load %arg4[%c0_200, %c0_201, %c0_202] : memref<9x4x8xf32, #tpu.memory_space<vmem>>, vector<1x4x8xf32>
    %268 = vector.shape_cast %267 : vector<1x4x8xf32> to vector<4x8xf32>
    %cst_203 = arith.constant dense<0.000000e+00> : vector<128x8xf32>
    %269 = tpu.matmul %266, %268, %cst_203 {dimension_numbers = #tpu.dot_dimension_numbers<[1], [0], [0], [1], [0, 0, 1, 1], [], []>} : vector<128x4xf32>, vector<4x8xf32>, vector<128x8xf32> -> vector<128x8xf32>
    %270 = arith.addf %262, %269 : vector<128x8xf32>
    %271 = vector.extract_strided_slice %264 {offsets = [0, 1, 0], sizes = [8, 16, 4], strides = [1, 1, 1]} : vector<8x18x4xf32> to vector<8x16x4xf32>
    %272 = vector.shape_cast %271 : vector<8x16x4xf32> to vector<128x4xf32>
    %c1_204 = arith.constant 1 : index
    %c0_205 = arith.constant 0 : index
    %c0_206 = arith.constant 0 : index
    %273 = vector.load %arg4[%c1_204, %c0_205, %c0_206] : memref<9x4x8xf32, #tpu.memory_space<vmem>>, vector<1x4x8xf32>
    %274 = vector.shape_cast %273 : vector<1x4x8xf32> to vector<4x8xf32>
    %cst_207 = arith.constant dense<0.000000e+00> : vector<128x8xf32>
    %275 = tpu.matmul %272, %274, %cst_207 {dimension_numbers = #tpu.dot_dimension_numbers<[1], [0], [0], [1], [0, 0, 1, 1], [], []>} : vector<128x4xf32>, vector<4x8xf32>, vector<128x8xf32> -> vector<128x8xf32>
    %276 = arith.addf %270, %275 : vector<128x8xf32>
    %277 = vector.extract_strided_slice %264 {offsets = [0, 2, 0], sizes = [8, 16, 4], strides = [1, 1, 1]} : vector<8x18x4xf32> to vector<8x16x4xf32>
    %278 = vector.shape_cast %277 : vector<8x16x4xf32> to vector<128x4xf32>
    %c2_208 = arith.constant 2 : index
    %c0_209 = arith.constant 0 : index
    %c0_210 = arith.constant 0 : index
    %279 = vector.load %arg4[%c2_208, %c0_209, %c0_210] : memref<9x4x8xf32, #tpu.memory_space<vmem>>, vector<1x4x8xf32>
    %280 = vector.shape_cast %279 : vector<1x4x8xf32> to vector<4x8xf32>
    %cst_211 = arith.constant dense<0.000000e+00> : vector<128x8xf32>
    %281 = tpu.matmul %278, %280, %cst_211 {dimension_numbers = #tpu.dot_dimension_numbers<[1], [0], [0], [1], [0, 0, 1, 1], [], []>} : vector<128x4xf32>, vector<4x8xf32>, vector<128x8xf32> -> vector<128x8xf32>
    %282 = arith.addf %276, %281 : vector<128x8xf32>
    %c0_212 = arith.constant 0 : index
    %c9_213 = arith.constant 9 : index
    %c0_214 = arith.constant 0 : index
    %c0_215 = arith.constant 0 : index
    %283 = vector.load %arg9[%c0_212, %c9_213, %c0_214, %c0_215] : memref<1x18x18x4xf32, #tpu.memory_space<vmem>>, vector<1x8x18x4xf32>
    %284 = vector.shape_cast %283 : vector<1x8x18x4xf32> to vector<8x18x4xf32>
    %285 = vector.extract_strided_slice %284 {offsets = [0, 0, 0], sizes = [8, 16, 4], strides = [1, 1, 1]} : vector<8x18x4xf32> to vector<8x16x4xf32>
    %286 = vector.shape_cast %285 : vector<8x16x4xf32> to vector<128x4xf32>
    %c3_216 = arith.constant 3 : index
    %c0_217 = arith.constant 0 : index
    %c0_218 = arith.constant 0 : index
    %287 = vector.load %arg4[%c3_216, %c0_217, %c0_218] : memref<9x4x8xf32, #tpu.memory_space<vmem>>, vector<1x4x8xf32>
    %288 = vector.shape_cast %287 : vector<1x4x8xf32> to vector<4x8xf32>
    %cst_219 = arith.constant dense<0.000000e+00> : vector<128x8xf32>
    %289 = tpu.matmul %286, %288, %cst_219 {dimension_numbers = #tpu.dot_dimension_numbers<[1], [0], [0], [1], [0, 0, 1, 1], [], []>} : vector<128x4xf32>, vector<4x8xf32>, vector<128x8xf32> -> vector<128x8xf32>
    %290 = arith.addf %282, %289 : vector<128x8xf32>
    %291 = vector.extract_strided_slice %284 {offsets = [0, 1, 0], sizes = [8, 16, 4], strides = [1, 1, 1]} : vector<8x18x4xf32> to vector<8x16x4xf32>
    %292 = vector.shape_cast %291 : vector<8x16x4xf32> to vector<128x4xf32>
    %c4_220 = arith.constant 4 : index
    %c0_221 = arith.constant 0 : index
    %c0_222 = arith.constant 0 : index
    %293 = vector.load %arg4[%c4_220, %c0_221, %c0_222] : memref<9x4x8xf32, #tpu.memory_space<vmem>>, vector<1x4x8xf32>
    %294 = vector.shape_cast %293 : vector<1x4x8xf32> to vector<4x8xf32>
    %cst_223 = arith.constant dense<0.000000e+00> : vector<128x8xf32>
    %295 = tpu.matmul %292, %294, %cst_223 {dimension_numbers = #tpu.dot_dimension_numbers<[1], [0], [0], [1], [0, 0, 1, 1], [], []>} : vector<128x4xf32>, vector<4x8xf32>, vector<128x8xf32> -> vector<128x8xf32>
    %296 = arith.addf %290, %295 : vector<128x8xf32>
    %297 = vector.extract_strided_slice %284 {offsets = [0, 2, 0], sizes = [8, 16, 4], strides = [1, 1, 1]} : vector<8x18x4xf32> to vector<8x16x4xf32>
    %298 = vector.shape_cast %297 : vector<8x16x4xf32> to vector<128x4xf32>
    %c5_224 = arith.constant 5 : index
    %c0_225 = arith.constant 0 : index
    %c0_226 = arith.constant 0 : index
    %299 = vector.load %arg4[%c5_224, %c0_225, %c0_226] : memref<9x4x8xf32, #tpu.memory_space<vmem>>, vector<1x4x8xf32>
    %300 = vector.shape_cast %299 : vector<1x4x8xf32> to vector<4x8xf32>
    %cst_227 = arith.constant dense<0.000000e+00> : vector<128x8xf32>
    %301 = tpu.matmul %298, %300, %cst_227 {dimension_numbers = #tpu.dot_dimension_numbers<[1], [0], [0], [1], [0, 0, 1, 1], [], []>} : vector<128x4xf32>, vector<4x8xf32>, vector<128x8xf32> -> vector<128x8xf32>
    %302 = arith.addf %296, %301 : vector<128x8xf32>
    %c0_228 = arith.constant 0 : index
    %c10_229 = arith.constant 10 : index
    %c0_230 = arith.constant 0 : index
    %c0_231 = arith.constant 0 : index
    %303 = vector.load %arg9[%c0_228, %c10_229, %c0_230, %c0_231] : memref<1x18x18x4xf32, #tpu.memory_space<vmem>>, vector<1x8x18x4xf32>
    %304 = vector.shape_cast %303 : vector<1x8x18x4xf32> to vector<8x18x4xf32>
    %305 = vector.extract_strided_slice %304 {offsets = [0, 0, 0], sizes = [8, 16, 4], strides = [1, 1, 1]} : vector<8x18x4xf32> to vector<8x16x4xf32>
    %306 = vector.shape_cast %305 : vector<8x16x4xf32> to vector<128x4xf32>
    %c6_232 = arith.constant 6 : index
    %c0_233 = arith.constant 0 : index
    %c0_234 = arith.constant 0 : index
    %307 = vector.load %arg4[%c6_232, %c0_233, %c0_234] : memref<9x4x8xf32, #tpu.memory_space<vmem>>, vector<1x4x8xf32>
    %308 = vector.shape_cast %307 : vector<1x4x8xf32> to vector<4x8xf32>
    %cst_235 = arith.constant dense<0.000000e+00> : vector<128x8xf32>
    %309 = tpu.matmul %306, %308, %cst_235 {dimension_numbers = #tpu.dot_dimension_numbers<[1], [0], [0], [1], [0, 0, 1, 1], [], []>} : vector<128x4xf32>, vector<4x8xf32>, vector<128x8xf32> -> vector<128x8xf32>
    %310 = arith.addf %302, %309 : vector<128x8xf32>
    %311 = vector.extract_strided_slice %304 {offsets = [0, 1, 0], sizes = [8, 16, 4], strides = [1, 1, 1]} : vector<8x18x4xf32> to vector<8x16x4xf32>
    %312 = vector.shape_cast %311 : vector<8x16x4xf32> to vector<128x4xf32>
    %c7_236 = arith.constant 7 : index
    %c0_237 = arith.constant 0 : index
    %c0_238 = arith.constant 0 : index
    %313 = vector.load %arg4[%c7_236, %c0_237, %c0_238] : memref<9x4x8xf32, #tpu.memory_space<vmem>>, vector<1x4x8xf32>
    %314 = vector.shape_cast %313 : vector<1x4x8xf32> to vector<4x8xf32>
    %cst_239 = arith.constant dense<0.000000e+00> : vector<128x8xf32>
    %315 = tpu.matmul %312, %314, %cst_239 {dimension_numbers = #tpu.dot_dimension_numbers<[1], [0], [0], [1], [0, 0, 1, 1], [], []>} : vector<128x4xf32>, vector<4x8xf32>, vector<128x8xf32> -> vector<128x8xf32>
    %316 = arith.addf %310, %315 : vector<128x8xf32>
    %317 = vector.extract_strided_slice %304 {offsets = [0, 2, 0], sizes = [8, 16, 4], strides = [1, 1, 1]} : vector<8x18x4xf32> to vector<8x16x4xf32>
    %318 = vector.shape_cast %317 : vector<8x16x4xf32> to vector<128x4xf32>
    %c8_240 = arith.constant 8 : index
    %c0_241 = arith.constant 0 : index
    %c0_242 = arith.constant 0 : index
    %319 = vector.load %arg4[%c8_240, %c0_241, %c0_242] : memref<9x4x8xf32, #tpu.memory_space<vmem>>, vector<1x4x8xf32>
    %320 = vector.shape_cast %319 : vector<1x4x8xf32> to vector<4x8xf32>
    %cst_243 = arith.constant dense<0.000000e+00> : vector<128x8xf32>
    %321 = tpu.matmul %318, %320, %cst_243 {dimension_numbers = #tpu.dot_dimension_numbers<[1], [0], [0], [1], [0, 0, 1, 1], [], []>} : vector<128x4xf32>, vector<4x8xf32>, vector<128x8xf32> -> vector<128x8xf32>
    %322 = arith.addf %316, %321 : vector<128x8xf32>
    %c0_244 = arith.constant 0 : index
    %c0_245 = arith.constant 0 : index
    %c0_246 = arith.constant 0 : index
    %323 = vector.load %arg5[%c0_244, %c0_245, %c0_246] : memref<3x1x8xf32, #tpu.memory_space<vmem>>, vector<1x1x8xf32>
    %324 = vector.shape_cast %323 : vector<1x1x8xf32> to vector<1x8xf32>
    %325 = vector.broadcast %324 : vector<1x8xf32> to vector<128x8xf32>
    %326 = arith.mulf %322, %325 : vector<128x8xf32>
    %c1_247 = arith.constant 1 : index
    %c0_248 = arith.constant 0 : index
    %c0_249 = arith.constant 0 : index
    %327 = vector.load %arg5[%c1_247, %c0_248, %c0_249] : memref<3x1x8xf32, #tpu.memory_space<vmem>>, vector<1x1x8xf32>
    %328 = vector.shape_cast %327 : vector<1x1x8xf32> to vector<1x8xf32>
    %329 = vector.broadcast %328 : vector<1x8xf32> to vector<128x8xf32>
    %330 = arith.addf %326, %329 : vector<128x8xf32>
    %cst_250 = arith.constant 0.000000e+00 : f32
    %331 = vector.broadcast %cst_250 : f32 to vector<128x8xf32>
    %332 = arith.cmpf ogt, %330, %331 : vector<128x8xf32>
    %c2_251 = arith.constant 2 : index
    %c0_252 = arith.constant 0 : index
    %c0_253 = arith.constant 0 : index
    %333 = vector.load %arg5[%c2_251, %c0_252, %c0_253] : memref<3x1x8xf32, #tpu.memory_space<vmem>>, vector<1x1x8xf32>
    %334 = vector.shape_cast %333 : vector<1x1x8xf32> to vector<1x8xf32>
    %335 = vector.broadcast %334 : vector<1x8xf32> to vector<128x8xf32>
    %336 = arith.mulf %335, %330 : vector<128x8xf32>
    %337 = arith.select %332, %330, %336 : vector<128x8xi1>, vector<128x8xf32>
    %338 = vector.extract_strided_slice %337 {offsets = [0, 0], sizes = [128, 4], strides = [1, 1]} : vector<128x8xf32> to vector<128x4xf32>
    %339 = tpu.transpose %338, [1, 0] : vector<128x4xf32> -> vector<4x128xf32>
    %c0_254 = arith.constant 0 : index
    %c8_255 = arith.constant 8 : index
    %c128_256 = arith.constant 128 : index
    %340 = vector.load %arg8[%c0_254, %c8_255, %c128_256] : memref<1x16x256xf32, #tpu.memory_space<vmem>>, vector<1x4x128xf32>
    %341 = vector.shape_cast %340 : vector<1x4x128xf32> to vector<4x128xf32>
    %342 = vector.shape_cast %339 : vector<4x128xf32> to vector<1x4x128xf32>
    tpu.vector_store %arg8[%c0_254, %c8_255, %c128_256], %342 {strides = array<i32>} : memref<1x16x256xf32, #tpu.memory_space<vmem>>, vector<1x4x128xf32>,
    %343 = vector.extract_strided_slice %337 {offsets = [0, 4], sizes = [128, 4], strides = [1, 1]} : vector<128x8xf32> to vector<128x4xf32>
    %344 = vector.shape_cast %343 : vector<128x4xf32> to vector<8x16x4xf32>
    %c0_257 = arith.constant 0 : index
    %c9_258 = arith.constant 9 : index
    %c1_259 = arith.constant 1 : index
    %c0_260 = arith.constant 0 : index
    %345 = vector.load %arg10[%c0_257, %c9_258, %c1_259, %c0_260] : memref<1x18x18x4xf32, #tpu.memory_space<vmem>>, vector<1x8x16x4xf32>
    %346 = vector.shape_cast %345 : vector<1x8x16x4xf32> to vector<8x16x4xf32>
    %347 = vector.shape_cast %344 : vector<8x16x4xf32> to vector<1x8x16x4xf32>
    tpu.vector_store %arg10[%c0_257, %c9_258, %c1_259, %c0_260], %347 {strides = array<i32>} : memref<1x18x18x4xf32, #tpu.memory_space<vmem>>, vector<1x8x16x4xf32>,
    %cst_261 = arith.constant 0.000000e+00 : f32
    %348 = vector.broadcast %cst_261 : f32 to vector<128x4xf32>
    %c0_262 = arith.constant 0 : index
    %c0_263 = arith.constant 0 : index
    %c0_264 = arith.constant 0 : index
    %c0_265 = arith.constant 0 : index
    %349 = vector.load %arg10[%c0_262, %c0_263, %c0_264, %c0_265] : memref<1x18x18x4xf32, #tpu.memory_space<vmem>>, vector<1x8x18x4xf32>
    %350 = vector.shape_cast %349 : vector<1x8x18x4xf32> to vector<8x18x4xf32>
    %351 = vector.extract_strided_slice %350 {offsets = [0, 0, 0], sizes = [8, 16, 4], strides = [1, 1, 1]} : vector<8x18x4xf32> to vector<8x16x4xf32>
    %352 = vector.shape_cast %351 : vector<8x16x4xf32> to vector<128x4xf32>
    %c0_266 = arith.constant 0 : index
    %c0_267 = arith.constant 0 : index
    %c0_268 = arith.constant 0 : index
    %353 = vector.load %arg6[%c0_266, %c0_267, %c0_268] : memref<9x4x4xf32, #tpu.memory_space<vmem>>, vector<1x4x4xf32>
    %354 = vector.shape_cast %353 : vector<1x4x4xf32> to vector<4x4xf32>
    %cst_269 = arith.constant dense<0.000000e+00> : vector<128x4xf32>
    %355 = tpu.matmul %352, %354, %cst_269 {dimension_numbers = #tpu.dot_dimension_numbers<[1], [0], [0], [1], [0, 0, 1, 1], [], []>} : vector<128x4xf32>, vector<4x4xf32>, vector<128x4xf32> -> vector<128x4xf32>
    %356 = arith.addf %348, %355 : vector<128x4xf32>
    %357 = vector.extract_strided_slice %350 {offsets = [0, 1, 0], sizes = [8, 16, 4], strides = [1, 1, 1]} : vector<8x18x4xf32> to vector<8x16x4xf32>
    %358 = vector.shape_cast %357 : vector<8x16x4xf32> to vector<128x4xf32>
    %c1_270 = arith.constant 1 : index
    %c0_271 = arith.constant 0 : index
    %c0_272 = arith.constant 0 : index
    %359 = vector.load %arg6[%c1_270, %c0_271, %c0_272] : memref<9x4x4xf32, #tpu.memory_space<vmem>>, vector<1x4x4xf32>
    %360 = vector.shape_cast %359 : vector<1x4x4xf32> to vector<4x4xf32>
    %cst_273 = arith.constant dense<0.000000e+00> : vector<128x4xf32>
    %361 = tpu.matmul %358, %360, %cst_273 {dimension_numbers = #tpu.dot_dimension_numbers<[1], [0], [0], [1], [0, 0, 1, 1], [], []>} : vector<128x4xf32>, vector<4x4xf32>, vector<128x4xf32> -> vector<128x4xf32>
    %362 = arith.addf %356, %361 : vector<128x4xf32>
    %363 = vector.extract_strided_slice %350 {offsets = [0, 2, 0], sizes = [8, 16, 4], strides = [1, 1, 1]} : vector<8x18x4xf32> to vector<8x16x4xf32>
    %364 = vector.shape_cast %363 : vector<8x16x4xf32> to vector<128x4xf32>
    %c2_274 = arith.constant 2 : index
    %c0_275 = arith.constant 0 : index
    %c0_276 = arith.constant 0 : index
    %365 = vector.load %arg6[%c2_274, %c0_275, %c0_276] : memref<9x4x4xf32, #tpu.memory_space<vmem>>, vector<1x4x4xf32>
    %366 = vector.shape_cast %365 : vector<1x4x4xf32> to vector<4x4xf32>
    %cst_277 = arith.constant dense<0.000000e+00> : vector<128x4xf32>
    %367 = tpu.matmul %364, %366, %cst_277 {dimension_numbers = #tpu.dot_dimension_numbers<[1], [0], [0], [1], [0, 0, 1, 1], [], []>} : vector<128x4xf32>, vector<4x4xf32>, vector<128x4xf32> -> vector<128x4xf32>
    %368 = arith.addf %362, %367 : vector<128x4xf32>
    %c0_278 = arith.constant 0 : index
    %c1_279 = arith.constant 1 : index
    %c0_280 = arith.constant 0 : index
    %c0_281 = arith.constant 0 : index
    %369 = vector.load %arg10[%c0_278, %c1_279, %c0_280, %c0_281] : memref<1x18x18x4xf32, #tpu.memory_space<vmem>>, vector<1x8x18x4xf32>
    %370 = vector.shape_cast %369 : vector<1x8x18x4xf32> to vector<8x18x4xf32>
    %371 = vector.extract_strided_slice %370 {offsets = [0, 0, 0], sizes = [8, 16, 4], strides = [1, 1, 1]} : vector<8x18x4xf32> to vector<8x16x4xf32>
    %372 = vector.shape_cast %371 : vector<8x16x4xf32> to vector<128x4xf32>
    %c3_282 = arith.constant 3 : index
    %c0_283 = arith.constant 0 : index
    %c0_284 = arith.constant 0 : index
    %373 = vector.load %arg6[%c3_282, %c0_283, %c0_284] : memref<9x4x4xf32, #tpu.memory_space<vmem>>, vector<1x4x4xf32>
    %374 = vector.shape_cast %373 : vector<1x4x4xf32> to vector<4x4xf32>
    %cst_285 = arith.constant dense<0.000000e+00> : vector<128x4xf32>
    %375 = tpu.matmul %372, %374, %cst_285 {dimension_numbers = #tpu.dot_dimension_numbers<[1], [0], [0], [1], [0, 0, 1, 1], [], []>} : vector<128x4xf32>, vector<4x4xf32>, vector<128x4xf32> -> vector<128x4xf32>
    %376 = arith.addf %368, %375 : vector<128x4xf32>
    %377 = vector.extract_strided_slice %370 {offsets = [0, 1, 0], sizes = [8, 16, 4], strides = [1, 1, 1]} : vector<8x18x4xf32> to vector<8x16x4xf32>
    %378 = vector.shape_cast %377 : vector<8x16x4xf32> to vector<128x4xf32>
    %c4_286 = arith.constant 4 : index
    %c0_287 = arith.constant 0 : index
    %c0_288 = arith.constant 0 : index
    %379 = vector.load %arg6[%c4_286, %c0_287, %c0_288] : memref<9x4x4xf32, #tpu.memory_space<vmem>>, vector<1x4x4xf32>
    %380 = vector.shape_cast %379 : vector<1x4x4xf32> to vector<4x4xf32>
    %cst_289 = arith.constant dense<0.000000e+00> : vector<128x4xf32>
    %381 = tpu.matmul %378, %380, %cst_289 {dimension_numbers = #tpu.dot_dimension_numbers<[1], [0], [0], [1], [0, 0, 1, 1], [], []>} : vector<128x4xf32>, vector<4x4xf32>, vector<128x4xf32> -> vector<128x4xf32>
    %382 = arith.addf %376, %381 : vector<128x4xf32>
    %383 = vector.extract_strided_slice %370 {offsets = [0, 2, 0], sizes = [8, 16, 4], strides = [1, 1, 1]} : vector<8x18x4xf32> to vector<8x16x4xf32>
    %384 = vector.shape_cast %383 : vector<8x16x4xf32> to vector<128x4xf32>
    %c5_290 = arith.constant 5 : index
    %c0_291 = arith.constant 0 : index
    %c0_292 = arith.constant 0 : index
    %385 = vector.load %arg6[%c5_290, %c0_291, %c0_292] : memref<9x4x4xf32, #tpu.memory_space<vmem>>, vector<1x4x4xf32>
    %386 = vector.shape_cast %385 : vector<1x4x4xf32> to vector<4x4xf32>
    %cst_293 = arith.constant dense<0.000000e+00> : vector<128x4xf32>
    %387 = tpu.matmul %384, %386, %cst_293 {dimension_numbers = #tpu.dot_dimension_numbers<[1], [0], [0], [1], [0, 0, 1, 1], [], []>} : vector<128x4xf32>, vector<4x4xf32>, vector<128x4xf32> -> vector<128x4xf32>
    %388 = arith.addf %382, %387 : vector<128x4xf32>
    %c0_294 = arith.constant 0 : index
    %c2_295 = arith.constant 2 : index
    %c0_296 = arith.constant 0 : index
    %c0_297 = arith.constant 0 : index
    %389 = vector.load %arg10[%c0_294, %c2_295, %c0_296, %c0_297] : memref<1x18x18x4xf32, #tpu.memory_space<vmem>>, vector<1x8x18x4xf32>
    %390 = vector.shape_cast %389 : vector<1x8x18x4xf32> to vector<8x18x4xf32>
    %391 = vector.extract_strided_slice %390 {offsets = [0, 0, 0], sizes = [8, 16, 4], strides = [1, 1, 1]} : vector<8x18x4xf32> to vector<8x16x4xf32>
    %392 = vector.shape_cast %391 : vector<8x16x4xf32> to vector<128x4xf32>
    %c6_298 = arith.constant 6 : index
    %c0_299 = arith.constant 0 : index
    %c0_300 = arith.constant 0 : index
    %393 = vector.load %arg6[%c6_298, %c0_299, %c0_300] : memref<9x4x4xf32, #tpu.memory_space<vmem>>, vector<1x4x4xf32>
    %394 = vector.shape_cast %393 : vector<1x4x4xf32> to vector<4x4xf32>
    %cst_301 = arith.constant dense<0.000000e+00> : vector<128x4xf32>
    %395 = tpu.matmul %392, %394, %cst_301 {dimension_numbers = #tpu.dot_dimension_numbers<[1], [0], [0], [1], [0, 0, 1, 1], [], []>} : vector<128x4xf32>, vector<4x4xf32>, vector<128x4xf32> -> vector<128x4xf32>
    %396 = arith.addf %388, %395 : vector<128x4xf32>
    %397 = vector.extract_strided_slice %390 {offsets = [0, 1, 0], sizes = [8, 16, 4], strides = [1, 1, 1]} : vector<8x18x4xf32> to vector<8x16x4xf32>
    %398 = vector.shape_cast %397 : vector<8x16x4xf32> to vector<128x4xf32>
    %c7_302 = arith.constant 7 : index
    %c0_303 = arith.constant 0 : index
    %c0_304 = arith.constant 0 : index
    %399 = vector.load %arg6[%c7_302, %c0_303, %c0_304] : memref<9x4x4xf32, #tpu.memory_space<vmem>>, vector<1x4x4xf32>
    %400 = vector.shape_cast %399 : vector<1x4x4xf32> to vector<4x4xf32>
    %cst_305 = arith.constant dense<0.000000e+00> : vector<128x4xf32>
    %401 = tpu.matmul %398, %400, %cst_305 {dimension_numbers = #tpu.dot_dimension_numbers<[1], [0], [0], [1], [0, 0, 1, 1], [], []>} : vector<128x4xf32>, vector<4x4xf32>, vector<128x4xf32> -> vector<128x4xf32>
    %402 = arith.addf %396, %401 : vector<128x4xf32>
    %403 = vector.extract_strided_slice %390 {offsets = [0, 2, 0], sizes = [8, 16, 4], strides = [1, 1, 1]} : vector<8x18x4xf32> to vector<8x16x4xf32>
    %404 = vector.shape_cast %403 : vector<8x16x4xf32> to vector<128x4xf32>
    %c8_306 = arith.constant 8 : index
    %c0_307 = arith.constant 0 : index
    %c0_308 = arith.constant 0 : index
    %405 = vector.load %arg6[%c8_306, %c0_307, %c0_308] : memref<9x4x4xf32, #tpu.memory_space<vmem>>, vector<1x4x4xf32>
    %406 = vector.shape_cast %405 : vector<1x4x4xf32> to vector<4x4xf32>
    %cst_309 = arith.constant dense<0.000000e+00> : vector<128x4xf32>
    %407 = tpu.matmul %404, %406, %cst_309 {dimension_numbers = #tpu.dot_dimension_numbers<[1], [0], [0], [1], [0, 0, 1, 1], [], []>} : vector<128x4xf32>, vector<4x4xf32>, vector<128x4xf32> -> vector<128x4xf32>
    %408 = arith.addf %402, %407 : vector<128x4xf32>
    %c0_310 = arith.constant 0 : index
    %c0_311 = arith.constant 0 : index
    %c0_312 = arith.constant 0 : index
    %409 = vector.load %arg7[%c0_310, %c0_311, %c0_312] : memref<3x1x4xf32, #tpu.memory_space<vmem>>, vector<1x1x4xf32>
    %410 = vector.shape_cast %409 : vector<1x1x4xf32> to vector<1x4xf32>
    %411 = vector.broadcast %410 : vector<1x4xf32> to vector<128x4xf32>
    %412 = arith.mulf %408, %411 : vector<128x4xf32>
    %c1_313 = arith.constant 1 : index
    %c0_314 = arith.constant 0 : index
    %c0_315 = arith.constant 0 : index
    %413 = vector.load %arg7[%c1_313, %c0_314, %c0_315] : memref<3x1x4xf32, #tpu.memory_space<vmem>>, vector<1x1x4xf32>
    %414 = vector.shape_cast %413 : vector<1x1x4xf32> to vector<1x4xf32>
    %415 = vector.broadcast %414 : vector<1x4xf32> to vector<128x4xf32>
    %416 = arith.addf %412, %415 : vector<128x4xf32>
    %cst_316 = arith.constant 0.000000e+00 : f32
    %417 = vector.broadcast %cst_316 : f32 to vector<128x4xf32>
    %418 = arith.cmpf ogt, %416, %417 : vector<128x4xf32>
    %c2_317 = arith.constant 2 : index
    %c0_318 = arith.constant 0 : index
    %c0_319 = arith.constant 0 : index
    %419 = vector.load %arg7[%c2_317, %c0_318, %c0_319] : memref<3x1x4xf32, #tpu.memory_space<vmem>>, vector<1x1x4xf32>
    %420 = vector.shape_cast %419 : vector<1x1x4xf32> to vector<1x4xf32>
    %421 = vector.broadcast %420 : vector<1x4xf32> to vector<128x4xf32>
    %422 = arith.mulf %421, %416 : vector<128x4xf32>
    %423 = arith.select %418, %416, %422 : vector<128x4xi1>, vector<128x4xf32>
    %424 = tpu.transpose %423, [1, 0] : vector<128x4xf32> -> vector<4x128xf32>
    %c0_320 = arith.constant 0 : index
    %c12 = arith.constant 12 : index
    %c0_321 = arith.constant 0 : index
    %425 = vector.load %arg8[%c0_320, %c12, %c0_321] : memref<1x16x256xf32, #tpu.memory_space<vmem>>, vector<1x4x128xf32>
    %426 = vector.shape_cast %425 : vector<1x4x128xf32> to vector<4x128xf32>
    %427 = vector.shape_cast %424 : vector<4x128xf32> to vector<1x4x128xf32>
    tpu.vector_store %arg8[%c0_320, %c12, %c0_321], %427 {strides = array<i32>} : memref<1x16x256xf32, #tpu.memory_space<vmem>>, vector<1x4x128xf32>,
    %cst_322 = arith.constant 0.000000e+00 : f32
    %428 = vector.broadcast %cst_322 : f32 to vector<128x4xf32>
    %c0_323 = arith.constant 0 : index
    %c8_324 = arith.constant 8 : index
    %c0_325 = arith.constant 0 : index
    %c0_326 = arith.constant 0 : index
    %429 = vector.load %arg10[%c0_323, %c8_324, %c0_325, %c0_326] : memref<1x18x18x4xf32, #tpu.memory_space<vmem>>, vector<1x8x18x4xf32>
    %430 = vector.shape_cast %429 : vector<1x8x18x4xf32> to vector<8x18x4xf32>
    %431 = vector.extract_strided_slice %430 {offsets = [0, 0, 0], sizes = [8, 16, 4], strides = [1, 1, 1]} : vector<8x18x4xf32> to vector<8x16x4xf32>
    %432 = vector.shape_cast %431 : vector<8x16x4xf32> to vector<128x4xf32>
    %c0_327 = arith.constant 0 : index
    %c0_328 = arith.constant 0 : index
    %c0_329 = arith.constant 0 : index
    %433 = vector.load %arg6[%c0_327, %c0_328, %c0_329] : memref<9x4x4xf32, #tpu.memory_space<vmem>>, vector<1x4x4xf32>
    %434 = vector.shape_cast %433 : vector<1x4x4xf32> to vector<4x4xf32>
    %cst_330 = arith.constant dense<0.000000e+00> : vector<128x4xf32>
    %435 = tpu.matmul %432, %434, %cst_330 {dimension_numbers = #tpu.dot_dimension_numbers<[1], [0], [0], [1], [0, 0, 1, 1], [], []>} : vector<128x4xf32>, vector<4x4xf32>, vector<128x4xf32> -> vector<128x4xf32>
    %436 = arith.addf %428, %435 : vector<128x4xf32>
    %437 = vector.extract_strided_slice %430 {offsets = [0, 1, 0], sizes = [8, 16, 4], strides = [1, 1, 1]} : vector<8x18x4xf32> to vector<8x16x4xf32>
    %438 = vector.shape_cast %437 : vector<8x16x4xf32> to vector<128x4xf32>
    %c1_331 = arith.constant 1 : index
    %c0_332 = arith.constant 0 : index
    %c0_333 = arith.constant 0 : index
    %439 = vector.load %arg6[%c1_331, %c0_332, %c0_333] : memref<9x4x4xf32, #tpu.memory_space<vmem>>, vector<1x4x4xf32>
    %440 = vector.shape_cast %439 : vector<1x4x4xf32> to vector<4x4xf32>
    %cst_334 = arith.constant dense<0.000000e+00> : vector<128x4xf32>
    %441 = tpu.matmul %438, %440, %cst_334 {dimension_numbers = #tpu.dot_dimension_numbers<[1], [0], [0], [1], [0, 0, 1, 1], [], []>} : vector<128x4xf32>, vector<4x4xf32>, vector<128x4xf32> -> vector<128x4xf32>
    %442 = arith.addf %436, %441 : vector<128x4xf32>
    %443 = vector.extract_strided_slice %430 {offsets = [0, 2, 0], sizes = [8, 16, 4], strides = [1, 1, 1]} : vector<8x18x4xf32> to vector<8x16x4xf32>
    %444 = vector.shape_cast %443 : vector<8x16x4xf32> to vector<128x4xf32>
    %c2_335 = arith.constant 2 : index
    %c0_336 = arith.constant 0 : index
    %c0_337 = arith.constant 0 : index
    %445 = vector.load %arg6[%c2_335, %c0_336, %c0_337] : memref<9x4x4xf32, #tpu.memory_space<vmem>>, vector<1x4x4xf32>
    %446 = vector.shape_cast %445 : vector<1x4x4xf32> to vector<4x4xf32>
    %cst_338 = arith.constant dense<0.000000e+00> : vector<128x4xf32>
    %447 = tpu.matmul %444, %446, %cst_338 {dimension_numbers = #tpu.dot_dimension_numbers<[1], [0], [0], [1], [0, 0, 1, 1], [], []>} : vector<128x4xf32>, vector<4x4xf32>, vector<128x4xf32> -> vector<128x4xf32>
    %448 = arith.addf %442, %447 : vector<128x4xf32>
    %c0_339 = arith.constant 0 : index
    %c9_340 = arith.constant 9 : index
    %c0_341 = arith.constant 0 : index
    %c0_342 = arith.constant 0 : index
    %449 = vector.load %arg10[%c0_339, %c9_340, %c0_341, %c0_342] : memref<1x18x18x4xf32, #tpu.memory_space<vmem>>, vector<1x8x18x4xf32>
    %450 = vector.shape_cast %449 : vector<1x8x18x4xf32> to vector<8x18x4xf32>
    %451 = vector.extract_strided_slice %450 {offsets = [0, 0, 0], sizes = [8, 16, 4], strides = [1, 1, 1]} : vector<8x18x4xf32> to vector<8x16x4xf32>
    %452 = vector.shape_cast %451 : vector<8x16x4xf32> to vector<128x4xf32>
    %c3_343 = arith.constant 3 : index
    %c0_344 = arith.constant 0 : index
    %c0_345 = arith.constant 0 : index
    %453 = vector.load %arg6[%c3_343, %c0_344, %c0_345] : memref<9x4x4xf32, #tpu.memory_space<vmem>>, vector<1x4x4xf32>
    %454 = vector.shape_cast %453 : vector<1x4x4xf32> to vector<4x4xf32>
    %cst_346 = arith.constant dense<0.000000e+00> : vector<128x4xf32>
    %455 = tpu.matmul %452, %454, %cst_346 {dimension_numbers = #tpu.dot_dimension_numbers<[1], [0], [0], [1], [0, 0, 1, 1], [], []>} : vector<128x4xf32>, vector<4x4xf32>, vector<128x4xf32> -> vector<128x4xf32>
    %456 = arith.addf %448, %455 : vector<128x4xf32>
    %457 = vector.extract_strided_slice %450 {offsets = [0, 1, 0], sizes = [8, 16, 4], strides = [1, 1, 1]} : vector<8x18x4xf32> to vector<8x16x4xf32>
    %458 = vector.shape_cast %457 : vector<8x16x4xf32> to vector<128x4xf32>
    %c4_347 = arith.constant 4 : index
    %c0_348 = arith.constant 0 : index
    %c0_349 = arith.constant 0 : index
    %459 = vector.load %arg6[%c4_347, %c0_348, %c0_349] : memref<9x4x4xf32, #tpu.memory_space<vmem>>, vector<1x4x4xf32>
    %460 = vector.shape_cast %459 : vector<1x4x4xf32> to vector<4x4xf32>
    %cst_350 = arith.constant dense<0.000000e+00> : vector<128x4xf32>
    %461 = tpu.matmul %458, %460, %cst_350 {dimension_numbers = #tpu.dot_dimension_numbers<[1], [0], [0], [1], [0, 0, 1, 1], [], []>} : vector<128x4xf32>, vector<4x4xf32>, vector<128x4xf32> -> vector<128x4xf32>
    %462 = arith.addf %456, %461 : vector<128x4xf32>
    %463 = vector.extract_strided_slice %450 {offsets = [0, 2, 0], sizes = [8, 16, 4], strides = [1, 1, 1]} : vector<8x18x4xf32> to vector<8x16x4xf32>
    %464 = vector.shape_cast %463 : vector<8x16x4xf32> to vector<128x4xf32>
    %c5_351 = arith.constant 5 : index
    %c0_352 = arith.constant 0 : index
    %c0_353 = arith.constant 0 : index
    %465 = vector.load %arg6[%c5_351, %c0_352, %c0_353] : memref<9x4x4xf32, #tpu.memory_space<vmem>>, vector<1x4x4xf32>
    %466 = vector.shape_cast %465 : vector<1x4x4xf32> to vector<4x4xf32>
    %cst_354 = arith.constant dense<0.000000e+00> : vector<128x4xf32>
    %467 = tpu.matmul %464, %466, %cst_354 {dimension_numbers = #tpu.dot_dimension_numbers<[1], [0], [0], [1], [0, 0, 1, 1], [], []>} : vector<128x4xf32>, vector<4x4xf32>, vector<128x4xf32> -> vector<128x4xf32>
    %468 = arith.addf %462, %467 : vector<128x4xf32>
    %c0_355 = arith.constant 0 : index
    %c10_356 = arith.constant 10 : index
    %c0_357 = arith.constant 0 : index
    %c0_358 = arith.constant 0 : index
    %469 = vector.load %arg10[%c0_355, %c10_356, %c0_357, %c0_358] : memref<1x18x18x4xf32, #tpu.memory_space<vmem>>, vector<1x8x18x4xf32>
    %470 = vector.shape_cast %469 : vector<1x8x18x4xf32> to vector<8x18x4xf32>
    %471 = vector.extract_strided_slice %470 {offsets = [0, 0, 0], sizes = [8, 16, 4], strides = [1, 1, 1]} : vector<8x18x4xf32> to vector<8x16x4xf32>
    %472 = vector.shape_cast %471 : vector<8x16x4xf32> to vector<128x4xf32>
    %c6_359 = arith.constant 6 : index
    %c0_360 = arith.constant 0 : index
    %c0_361 = arith.constant 0 : index
    %473 = vector.load %arg6[%c6_359, %c0_360, %c0_361] : memref<9x4x4xf32, #tpu.memory_space<vmem>>, vector<1x4x4xf32>
    %474 = vector.shape_cast %473 : vector<1x4x4xf32> to vector<4x4xf32>
    %cst_362 = arith.constant dense<0.000000e+00> : vector<128x4xf32>
    %475 = tpu.matmul %472, %474, %cst_362 {dimension_numbers = #tpu.dot_dimension_numbers<[1], [0], [0], [1], [0, 0, 1, 1], [], []>} : vector<128x4xf32>, vector<4x4xf32>, vector<128x4xf32> -> vector<128x4xf32>
    %476 = arith.addf %468, %475 : vector<128x4xf32>
    %477 = vector.extract_strided_slice %470 {offsets = [0, 1, 0], sizes = [8, 16, 4], strides = [1, 1, 1]} : vector<8x18x4xf32> to vector<8x16x4xf32>
    %478 = vector.shape_cast %477 : vector<8x16x4xf32> to vector<128x4xf32>
    %c7_363 = arith.constant 7 : index
    %c0_364 = arith.constant 0 : index
    %c0_365 = arith.constant 0 : index
    %479 = vector.load %arg6[%c7_363, %c0_364, %c0_365] : memref<9x4x4xf32, #tpu.memory_space<vmem>>, vector<1x4x4xf32>
    %480 = vector.shape_cast %479 : vector<1x4x4xf32> to vector<4x4xf32>
    %cst_366 = arith.constant dense<0.000000e+00> : vector<128x4xf32>
    %481 = tpu.matmul %478, %480, %cst_366 {dimension_numbers = #tpu.dot_dimension_numbers<[1], [0], [0], [1], [0, 0, 1, 1], [], []>} : vector<128x4xf32>, vector<4x4xf32>, vector<128x4xf32> -> vector<128x4xf32>
    %482 = arith.addf %476, %481 : vector<128x4xf32>
    %483 = vector.extract_strided_slice %470 {offsets = [0, 2, 0], sizes = [8, 16, 4], strides = [1, 1, 1]} : vector<8x18x4xf32> to vector<8x16x4xf32>
    %484 = vector.shape_cast %483 : vector<8x16x4xf32> to vector<128x4xf32>
    %c8_367 = arith.constant 8 : index
    %c0_368 = arith.constant 0 : index
    %c0_369 = arith.constant 0 : index
    %485 = vector.load %arg6[%c8_367, %c0_368, %c0_369] : memref<9x4x4xf32, #tpu.memory_space<vmem>>, vector<1x4x4xf32>
    %486 = vector.shape_cast %485 : vector<1x4x4xf32> to vector<4x4xf32>
    %cst_370 = arith.constant dense<0.000000e+00> : vector<128x4xf32>
    %487 = tpu.matmul %484, %486, %cst_370 {dimension_numbers = #tpu.dot_dimension_numbers<[1], [0], [0], [1], [0, 0, 1, 1], [], []>} : vector<128x4xf32>, vector<4x4xf32>, vector<128x4xf32> -> vector<128x4xf32>
    %488 = arith.addf %482, %487 : vector<128x4xf32>
    %c0_371 = arith.constant 0 : index
    %c0_372 = arith.constant 0 : index
    %c0_373 = arith.constant 0 : index
    %489 = vector.load %arg7[%c0_371, %c0_372, %c0_373] : memref<3x1x4xf32, #tpu.memory_space<vmem>>, vector<1x1x4xf32>
    %490 = vector.shape_cast %489 : vector<1x1x4xf32> to vector<1x4xf32>
    %491 = vector.broadcast %490 : vector<1x4xf32> to vector<128x4xf32>
    %492 = arith.mulf %488, %491 : vector<128x4xf32>
    %c1_374 = arith.constant 1 : index
    %c0_375 = arith.constant 0 : index
    %c0_376 = arith.constant 0 : index
    %493 = vector.load %arg7[%c1_374, %c0_375, %c0_376] : memref<3x1x4xf32, #tpu.memory_space<vmem>>, vector<1x1x4xf32>
    %494 = vector.shape_cast %493 : vector<1x1x4xf32> to vector<1x4xf32>
    %495 = vector.broadcast %494 : vector<1x4xf32> to vector<128x4xf32>
    %496 = arith.addf %492, %495 : vector<128x4xf32>
    %cst_377 = arith.constant 0.000000e+00 : f32
    %497 = vector.broadcast %cst_377 : f32 to vector<128x4xf32>
    %498 = arith.cmpf ogt, %496, %497 : vector<128x4xf32>
    %c2_378 = arith.constant 2 : index
    %c0_379 = arith.constant 0 : index
    %c0_380 = arith.constant 0 : index
    %499 = vector.load %arg7[%c2_378, %c0_379, %c0_380] : memref<3x1x4xf32, #tpu.memory_space<vmem>>, vector<1x1x4xf32>
    %500 = vector.shape_cast %499 : vector<1x1x4xf32> to vector<1x4xf32>
    %501 = vector.broadcast %500 : vector<1x4xf32> to vector<128x4xf32>
    %502 = arith.mulf %501, %496 : vector<128x4xf32>
    %503 = arith.select %498, %496, %502 : vector<128x4xi1>, vector<128x4xf32>
    %504 = tpu.transpose %503, [1, 0] : vector<128x4xf32> -> vector<4x128xf32>
    %c0_381 = arith.constant 0 : index
    %c12_382 = arith.constant 12 : index
    %c128_383 = arith.constant 128 : index
    %505 = vector.load %arg8[%c0_381, %c12_382, %c128_383] : memref<1x16x256xf32, #tpu.memory_space<vmem>>, vector<1x4x128xf32>
    %506 = vector.shape_cast %505 : vector<1x4x128xf32> to vector<4x128xf32>
    %507 = vector.shape_cast %504 : vector<4x128xf32> to vector<1x4x128xf32>
    tpu.vector_store %arg8[%c0_381, %c12_382, %c128_383], %507 {strides = array<i32>} : memref<1x16x256xf32, #tpu.memory_space<vmem>>, vector<1x4x128xf32>,
    return
  }
  func.func @transform_0(%arg0: i32) -> (i32, i32, i32, i32) {
    %c0_i32 = arith.constant 0 : i32
    %c0_i32_0 = arith.constant 0 : i32
    %c0_i32_1 = arith.constant 0 : i32
    %c0_i32_2 = arith.constant 0 : i32
    return %arg0, %c0_i32, %c0_i32_0, %c0_i32_1 : i32, i32, i32, i32
  }
  func.func @transform_1(%arg0: i32) -> (i32, i32, i32) {
    %c0_i32 = arith.constant 0 : i32
    %c0_i32_0 = arith.constant 0 : i32
    %c0_i32_1 = arith.constant 0 : i32
    %c0_i32_2 = arith.constant 0 : i32
    return %c0_i32, %c0_i32_0, %c0_i32_1 : i32, i32, i32
  }
  func.func @transform_2(%arg0: i32) -> (i32, i32, i32) {
    %c0_i32 = arith.constant 0 : i32
    %c0_i32_0 = arith.constant 0 : i32
    %c0_i32_1 = arith.constant 0 : i32
    %c0_i32_2 = arith.constant 0 : i32
    return %c0_i32, %c0_i32_0, %c0_i32_1 : i32, i32, i32
  }
  func.func @transform_3(%arg0: i32) -> (i32, i32, i32) {
    %c0_i32 = arith.constant 0 : i32
    %c0_i32_0 = arith.constant 0 : i32
    %c0_i32_1 = arith.constant 0 : i32
    %c0_i32_2 = arith.constant 0 : i32
    return %c0_i32, %c0_i32_0, %c0_i32_1 : i32, i32, i32
  }
  func.func @transform_4(%arg0: i32) -> (i32, i32, i32) {
    %c0_i32 = arith.constant 0 : i32
    %c0_i32_0 = arith.constant 0 : i32
    %c0_i32_1 = arith.constant 0 : i32
    %c0_i32_2 = arith.constant 0 : i32
    return %c0_i32, %c0_i32_0, %c0_i32_1 : i32, i32, i32
  }
  func.func @transform_5(%arg0: i32) -> (i32, i32, i32) {
    %c0_i32 = arith.constant 0 : i32
    %c0_i32_0 = arith.constant 0 : i32
    %c0_i32_1 = arith.constant 0 : i32
    %c0_i32_2 = arith.constant 0 : i32
    return %c0_i32, %c0_i32_0, %c0_i32_1 : i32, i32, i32
  }
  func.func @transform_6(%arg0: i32) -> (i32, i32, i32) {
    %c0_i32 = arith.constant 0 : i32
    %c0_i32_0 = arith.constant 0 : i32
    %c0_i32_1 = arith.constant 0 : i32
    %c0_i32_2 = arith.constant 0 : i32
    return %c0_i32, %c0_i32_0, %c0_i32_1 : i32, i32, i32
  }
  func.func @transform_7(%arg0: i32) -> (i32, i32, i32) {
    %c0_i32 = arith.constant 0 : i32
    %c0_i32_0 = arith.constant 0 : i32
    %c0_i32_1 = arith.constant 0 : i32
    return %arg0, %c0_i32, %c0_i32_0 : i32, i32, i32
  }
}

</mosaic_0001>

<bundles_post_ra>
// kernel: tpu_custom_call.1
= control target key start
LH: loop header
LB: loop body
LE: loop exit
PB: predicated region body
PF: predicated region fallthrough
CT: control target
= control target key end

     0   :  { %12 = vsyncpa [#allocation5], 0  ;;  %s17027_s0 = inlined_call_operand.vmem [shape: f32[2,18,18,8], index: 0, kind: input, shape index: {}]   ;;  %s17028_s1 = inlined_call_operand.vmem [shape: f32[9,8,12], index: 1, kind: input, shape index: {}]   ;;  %s17029_s2 = inlined_call_operand.vmem [shape: f32[3,1,12], index: 2, kind: input, shape index: {}]   ;;  %s17030_s3 = inlined_call_operand.vmem [shape: f32[9,4,8], index: 3, kind: input, shape index: {}]   ;;  %s17031_s4 = inlined_call_operand.vmem [shape: f32[3,1,8], index: 4, kind: input, shape index: {}]   ;;  %s17032_s5 = inlined_call_operand.vmem [shape: f32[9,4,4], index: 5, kind: input, shape index: {}]   ;;  %s17033_s6 = inlined_call_operand.vmem [shape: f32[3,1,4], index: 6, kind: input, shape index: {}]   ;;  %s17034_s7 = inlined_call_operand.hbm [shape: f32[2,16,256], index: 7, kind: output, shape index: {}]  }
   0x1   :  { %14 = vsyncpa [#allocation5 + $0x1], 0  ;;  %s11266_s24 = smov 0   ;;  %s11268_s25 = smov 0  }
   0x2   :  { %s11270_s26 = smov 0   ;;  %s11272_s27 = smov 0  }
   0x3 LB: > { %s11287_s28 = sadd.s32 4294967295, %s11219_s27   ;;  %s9966_s29 = sadd.s32 4294967294, %s11219_s27   ;;  %s11219_s27 = sphi %s11272_s27, %s17661_s27   ;;  %s11215_s26 = sphi %s11270_s26, %s17660_s26   ;;  %s11211_s25 = sphi %s11268_s25, %s17659_s25   ;;  %s11207_s24 = sphi %s11266_s24, %s17658_s24  }
   0x4   : > { %s11291_s30 = sadd.s32 1, %s11219_s27   ;;  %s179_s8 = sadd.s32 1, %s11215_s26 }
   0x5   : > { %s176_s9 = ssub.s32 %s11219_s27, %s11291_s30  ;;  %p189_p0 = scmp.ne.s32.totalorder %s11215_s26, %s11211_s25 }
   0x6   : > { %p177_p1 = scmp.eq.s32.totalorder %s176_s9, 0  ;;  %p190_p2 = scmp.eq.s32.totalorder %s11287_s28, 1 }
   0x7   : > { %p195_p3 = scmp.ne.s32.totalorder %s11211_s25, %s11207_s24  ;;  %p196_p4 = scmp.eq.s32.totalorder %s9966_s29, 1 }
   0x8   : > { %s11302_s10 = scalar_select %p177_p1, %s11215_s26, %s179_s8  }
   0x9   : > { %p11304_p5 = por %p190_p2, %p189_p0  ;;  %p11308_p6 = por %p196_p4, %p195_p3 }
   0xa   : > { %p9969_p7 = scmp.ge.s32.totalorder %s11219_s27, 1  ;;  %p240_p8 = scmp.lt.s32.totalorder %s11219_s27, 3 }
   0xc   : > { %p241_p9 = pnand %p9969_p7, %p240_p8 }
   0xe   : > { %244 = sbr.rel (%p241_p9) target bundleno = 1975 (0x7b7), region = 48 }
  0x13   : > { %v11317_v0 = vld [vmem:[%s17028_s1] sm:$0xff]  ;;  %p272_p10 = scmp.lt.s32.totalorder %s11287_s28, 1  ;;  %v9972_v1 = vld [vmem:[%s17028_s1 + $0x8] sm:$0xff]  ;;  %v11326_v2 = vld [vmem:[%s17028_s1 + $0x10] sm:$0xff]  ;;  %vm479_vm0 = vcmask 64512   ;;  %vm436_vm1 = vcmask 1046528  }
  0x14   : > { %624 = vmatpush.msra.mxu1 %v11317_v0  ;;  %11059 = vmatpush.msra.mxu3 %v11317_v0  ;;  %v11333_v3 = vld [vmem:[%s17028_s1 + $0x18] sm:$0xff]  ;;  %v11338_v4 = vld [vmem:[%s17028_s1 + $0x20] sm:$0xff]  ;;  %v10080_v5 = vld [vmem:[%s17028_s1 + $0x28] sm:$0xff]  ;;  %vm674_vm2 = vcmask 1045504   ;;  %s11221_s23 = smov 120   ;;  %vm3696_vm14 = vcmask 1043456  }
  0x15   : > { %s273_s8 = scalar_select %p272_p10, %s11287_s28, 1  ;;  %527 = vmatpush.msra.mxu0 %v9972_v1  ;;  %11058 = vmatpush.msra.mxu2 %v9972_v1  ;;  %v10121_v53 = vld [vmem:[%s17028_s1 + $0x30] sm:$0xff]  ;;  %v10138_v54 = vld [vmem:[%s17028_s1 + $0x38] sm:$0xff]  ;;  %vm277_vm15 = vcmask 31744  }
  0x16   : > { %920 = vmatpush.msrb.mxu3 %v11333_v3  ;;  %1238 = vmatpush.msrb.mxu1 %v10080_v5  ;;  %v10155_v5 = vld [vmem:[%s17028_s1 + $0x40] sm:$0xff]  ;;  %s11223_s22 = smov 124   ;;  %s269_s18 = sand.u32 1, %s11211_s25  }
  0x17   : > { %764 = vmatpush.msrb.mxu2 %v11326_v2  ;;  %s11060_s9 = smul.u32 432, %s273_s8  ;;  %1083 = vmatpush.msrb.mxu0 %v11338_v4  ;;  %s9970_s19 = sshll.u32 %s269_s18, 5 }
  0x18   : > { %s16972_s20 = scalar_lea.vmem [#allocation4], %s9970_s19  ;;  %s11057_s21 = sshll.u32 %s11287_s28, 5 }
  0x19   : > { %s11350_s15 = scalar_lea.vmem %s17027_s0, %s11060_s9  ;;  %s9900_s9 = scalar_lea.hbm %s17034_s7, %s11057_s21 }
  0x1a   : > { %v11353_v6 = vld [vmem:[%s11350_s15] sm:$0xff]  ;;  %v11359_v8 = vld [vmem:[%s11350_s15 + $0x8] sm:$0xff]  ;;  %v11375_v14 = vld [vmem:[%s11350_s15 + $0x10] sm:$0x3]  ;;  %s9901_s13 = sshll.u32 %s16972_s20, 4  ;;  %s11177_s17 = scalar_lea.hbm %s17034_s7, 64  ;;  %s9902_s13 = int_to_ptr.vmem [resolvable:$true] %s9901_s13 }
  0x1b   : > { %v11356_v7 = vld [vmem:[%s11350_s15 + $0x60] sm:$0xff]  ;;  %v437_v9 = vrot.slane %v11353_v6, 1  ;;  %9989 = vmatmul.msk.f32.vlgmr.msra.gmra.mxu1 %vm479_vm0, %v11353_v6  ;;  %v11368_v11 = vld [vmem:[%s11350_s15 + $0x68] sm:$0xff]  ;;  %v438_v12 = vrot.slane %v11359_v8, 1  ;;  %v11378_v15 = vld [vmem:[%s11350_s15 + $0x70] sm:$0x3] }
  0x1c   : > { %v457_v10 = vrot.slane %v11356_v7, 1  ;;  %9997 = vmatmul.msk.f32.vlgmr.msra.gmra.mxu3 %vm479_vm0, %v11356_v7  ;;  %v11372_v13 = vrot.slane %v11368_v11, 1  ;;  %2124 = vmatpush.msra.mxu1 %v9972_v1  ;;  %v440_v18 = vrot.slane %v11375_v14, 1  ;;  %v460_v19 = vrot.slane %v11378_v15, 1  ;;  %v11398_v22 = vld [vmem:[%s11350_s15 + $0x18] sm:$0xff]  ;;  %v11404_v24 = vld [vmem:[%s11350_s15 + $0x20] sm:$0xff] }
  0x1d   : > { %v439_v16 = vsel %vm436_vm1, %v437_v9, %v438_v12  ;;  %v11401_v23 = vld [vmem:[%s11350_s15 + $0x78] sm:$0xff]  ;;  %v11407_v25 = vld [vmem:[%s11350_s15 + $0x80] sm:$0xff]  ;;  %v442_v26 = vrot.slane %v11398_v22, 1  ;;  %v11414_v28 = vrot.slane %v11404_v24, 1  ;;  %v11432_v32 = vld [vmem:[%s11350_s15 + $0x28] sm:$0x3]  ;;  %1557 = vmatpush.msra.mxu3 %v10138_v54 }
  0x1e   : > { %v11383_v17 = vsel %vm436_vm1, %v457_v10, %v11372_v13  ;;  %9973 = vmatmul.msk.f32.vlgmr.msra.gmra.mxu0 %vm479_vm0, %v439_v16  ;;  %v441_v20 = vsel %vm436_vm1, %v438_v12, %v440_v18  ;;  %v461_v21 = vsel %vm436_vm1, %v11372_v13, %v460_v19  ;;  %v462_v27 = vrot.slane %v11401_v23, 1  ;;  %v11435_v33 = vld [vmem:[%s11350_s15 + $0x88] sm:$0x3]  ;;  %v11452_v38 = vld [vmem:[%s11350_s15 + $0x30] sm:$0xff]  ;;  %v11458_v40 = vld [vmem:[%s11350_s15 + $0x38] sm:$0xff] }
  0x1f   : > { %9981 = vmatmul.msk.f32.vlgmr.msra.gmra.mxu2 %vm479_vm0, %v11383_v17  ;;  %v11417_v29 = vrot.slane %v11407_v25, 1  ;;  %v11425_v30 = vsel %vm436_vm1, %v442_v26, %v11414_v28  ;;  %v445_v34 = vrot.slane %v11432_v32, 1  ;;  %v465_v35 = vrot.slane %v11435_v33, 1  ;;  %v11455_v39 = vld [vmem:[%s11350_s15 + $0x90] sm:$0xff]  ;;  %v11461_v41 = vld [vmem:[%s11350_s15 + $0x98] sm:$0xff]  ;;  %v11516_v60 = vld [vmem:[%s11350_s15 + $0x48] sm:$0xff]  ;;  %1712 = vmatpush.msra.mxu0 %v10155_v5 }
  0x20   : > { %v447_v42 = vrot.slane %v11452_v38, 1  ;;  %v467_v43 = vrot.slane %v11455_v39, 1  ;;  %v11468_v44 = vrot.slane %v11458_v40, 1  ;;  %v11471_v45 = vrot.slane %v11461_v41, 1  ;;  %v11488_v50 = vld [vmem:[%s11350_s15 + $0x40] sm:$0x3]  ;;  %1394 = vmatpush.msra.mxu2 %v10121_v53 }
  0x21   : > { %v11429_v31 = vsel %vm436_vm1, %v462_v27, %v11417_v29  ;;  %v446_v36 = vsel %vm436_vm1, %v11414_v28, %v445_v34  ;;  %v466_v37 = vsel %vm436_vm1, %v11417_v29, %v465_v35  ;;  %v675_v46 = vrot.slane %v11353_v6, 2  ;;  %v11491_v51 = vld [vmem:[%s11350_s15 + $0xa0] sm:$0x3]  ;;  %v11519_v61 = vld [vmem:[%s11350_s15 + $0xa8] sm:$0xff]  ;;  %v11522_v62 = vld [vmem:[%s11350_s15 + $0x50] sm:$0xff] }
  0x22   : > { %v676_v47 = vrot.slane %v11359_v8, 2  ;;  %v11481_v48 = vsel %vm436_vm1, %v447_v42, %v11468_v44  ;;  %v11485_v49 = vsel %vm436_vm1, %v467_v43, %v11471_v45  ;;  %v450_v55 = vrot.slane %v11488_v50, 1  ;;  %17239 = vst [vmem:[#allocation7_spill] sm:$0xff] %v11519_v61  ;;  %v11525_v63 = vld [vmem:[%s11350_s15 + $0xb0] sm:$0xff]  ;;  %v11554_v16 = vld [vmem:[%s11350_s15 + $0x58] sm:$0x3] }
  0x23   : > { %9990 = vmatmul.msk.f32.gmra.mxu1 %vm479_vm0, %v11359_v8  ;;  %v470_v56 = vrot.slane %v11491_v51, 1  ;;  %v678_v57 = vrot.slane %v11375_v14, 2  ;;  %17240 = vst [vmem:[#allocation8_spill] sm:$0xff] %v11525_v63  ;;  %v452_v6 = vrot.slane %v11516_v60, 1  ;;  %v472_v8 = vrot.slane %v11519_v61, 1 }
  0x24   : > { %9998 = vmatmul.msk.f32.gmra.mxu3 %vm479_vm0, %v11368_v11  ;;  %v677_v52 = vsel %vm674_vm2, %v675_v46, %v676_v47  ;;  %v451_v58 = vsel %vm436_vm1, %v11468_v44, %v450_v55  ;;  %v11536_v9 = vrot.slane %v11522_v62, 1  ;;  %v11539_v10 = vrot.slane %v11525_v63, 1  ;;  %v11557_v18 = vld [vmem:[%s11350_s15 + $0xb8] sm:$0x3] }
  0x25   : > { %v471_v59 = vsel %vm436_vm1, %v11471_v45, %v470_v56  ;;  %v679_v1 = vsel %vm674_vm2, %v676_v47, %v678_v57  ;;  %v455_v19 = vrot.slane %v11554_v16, 1  ;;  %v1150_v34 = vrot.slane %v11404_v24, 2  ;;  %v10030_v55 = vld [vmem:[%s11350_s15 + $0x58] sm:$0x3] }
  0x26   : > { %9974 = vmatmul.msk.f32.gmra.mxu0 %vm479_vm0, %v441_v20  ;;  %17241 = vst [vmem:[#allocation9_spill] sm:$0xff] %v11539_v10  ;;  %v11547_v12 = vsel %vm436_vm1, %v452_v6, %v11536_v9  ;;  %v11551_v14 = vsel %vm436_vm1, %v472_v8, %v11539_v10  ;;  %v475_v20 = vrot.slane %v11557_v18, 1  ;;  %v690_v47 = vrot.slane %v11516_v60, 2 }
  0x27   : > { %9982 = vmatmul.msk.f32.gmra.mxu2 %vm479_vm0, %v461_v21  ;;  %17242 = vst [vmem:[#allocation10_spill] sm:$0xff] %v11551_v14  ;;  %v680_v21 = vrot.slane %v11398_v22, 2  ;;  %v456_v26 = vsel %vm436_vm1, %v11536_v9, %v455_v19  ;;  %v11624_v54 = vrot.slane %v11522_v62, 2  ;;  %v1162_v56 = vrot.slane %v10030_v55, 2  ;;  %v10033_v19 = vld [vmem:[%s11350_s15 + $0x70] sm:$0x3] }
  0x28   : > { %v476_v27 = vsel %vm436_vm1, %v11539_v10, %v475_v20  ;;  %v11653_v8 = vrot.slane %v11368_v11, 2  ;;  %v1167_v20 = vrot.slane %v10033_v19, 2 }
  0x29   : > { %v1151_v35 = vsel %vm674_vm2, %v680_v21, %v1150_v34  ;;  %v1163_v57 = vsel %vm674_vm2, %v11624_v54, %v1162_v56 }
  0x2a   : > { %v1168_v21 = vsel %vm674_vm2, %v11653_v8, %v1167_v20 }
  0x2b   : > { %9991 = vmatmul.msk.f32.gmra.mxu1 %vm479_vm0, %v11398_v22 }
  0x2c   : > { %9999 = vmatmul.msk.f32.gmra.mxu3 %vm479_vm0, %v11401_v23 }
  0x2e   : > { %9975 = vmatmul.msk.f32.gmra.mxu0 %vm479_vm0, %v11425_v30 }
  0x2f   : > { %9983 = vmatmul.msk.f32.gmra.mxu2 %vm479_vm0, %v11429_v31 }
  0x33   : > { %9992 = vmatmul.msk.f32.gmra.mxu1 %vm479_vm0, %v11404_v24 }
  0x34   : > { %10000 = vmatmul.msk.f32.gmra.mxu3 %vm479_vm0, %v11407_v25 }
  0x36   : > { %9976 = vmatmul.msk.f32.gmra.mxu0 %vm479_vm0, %v446_v36  ;;  %v10024_v36 = vld [vmem:[%s11350_s15 + $0x28] sm:$0x3] }
  0x37   : > { %9984 = vmatmul.msk.f32.gmra.mxu2 %vm479_vm0, %v466_v37  ;;  %v1152_v37 = vrot.slane %v10024_v36, 2  ;;  %v997_v43 = vrot.slane %v10024_v36, 1 }
  0x39   : > { %v1153_v42 = vsel %vm674_vm2, %v1150_v34, %v1152_v37  ;;  %v11682_v37 = vrot.slane %v11407_v25, 2 }
  0x3b   : > { %9993 = vmatmul.msk.f32.gmra.mxu1 %vm479_vm0, %v11452_v38 }
  0x3c   : > { %10001 = vmatmul.msk.f32.gmra.mxu3 %vm479_vm0, %v11455_v39 }
  0x3e   : > { %9977 = vmatmul.msk.f32.gmra.mxu0 %vm479_vm0, %v11481_v48 }
  0x3f   : > { %9985 = vmatmul.msk.f32.gmra.mxu2 %vm479_vm0, %v11485_v49 }
  0x43   : > { %9994 = vmatmul.msk.f32.gmra.mxu1 %vm479_vm0, %v11458_v40 }
  0x44   : > { %10002 = vmatmul.msk.f32.gmra.mxu3 %vm479_vm0, %v11461_v41 }
  0x46   : > { %9978 = vmatmul.msk.f32.gmra.mxu0 %vm479_vm0, %v451_v58  ;;  %v688_v58 = vrot.slane %v11488_v50, 2 }
  0x47   : > { %9986 = vmatmul.msk.f32.gmra.mxu2 %vm479_vm0, %v471_v59  ;;  %v1007_v59 = vrot.slane %v10030_v55, 1 }
  0x49   : > { %v1008_v6 = vsel %vm436_vm1, %v11536_v9, %v1007_v59 }
  0x4b   : > { %9995 = vmatmul.msk.f32.gmra.mxu1 %vm479_vm0, %v11516_v60 }
  0x4c   : > { %10003 = vmatmul.msk.f32.gmra.mxu3 %vm479_vm0, %v11519_v61 }
  0x4e   : > { %9979 = vmatmul.msk.f32.gmra.mxu0 %vm479_vm0, %v11547_v12 }
  0x4f   : > { %9987 = vmatmul.msk.f32.gmra.mxu2 %vm479_vm0, %v11551_v14 }
  0x53   : > { %9996 = vmatmul.msk.f32.gmra.mxu1 %vm479_vm0, %v11522_v62 }
  0x54   : > { %10004 = vmatmul.msk.f32.gmra.mxu3 %vm479_vm0, %v11525_v63 }
  0x56   : > { %9980 = vmatmul.msk.f32.gmra.mxu0 %vm479_vm0, %v456_v26  ;;  %v693_v26 = vrot.slane %v11554_v16, 2 }
  0x57   : > { %9988 = vmatmul.msk.f32.gmra.mxu2 %vm479_vm0, %v476_v27  ;;  %v1012_v27 = vrot.slane %v10033_v19, 1 }
  0x59   : > { %v1013_v36 = vsel %vm436_vm1, %v11372_v13, %v1012_v27 }
  0x5b   : > { %10081 = vmatmul.msk.f32.vlgmr.msrb.gmra.mxu1 %vm479_vm0, %v1151_v35 }
  0x5c   : > { %10047 = vmatmul.msk.f32.vlgmr.msrb.gmra.mxu3 %vm479_vm0, %v11398_v22  ;;  %2676 = vmatpush.msrb.mxu1 %v11338_v4  ;;  %v998_v4 = vsel %vm436_vm1, %v11414_v28, %v997_v43  ;;  %v11597_v22 = vrot.slane %v11458_v40, 2  ;;  %v10036_v43 = vld [vmem:[%s11350_s15 + $0x88] sm:$0x3] }
  0x5d   : > { %2359 = vmatpush.msrb.mxu3 %v11326_v2  ;;  %v685_v2 = vrot.slane %v11452_v38, 2 }
  0x5e   : > { %10064 = vmatmul.msk.f32.vlgmr.msrb.gmra.mxu0 %vm479_vm0, %v11425_v30  ;;  %v683_v30 = vrot.slane %v11432_v32, 2  ;;  %v11630_v32 = vsel %vm674_vm2, %v690_v47, %v11624_v54  ;;  %v689_v5 = vsel %vm674_vm2, %v11597_v22, %v688_v58 }
  0x5f   : > { %10006 = vmatmul.msk.f32.vlgmr.msrb.gmra.mxu2 %vm479_vm0, %v677_v52  ;;  %2514 = vmatpush.msrb.mxu0 %v11333_v3  ;;  %v10027_v3 = vld [vmem:[%s11350_s15 + $0x40] sm:$0x3] }
  0x60   : > { %2221 = vmatpush.msrb.mxu2 %v11317_v0  ;;  %v11603_v0 = vsel %vm674_vm2, %v685_v2, %v11597_v22  ;;  %v1002_v46 = vrot.slane %v10027_v3, 1  ;;  %v684_v52 = vsel %vm674_vm2, %v1150_v34, %v683_v30  ;;  %v700_v34 = vrot.slane %v11401_v23, 2 }
  0x61   : > { %v698_v30 = vrot.slane %v11378_v15, 2 }
  0x62   : > { %v1003_v53 = vsel %vm436_vm1, %v11468_v44, %v1002_v46  ;;  %v1017_v46 = vrot.slane %v10036_v43, 1 }
  0x63   : > { %10082 = vmatmul.msk.f32.gmra.mxu1 %vm479_vm0, %v1153_v42  ;;  %v11690_v42 = vsel %vm674_vm2, %v700_v34, %v11682_v37  ;;  %v699_v56 = vsel %vm674_vm2, %v11653_v8, %v698_v30 }
  0x64   : > { %10048 = vmatmul.msk.f32.gmra.mxu3 %vm479_vm0, %v11404_v24  ;;  %v1157_v24 = vrot.slane %v10027_v3, 2  ;;  %v1018_v15 = vsel %vm436_vm1, %v11417_v29, %v1017_v46  ;;  %v11762_v46 = vrot.slane %v11525_v63, 2 }
  0x66   : > { %10065 = vmatmul.msk.f32.gmra.mxu0 %vm479_vm0, %v998_v4  ;;  %v1158_v28 = vsel %vm674_vm2, %v11597_v22, %v1157_v24  ;;  %v1172_v4 = vrot.slane %v10036_v43, 2 }
  0x67   : > { %10007 = vmatmul.msk.f32.gmra.mxu2 %vm479_vm0, %v679_v1  ;;  %v695_v1 = vrot.slane %v11356_v7, 2 }
  0x69   : > { %v11659_v50 = vsel %vm674_vm2, %v695_v1, %v11653_v8 }
  0x6b   : > { %10083 = vmatmul.msk.f32.gmra.mxu1 %vm479_vm0, %v11603_v0 }
  0x6c   : > { %10049 = vmatmul.msk.f32.gmra.mxu3 %vm479_vm0, %v11452_v38 }
  0x6e   : > { %10066 = vmatmul.msk.f32.gmra.mxu0 %vm479_vm0, %v11481_v48 }
  0x6f   : > { %10008 = vmatmul.msk.f32.gmra.mxu2 %vm479_vm0, %v1151_v35  ;;  %v694_v35 = vsel %vm674_vm2, %v11624_v54, %v693_v26 }
  0x73   : > { %10084 = vmatmul.msk.f32.gmra.mxu1 %vm479_vm0, %v1158_v28  ;;  %v1173_v28 = vsel %vm674_vm2, %v11682_v37, %v1172_v4 }
  0x74   : > { %10050 = vmatmul.msk.f32.gmra.mxu3 %vm479_vm0, %v11458_v40 }
  0x76   : > { %10067 = vmatmul.msk.f32.gmra.mxu0 %vm479_vm0, %v1003_v53  ;;  %v705_v53 = vrot.slane %v11455_v39, 2 }
  0x77   : > { %10009 = vmatmul.msk.f32.gmra.mxu2 %vm479_vm0, %v684_v52 }
  0x7b   : > { %10085 = vmatmul.msk.f32.gmra.mxu1 %vm479_vm0, %v11630_v32 }
  0x7c   : > { %10051 = vmatmul.msk.f32.gmra.mxu3 %vm479_vm0, %v11516_v60 }
  0x7e   : > { %10068 = vmatmul.msk.f32.gmra.mxu0 %vm479_vm0, %v11547_v12 }
  0x7f   : > { %10010 = vmatmul.msk.f32.gmra.mxu2 %vm479_vm0, %v11603_v0 }
  0x83   : > { %10086 = vmatmul.msk.f32.gmra.mxu1 %vm479_vm0, %v1163_v57  ;;  %v11721_v57 = vrot.slane %v11461_v41, 2 }
  0x84   : > { %10052 = vmatmul.msk.f32.gmra.mxu3 %vm479_vm0, %v11522_v62 }
  0x85   : > { %v11729_v1 = vsel %vm674_vm2, %v705_v53, %v11721_v57 }
  0x86   : > { %10069 = vmatmul.msk.f32.gmra.mxu0 %vm479_vm0, %v1008_v6 }
  0x87   : > { %10011 = vmatmul.msk.f32.gmra.mxu2 %vm479_vm0, %v689_v5  ;;  %v10039_v5 = vld [vmem:[%s11350_s15 + $0xa0] sm:$0x3] }
  0x8b   : > { %10087 = vmatmul.msk.f32.gmra.mxu1 %vm479_vm0, %v11659_v50 }
  0x8c   : > { %10053 = vmatmul.msk.f32.gmra.mxu3 %vm479_vm0, %v11356_v7 }
  0x8e   : > { %10070 = vmatmul.msk.f32.gmra.mxu0 %vm479_vm0, %v11383_v17 }
  0x8f   : > { %10012 = vmatmul.msk.f32.gmra.mxu2 %vm479_vm0, %v11630_v32 }
  0x93   : > { %10088 = vmatmul.msk.f32.gmra.mxu1 %vm479_vm0, %v1168_v21  ;;  %v1177_v21 = vrot.slane %v10039_v5, 2 }
  0x94   : > { %10054 = vmatmul.msk.f32.gmra.mxu3 %vm479_vm0, %v11368_v11 }
  0x95   : > { %v1178_v34 = vsel %vm674_vm2, %v11721_v57, %v1177_v21 }
  0x96   : > { %10071 = vmatmul.msk.f32.gmra.mxu0 %vm479_vm0, %v1013_v36  ;;  %v1022_v36 = vrot.slane %v10039_v5, 1 }
  0x97   : > { %10013 = vmatmul.msk.f32.gmra.mxu2 %vm479_vm0, %v694_v35  ;;  %v703_v35 = vrot.slane %v11435_v33, 2 }
  0x98   : > { %v11686_v16 = vpop.f32.mrf.mxu1  ;;  %v1023_v33 = vsel %vm436_vm1, %v11471_v45, %v1022_v36  ;;  %v708_v36 = vrot.slane %v11491_v51, 2 }
  0x99   : > { %v704_v30 = vsel %vm674_vm2, %v11682_v37, %v703_v35 }
  0x9b   : > { %10089 = vmatmul.msk.f32.gmra.mxu1 %vm479_vm0, %v11690_v42  ;;  %v11697_v2 = vpop.f32.mrf.mxu0 }
  0x9c   : > { %10055 = vmatmul.msk.f32.gmra.mxu3 %vm479_vm0, %v11401_v23 }
  0x9e   : > { %10072 = vmatmul.msk.f32.gmra.mxu0 %vm479_vm0, %v11429_v31 }
  0x9f   : > { %v650_v3 = vpop.f32.mrf.mxu3  ;;  %10014 = vmatmul.msk.f32.gmra.mxu2 %vm479_vm0, %v11659_v50 }
  0xa0   : > { %v11703_v24 = vpop.f32.mrf.mxu1 }
  0xa2   : > { %v553_v47 = vpop.f32.mrf.mxu2 }
  0xa3   : > { %v11708_v52 = vadd.f32 %v650_v3, %v553_v47  ;;  %10090 = vmatmul.msk.f32.gmra.mxu1 %vm479_vm0, %v1173_v28  ;;  %v11714_v55 = vpop.f32.mrf.mxu0  ;;  %v710_v3 = vrot.slane %v11519_v61, 2 }
  0xa4   : > { %10056 = vmatmul.msk.f32.gmra.mxu3 %vm479_vm0, %v11407_v25 }
  0xa6   : > { %10073 = vmatmul.msk.f32.gmra.mxu0 %vm479_vm0, %v1018_v15  ;;  %v10042_v15 = vld [vmem:[%s11350_s15 + $0xb8] sm:$0x3] }
  0xa7   : > { %v653_v58 = vpop.f32.mrf.mxu3  ;;  %10015 = vmatmul.msk.f32.gmra.mxu2 %vm479_vm0, %v699_v56  ;;  %v11770_v56 = vsel %vm674_vm2, %v710_v3, %v11762_v46  ;;  %v1182_v21 = vrot.slane %v10042_v15, 2  ;;  %v11791_v3 = vld [vmem:[%s11350_s15 + $0xc0] sm:$0xff] }
  0xa8   : > { %v11725_v59 = vpop.f32.mrf.mxu1  ;;  %17244 = vst [vmem:[#allocation12_spill] sm:$0xff] %v11770_v56 }
  0xa9   : > { %v1183_v35 = vsel %vm674_vm2, %v11762_v46, %v1182_v21  ;;  %17246 = vst [vmem:[#allocation14_spill] sm:$0xff] %v11791_v3  ;;  %v709_v21 = vsel %vm674_vm2, %v11721_v57, %v708_v36 }
  0xaa   : > { %v556_v6 = vpop.f32.mrf.mxu2 }
  0xab   : > { %v11732_v19 = vadd.f32 %v653_v58, %v556_v6  ;;  %10091 = vmatmul.msk.f32.gmra.mxu1 %vm479_vm0, %v11729_v1  ;;  %v11738_v20 = vpop.f32.mrf.mxu0 }
  0xac   : > { %10057 = vmatmul.msk.f32.gmra.mxu3 %vm479_vm0, %v11455_v39 }
  0xae   : > { %10074 = vmatmul.msk.f32.gmra.mxu0 %vm479_vm0, %v11485_v49 }
  0xaf   : > { %v656_v26 = vpop.f32.mrf.mxu3  ;;  %10016 = vmatmul.msk.f32.gmra.mxu2 %vm479_vm0, %v11690_v42 }
  0xb0   : > { %v11744_v27 = vpop.f32.mrf.mxu1 }
  0xb2   : > { %v559_v43 = vpop.f32.mrf.mxu2 }
  0xb3   : > { %v11749_v4 = vadd.f32 %v656_v26, %v559_v43  ;;  %10092 = vmatmul.msk.f32.gmra.mxu1 %vm479_vm0, %v1178_v34  ;;  %v11755_v28 = vpop.f32.mrf.mxu0  ;;  %v1027_v43 = vrot.slane %v10042_v15, 1  ;;  %v1184_v15 = vrot.slane %v11791_v3, 2 }
  0xb4   : > { %10058 = vmatmul.msk.f32.gmra.mxu3 %vm479_vm0, %v11461_v41 }
  0xb5   : > { %17243 = vst [vmem:[#allocation11_spill] sm:$0xff] %v11749_v4  ;;  %v1028_v51 = vsel %vm436_vm1, %v11539_v10, %v1027_v43 }
  0xb6   : > { %10075 = vmatmul.msk.f32.gmra.mxu0 %vm479_vm0, %v1023_v33 }
  0xb7   : > { %v659_v47 = vpop.f32.mrf.mxu3  ;;  %10017 = vmatmul.msk.f32.gmra.mxu2 %vm479_vm0, %v704_v30  ;;  %v11794_v30 = vld [vmem:[%s11350_s15 + $0xc8] sm:$0xff] }
  0xb8   : > { %v11766_v53 = vpop.f32.mrf.mxu1  ;;  %17247 = vst [vmem:[#allocation15_spill] sm:$0xff] %v11794_v30  ;;  %v11821_v43 = vrot.slane %v11794_v30, 1 }
  0xba   : > { %v562_v58 = vpop.f32.mrf.mxu2 }
  0xbb   : > { %v11773_v5 = vadd.f32 %v659_v47, %v562_v58  ;;  %10093 = vmatmul.msk.f32.gmra.mxu1 %vm479_vm0, %v11770_v56  ;;  %v11779_v6 = vpop.f32.mrf.mxu0 }
  0xbc   : > { %10059 = vmatmul.msk.f32.gmra.mxu3 %vm479_vm0, %v11519_v61 }
  0xbd   : > { %17245 = vst [vmem:[#allocation13_spill] sm:$0xff] %v11773_v5  ;;  %v11809_v5 = vrot.slane %v11794_v30, 2 }
  0xbe   : > { %10076 = vmatmul.msk.f32.gmra.mxu0 %vm479_vm0, %v11551_v14 }
  0xbf   : > { %v662_v26 = vpop.f32.mrf.mxu3  ;;  %10018 = vmatmul.msk.f32.gmra.mxu2 %vm479_vm0, %v11729_v1  ;;  %17249 = vst [vmem:[#allocation17_spill] sm:$0xff] %v11809_v5  ;;  %v11818_v36 = vsel %vm674_vm2, %v1184_v15, %v11809_v5 }
  0xc0   : > { %v11785_v34 = vpop.f32.mrf.mxu1  ;;  %17250 = vst [vmem:[#allocation18_spill] sm:$0xff] %v11818_v36 }
  0xc2   : > { %v565_v33 = vpop.f32.mrf.mxu2 }
  0xc3   : > { %v11796_v47 = vadd.f32 %v662_v26, %v565_v33  ;;  %10094 = vmatmul.msk.f32.gmra.mxu1 %vm479_vm0, %v1183_v35  ;;  %v11801_v58 = vpop.f32.mrf.mxu0  ;;  %v1029_v35 = vrot.slane %v11791_v3, 1 }
  0xc4   : > { %10060 = vmatmul.msk.f32.gmra.mxu3 %vm479_vm0, %v11525_v63 }
  0xc5   : > { %17248 = vst [vmem:[#allocation16_spill] sm:$0xff] %v11796_v47  ;;  %v10045_v47 = vld [vmem:[%s11350_s15 + $0xd0] sm:$0x3] }
  0xc6   : > { %10077 = vmatmul.msk.f32.gmra.mxu0 %vm479_vm0, %v1028_v51  ;;  %v11834_v51 = vsel %vm436_vm1, %v1029_v35, %v11821_v43  ;;  %v1187_v15 = vrot.slane %v10045_v47, 2 }
  0xc7   : > { %v665_v26 = vpop.f32.mrf.mxu3  ;;  %10019 = vmatmul.msk.f32.gmra.mxu2 %vm479_vm0, %v709_v21 }
  0xc8   : > { %v11813_v33 = vpop.f32.mrf.mxu1 }
  0xca   : > { %v568_v63 = vpop.f32.mrf.mxu2 }
  0xcb   : > { %v11824_v4 = vadd.f32 %v665_v26, %v568_v63  ;;  %10095 = vmatmul.msk.f32.gmra.mxu1 %vm479_vm0, %v11818_v36  ;;  %v11830_v21 = vpop.f32.mrf.mxu0  ;;  %v1188_v26 = vsel %vm674_vm2, %v11809_v5, %v1187_v15  ;;  %v1032_v36 = vrot.slane %v10045_v47, 1  ;;  %v11860_v47 = vld [vmem:[%s11350_s15 + $0xd0] sm:$0x3] }
  0xcc   : > { %10061 = vmatmul.msk.f32.gmra.mxu3 %vm479_vm0, %v11791_v3  ;;  %17253 = vst [vmem:[#allocation21_spill] sm:$0xff] %v11860_v47 }
  0xcd   : > { %17251 = vst [vmem:[#allocation19_spill] sm:$0xff] %v11824_v4  ;;  %v713_v4 = vrot.slane %v11557_v18, 2  ;;  %v1033_v14 = vsel %vm436_vm1, %v11821_v43, %v1032_v36  ;;  %v10099_v18 = vld [vmem:[%s11350_s15 + $0x40] sm:$0x3] }
  0xce   : > { %10078 = vmatmul.msk.f32.gmra.mxu0 %vm479_vm0, %v11834_v51  ;;  %v1471_v36 = vrot.slane %v10099_v18, 1 }
  0xcf   : > { %v668_v10 = vpop.f32.mrf.mxu3  ;;  %10020 = vmatmul.msk.f32.gmra.mxu2 %vm479_vm0, %v11770_v56  ;;  %v714_v61 = vsel %vm674_vm2, %v11762_v46, %v713_v4 }
  0xd0   : > { %v11840_v63 = vpop.f32.mrf.mxu1 }
  0xd2   : > { %v571_v35 = vpop.f32.mrf.mxu2 }
  0xd3   : > { %v11845_v3 = vadd.f32 %v668_v10, %v571_v35  ;;  %10096 = vmatmul.msk.f32.gmra.mxu1 %vm479_vm0, %v1188_v26  ;;  %v11850_v56 = vpop.f32.mrf.mxu0 }
  0xd4   : > { %10062 = vmatmul.msk.f32.gmra.mxu3 %vm479_vm0, %v11794_v30  ;;  %v11880_v30 = vld [vmem:[%s11350_s15 + $0xd8] sm:$0xff] }
  0xd5   : > { %17252 = vst [vmem:[#allocation20_spill] sm:$0xff] %v11845_v3 }
  0xd6   : > { %10079 = vmatmul.msk.f32.gmra.mxu0 %vm479_vm0, %v1033_v14 }
  0xd7   : > { %v671_v15 = vpop.f32.mrf.mxu3  ;;  %10021 = vmatmul.msk.f32.gmra.mxu2 %vm479_vm0, %v714_v61  ;;  %v2039_v61 = vrot.slane %v11860_v47, 1  ;;  %v11883_v47 = vld [vmem:[%s11350_s15 + $0xe0] sm:$0xff] }
  0xd8   : > { %v1240_v10 = vpop.f32.mrf.mxu1 }
  0xda   : > { %v574_v35 = vpop.f32.mrf.mxu2 }
  0xdb   : > { %v11862_v26 = vadd.f32 %v671_v15, %v574_v35  ;;  %10199 = vmatmul.msk.f32.vlgmr.msra.gmra.mxu1 %vm479_vm0, %v11834_v51  ;;  %v1085_v4 = vpop.f32.mrf.mxu0  ;;  %v1472_v15 = vsel %vm436_vm1, %v11468_v44, %v1471_v36  ;;  %v1626_v35 = vrot.slane %v10099_v18, 2  ;;  %v2041_v18 = vrot.slane %v11880_v30, 1 }
  0xdc   : > { %10139 = vmatmul.msk.f32.vlgmr.msra.gmra.mxu3 %vm479_vm0, %v11481_v48  ;;  %v2040_v48 = vsel %vm436_vm1, %v11821_v43, %v2039_v61 }
  0xdd   : > { %17254 = vst [vmem:[#allocation22_spill] sm:$0xff] %v11862_v26  ;;  %v627_v26 = vadd.f32 %v11686_v16, %v11697_v2  ;;  %v11891_v16 = vrot.slane %v11883_v47, 1 }
  0xde   : > { %10156 = vmatmul.msk.f32.vlgmr.msra.gmra.mxu0 %vm479_vm0, %v11603_v0  ;;  %v1627_v0 = vsel %vm674_vm2, %v11597_v22, %v1626_v35  ;;  %v630_v22 = vadd.f32 %v11703_v24, %v11714_v55 }
  0xdf   : > { %v922_v14 = vpop.f32.mrf.mxu3  ;;  %10122 = vmatmul.msk.f32.vlgmr.msra.gmra.mxu2 %vm479_vm0, %v11452_v38  ;;  %v11898_v61 = vsel %vm436_vm1, %v2041_v18, %v11891_v16 }
  0xe0   : > { %v1243_v3 = vpop.f32.mrf.mxu1 }
  0xe2   : > { %v766_v5 = vpop.f32.mrf.mxu2 }
  0xe3   : > { %v814_v38 = vadd.f32 %v766_v5, %v627_v26  ;;  %10200 = vmatmul.msk.f32.gmra.mxu1 %vm479_vm0, %v2040_v48  ;;  %v1088_v44 = vpop.f32.mrf.mxu0  ;;  %v11904_v48 = vld [vmem:[%s11350_s15 + $0xe8] sm:$0x3] }
  0xe4   : > { %10140 = vmatmul.msk.f32.gmra.mxu3 %vm479_vm0, %v1472_v15  ;;  %v10102_v15 = vld [vmem:[%s11350_s15 + $0x58] sm:$0x3] }
  0xe5   : > { %v970_v2 = vadd.f32 %v922_v14, %v814_v38 }
  0xe6   : > { %10157 = vmatmul.msk.f32.gmra.mxu0 %vm479_vm0, %v1627_v0  ;;  %v2044_v0 = vrot.slane %v11904_v48, 1 }
  0xe7   : > { %v925_v36 = vpop.f32.mrf.mxu3  ;;  %10123 = vmatmul.msk.f32.gmra.mxu2 %vm479_vm0, %v11458_v40  ;;  %v1133_v5 = vadd.f32 %v1085_v4, %v970_v2  ;;  %v1476_v4 = vrot.slane %v10102_v15, 1 }
  0xe8   : > { %v1246_v26 = vpop.f32.mrf.mxu1  ;;  %v2045_v2 = vsel %vm436_vm1, %v11891_v16, %v2044_v0 }
  0xe9   : > { %v11906_v35 = vadd.f32 %v1240_v10, %v1133_v5  ;;  %v1631_v5 = vrot.slane %v10102_v15, 2 }
  0xea   : > { %v769_v14 = vpop.f32.mrf.mxu2 }
  0xeb   : > { %v815_v38 = vadd.f32 %v769_v14, %v630_v22  ;;  %10201 = vmatmul.msk.f32.gmra.mxu1 %vm479_vm0, %v11898_v61  ;;  %v1091_v40 = vpop.f32.mrf.mxu0  ;;  %v633_v22 = vadd.f32 %v11725_v59, %v11738_v20  ;;  %v11927_v14 = vld [vmem:[%s11350_s15 + $0xf8] sm:$0xff] }
  0xec   : > { %10141 = vmatmul.msk.f32.gmra.mxu3 %vm479_vm0, %v11547_v12  ;;  %v1477_v12 = vsel %vm436_vm1, %v11536_v9, %v1476_v4  ;;  %v11937_v20 = vrot.slane %v11927_v14, 1 }
  0xed   : > { %v971_v24 = vadd.f32 %v925_v36, %v815_v38  ;;  %v11924_v36 = vld [vmem:[%s11350_s15 + $0xf0] sm:$0xff] }
  0xee   : > { %10158 = vmatmul.msk.f32.gmra.mxu0 %vm479_vm0, %v11630_v32  ;;  %v2046_v59 = vrot.slane %v11924_v36, 1 }
  0xef   : > { %v928_v55 = vpop.f32.mrf.mxu3  ;;  %10124 = vmatmul.msk.f32.gmra.mxu2 %vm479_vm0, %v11516_v60  ;;  %v1134_v10 = vadd.f32 %v1088_v44, %v971_v24  ;;  %v1632_v44 = vsel %vm674_vm2, %v11624_v54, %v1631_v5  ;;  %v636_v54 = vadd.f32 %v11744_v27, %v11755_v28 }
  0xf0   : > { %v1249_v18 = vpop.f32.mrf.mxu1  ;;  %v11944_v24 = vsel %vm436_vm1, %v2046_v59, %v11937_v20  ;;  %v639_v59 = vadd.f32 %v11766_v53, %v11779_v6 }
  0xf1   : > { %v11929_v60 = vadd.f32 %v1243_v3, %v1134_v10  ;;  %v10105_v10 = vld [vmem:[%s11350_s15 + $0x70] sm:$0x3] }
  0xf2   : > { %v772_v38 = vpop.f32.mrf.mxu2 }
  0xf3   : > { %v816_v32 = vadd.f32 %v772_v38, %v633_v22  ;;  %10202 = vmatmul.msk.f32.gmra.mxu1 %vm479_vm0, %v2045_v2  ;;  %v1094_v9 = vpop.f32.mrf.mxu0 }
  0xf4   : > { %10142 = vmatmul.msk.f32.gmra.mxu3 %vm479_vm0, %v1477_v12  ;;  %v11950_v12 = vld [vmem:[%s11350_s15 + $0x100] sm:$0x3] }
  0xf5   : > { %v972_v15 = vadd.f32 %v928_v55, %v816_v32  ;;  %v2049_v22 = vrot.slane %v11950_v12, 1 }
  0xf6   : > { %10159 = vmatmul.msk.f32.gmra.mxu0 %vm479_vm0, %v1632_v44  ;;  %v1636_v44 = vrot.slane %v10105_v10, 2 }
  0xf7   : > { %v931_v3 = vpop.f32.mrf.mxu3  ;;  %10125 = vmatmul.msk.f32.gmra.mxu2 %vm479_vm0, %v11522_v62  ;;  %v1135_v4 = vadd.f32 %v1091_v40, %v972_v15  ;;  %v1481_v40 = vrot.slane %v10105_v10, 1  ;;  %v2050_v32 = vsel %vm436_vm1, %v11937_v20, %v2049_v22  ;;  %v11970_v15 = vld [vmem:[%s11350_s15 + $0x108] sm:$0xff]  ;;  %v11996_v22 = vld [vmem:[%s11350_s15 + $0x118] sm:$0x3] }
  0xf8   : > { %v1252_v0 = vpop.f32.mrf.mxu1  ;;  %v2051_v53 = vrot.slane %v11970_v15, 1 }
  0xf9   : > { %v11952_v2 = vadd.f32 %v1246_v26, %v1135_v4 }
  0xfa   : > { %v775_v55 = vpop.f32.mrf.mxu2 }
  0xfb   : > { %v817_v5 = vadd.f32 %v775_v55, %v636_v54  ;;  %10203 = vmatmul.msk.f32.gmra.mxu1 %vm479_vm0, %v11944_v24  ;;  %v1097_v62 = vpop.f32.mrf.mxu0 }
  0xfc   : > { %10143 = vmatmul.msk.f32.gmra.mxu3 %vm479_vm0, %v11383_v17  ;;  %v1482_v17 = vsel %vm436_vm1, %v11372_v13, %v1481_v40  ;;  %v10108_v40 = vld [vmem:[%s11350_s15 + $0x88] sm:$0x3] }
  0xfd   : > { %v973_v27 = vadd.f32 %v931_v3, %v817_v5  ;;  %v11973_v3 = vld [vmem:[%s11350_s15 + $0x110] sm:$0xff] }
  0xfe   : > { %10160 = vmatmul.msk.f32.gmra.mxu0 %vm479_vm0, %v11659_v50  ;;  %v11983_v6 = vrot.slane %v11973_v3, 1 }
  0xff   : > { %v934_v28 = vpop.f32.mrf.mxu3  ;;  %10126 = vmatmul.msk.f32.gmra.mxu2 %vm479_vm0, %v11356_v7  ;;  %v1136_v26 = vadd.f32 %v1094_v9, %v973_v27  ;;  %v1637_v9 = vsel %vm674_vm2, %v11653_v8, %v1636_v44  ;;  %v642_v8 = vadd.f32 %v11785_v34, %v11801_v58 }
 0x100   : > { %v1255_v38 = vpop.f32.mrf.mxu1  ;;  %v11990_v5 = vsel %vm436_vm1, %v2051_v53, %v11983_v6 }
 0x101   : > { %v11975_v7 = vadd.f32 %v1249_v18, %v1136_v26 }
 0x102   : > { %v778_v4 = vpop.f32.mrf.mxu2 }
 0x103   : > { %v818_v50 = vadd.f32 %v778_v4, %v639_v59  ;;  %10204 = vmatmul.msk.f32.gmra.mxu1 %vm479_vm0, %v2050_v32  ;;  %v1100_v13 = vpop.f32.mrf.mxu0  ;;  %v1641_v59 = vrot.slane %v10108_v40, 2  ;;  %v645_v4 = vadd.f32 %v11813_v33, %v11830_v21 }
 0x104   : > { %10144 = vmatmul.msk.f32.gmra.mxu3 %vm479_vm0, %v1482_v17  ;;  %v2054_v17 = vrot.slane %v11996_v22, 1 }
 0x105   : > { %v974_v54 = vadd.f32 %v934_v28, %v818_v50  ;;  %v12016_v50 = vld [vmem:[%s11350_s15 + $0x120] sm:$0xff] }
 0x106   : > { %10161 = vmatmul.msk.f32.gmra.mxu0 %vm479_vm0, %v1637_v9  ;;  %v2055_v44 = vsel %vm436_vm1, %v11983_v6, %v2054_v17  ;;  %v12019_v9 = vld [vmem:[%s11350_s15 + $0x128] sm:$0xff]  ;;  %v2056_v33 = vrot.slane %v12016_v50, 1 }
 0x107   : > { %v937_v18 = vpop.f32.mrf.mxu3  ;;  %10127 = vmatmul.msk.f32.gmra.mxu2 %vm479_vm0, %v11368_v11  ;;  %v1137_v10 = vadd.f32 %v1097_v62, %v974_v54  ;;  %v1486_v62 = vrot.slane %v10108_v40, 1  ;;  %v12029_v21 = vrot.slane %v12019_v9, 1  ;;  %v10111_v40 = vld [vmem:[%s11350_s15 + $0xa0] sm:$0x3] }
 0x108   : > { %v1258_v55 = vpop.f32.mrf.mxu1 }
 0x109   : > { %v11998_v27 = vadd.f32 %v1252_v0, %v1137_v10 }
 0x10a   : > { %v781_v28 = vpop.f32.mrf.mxu2 }
 0x10b   : > { %v819_v26 = vadd.f32 %v781_v28, %v642_v8  ;;  %10205 = vmatmul.msk.f32.gmra.mxu1 %vm479_vm0, %v11990_v5  ;;  %v1103_v11 = vpop.f32.mrf.mxu0  ;;  %v12036_v8 = vsel %vm436_vm1, %v2056_v33, %v12029_v21  ;;  %v12042_v28 = vld [vmem:[%s11350_s15 + $0x130] sm:$0x3] }
 0x10c   : > { %10145 = vmatmul.msk.f32.gmra.mxu3 %vm479_vm0, %v11429_v31  ;;  %v1487_v31 = vsel %vm436_vm1, %v11417_v29, %v1486_v62 }
 0x10d   : > { %v975_v34 = vadd.f32 %v937_v18, %v819_v26 }
 0x10e   : > { %10162 = vmatmul.msk.f32.gmra.mxu0 %vm479_vm0, %v11690_v42 }
 0x10f   : > { %v940_v58 = vpop.f32.mrf.mxu3  ;;  %10128 = vmatmul.msk.f32.gmra.mxu2 %vm479_vm0, %v11401_v23  ;;  %v1138_v0 = vadd.f32 %v1100_v13, %v975_v34  ;;  %v1642_v13 = vsel %vm674_vm2, %v11682_v37, %v1641_v59  ;;  %v648_v37 = vadd.f32 %v11840_v63, %v11850_v56  ;;  %v2059_v34 = vrot.slane %v12042_v28, 1  ;;  %v12063_v59 = vld [vmem:[%s11350_s15 + $0x140] sm:$0xff] }
 0x110   : > { %v1261_v32 = vpop.f32.mrf.mxu1 }
 0x111   : > { %v12021_v23 = vadd.f32 %v1255_v38, %v1138_v0  ;;  %v2060_v0 = vsel %vm436_vm1, %v12029_v21, %v2059_v34 }
 0x112   : > { %v784_v53 = vpop.f32.mrf.mxu2 }
 0x113   : > { %v820_v42 = vadd.f32 %v784_v53, %v645_v4  ;;  %10206 = vmatmul.msk.f32.gmra.mxu1 %vm479_vm0, %v2055_v44  ;;  %v1106_v29 = vpop.f32.mrf.mxu0  ;;  %v12060_v44 = vld [vmem:[%s11350_s15 + $0x138] sm:$0xff] }
 0x114   : > { %10146 = vmatmul.msk.f32.gmra.mxu3 %vm479_vm0, %v1487_v31  ;;  %v1646_v31 = vrot.slane %v10111_v40, 2 }
 0x115   : > { %v976_v54 = vadd.f32 %v940_v58, %v820_v42  ;;  %v2061_v42 = vrot.slane %v12060_v44, 1 }
 0x116   : > { %10163 = vmatmul.msk.f32.gmra.mxu0 %vm479_vm0, %v1642_v13  ;;  %v1647_v53 = vsel %vm674_vm2, %v11721_v57, %v1646_v31  ;;  %v12085_v57 = vld [vmem:[%s11350_s15 + $0x148] sm:$0x3] }
 0x117   : > { %v943_v38 = vpop.f32.mrf.mxu3  ;;  %10129 = vmatmul.msk.f32.gmra.mxu2 %vm479_vm0, %v11407_v25  ;;  %v1139_v18 = vadd.f32 %v1103_v11, %v976_v54  ;;  %v1491_v11 = vrot.slane %v10111_v40, 1 }
 0x118   : > { %v1264_v10 = vpop.f32.mrf.mxu1 }
 0x119   : > { %v12044_v26 = vadd.f32 %v1258_v55, %v1139_v18 }
 0x11a   : > { %v787_v62 = vpop.f32.mrf.mxu2 }
 0x11b   : > { %v821_v17 = vadd.f32 %v787_v62, %v648_v37  ;;  %10207 = vmatmul.msk.f32.gmra.mxu1 %vm479_vm0, %v12036_v8  ;;  %v1109_v25 = vpop.f32.mrf.mxu0  ;;  %v17255_v62 = vld [vmem:[#allocation10_spill] sm:$0xff] }
 0x11c   : > { %10147 = vmatmul.msk.f32.gmra.mxu3 %vm479_vm0, %v11485_v49  ;;  %v1492_v49 = vsel %vm436_vm1, %v11471_v45, %v1491_v11 }
 0x11d   : > { %v977_v56 = vadd.f32 %v943_v38, %v821_v17  ;;  %v10114_v38 = vld [vmem:[%s11350_s15 + $0xb8] sm:$0x3] }
 0x11e   : > { %10164 = vmatmul.msk.f32.gmra.mxu0 %vm479_vm0, %v11729_v1  ;;  %v1496_v17 = vrot.slane %v10114_v38, 1  ;;  %v1651_v31 = vrot.slane %v10114_v38, 2 }
 0x11f   : > { %v946_v63 = vpop.f32.mrf.mxu3  ;;  %10130 = vmatmul.msk.f32.gmra.mxu2 %vm479_vm0, %v11455_v39  ;;  %v1140_v55 = vadd.f32 %v1106_v29, %v977_v56  ;;  %v12074_v29 = vrot.slane %v12063_v59, 1  ;;  %v17256_v56 = vld [vmem:[#allocation7_spill] sm:$0xff] }
 0x120   : > { %v1267_v58 = vpop.f32.mrf.mxu1 }
 0x121   : > { %v12065_v4 = vadd.f32 %v1261_v32, %v1140_v55  ;;  %v12081_v54 = vsel %vm436_vm1, %v2061_v42, %v12074_v29  ;;  %v17258_v55 = vld [vmem:[#allocation9_spill] sm:$0xff] }
 0x122   : > { %v790_v39 = vpop.f32.mrf.mxu2 }
 0x123   : > { %v822_v1 = vadd.f32 %v790_v39, %v11708_v52  ;;  %10208 = vmatmul.msk.f32.gmra.mxu1 %vm479_vm0, %v2060_v0  ;;  %v1112_v45 = vpop.f32.mrf.mxu0  ;;  %v12104_v39 = vld [vmem:[%s11350_s15 + $0x150] sm:$0xff] }
 0x124   : > { %10148 = vmatmul.msk.f32.gmra.mxu3 %vm479_vm0, %v1492_v49  ;;  %v1497_v49 = vsel %vm436_vm1, %v17258_v55, %v1496_v17  ;;  %v2066_v38 = vrot.slane %v12104_v39, 1  ;;  %v17264_v55 = vld [vmem:[#allocation13_spill] sm:$0xff] }
 0x125   : > { %v978_v32 = vadd.f32 %v946_v63, %v822_v1  ;;  %v12107_v1 = vld [vmem:[%s11350_s15 + $0x158] sm:$0xff] }
 0x126   : > { %10165 = vmatmul.msk.f32.gmra.mxu0 %vm479_vm0, %v1647_v53  ;;  %17259 = vst [vmem:[#allocation10_spill] sm:$0xff] %v12107_v1 }
 0x127   : > { %v949_v13 = vpop.f32.mrf.mxu3  ;;  %10131 = vmatmul.msk.f32.gmra.mxu2 %vm479_vm0, %v11461_v41  ;;  %v1141_v52 = vadd.f32 %v1109_v25, %v978_v32  ;;  %v2064_v25 = vrot.slane %v12085_v57, 1  ;;  %v17260_v32 = vld [vmem:[#allocation11_spill] sm:$0xff] }
 0x128   : > { %v1270_v33 = vpop.f32.mrf.mxu1 }
 0x129   : > { %v12087_v18 = vadd.f32 %v1264_v10, %v1141_v52  ;;  %v17257_v10 = vld [vmem:[#allocation12_spill] sm:$0xff]  ;;  %v2065_v0 = vsel %vm436_vm1, %v12074_v29, %v2064_v25  ;;  %v1652_v52 = vsel %vm674_vm2, %v11762_v46, %v1651_v31  ;;  %v12129_v46 = vld [vmem:[%s11350_s15 + $0x160] sm:$0x3] }
 0x12a   : > { %v793_v37 = vpop.f32.mrf.mxu2  ;;  %17262 = vst [vmem:[#allocation7_spill] sm:$0xff] %v12129_v46 }
 0x12b   : > { %v823_v40 = vadd.f32 %v793_v37, %v11732_v19  ;;  %10209 = vmatmul.msk.f32.gmra.mxu1 %vm479_vm0, %v12081_v54  ;;  %v1115_v41 = vpop.f32.mrf.mxu0  ;;  %v12118_v37 = vrot.slane %v12107_v1, 1 }
 0x12c   : > { %10149 = vmatmul.msk.f32.gmra.mxu3 %vm479_vm0, %v17255_v62  ;;  %v17261_v62 = vld [vmem:[#allocation8_spill] sm:$0xff] }
 0x12d   : > { %v979_v11 = vadd.f32 %v949_v13, %v823_v40 }
 0x12e   : > { %10166 = vmatmul.msk.f32.gmra.mxu0 %vm479_vm0, %v17257_v10 }
 0x12f   : > { %v952_v34 = vpop.f32.mrf.mxu3  ;;  %10132 = vmatmul.msk.f32.gmra.mxu2 %vm479_vm0, %v17256_v56  ;;  %v1142_v19 = vadd.f32 %v1112_v45, %v979_v11  ;;  %v12125_v11 = vsel %vm436_vm1, %v2066_v38, %v12118_v37  ;;  %v10117_v56 = vld [vmem:[%s11350_s15 + $0xd0] sm:$0x3] }
 0x130   : > { %v1273_v63 = vpop.f32.mrf.mxu1 }
 0x131   : > { %v12109_v53 = vadd.f32 %v1267_v58, %v1142_v19 }
 0x132   : > { %v796_v42 = vpop.f32.mrf.mxu2 }
 0x133   : > { %v824_v13 = vadd.f32 %v796_v42, %v17260_v32  ;;  %10210 = vmatmul.msk.f32.gmra.mxu1 %vm479_vm0, %v2065_v0  ;;  %v1118_v45 = vpop.f32.mrf.mxu0  ;;  %v2069_v0 = vrot.slane %v12129_v46, 1  ;;  %v17265_v32 = vld [vmem:[#allocation14_spill] sm:$0xff] }
 0x134   : > { %10150 = vmatmul.msk.f32.gmra.mxu3 %vm479_vm0, %v1497_v49  ;;  %v1501_v49 = vrot.slane %v10117_v56, 1 }
 0x135   : > { %v980_v58 = vadd.f32 %v952_v34, %v824_v13 }
 0x136   : > { %10167 = vmatmul.msk.f32.gmra.mxu0 %vm479_vm0, %v1652_v52  ;;  %v1502_v38 = vsel %vm436_vm1, %v11821_v43, %v1501_v49 }
 0x137   : > { %v955_v40 = vpop.f32.mrf.mxu3  ;;  %10133 = vmatmul.msk.f32.gmra.mxu2 %vm479_vm0, %v17261_v62  ;;  %v1143_v17 = vadd.f32 %v1115_v41, %v980_v58  ;;  %v2070_v58 = vsel %vm436_vm1, %v12118_v37, %v2069_v0  ;;  %v10347_v62 = vld [vmem:[%s17028_s1 + $0x30] sm:$0xff] }
 0x138   : > { %v1276_v25 = vpop.f32.mrf.mxu1  ;;  %2985 = vmatpush.msra.mxu3 %v10347_v62  ;;  %v17272_v62 = vld [vmem:[#allocation15_spill] sm:$0xff] }
 0x139   : > { %v12131_v10 = vadd.f32 %v1270_v33, %v1143_v17  ;;  %v17266_v33 = vld [vmem:[#allocation18_spill] sm:$0xff]  ;;  %v12154_v17 = vld [vmem:[%s11350_s15 + $0x168] sm:$0xff] }
 0x13a   : > { %v799_v19 = vpop.f32.mrf.mxu2  ;;  %17267 = vst [vmem:[#allocation9_spill] sm:$0xff] %v12154_v17  ;;  %v2071_v0 = vrot.slane %v12154_v17, 1 }
 0x13b   : > { %17263 = vst [vmem:[#allocation12_spill] sm:$0xff] %v12131_v10  ;;  %v825_v34 = vadd.f32 %v799_v19, %v17264_v55  ;;  %10211 = vmatmul.msk.f32.gmra.mxu1 %vm479_vm0, %v12125_v11  ;;  %v1121_v41 = vpop.f32.mrf.mxu0  ;;  %v12157_v19 = vld [vmem:[%s11350_s15 + $0x170] sm:$0xff] }
 0x13c   : > { %10151 = vmatmul.msk.f32.gmra.mxu3 %vm479_vm0, %v11834_v51  ;;  %v10306_v51 = vld [vmem:[%s17028_s1 + $0x28] sm:$0xff]  ;;  %17268 = vst [vmem:[#allocation11_spill] sm:$0xff] %v12157_v19 }
 0x13d   : > { %v981_v31 = vadd.f32 %v955_v40, %v825_v34  ;;  %v1656_v40 = vrot.slane %v10117_v56, 2  ;;  %2830 = vmatpush.msra.mxu2 %v10306_v51  ;;  %v17270_v34 = vld [vmem:[#allocation16_spill] sm:$0xff]  ;;  %v17271_v56 = vld [vmem:[#allocation17_spill] sm:$0xff]  ;;  %v12168_v51 = vrot.slane %v12157_v19, 1  ;;  %v12186_v19 = vld [vmem:[%s11350_s15 + $0x178] sm:$0x3] }
 0x13e   : > { %10168 = vmatmul.msk.f32.gmra.mxu0 %vm479_vm0, %v17266_v33  ;;  %17274 = vst [vmem:[#allocation14_spill] sm:$0xff] %v12186_v19  ;;  %v2074_v1 = vrot.slane %v12186_v19, 1 }
 0x13f   : > { %v958_v42 = vpop.f32.mrf.mxu3  ;;  %10134 = vmatmul.msk.f32.gmra.mxu2 %vm479_vm0, %v17265_v32  ;;  %v1144_v13 = vadd.f32 %v1118_v45, %v981_v31  ;;  %v1657_v49 = vsel %vm674_vm2, %v17271_v56, %v1656_v40  ;;  %v1658_v40 = vrot.slane %v11880_v30, 2 }
 0x140   : > { %v1279_v52 = vpop.f32.mrf.mxu1 }
 0x141   : > { %v12159_v55 = vadd.f32 %v1273_v63, %v1144_v13 }
 0x142   : > { %v802_v45 = vpop.f32.mrf.mxu2 }
 0x143   : > { %17269 = vst [vmem:[#allocation8_spill] sm:$0xff] %v12159_v55  ;;  %v826_v31 = vadd.f32 %v802_v45, %v17270_v34  ;;  %10212 = vmatmul.msk.f32.gmra.mxu1 %vm479_vm0, %v2070_v58  ;;  %v1124_v43 = vpop.f32.mrf.mxu0  ;;  %v12175_v58 = vsel %vm436_vm1, %v2071_v0, %v12168_v51  ;;  %v12179_v34 = vrot.slane %v11883_v47, 2 }
 0x144   : > { %10152 = vmatmul.msk.f32.gmra.mxu3 %vm479_vm0, %v1502_v38  ;;  %17273 = vst [vmem:[#allocation13_spill] sm:$0xff] %v12175_v58 }
 0x145   : > { %v982_v63 = vadd.f32 %v958_v42, %v826_v31  ;;  %v10364_v42 = vld [vmem:[%s17028_s1 + $0x38] sm:$0xff]  ;;  %v10120_v31 = vld [vmem:[%s11350_s15 + $0xe8] sm:$0x3]  ;;  %v12197_v46 = vsel %vm674_vm2, %v1658_v40, %v12179_v34  ;;  %v2075_v40 = vsel %vm436_vm1, %v12168_v51, %v2074_v1 }
 0x146   : > { %10169 = vmatmul.msk.f32.gmra.mxu0 %vm479_vm0, %v1657_v49  ;;  %v1506_v55 = vrot.slane %v10120_v31, 1 }
 0x147   : > { %v961_v13 = vpop.f32.mrf.mxu3  ;;  %10135 = vmatmul.msk.f32.gmra.mxu2 %vm479_vm0, %v17272_v62  ;;  %v1145_v38 = vadd.f32 %v1121_v41, %v982_v63  ;;  %3147 = vmatpush.msra.mxu0 %v10364_v42  ;;  %v17276_v63 = vld [vmem:[#allocation19_spill] sm:$0xff] }
 0x148   : > { %v1282_v45 = vpop.f32.mrf.mxu1 }
 0x149   : > { %v12188_v49 = vadd.f32 %v1276_v25, %v1145_v38 }
 0x14a   : > { %v805_v41 = vpop.f32.mrf.mxu2 }
 0x14b   : > { %17275 = vst [vmem:[#allocation18_spill] sm:$0xff] %v12188_v49  ;;  %v827_v17 = vadd.f32 %v805_v41, %v17276_v63  ;;  %10213 = vmatmul.msk.f32.gmra.mxu1 %vm479_vm0, %v12175_v58  ;;  %v1127_v0 = vpop.f32.mrf.mxu0  ;;  %v1507_v63 = vsel %vm436_vm1, %v11891_v16, %v1506_v55  ;;  %v1661_v49 = vrot.slane %v10120_v31, 2  ;;  %v17277_v58 = vld [vmem:[#allocation20_spill] sm:$0xff] }
 0x14c   : > { %10153 = vmatmul.msk.f32.gmra.mxu3 %vm479_vm0, %v11898_v61 }
 0x14d   : > { %v983_v42 = vadd.f32 %v961_v13, %v827_v17  ;;  %v10381_v17 = vld [vmem:[%s17028_s1 + $0x40] sm:$0xff]  ;;  %v1662_v1 = vsel %vm674_vm2, %v12179_v34, %v1661_v49  ;;  %v17279_v49 = vld [vmem:[#allocation21_spill] sm:$0xff] }
 0x14e   : > { %10170 = vmatmul.msk.f32.gmra.mxu0 %vm479_vm0, %v12197_v46  ;;  %3301 = vmatpush.msra.mxu1 %v10381_v17 }
 0x14f   : > { %v964_v25 = vpop.f32.mrf.mxu3  ;;  %10136 = vmatmul.msk.f32.gmra.mxu2 %vm479_vm0, %v11880_v30  ;;  %v1146_v38 = vadd.f32 %v1124_v43, %v983_v42 }
 0x150   : > { %v1285_v41 = vpop.f32.mrf.mxu1 }
 0x151   : > { %v12211_v13 = vadd.f32 %v1279_v52, %v1146_v38  ;;  %v12224_v38 = vld [vmem:[%s11350_s15 + $0xe8] sm:$0x3] }
 0x152   : > { %v808_v19 = vpop.f32.mrf.mxu2 }
 0x153   : > { %v828_v10 = vadd.f32 %v808_v19, %v17277_v58  ;;  %10214 = vmatmul.msk.f32.gmra.mxu1 %vm479_vm0, %v2075_v40  ;;  %v1130_v55 = vpop.f32.mrf.mxu0 }
 0x154   : > { %10154 = vmatmul.msk.f32.gmra.mxu3 %vm479_vm0, %v1507_v63  ;;  %v17278_v63 = vld [vmem:[#allocation22_spill] sm:$0xff] }
 0x155   : > { %v984_v43 = vadd.f32 %v964_v25, %v828_v10  ;;  %v2274_v25 = vrot.slane %v17279_v49, 2  ;;  %v12270_v49 = vld [vmem:[%s17029_s2 + $0x2] ss:$0 sm:$0xff] }
 0x156   : > { %10171 = vmatmul.msk.f32.gmra.mxu0 %vm479_vm0, %v1662_v1 }
 0x157   : > { %v967_v31 = vpop.f32.mrf.mxu3  ;;  %10137 = vmatmul.msk.f32.gmra.mxu2 %vm479_vm0, %v11883_v47  ;;  %v1147_v52 = vadd.f32 %v1127_v0, %v984_v43  ;;  %v2591_v0 = vrot.slane %v12224_v38, 1 }
 0x158   : > { %v12221_v42 = vpop.f32.mrf.mxu1 }
 0x159   : > { %v12226_v19 = vadd.f32 %v1282_v45, %v1147_v52 }
 0x15a   : > { %v811_v58 = vpop.f32.mrf.mxu2 }
 0x15b   : > { %v829_v40 = vadd.f32 %v811_v58, %v17278_v63  ;;  %10290 = vmatmul.msk.f32.vlgmr.msrb.gmra.mxu1 %vm479_vm0, %v11898_v61  ;;  %v1714_v10 = vpop.f32.mrf.mxu0  ;;  %v2592_v61 = vsel %vm436_vm1, %v11891_v16, %v2591_v0  ;;  %v12253_v63 = vld [vmem:[%s17029_s2] ss:$0 sm:$0xff]  ;;  %v12262_v16 = vld [vmem:[%s17029_s2 + $0x1] ss:$0 sm:$0xff] }
 0x15c   : > { %10232 = vmatmul.msk.f32.vlgmr.msrb.gmra.mxu3 %vm479_vm0, %v17266_v33  ;;  %v2275_v33 = vsel %vm674_vm2, %v17271_v56, %v2274_v25 }
 0x15d   : > { %v985_v17 = vadd.f32 %v967_v31, %v829_v40 }
 0x15e   : > { %10273 = vmatmul.msk.f32.vlgmr.msrb.gmra.mxu0 %vm479_vm0, %v11880_v30 }
 0x15f   : > { %v1559_v1 = vpop.f32.mrf.mxu3  ;;  %10215 = vmatmul.msk.f32.vlgmr.msrb.gmra.mxu2 %vm479_vm0, %v17265_v32  ;;  %v1148_v45 = vadd.f32 %v1130_v55, %v985_v17 }
 0x160   : > { %v12239_v43 = vpop.f32.mrf.mxu1 }
 0x161   : > { %v12245_v52 = vadd.f32 %v1285_v41, %v1148_v45 }
 0x162   : > { %v1396_v31 = vpop.f32.mrf.mxu2 }
 0x163   : > { %v1444_v58 = vadd.f32 %v1396_v31, %v11906_v35  ;;  %10291 = vmatmul.msk.f32.gmra.mxu1 %vm479_vm0, %v2592_v61  ;;  %v1717_v32 = vpop.f32.mrf.mxu0 }
 0x164   : > { %10233 = vmatmul.msk.f32.gmra.mxu3 %vm479_vm0, %v2275_v33 }
 0x165   : > { %v1607_v55 = vadd.f32 %v1559_v1, %v1444_v58  ;;  %v2279_v1 = vrot.slane %v11904_v48, 2 }
 0x166   : > { %10274 = vmatmul.msk.f32.gmra.mxu0 %vm479_vm0, %v11883_v47 }
 0x167   : > { %v1562_v56 = vpop.f32.mrf.mxu3  ;;  %v1762_v40 = vadd.f32 %v1714_v10, %v1607_v55  ;;  %10216 = vmatmul.msk.f32.gmra.mxu2 %vm479_vm0, %v17272_v62  ;;  %v12273_v10 = vld [vmem:[%s11350_s15 + $0x100] sm:$0x3]  ;;  %v2280_v48 = vsel %vm674_vm2, %v12179_v34, %v2279_v1 }
 0x168   : > { %v12264_v35 = vpop.f32.mrf.mxu1  ;;  %v2596_v45 = vrot.slane %v12273_v10, 1 }
 0x169   : > { %v1782_v41 = vmul.f32 %v12253_v63, %v1762_v40 }
 0x16a   : > { %v1399_v62 = vpop.f32.mrf.mxu2 }
 0x16b   : > { %v1445_v25 = vadd.f32 %v1399_v62, %v11929_v60  ;;  %10292 = vmatmul.msk.f32.gmra.mxu1 %vm479_vm0, %v11944_v24  ;;  %v1803_v0 = vadd.f32 %v12262_v16, %v1782_v41  ;;  %v1720_v17 = vpop.f32.mrf.mxu0  ;;  %v2597_v24 = vsel %vm436_vm1, %v11937_v20, %v2596_v45  ;;  %v2281_v62 = vrot.slane %v11924_v36, 2 }
 0x16c   : > { %10234 = vmatmul.msk.f32.gmra.mxu3 %vm479_vm0, %v12197_v46 }
 0x16d   : > { %v1608_v33 = vadd.f32 %v1562_v56, %v1445_v25  ;;  %vm1819_vm3 = vcmp.gt.f32.partialorder %v1803_v0, 0.0  ;;  %v1840_v61 = vmul.f32 %v12270_v49, %v1803_v0  ;;  %v12305_v25 = vrot.slane %v11927_v14, 2 }
 0x16e   : > { %10275 = vmatmul.msk.f32.gmra.mxu0 %vm479_vm0, %v11924_v36 }
 0x16f   : > { %v1565_v31 = vpop.f32.mrf.mxu3  ;;  %v1763_v58 = vadd.f32 %v1717_v32, %v1608_v33  ;;  %10217 = vmatmul.msk.f32.gmra.mxu2 %vm479_vm0, %v11880_v30  ;;  %v12288_v60 = vsel %vm1819_vm3, %v1803_v0, %v1840_v61  ;;  %v12318_v33 = vsel %vm674_vm2, %v2281_v62, %v12305_v25 }
 0x170   : > { %17280 = vst [vmem:[#allocation16_spill] sm:$0xff] %v12288_v60  ;;  %1921 = vrot.lane.b32.xlu0 %v12288_v60, %s11221_s23  ;;  %v12297_v55 = vpop.f32.mrf.mxu1 }
 0x171   : > { %v1783_v32 = vmul.f32 %v12253_v63, %v1763_v58 }
 0x172   : > { %v1402_v30 = vpop.f32.mrf.mxu2 }
 0x173   : > { %v1446_v56 = vadd.f32 %v1402_v30, %v11952_v2  ;;  %10293 = vmatmul.msk.f32.gmra.mxu1 %vm479_vm0, %v2597_v24  ;;  %v1804_v40 = vadd.f32 %v12262_v16, %v1783_v32  ;;  %v1723_v41 = vpop.f32.mrf.mxu0  ;;  %v2284_v32 = vrot.slane %v11950_v12, 2 }
 0x174   : > { %10235 = vmatmul.msk.f32.gmra.mxu3 %vm479_vm0, %v2280_v48 }
 0x175   : > { %v1609_v20 = vadd.f32 %v1565_v31, %v1446_v56  ;;  %vm1820_vm4 = vcmp.gt.f32.partialorder %v1804_v40, 0.0  ;;  %v1841_v0 = vmul.f32 %v12270_v49, %v1804_v40  ;;  %v12322_v31 = vld [vmem:[%s11350_s15 + $0x118] sm:$0x3]  ;;  %v2285_v12 = vsel %vm674_vm2, %v12305_v25, %v2284_v32 }
 0x176   : > { %10276 = vmatmul.msk.f32.gmra.mxu0 %vm479_vm0, %v11927_v14  ;;  %v2601_v30 = vrot.slane %v12322_v31, 1 }
 0x177   : > { %v1568_v1 = vpop.f32.mrf.mxu3  ;;  %v1764_v45 = vadd.f32 %v1720_v17, %v1609_v20  ;;  %10218 = vmatmul.msk.f32.gmra.mxu2 %vm479_vm0, %v11883_v47  ;;  %v12312_v2 = vsel %vm1820_vm4, %v1804_v40, %v1841_v0 }
 0x178   : > { %17281 = vst [vmem:[#allocation17_spill] sm:$0xff] %v12312_v2  ;;  %1923 = vrot.lane.b32.xlu0 %v12312_v2, %s11221_s23  ;;  %v12330_v48 = vpop.f32.mrf.mxu1  ;;  %v2602_v20 = vsel %vm436_vm1, %v11983_v6, %v2601_v30 }
 0x179   : > { %v1784_v61 = vmul.f32 %v12253_v63, %v1764_v45 }
 0x17a   : > { %v1405_v17 = vpop.f32.mrf.mxu2 }
 0x17b   : > { %v1447_v58 = vadd.f32 %v1405_v17, %v11975_v7  ;;  %10294 = vmatmul.msk.f32.gmra.mxu1 %vm479_vm0, %v11990_v5  ;;  %v1805_v47 = vadd.f32 %v12262_v16, %v1784_v61  ;;  %v1726_v24 = vpop.f32.mrf.mxu0  ;;  %v2286_v61 = vrot.slane %v11970_v15, 2  ;;  %v12354_v17 = vrot.slane %v11973_v3, 2 }
 0x17c   : > { %10236 = vmatmul.msk.f32.gmra.mxu3 %vm479_vm0, %v12318_v33 }
 0x17d   : > { %v1610_v56 = vadd.f32 %v1568_v1, %v1447_v58  ;;  %vm1821_vm5 = vcmp.gt.f32.partialorder %v1805_v47, 0.0  ;;  %v1842_v40 = vmul.f32 %v12270_v49, %v1805_v47 }
 0x17e   : > { %10277 = vmatmul.msk.f32.gmra.mxu0 %vm479_vm0, %v11970_v15 }
 0x17f   : > { %v1571_v7 = vpop.f32.mrf.mxu3  ;;  %v1765_v62 = vadd.f32 %v1723_v41, %v1610_v56  ;;  %10219 = vmatmul.msk.f32.gmra.mxu2 %vm479_vm0, %v11924_v36  ;;  %v12339_v5 = vsel %vm1821_vm5, %v1805_v47, %v1842_v40  ;;  %v12369_v56 = vsel %vm674_vm2, %v2286_v61, %v12354_v17 }
 0x180   : > { %17282 = vst [vmem:[#allocation15_spill] sm:$0xff] %v12339_v5  ;;  %1925 = vrot.lane.b32.xlu1 %v12339_v5, %s11221_s23  ;;  %v12357_v47 = vpop.f32.mrf.mxu1 }
 0x181   : > { %v1785_v0 = vmul.f32 %v12253_v63, %v1765_v62 }
 0x182   : > { %v1408_v41 = vpop.f32.mrf.mxu2 }
 0x183   : > { %v1448_v1 = vadd.f32 %v1408_v41, %v11998_v27  ;;  %10295 = vmatmul.msk.f32.gmra.mxu1 %vm479_vm0, %v2602_v20  ;;  %v1806_v36 = vadd.f32 %v12262_v16, %v1785_v0  ;;  %v1729_v45 = vpop.f32.mrf.mxu0  ;;  %v2289_v20 = vrot.slane %v11996_v22, 2 }
 0x184   : > { %10237 = vmatmul.msk.f32.gmra.mxu3 %vm479_vm0, %v2285_v12 }
 0x185   : > { %v1611_v58 = vadd.f32 %v1571_v7, %v1448_v1  ;;  %vm1822_vm6 = vcmp.gt.f32.partialorder %v1806_v36, 0.0  ;;  %v1843_v6 = vmul.f32 %v12270_v49, %v1806_v36  ;;  %v12373_v7 = vld [vmem:[%s11350_s15 + $0x130] sm:$0x3]  ;;  %v2290_v22 = vsel %vm674_vm2, %v12354_v17, %v2289_v20 }
 0x186   : > { %10278 = vmatmul.msk.f32.gmra.mxu0 %vm479_vm0, %v11973_v3  ;;  %v2606_v0 = vrot.slane %v12373_v7, 1 }
 0x187   : > { %v1574_v27 = vpop.f32.mrf.mxu3  ;;  %v1766_v32 = vadd.f32 %v1726_v24, %v1611_v58  ;;  %10220 = vmatmul.msk.f32.gmra.mxu2 %vm479_vm0, %v11927_v14  ;;  %v12363_v30 = vsel %vm1822_vm6, %v1806_v36, %v1843_v6 }
 0x188   : > { %17283 = vst [vmem:[#allocation19_spill] sm:$0xff] %v12363_v30  ;;  %1927 = vrot.lane.b32.xlu1 %v12363_v30, %s11221_s23  ;;  %v2607_v58 = vsel %vm436_vm1, %v12029_v21, %v2606_v0 }
 0x189   : > { %v1786_v40 = vmul.f32 %v12253_v63, %v1766_v32 }
 0x18a   : > { %v1411_v24 = vpop.f32.mrf.mxu2 }
 0x18b   : > { %v1449_v62 = vadd.f32 %v1411_v24, %v12021_v23  ;;  %10296 = vmatmul.msk.f32.gmra.mxu1 %vm479_vm0, %v12036_v8  ;;  %v1807_v14 = vadd.f32 %v12262_v16, %v1786_v40  ;;  %v1732_v12 = vpop.f32.mrf.mxu0  ;;  %v12390_v8 = vpop.f32.mrf.mxu1  ;;  %v2291_v40 = vrot.slane %v12016_v50, 2  ;;  %v12405_v24 = vrot.slane %v12019_v9, 2 }
 0x18c   : > { %10238 = vmatmul.msk.f32.gmra.mxu3 %vm479_vm0, %v12369_v56 }
 0x18d   : > { %v1612_v41 = vadd.f32 %v1574_v27, %v1449_v62  ;;  %vm1823_vm7 = vcmp.gt.f32.partialorder %v1807_v14, 0.0  ;;  %v1844_v1 = vmul.f32 %v12270_v49, %v1807_v14  ;;  %v12418_v0 = vsel %vm674_vm2, %v2291_v40, %v12405_v24 }
 0x18e   : > { %10279 = vmatmul.msk.f32.gmra.mxu0 %vm479_vm0, %v12016_v50 }
 0x18f   : > { %v1577_v36 = vpop.f32.mrf.mxu3  ;;  %v1767_v61 = vadd.f32 %v1729_v45, %v1612_v41  ;;  %10221 = vmatmul.msk.f32.gmra.mxu2 %vm479_vm0, %v11970_v15  ;;  %v12388_v23 = vsel %vm1823_vm7, %v1807_v14, %v1844_v1  ;;  %v12422_v1 = vld [vmem:[%s11350_s15 + $0x148] sm:$0x3] }
 0x190   : > { %17284 = vst [vmem:[#allocation20_spill] sm:$0xff] %v12388_v23  ;;  %1929 = vrot.lane.b32.xlu2 %v12388_v23, %s11221_s23  ;;  %v2750_v23 = vrot.slane %v12273_v10, 2 }
 0x191   : > { %v1787_v45 = vmul.f32 %v12253_v63, %v1767_v61 }
 0x192   : > { %v1414_v6 = vpop.f32.mrf.mxu2 }
 0x193   : > { %v1450_v15 = vadd.f32 %v1414_v6, %v12044_v26  ;;  %10297 = vmatmul.msk.f32.gmra.mxu1 %vm479_vm0, %v2607_v58  ;;  %v1808_v27 = vadd.f32 %v12262_v16, %v1787_v45  ;;  %v1735_v32 = vpop.f32.mrf.mxu0  ;;  %v2294_v58 = vrot.slane %v12042_v28, 2  ;;  %v2611_v45 = vrot.slane %v12422_v1, 1 }
 0x194   : > { %10239 = vmatmul.msk.f32.gmra.mxu3 %vm479_vm0, %v2290_v22 }
 0x195   : > { %v1613_v62 = vadd.f32 %v1577_v36, %v1450_v15  ;;  %vm1824_vm8 = vcmp.gt.f32.partialorder %v1808_v27, 0.0  ;;  %v1845_v21 = vmul.f32 %v12270_v49, %v1808_v27  ;;  %v2295_v28 = vsel %vm674_vm2, %v12405_v24, %v2294_v58 }
 0x196   : > { %10280 = vmatmul.msk.f32.gmra.mxu0 %vm479_vm0, %v12019_v9 }
 0x197   : > { %v1580_v14 = vpop.f32.mrf.mxu3  ;;  %v1768_v20 = vadd.f32 %v1732_v12, %v1613_v62  ;;  %10222 = vmatmul.msk.f32.gmra.mxu2 %vm479_vm0, %v11973_v3  ;;  %v12412_v26 = vsel %vm1824_vm8, %v1808_v27, %v1845_v21  ;;  %v12424_v12 = vpop.f32.mrf.mxu1  ;;  %vm280_vm8 = vcmask 25600  }
 0x198   : > { %17285 = vst [vmem:[#allocation22_spill] sm:$0xff] %v12412_v26  ;;  %1931 = vrot.lane.b32.xlu2 %v12412_v26, %s11221_s23 }
 0x199   : > { %v1788_v41 = vmul.f32 %v12253_v63, %v1768_v20 }
 0x19a   : > { %v1417_v36 = vpop.f32.mrf.mxu2 }
 0x19b   : > { %v1451_v3 = vadd.f32 %v1417_v36, %v12065_v4  ;;  %10298 = vmatmul.msk.f32.gmra.mxu1 %vm479_vm0, %v12081_v54  ;;  %v1809_v61 = vadd.f32 %v12262_v16, %v1788_v41  ;;  %v1738_v22 = vpop.f32.mrf.mxu0  ;;  %v2612_v54 = vsel %vm436_vm1, %v12074_v29, %v2611_v45  ;;  %v2296_v41 = vrot.slane %v12060_v44, 2 }
 0x19c   : > { %10240 = vmatmul.msk.f32.gmra.mxu3 %vm479_vm0, %v12418_v0  ;;  %v12456_v36 = vrot.slane %v12063_v59, 2 }
 0x19d   : > { %v1614_v6 = vadd.f32 %v1580_v14, %v1451_v3  ;;  %vm1825_vm9 = vcmp.gt.f32.partialorder %v1809_v61, 0.0  ;;  %v1846_v15 = vmul.f32 %v12270_v49, %v1809_v61 }
 0x19e   : > { %10281 = vmatmul.msk.f32.gmra.mxu0 %vm479_vm0, %v12060_v44  ;;  %v12469_v45 = vsel %vm674_vm2, %v2296_v41, %v12456_v36 }
 0x19f   : > { %v1583_v27 = vpop.f32.mrf.mxu3  ;;  %v1769_v40 = vadd.f32 %v1735_v32, %v1614_v6  ;;  %10223 = vmatmul.msk.f32.gmra.mxu2 %vm479_vm0, %v12016_v50  ;;  %v12439_v4 = vsel %vm1825_vm9, %v1809_v61, %v1846_v15  ;;  %v12452_v14 = vpop.f32.mrf.mxu1  ;;  %v10265_v15 = vld [vmem:[%s11350_s15 + $0x160] sm:$0x3] }
 0x1a0   : > { %17286 = vst [vmem:[#allocation21_spill] sm:$0xff] %v12439_v4  ;;  %1933 = vrot.lane.b32.xlu0 %v12439_v4, %s11221_s23 }
 0x1a1   : > { %v1789_v62 = vmul.f32 %v12253_v63, %v1769_v40 }
 0x1a2   : > { %v1420_v32 = vpop.f32.mrf.mxu2 }
 0x1a3   : > { %v1452_v21 = vadd.f32 %v1420_v32, %v12087_v18  ;;  %10299 = vmatmul.msk.f32.gmra.mxu1 %vm479_vm0, %v2612_v54  ;;  %v1810_v50 = vadd.f32 %v12262_v16, %v1789_v62  ;;  %v1741_v20 = vpop.f32.mrf.mxu0  ;;  %v2616_v54 = vrot.slane %v10265_v15, 1 }
 0x1a4   : > { %10241 = vmatmul.msk.f32.gmra.mxu3 %vm479_vm0, %v2295_v28  ;;  %v2299_v28 = vrot.slane %v12085_v57, 2 }
 0x1a5   : > { %v1615_v29 = vadd.f32 %v1583_v27, %v1452_v21  ;;  %vm1826_vm10 = vcmp.gt.f32.partialorder %v1810_v50, 0.0  ;;  %v1847_v3 = vmul.f32 %v12270_v49, %v1810_v50  ;;  %v2617_v41 = vsel %vm436_vm1, %v12118_v37, %v2616_v54 }
 0x1a6   : > { %10282 = vmatmul.msk.f32.gmra.mxu0 %vm479_vm0, %v12063_v59  ;;  %v2300_v57 = vsel %vm674_vm2, %v12456_v36, %v2299_v28 }
 0x1a7   : > { %v1586_v18 = vpop.f32.mrf.mxu3  ;;  %v1770_v61 = vadd.f32 %v1738_v22, %v1615_v29  ;;  %10224 = vmatmul.msk.f32.gmra.mxu2 %vm479_vm0, %v12019_v9  ;;  %v12463_v58 = vsel %vm1826_vm10, %v1810_v50, %v1847_v3  ;;  %v12481_v21 = vpop.f32.mrf.mxu1  ;;  %v17289_v3 = vld [vmem:[#allocation12_spill] sm:$0xff] }
 0x1a8   : > { %17287 = vst [vmem:[#allocation23_spill] sm:$0xff] %v12463_v58  ;;  %1935 = vrot.lane.b32.xlu1 %v12463_v58, %s11221_s23 }
 0x1a9   : > { %v1790_v6 = vmul.f32 %v12253_v63, %v1770_v61  ;;  %v2301_v61 = vrot.slane %v12104_v39, 2 }
 0x1aa   : > { %v1423_v27 = vpop.f32.mrf.mxu2 }
 0x1ab   : > { %v1453_v22 = vadd.f32 %v1423_v27, %v12109_v53  ;;  %10300 = vmatmul.msk.f32.gmra.mxu1 %vm479_vm0, %v12125_v11  ;;  %v1811_v9 = vadd.f32 %v12262_v16, %v1790_v6  ;;  %v1744_v40 = vpop.f32.mrf.mxu0  ;;  %v17290_v6 = vld [vmem:[#allocation10_spill] sm:$0xff] }
 0x1ac   : > { %10242 = vmatmul.msk.f32.gmra.mxu3 %vm479_vm0, %v12469_v45  ;;  %v12502_v15 = vrot.slane %v17290_v6, 2 }
 0x1ad   : > { %v1616_v62 = vadd.f32 %v1586_v18, %v1453_v22  ;;  %vm1827_vm11 = vcmp.gt.f32.partialorder %v1811_v9, 0.0  ;;  %v1848_v32 = vmul.f32 %v12270_v49, %v1811_v9 }
 0x1ae   : > { %10283 = vmatmul.msk.f32.gmra.mxu0 %vm479_vm0, %v12104_v39 }
 0x1af   : > { %v1589_v50 = vpop.f32.mrf.mxu3  ;;  %v1771_v53 = vadd.f32 %v1741_v20, %v1616_v62  ;;  %10225 = vmatmul.msk.f32.gmra.mxu2 %vm479_vm0, %v12060_v44  ;;  %v12487_v11 = vsel %vm1827_vm11, %v1811_v9, %v1848_v32  ;;  %v12511_v62 = vpop.f32.mrf.mxu1  ;;  %v12517_v32 = vsel %vm674_vm2, %v2301_v61, %v12502_v15 }
 0x1b0   : > { %17288 = vst [vmem:[#allocation24_spill] sm:$0xff] %v12487_v11  ;;  %1937 = vrot.lane.b32.xlu2 %v12487_v11, %s11221_s23 }
 0x1b1   : > { %v1791_v29 = vmul.f32 %v12253_v63, %v1771_v53 }
 0x1b2   : > { %v1426_v20 = vpop.f32.mrf.mxu2 }
 0x1b3   : > { %v1454_v18 = vadd.f32 %v1426_v20, %v17289_v3  ;;  %10301 = vmatmul.msk.f32.gmra.mxu1 %vm479_vm0, %v2617_v41  ;;  %v1812_v44 = vadd.f32 %v12262_v16, %v1791_v29  ;;  %v1747_v22 = vpop.f32.mrf.mxu0  ;;  %v17293_v41 = vld [vmem:[#allocation13_spill] sm:$0xff]  ;;  %v17294_v20 = vld [vmem:[#allocation7_spill] sm:$0xff] }
 0x1b4   : > { %10243 = vmatmul.msk.f32.gmra.mxu3 %vm479_vm0, %v2300_v57  ;;  %v17292_v57 = vld [vmem:[#allocation8_spill] sm:$0xff]  ;;  %v2304_v3 = vrot.slane %v17294_v20, 2 }
 0x1b5   : > { %v1617_v27 = vadd.f32 %v1589_v50, %v1454_v18  ;;  %vm1828_vm12 = vcmp.gt.f32.partialorder %v1812_v44, 0.0  ;;  %v1849_v37 = vmul.f32 %v12270_v49, %v1812_v44 }
 0x1b6   : > { %10284 = vmatmul.msk.f32.gmra.mxu0 %vm479_vm0, %v17290_v6 }
 0x1b7   : > { %v1592_v9 = vpop.f32.mrf.mxu3  ;;  %v1772_v28 = vadd.f32 %v1744_v40, %v1617_v27  ;;  %10226 = vmatmul.msk.f32.gmra.mxu2 %vm479_vm0, %v12063_v59  ;;  %v12509_v54 = vsel %vm1828_vm12, %v1812_v44, %v1849_v37  ;;  %v10268_v40 = vld [vmem:[%s11350_s15 + $0x178] sm:$0x3] }
 0x1b8   : > { %17291 = vst [vmem:[#allocation12_spill] sm:$0xff] %v12509_v54  ;;  %1939 = vrot.lane.b32.xlu0 %v12509_v54, %s11221_s23  ;;  %v2621_v18 = vrot.slane %v10268_v40, 1  ;;  %v12542_v40 = vld [vmem:[%s11350_s15 + $0x180] sm:$0xff] }
 0x1b9   : > { %v1792_v50 = vmul.f32 %v12253_v63, %v1772_v28  ;;  %v17295_v28 = vld [vmem:[#allocation9_spill] sm:$0xff] }
 0x1ba   : > { %v1429_v53 = vpop.f32.mrf.mxu2 }
 0x1bb   : > { %v1455_v59 = vadd.f32 %v1429_v53, %v17292_v57  ;;  %10302 = vmatmul.msk.f32.gmra.mxu1 %vm479_vm0, %v17293_v41  ;;  %v1813_v29 = vadd.f32 %v12262_v16, %v1792_v50  ;;  %v1750_v57 = vpop.f32.mrf.mxu0  ;;  %v2622_v50 = vsel %vm436_vm1, %v12168_v51, %v2621_v18  ;;  %v3597_v41 = vld [vmem:[%s17030_s3] sm:$0xf]  ;;  %v17297_v51 = vld [vmem:[#allocation18_spill] sm:$0xff] }
 0x1bc   : > { %10244 = vmatmul.msk.f32.gmra.mxu3 %vm479_vm0, %v12517_v32 }
 0x1bd   : > { %v1618_v44 = vadd.f32 %v1592_v9, %v1455_v59  ;;  %vm1829_vm13 = vcmp.gt.f32.partialorder %v1813_v29, 0.0  ;;  %v1850_v61 = vmul.f32 %v12270_v49, %v1813_v29  ;;  %v2305_v9 = vsel %vm674_vm2, %v12502_v15, %v2304_v3  ;;  %v10400_v59 = vld [vmem:[%s17030_s3 + $0x4] sm:$0xf]  ;;  %10418 = vmatpush.msk.msrb.mxu3 %vm3696_vm14, %v3597_v41 }
 0x1be   : > { %10285 = vmatmul.msk.f32.gmra.mxu0 %vm479_vm0, %v17295_v28  ;;  %10401 = vmatpush.msk.msrb.mxu2 %vm3696_vm14, %v10400_v59  ;;  %v2623_v59 = vrot.slane %v12542_v40, 1 }
 0x1bf   : > { %v1595_v27 = vpop.f32.mrf.mxu3  ;;  %v1773_v37 = vadd.f32 %v1747_v22, %v1618_v44  ;;  %10227 = vmatmul.msk.f32.gmra.mxu2 %vm479_vm0, %v12104_v39  ;;  %v12533_v53 = vsel %vm1829_vm13, %v1813_v29, %v1850_v61  ;;  %v12545_v22 = vld [vmem:[%s11350_s15 + $0x188] sm:$0xff]  ;;  %v12554_v29 = vpop.f32.mrf.mxu1  ;;  %v11222_v44 = vmov 0.0   ;;  %v2306_v61 = vrot.slane %v17295_v28, 2 }
 0x1c0   : > { %17296 = vst [vmem:[#allocation10_spill] sm:$0xff] %v12533_v53  ;;  %1941 = vrot.lane.b32.xlu1 %v12533_v53, %s11221_s23  ;;  %v12570_v41 = vrot.slane %v12545_v22, 1 }
 0x1c1   : > { %v1793_v39 = vmul.f32 %v12253_v63, %v1773_v37  ;;  %282 = vst.msk [vmem:[#allocation2 + $0x18] sm:$0xff] %vm277_vm15, %v11222_v44  ;;  %v17298_v37 = vld [vmem:[#allocation11_spill] sm:$0xff] }
 0x1c2   : > { %v1432_v20 = vpop.f32.mrf.mxu2  ;;  %v12566_v53 = vrot.slane %v17298_v37, 2  ;;  %283 = vst.msk [vmem:[#allocation2 + $0x20] sm:$0xff] %vm277_vm15, %v11222_v44 }
 0x1c3   : > { %v1456_v3 = vadd.f32 %v1432_v20, %v17297_v51  ;;  %10303 = vmatmul.msk.f32.gmra.mxu1 %vm479_vm0, %v2622_v50  ;;  %v1814_v18 = vadd.f32 %v12262_v16, %v1793_v39  ;;  %278 = vst.msk [vmem:[#allocation2] sm:$0xff] %vm277_vm15, %v11222_v44 }
 0x1c4   : > { %10245 = vmatmul.msk.f32.gmra.mxu3 %vm479_vm0, %v2305_v9  ;;  %279 = vst.msk [vmem:[#allocation2 + $0x8] sm:$0xff] %vm277_vm15, %v11222_v44  ;;  %v12591_v51 = vsel %vm674_vm2, %v2306_v61, %v12566_v53 }
 0x1c5   : > { %v1619_v9 = vadd.f32 %v1595_v27, %v1456_v3  ;;  %vm1830_vm3 = vcmp.gt.f32.partialorder %v1814_v18, 0.0  ;;  %v1851_v50 = vmul.f32 %v12270_v49, %v1814_v18  ;;  %285 = vst.msk [vmem:[#allocation2 + $0x30] sm:$0xff] %vm277_vm15, %v11222_v44  ;;  %v12601_v3 = vld [vmem:[%s11350_s15 + $0x190] sm:$0x3] }
 0x1c6   : > { %10286 = vmatmul.msk.f32.gmra.mxu0 %vm479_vm0, %v17298_v37  ;;  %286 = vst.msk [vmem:[#allocation2 + $0x38] sm:$0xff] %vm277_vm15, %v11222_v44  ;;  %v2626_v54 = vrot.slane %v12601_v3, 1 }
 0x1c7   : > { %v1774_v39 = vadd.f32 %v1750_v57, %v1619_v9  ;;  %10228 = vmatmul.msk.f32.gmra.mxu2 %vm479_vm0, %v17290_v6  ;;  %v12583_v20 = vsel %vm1830_vm3, %v1814_v18, %v1851_v50  ;;  %v1598_v27 = vpop.f32.mrf.mxu3  ;;  %v12595_v57 = vsel %vm436_vm1, %v2623_v59, %v12570_v41  ;;  %288 = vst.msk [vmem:[#allocation2 + $0x48] sm:$0xff] %vm277_vm15, %v11222_v44  ;;  %v1753_v18 = vpop.f32.mrf.mxu0 }
 0x1c8   : > { %17299 = vst [vmem:[#allocation8_spill] sm:$0xff] %v12583_v20  ;;  %1943 = vrot.lane.b32.xlu2 %v12583_v20, %s11221_s23  ;;  %v12615_v50 = vpop.f32.mrf.mxu1 }
 0x1c9   : > { %v1794_v6 = vmul.f32 %v12253_v63, %v1774_v39  ;;  %289 = vst.msk [vmem:[#allocation2 + $0x50] sm:$0xff] %vm277_vm15, %v11222_v44  ;;  %v17300_v39 = vld [vmem:[#allocation14_spill] sm:$0xff] }
 0x1ca   : > { %v1435_v9 = vpop.f32.mrf.mxu2  ;;  %291 = vst.msk [vmem:[#allocation2 + $0x60] sm:$0xff] %vm277_vm15, %v11222_v44  ;;  %v2309_v20 = vrot.slane %v17300_v39, 2 }
 0x1cb   : > { %v1457_v61 = vadd.f32 %v1435_v9, %v12211_v13  ;;  %10304 = vmatmul.msk.f32.gmra.mxu1 %vm479_vm0, %v12595_v57  ;;  %v1815_v59 = vadd.f32 %v12262_v16, %v1794_v6  ;;  %292 = vst.msk [vmem:[#allocation2 + $0x68] sm:$0xff] %vm277_vm15, %v11222_v44 }
 0x1cc   : > { %10246 = vmatmul.msk.f32.gmra.mxu3 %vm479_vm0, %v12591_v51  ;;  %294 = vst.msk [vmem:[#allocation2 + $0x78] sm:$0xff] %vm277_vm15, %v11222_v44 }
 0x1cd   : > { %v1620_v13 = vadd.f32 %v1598_v27, %v1457_v61  ;;  %vm1831_vm4 = vcmp.gt.f32.partialorder %v1815_v59, 0.0  ;;  %v1852_v9 = vmul.f32 %v12270_v49, %v1815_v59  ;;  %295 = vst.msk [vmem:[#allocation2 + $0x80] sm:$0xff] %vm277_vm15, %v11222_v44  ;;  %v2310_v27 = vsel %vm674_vm2, %v12566_v53, %v2309_v20  ;;  %v10323_v61 = vld [vmem:[%s11350_s15 + $0xf0] sm:$0xff] }
 0x1ce   : > { %10287 = vmatmul.msk.f32.gmra.mxu0 %vm479_vm0, %v12542_v40  ;;  %297 = vst.msk [vmem:[#allocation2 + $0x90] sm:$0xff] %vm277_vm15, %v11222_v44 }
 0x1cf   : > { %v1775_v6 = vadd.f32 %v1753_v18, %v1620_v13  ;;  %10229 = vmatmul.msk.f32.gmra.mxu2 %vm479_vm0, %v17295_v28  ;;  %v12630_v39 = vsel %vm1831_vm4, %v1815_v59, %v1852_v9  ;;  %v2627_v18 = vsel %vm436_vm1, %v12570_v41, %v2626_v54  ;;  %298 = vst.msk [vmem:[#allocation2 + $0x98] sm:$0xff] %vm277_vm15, %v11222_v44  ;;  %v12645_v59 = vld [vmem:[%s11350_s15 + $0xf8] sm:$0xff]  ;;  %v1601_v13 = vpop.f32.mrf.mxu3 }
 0x1d0   : > { %17301 = vst [vmem:[#allocation13_spill] sm:$0xff] %v12630_v39  ;;  %1945 = vrot.lane.b32.xlu0 %v12630_v39, %s11221_s23  ;;  %v3213_v39 = vrot.slane %v10323_v61, 2  ;;  %v3214_v11 = vrot.slane %v12645_v59, 2 }
 0x1d1   : > { %v1795_v28 = vmul.f32 %v12253_v63, %v1775_v6  ;;  %300 = vst.msk [vmem:[#allocation2 + $0xa8] sm:$0xff] %vm277_vm15, %v11222_v44  ;;  %v1756_v6 = vpop.f32.mrf.mxu0 }
 0x1d2   : > { %v1438_v9 = vpop.f32.mrf.mxu2  ;;  %301 = vst.msk [vmem:[#allocation2 + $0xb0] sm:$0xff] %vm277_vm15, %v11222_v44 }
 0x1d3   : > { %v1458_v20 = vadd.f32 %v1438_v9, %v12226_v19  ;;  %10305 = vmatmul.msk.f32.gmra.mxu1 %vm479_vm0, %v2627_v18  ;;  %v1816_v54 = vadd.f32 %v12262_v16, %v1795_v28  ;;  %303 = vst.msk [vmem:[#allocation2 + $0xc0] sm:$0xff] %vm277_vm15, %v11222_v44  ;;  %v3215_v9 = vsel %vm674_vm2, %v3213_v39, %v3214_v11 }
 0x1d4   : > { %10247 = vmatmul.msk.f32.gmra.mxu3 %vm479_vm0, %v2310_v27  ;;  %304 = vst.msk [vmem:[#allocation2 + $0xc8] sm:$0xff] %vm277_vm15, %v11222_v44  ;;  %v12663_v27 = vpop.f32.mrf.mxu1 }
 0x1d5   : > { %v1621_v58 = vadd.f32 %v1601_v13, %v1458_v20  ;;  %vm1832_vm5 = vcmp.gt.f32.partialorder %v1816_v54, 0.0  ;;  %v1853_v19 = vmul.f32 %v12270_v49, %v1816_v54  ;;  %306 = vst.msk [vmem:[#allocation2 + $0xd8] sm:$0xff] %vm277_vm15, %v11222_v44  ;;  %v3059_v13 = vrot.slane %v10323_v61, 1 }
 0x1d6   : > { %307 = vst.msk [vmem:[#allocation2 + $0xe0] sm:$0xff] %vm277_vm15, %v11222_v44  ;;  %10288 = vmatmul.msk.f32.gmra.mxu0 %vm479_vm0, %v12545_v22  ;;  %v3060_v20 = vrot.slane %v12645_v59, 1 }
 0x1d7   : > { %v1776_v18 = vadd.f32 %v1756_v6, %v1621_v58  ;;  %10230 = vmatmul.msk.f32.gmra.mxu2 %vm479_vm0, %v17298_v37  ;;  %v12671_v28 = vsel %vm1832_vm5, %v1816_v54, %v1853_v19  ;;  %309 = vst.msk [vmem:[#allocation2 + $0xf0] sm:$0xff] %vm277_vm15, %v11222_v44  ;;  %v10325_v37 = vld [vmem:[%s11350_s15 + $0x100] sm:$0x3]  ;;  %v1604_v19 = vpop.f32.mrf.mxu3 }
 0x1d8   : > { %17302 = vst [vmem:[#allocation7_spill] sm:$0xff] %v12671_v28  ;;  %1947 = vrot.lane.b32.xlu1 %v12671_v28, %s11221_s23  ;;  %v3216_v28 = vrot.slane %v10325_v37, 2 }
 0x1d9   : > { %310 = vst.msk [vmem:[#allocation2 + $0xf8] sm:$0xff] %vm277_vm15, %v11222_v44  ;;  %v1796_v58 = vmul.f32 %v12253_v63, %v1776_v18  ;;  %v3061_v18 = vsel %vm436_vm1, %v3059_v13, %v3060_v20 }
 0x1da   : > { %312 = vst.msk [vmem:[#allocation2 + $0x108] sm:$0xff] %vm277_vm15, %v11222_v44  ;;  %v1441_v54 = vpop.f32.mrf.mxu2 }
 0x1db   : > { %313 = vst.msk [vmem:[#allocation2 + $0x110] sm:$0xff] %vm277_vm15, %v11222_v44  ;;  %v1459_v6 = vadd.f32 %v1441_v54, %v12245_v52  ;;  %10382 = vmatmul.msk.f32.vlgmr.msra.gmra.mxu1 %vm479_vm0, %v3215_v9  ;;  %v1817_v39 = vadd.f32 %v12262_v16, %v1796_v58  ;;  %v2745_v54 = vrot.slane %v12224_v38, 2 }
 0x1dc   : > { %10348 = vmatmul.msk.f32.vlgmr.msra.gmra.mxu3 %vm479_vm0, %v10323_v61  ;;  %315 = vst.msk [vmem:[#allocation2 + $0x120] sm:$0xff] %vm277_vm15, %v11222_v44  ;;  %v1759_v61 = vpop.f32.mrf.mxu0  ;;  %v12708_v58 = vpop.f32.mrf.mxu1 }
 0x1dd   : > { %316 = vst.msk [vmem:[#allocation2 + $0x128] sm:$0xff] %vm277_vm15, %v11222_v44  ;;  %v1622_v4 = vadd.f32 %v1604_v19, %v1459_v6  ;;  %vm1833_vm6 = vcmp.gt.f32.partialorder %v1817_v39, 0.0  ;;  %v1854_v52 = vmul.f32 %v12270_v49, %v1817_v39  ;;  %v2746_v38 = vsel %vm674_vm2, %v12179_v34, %v2745_v54  ;;  %v10326_v54 = vld [vmem:[%s11350_s15 + $0x108] sm:$0xff] }
 0x1de   : > { %318 = vst.msk [vmem:[#allocation2 + $0x138] sm:$0xff] %vm277_vm15, %v11222_v44  ;;  %10365 = vmatmul.msk.f32.vlgmr.msra.gmra.mxu0 %vm479_vm0, %v3061_v18 }
 0x1df   : > { %319 = vst.msk [vmem:[#allocation2 + $0x140] sm:$0xff] %vm277_vm15, %v11222_v44  ;;  %v1777_v9 = vadd.f32 %v1759_v61, %v1622_v4  ;;  %10307 = vmatmul.msk.f32.vlgmr.msra.gmra.mxu2 %vm479_vm0, %v12197_v46  ;;  %v12704_v13 = vsel %vm1833_vm6, %v1817_v39, %v1854_v52  ;;  %v3217_v4 = vsel %vm674_vm2, %v3214_v11, %v3216_v28  ;;  %v3062_v46 = vrot.slane %v10325_v37, 1 }
 0x1e0   : > { %17303 = vst [vmem:[#allocation9_spill] sm:$0xff] %v12704_v13  ;;  %1949 = vrot.lane.b32.xlu2 %v12704_v13, %s11221_s23 }
 0x1e1   : > { %321 = vst.msk [vmem:[#allocation2 + $0x150] sm:$0xff] %vm277_vm15, %v11222_v44  ;;  %v1797_v6 = vmul.f32 %v12253_v63, %v1777_v9  ;;  %v3063_v63 = vsel %vm436_vm1, %v3060_v20, %v3062_v46  ;;  %v12798_v20 = vpop.f32.mrf.mxu3  ;;  %v10327_v46 = vld [vmem:[%s11350_s15 + $0x110] sm:$0xff] }
 0x1e2   : > { %322 = vst.msk [vmem:[#allocation2 + $0x158] sm:$0xff] %vm277_vm15, %v11222_v44  ;;  %v1922_v39 = vpop.permute.xlu0 %1921  ;;  %v12804_v19 = vpop.f32.mrf.mxu2 }
 0x1e3   : > { %324 = vst.msk [vmem:[#allocation2 + $0x168] sm:$0xff] %vm277_vm15, %v11222_v44  ;;  %10383 = vmatmul.msk.f32.gmra.mxu1 %vm479_vm0, %v3217_v4  ;;  %v1818_v11 = vadd.f32 %v12262_v16, %v1797_v6  ;;  %v3218_v6 = vrot.slane %v10326_v54, 2 }
 0x1e4   : > { %325 = vst.msk [vmem:[#allocation2 + $0x170] sm:$0xff] %vm277_vm15, %v11222_v44  ;;  %10349 = vmatmul.msk.f32.gmra.mxu3 %vm479_vm0, %v12645_v59  ;;  %v12748_v34 = vpop.f32.mrf.mxu1 }
 0x1e5   : > { %1970 = vst.msk [vmem:[#allocation2 + $0x19] sm:$0xff] %vm277_vm15, %v1922_v39  ;;  %vm1834_vm7 = vcmp.gt.f32.partialorder %v1818_v11, 0.0  ;;  %v1855_v28 = vmul.f32 %v12270_v49, %v1818_v11  ;;  %v10435_v49 = vld [vmem:[%s17030_s3 + $0x8] sm:$0xf]  ;;  %v3219_v39 = vrot.slane %v10327_v46, 2 }
 0x1e6   : > { %327 = vst.msk [vmem:[#allocation2 + $0x180] sm:$0xff] %vm277_vm15, %v11222_v44  ;;  %10366 = vmatmul.msk.f32.gmra.mxu0 %vm479_vm0, %v3063_v63  ;;  %v3064_v63 = vrot.slane %v10326_v54, 1 }
 0x1e7   : > { %328 = vst.msk [vmem:[#allocation2 + $0x188] sm:$0xff] %vm277_vm15, %v11222_v44  ;;  %10308 = vmatmul.msk.f32.gmra.mxu2 %vm479_vm0, %v2746_v38  ;;  %v12740_v16 = vsel %vm1834_vm7, %v1818_v11, %v1855_v28  ;;  %10436 = vmatpush.msk.msrb.mxu0 %vm3696_vm14, %v10435_v49  ;;  %v10453_v11 = vld [vmem:[%s17030_s3 + $0xc] sm:$0xf]  ;;  %v3220_v28 = vsel %vm674_vm2, %v3218_v6, %v3219_v39  ;;  %v10328_v6 = vld [vmem:[%s11350_s15 + $0x118] sm:$0x3] }
 0x1e8   : > { %330 = vst.msk [vmem:[#allocation2 + $0x198] sm:$0xff] %vm277_vm15, %v11222_v44  ;;  %1951 = vrot.lane.b32.xlu0 %v12740_v16, %s11221_s23  ;;  %10454 = vmatpush.msk.msrb.mxu1 %vm3696_vm14, %v10453_v11  ;;  %v3221_v11 = vrot.slane %v10328_v6, 2 }
 0x1e9   : > { %331 = vst.msk [vmem:[#allocation2 + $0x1a0] sm:$0xff] %vm277_vm15, %v11222_v44  ;;  %v12828_v52 = vpop.f32.mrf.mxu3 }
 0x1ea   : > { %17304 = vst [vmem:[#allocation18_spill] sm:$0xff] %v12740_v16  ;;  %v12834_v9 = vpop.f32.mrf.mxu2  ;;  %v1924_v4 = vpop.permute.xlu0 %1923 }
 0x1eb   : > { %333 = vst.msk [vmem:[#allocation3] sm:$0xff] %vm277_vm15, %v11222_v44  ;;  %10384 = vmatmul.msk.f32.gmra.mxu1 %vm479_vm0, %v3220_v28  ;;  %v3067_v28 = vrot.slane %v10328_v6, 1  ;;  %v12905_v6 = vpop.permute.xlu2 %1929 }
 0x1ec   : > { %334 = vst.msk [vmem:[#allocation3 + $0x8] sm:$0xff] %vm277_vm15, %v11222_v44  ;;  %v12776_v59 = vpop.f32.mrf.mxu1  ;;  %10350 = vmatmul.msk.f32.gmra.mxu3 %vm479_vm0, %v10326_v54 }
 0x1ed   : > { %336 = vst.msk [vmem:[#allocation3 + $0x18] sm:$0xff] %vm277_vm15, %v11222_v44 }
 0x1ee   : > { %337 = vst.msk [vmem:[#allocation3 + $0x20] sm:$0xff] %vm277_vm15, %v11222_v44 }
 0x1ef   : > { %339 = vst.msk [vmem:[#allocation3 + $0x30] sm:$0xff] %vm277_vm15, %v11222_v44  ;;  %10309 = vmatmul.msk.f32.gmra.mxu2 %vm479_vm0, %v12318_v33  ;;  %v12796_v33 = vpop.f32.mrf.mxu0 }
 0x1f0   : > { %340 = vst.msk [vmem:[#allocation3 + $0x38] sm:$0xff] %vm277_vm15, %v11222_v44 }
 0x1f1   : > { %342 = vst.msk [vmem:[#allocation3 + $0x48] sm:$0xff] %vm277_vm15, %v11222_v44  ;;  %v2367_v49 = vpop.f32.mrf.mxu3 }
 0x1f2   : > { %343 = vst.msk [vmem:[#allocation3 + $0x50] sm:$0xff] %vm277_vm15, %v11222_v44  ;;  %v2229_v13 = vpop.f32.mrf.mxu2 }
 0x1f3   : > { %345 = vst.msk [vmem:[#allocation3 + $0x60] sm:$0xff] %vm277_vm15, %v11222_v44  ;;  %v2230_v54 = vadd.f32 %v2229_v13, %v12264_v35  ;;  %v3222_v35 = vsel %vm674_vm2, %v3219_v39, %v3221_v11  ;;  %v10329_v13 = vld [vmem:[%s11350_s15 + $0x120] sm:$0xff] }
 0x1f4   : > { %346 = vst.msk [vmem:[#allocation3 + $0x68] sm:$0xff] %vm277_vm15, %v11222_v44  ;;  %v12802_v37 = vpop.f32.mrf.mxu1  ;;  %10351 = vmatmul.msk.f32.gmra.mxu3 %vm479_vm0, %v10327_v46  ;;  %10385 = vmatmul.msk.f32.gmra.mxu1 %vm479_vm0, %v3222_v35 }
 0x1f5   : > { %348 = vst.msk [vmem:[#allocation3 + $0x78] sm:$0xff] %vm277_vm15, %v11222_v44  ;;  %v2411_v30 = vadd.f32 %v2367_v49, %v2230_v54  ;;  %v12895_v49 = vld [vmem:[%s11350_s15 + $0x128] sm:$0xff]  ;;  %v12897_v54 = vld [vmem:[#allocation2 + $0x18] sm:$0xff] }
 0x1f6   : > { %349 = vst.msk [vmem:[#allocation3 + $0x80] sm:$0xff] %vm277_vm15, %v11222_v44  ;;  %v3224_v5 = vrot.slane %v12895_v49, 2  ;;  %v4189_v2 = vrot.slane %v12897_v54, 1  ;;  %v3070_v60 = vrot.slane %v12895_v49, 1 }
 0x1f7   : > { %351 = vst.msk [vmem:[#allocation3 + $0x90] sm:$0xff] %vm277_vm15, %v11222_v44  ;;  %v12826_v18 = vpop.f32.mrf.mxu0 }
 0x1f8   : > { %352 = vst.msk [vmem:[#allocation3 + $0x98] sm:$0xff] %vm277_vm15, %v11222_v44 }
 0x1f9   : > { %354 = vst.msk [vmem:[#allocation3 + $0xa8] sm:$0xff] %vm277_vm15, %v11222_v44 }
 0x1fa   : > { %355 = vst.msk [vmem:[#allocation3 + $0xb0] sm:$0xff] %vm277_vm15, %v11222_v44  ;;  %v2232_v39 = vpop.f32.mrf.mxu2 }
 0x1fb   : > { %357 = vst.msk [vmem:[#allocation3 + $0xc0] sm:$0xff] %vm277_vm15, %v11222_v44 }
 0x1fc   : > { %358 = vst.msk [vmem:[#allocation3 + $0xc8] sm:$0xff] %vm277_vm15, %v11222_v44  ;;  %v12832_v61 = vpop.f32.mrf.mxu1  ;;  %10352 = vmatmul.msk.f32.gmra.mxu3 %vm479_vm0, %v10329_v13 }
 0x1fd   : > { %360 = vst.msk [vmem:[#allocation3 + $0xd8] sm:$0xff] %vm277_vm15, %v11222_v44 }
 0x1fe   : > { %361 = vst.msk [vmem:[#allocation3 + $0xe0] sm:$0xff] %vm277_vm15, %v11222_v44 }
 0x1ff   : > { %363 = vst.msk [vmem:[#allocation3 + $0xf0] sm:$0xff] %vm277_vm15, %v11222_v44  ;;  %v2522_v38 = vpop.f32.mrf.mxu0 }
 0x200   : > { %364 = vst.msk [vmem:[#allocation3 + $0xf8] sm:$0xff] %vm277_vm15, %v11222_v44 }
 0x201   : > { %366 = vst.msk [vmem:[#allocation3 + $0x108] sm:$0xff] %vm277_vm15, %v11222_v44 }
 0x202   : > { %367 = vst.msk [vmem:[#allocation3 + $0x110] sm:$0xff] %vm277_vm15, %v11222_v44 }
 0x203   : > { %369 = vst.msk [vmem:[#allocation3 + $0x120] sm:$0xff] %vm277_vm15, %v11222_v44 }
 0x204   : > { %370 = vst.msk [vmem:[#allocation3 + $0x128] sm:$0xff] %vm277_vm15, %v11222_v44  ;;  %v12863_v16 = vpop.f32.mrf.mxu1  ;;  %10353 = vmatmul.msk.f32.gmra.mxu3 %vm479_vm0, %v12895_v49 }
 0x205   : > { %372 = vst.msk [vmem:[#allocation3 + $0x138] sm:$0xff] %vm277_vm15, %v11222_v44 }
 0x206   : > { %373 = vst.msk [vmem:[#allocation3 + $0x140] sm:$0xff] %vm277_vm15, %v11222_v44 }
 0x207   : > { %375 = vst.msk [vmem:[#allocation3 + $0x150] sm:$0xff] %vm277_vm15, %v11222_v44 }
 0x208   : > { %376 = vst.msk [vmem:[#allocation3 + $0x158] sm:$0xff] %vm277_vm15, %v11222_v44 }
 0x209   : > { %378 = vst.msk [vmem:[#allocation3 + $0x168] sm:$0xff] %vm277_vm15, %v11222_v44 }
 0x20a   : > { %379 = vst.msk [vmem:[#allocation3 + $0x170] sm:$0xff] %vm277_vm15, %v11222_v44 }
 0x20b   : > { %381 = vst.msk [vmem:[#allocation3 + $0x180] sm:$0xff] %vm277_vm15, %v11222_v44 }
 0x20c   : > { %382 = vst.msk [vmem:[#allocation3 + $0x188] sm:$0xff] %vm277_vm15, %v11222_v44 }
 0x20d   : > { %384 = vst.msk [vmem:[#allocation3 + $0x198] sm:$0xff] %vm277_vm15, %v11222_v44 }
 0x20e   : > { %385 = vst.msk [vmem:[#allocation3 + $0x1a0] sm:$0xff] %vm277_vm15, %v11222_v44 }
 0x20f   : > { %284 = vst.msk [vmem:[#allocation2 + $0x28] sm:$0x3] %vm280_vm8, %v11222_v44 }
 0x210   : > { %1971 = vst.msk [vmem:[#allocation2 + $0x21] sm:$0xff] %vm277_vm15, %v1924_v4  ;;  %v3065_v4 = vrot.slane %v10327_v46, 1  ;;  %v12901_v46 = vpop.f32.mrf.mxu1 }
 0x211   : > { %281 = vst.msk [vmem:[#allocation2 + $0x10] sm:$0x3] %vm280_vm8, %v11222_v44 }
 0x212   : > { %287 = vst.msk [vmem:[#allocation2 + $0x40] sm:$0x3] %vm280_vm8, %v11222_v44  ;;  %v3066_v26 = vsel %vm436_vm1, %v3064_v63, %v3065_v4  ;;  %v2751_v63 = vsel %vm674_vm2, %v12305_v25, %v2750_v23  ;;  %v2525_v25 = vpop.f32.mrf.mxu0  ;;  %v2370_v23 = vpop.f32.mrf.mxu3 }
 0x213   : > { %290 = vst.msk [vmem:[#allocation2 + $0x58] sm:$0x3] %vm280_vm8, %v11222_v44  ;;  %10367 = vmatmul.msk.f32.gmra.mxu0 %vm479_vm0, %v3066_v26  ;;  %10310 = vmatmul.msk.f32.gmra.mxu2 %vm479_vm0, %v2751_v63  ;;  %v3068_v26 = vsel %vm436_vm1, %v3065_v4, %v3067_v28  ;;  %v2233_v4 = vadd.f32 %v2232_v39, %v12297_v55  ;;  %v3223_v28 = vrot.slane %v10329_v13, 2  ;;  %v12922_v55 = vpop.permute.xlu1 %1925  ;;  %v3069_v39 = vrot.slane %v10329_v13, 1  ;;  %v10331_v13 = vld [vmem:[%s11350_s15 + $0x130] sm:$0x3] }
 0x214   : > { %293 = vst.msk [vmem:[#allocation2 + $0x70] sm:$0x3] %vm280_vm8, %v11222_v44 }
 0x215   : > { %296 = vst.msk [vmem:[#allocation2 + $0x88] sm:$0x3] %vm280_vm8, %v11222_v44  ;;  %v2412_v35 = vadd.f32 %v2370_v23, %v2233_v4  ;;  %v2755_v23 = vrot.slane %v12322_v31, 2  ;;  %v3071_v31 = vsel %vm436_vm1, %v3069_v39, %v3070_v60  ;;  %v3226_v39 = vrot.slane %v10331_v13, 2 }
 0x216   : > { %17305 = vst [vmem:[#allocation11_spill] sm:$0xff] %v12863_v16 }
 0x217   : > { %299 = vst.msk [vmem:[#allocation2 + $0xa0] sm:$0x3] %vm280_vm8, %v11222_v44  ;;  %v12888_v10 = vld [vmem:[#allocation2 + $0x20] sm:$0xff] }
 0x218   : > { %302 = vst.msk [vmem:[#allocation2 + $0xb8] sm:$0x3] %vm280_vm8, %v11222_v44  ;;  %v12910_v11 = vrot.slane %v12888_v10, 1  ;;  %v12913_v63 = vrot.slane %v12888_v10, 2 }
 0x219   : > { %305 = vst.msk [vmem:[#allocation2 + $0xd0] sm:$0x3] %vm280_vm8, %v11222_v44 }
 0x21a   : > { %308 = vst.msk [vmem:[#allocation2 + $0xe8] sm:$0x3] %vm280_vm8, %v11222_v44  ;;  %v12942_v16 = vsel %vm436_vm1, %v4189_v2, %v12910_v11  ;;  %v2235_v2 = vpop.f32.mrf.mxu2 }
 0x21b   : > { %311 = vst.msk [vmem:[#allocation2 + $0x100] sm:$0x3] %vm280_vm8, %v11222_v44  ;;  %10368 = vmatmul.msk.f32.gmra.mxu0 %vm479_vm0, %v3068_v26  ;;  %10311 = vmatmul.msk.f32.gmra.mxu2 %vm479_vm0, %v12369_v56  ;;  %v12930_v26 = vadd.f32 %v2522_v38, %v2411_v30  ;;  %v3225_v30 = vsel %vm674_vm2, %v3223_v28, %v3224_v5  ;;  %v2528_v56 = vpop.f32.mrf.mxu0  ;;  %v2373_v38 = vpop.f32.mrf.mxu3 }
 0x21c   : > { %314 = vst.msk [vmem:[#allocation2 + $0x118] sm:$0x3] %vm280_vm8, %v11222_v44  ;;  %10386 = vmatmul.msk.f32.gmra.mxu1 %vm479_vm0, %v3225_v30  ;;  %v2236_v28 = vadd.f32 %v2235_v2, %v12330_v48  ;;  %v12966_v30 = vadd.f32 %v2525_v25, %v2412_v35  ;;  %v1928_v48 = vpop.permute.xlu1 %1927 }
 0x21d   : > { %317 = vst.msk [vmem:[#allocation2 + $0x130] sm:$0x3] %vm280_vm8, %v11222_v44 }
 0x21e   : > { %320 = vst.msk [vmem:[#allocation2 + $0x148] sm:$0x3] %vm280_vm8, %v11222_v44 }
 0x21f   : > { %17306 = vst [vmem:[#allocation14_spill] sm:$0xff] %v12901_v46  ;;  %v4347_v46 = vrot.slane %v12897_v54, 2 }
 0x220   : > { %323 = vst.msk [vmem:[#allocation2 + $0x160] sm:$0x3] %vm280_vm8, %v11222_v44 }
 0x221   : > { %17307 = vst [vmem:[#allocation25_spill] sm:$0xff] %v12910_v11  ;;  %v12938_v4 = vsel %vm674_vm2, %v4347_v46, %v12913_v63  ;;  %v12953_v46 = vpop.f32.mrf.mxu1  ;;  %v2413_v11 = vadd.f32 %v2373_v38, %v2236_v28  ;;  %v10333_v38 = vld [vmem:[%s11350_s15 + $0x140] sm:$0xff] }
 0x222   : > { %17308 = vst [vmem:[#allocation26_spill] sm:$0xff] %v12913_v63  ;;  %v2756_v63 = vsel %vm674_vm2, %v12354_v17, %v2755_v23  ;;  %v3227_v17 = vsel %vm674_vm2, %v3224_v5, %v3226_v39  ;;  %v2238_v49 = vpop.f32.mrf.mxu2  ;;  %v3075_v39 = vrot.slane %v10333_v38, 1 }
 0x223   : > { %326 = vst.msk [vmem:[#allocation2 + $0x178] sm:$0x3] %vm280_vm8, %v11222_v44  ;;  %10369 = vmatmul.msk.f32.gmra.mxu0 %vm479_vm0, %v3071_v31  ;;  %10312 = vmatmul.msk.f32.gmra.mxu2 %vm479_vm0, %v2756_v63  ;;  %v2531_v25 = vpop.f32.mrf.mxu0  ;;  %v2376_v35 = vpop.f32.mrf.mxu3  ;;  %v10332_v63 = vld [vmem:[%s11350_s15 + $0x138] sm:$0xff]  ;;  %v2239_v5 = vadd.f32 %v2238_v49, %v12357_v47  ;;  %v10334_v49 = vld [vmem:[%s11350_s15 + $0x148] sm:$0x3] }
 0x224   : > { %329 = vst.msk [vmem:[#allocation2 + $0x190] sm:$0x3] %vm280_vm8, %v11222_v44  ;;  %10387 = vmatmul.msk.f32.gmra.mxu1 %vm479_vm0, %v3227_v17  ;;  %v3074_v28 = vrot.slane %v10332_v63, 1  ;;  %v1934_v47 = vpop.permute.xlu0 %1933  ;;  %10354 = vmatmul.msk.f32.gmra.mxu3 %vm479_vm0, %v10332_v63  ;;  %v2760_v17 = vrot.slane %v12373_v7, 2 }
 0x225   : > { %332 = vst.msk [vmem:[#allocation2 + $0x1a8] sm:$0x3] %vm280_vm8, %v11222_v44 }
 0x226   : > { %335 = vst.msk [vmem:[#allocation3 + $0x10] sm:$0x3] %vm280_vm8, %v11222_v44 }
 0x227   : > { %17309 = vst [vmem:[#allocation27_spill] sm:$0xff] %v12938_v4  ;;  %v3072_v4 = vrot.slane %v10331_v13, 1  ;;  %v2414_v13 = vadd.f32 %v2376_v35, %v2239_v5  ;;  %v1936_v35 = vpop.permute.xlu1 %1935  ;;  %v3231_v5 = vrot.slane %v10334_v49, 2 }
 0x228   : > { %338 = vst.msk [vmem:[#allocation3 + $0x28] sm:$0x3] %vm280_vm8, %v11222_v44 }
 0x229   : > { %341 = vst.msk [vmem:[#allocation3 + $0x40] sm:$0x3] %vm280_vm8, %v11222_v44  ;;  %v3073_v23 = vsel %vm436_vm1, %v3070_v60, %v3072_v4  ;;  %v12985_v31 = vpop.f32.mrf.mxu1  ;;  %v3228_v60 = vrot.slane %v10332_v63, 2  ;;  %v3229_v4 = vrot.slane %v10333_v38, 2 }
 0x22a   : > { %344 = vst.msk [vmem:[#allocation3 + $0x58] sm:$0x3] %vm280_vm8, %v11222_v44  ;;  %v2241_v7 = vpop.f32.mrf.mxu2 }
 0x22b   : > { %17310 = vst [vmem:[#allocation28_spill] sm:$0xff] %v12953_v46  ;;  %v1932_v46 = vpop.permute.xlu2 %1931  ;;  %10370 = vmatmul.msk.f32.gmra.mxu0 %vm479_vm0, %v3073_v23  ;;  %10313 = vmatmul.msk.f32.gmra.mxu2 %vm479_vm0, %v12418_v0  ;;  %v2379_v23 = vpop.f32.mrf.mxu3  ;;  %v3076_v0 = vsel %vm436_vm1, %v3074_v28, %v3075_v39 }
 0x22c   : > { %347 = vst.msk [vmem:[#allocation3 + $0x70] sm:$0x3] %vm280_vm8, %v11222_v44  ;;  %10355 = vmatmul.msk.f32.gmra.mxu3 %vm479_vm0, %v10333_v38 }
 0x22d   : > { %350 = vst.msk [vmem:[#allocation3 + $0x88] sm:$0x3] %vm280_vm8, %v11222_v44 }
 0x22e   : > { %353 = vst.msk [vmem:[#allocation3 + $0xa0] sm:$0x3] %vm280_vm8, %v11222_v44 }
 0x22f   : > { %356 = vst.msk [vmem:[#allocation3 + $0xb8] sm:$0x3] %vm280_vm8, %v11222_v44 }
 0x230   : > { %359 = vst.msk [vmem:[#allocation3 + $0xd0] sm:$0x3] %vm280_vm8, %v11222_v44 }
 0x231   : > { %362 = vst.msk [vmem:[#allocation3 + $0xe8] sm:$0x3] %vm280_vm8, %v11222_v44  ;;  %v13015_v63 = vpop.f32.mrf.mxu1 }
 0x232   : > { %365 = vst.msk [vmem:[#allocation3 + $0x100] sm:$0x3] %vm280_vm8, %v11222_v44 }
 0x233   : > { %368 = vst.msk [vmem:[#allocation3 + $0x118] sm:$0x3] %vm280_vm8, %v11222_v44  ;;  %v1938_v2 = vpop.permute.xlu2 %1937  ;;  %10371 = vmatmul.msk.f32.gmra.mxu0 %vm479_vm0, %v3076_v0 }
 0x234   : > { %17311 = vst [vmem:[#allocation29_spill] sm:$0xff] %v12985_v31  ;;  %v12996_v31 = vadd.f32 %v2528_v56, %v2413_v11  ;;  %v3230_v11 = vsel %vm674_vm2, %v3228_v60, %v3229_v4  ;;  %v2534_v56 = vpop.f32.mrf.mxu0  ;;  %v3077_v60 = vrot.slane %v10334_v49, 1 }
 0x235   : > { %371 = vst.msk [vmem:[#allocation3 + $0x130] sm:$0x3] %vm280_vm8, %v11222_v44  ;;  %10388 = vmatmul.msk.f32.gmra.mxu1 %vm479_vm0, %v3230_v11 }
 0x236   : > { %374 = vst.msk [vmem:[#allocation3 + $0x148] sm:$0x3] %vm280_vm8, %v11222_v44  ;;  %v3078_v11 = vsel %vm436_vm1, %v3075_v39, %v3077_v60  ;;  %v2765_v60 = vrot.slane %v12422_v1, 2 }
 0x237   : > { %377 = vst.msk [vmem:[#allocation3 + $0x160] sm:$0x3] %vm280_vm8, %v11222_v44 }
 0x238   : > { %380 = vst.msk [vmem:[#allocation3 + $0x178] sm:$0x3] %vm280_vm8, %v11222_v44 }
 0x239   : > { %383 = vst.msk [vmem:[#allocation3 + $0x190] sm:$0x3] %vm280_vm8, %v11222_v44 }
 0x23a   : > { %386 = vst.msk [vmem:[#allocation3 + $0x1a8] sm:$0x3] %vm280_vm8, %v11222_v44  ;;  %v2242_v44 = vadd.f32 %v2241_v7, %v12390_v8  ;;  %v1940_v8 = vpop.permute.xlu0 %1939 }
 0x23b   : > { %1974 = vst.msk [vmem:[#allocation2 + $0x49] sm:$0xff] %vm277_vm15, %v12905_v6  ;;  %v2761_v6 = vsel %vm674_vm2, %v12405_v24, %v2760_v17  ;;  %v1944_v28 = vpop.permute.xlu2 %1943  ;;  %v1942_v24 = vpop.permute.xlu1 %1941  ;;  %10372 = vmatmul.msk.f32.gmra.mxu0 %vm479_vm0, %v3078_v11 }
 0x23c   : > { %1972 = vst.msk [vmem:[#allocation2 + $0x31] sm:$0xff] %vm277_vm15, %v12922_v55  ;;  %v2415_v55 = vadd.f32 %v2379_v23, %v2242_v44  ;;  %10314 = vmatmul.msk.f32.gmra.mxu2 %vm479_vm0, %v2761_v6  ;;  %v2382_v17 = vpop.f32.mrf.mxu3  ;;  %v2244_v23 = vpop.f32.mrf.mxu2 }
 0x23d   : > { %17312 = vst [vmem:[#allocation30_spill] sm:$0xff] %v13015_v63  ;;  %v2245_v38 = vadd.f32 %v2244_v23, %v12424_v12 }
 0x23e   : > { %1975 = vst.msk [vmem:[#allocation2 + $0x51] sm:$0xff] %vm277_vm15, %v1932_v46  ;;  %v13025_v46 = vadd.f32 %v2531_v25, %v2414_v13  ;;  %v10335_v25 = vld [vmem:[%s11350_s15 + $0x150] sm:$0xff]  ;;  %v10336_v13 = vld [vmem:[%s11350_s15 + $0x158] sm:$0xff] }
 0x23f   : > { %1973 = vst.msk [vmem:[#allocation2 + $0x39] sm:$0xff] %vm277_vm15, %v1928_v48  ;;  %v3232_v48 = vsel %vm674_vm2, %v3229_v4, %v3231_v5  ;;  %v3234_v0 = vrot.slane %v10336_v13, 2  ;;  %v2416_v39 = vadd.f32 %v2382_v17, %v2245_v38  ;;  %v3079_v49 = vrot.slane %v10335_v25, 1  ;;  %10356 = vmatmul.msk.f32.gmra.mxu3 %vm479_vm0, %v10335_v25  ;;  %v10337_v38 = vld [vmem:[%s11350_s15 + $0x160] sm:$0x3] }
 0x240   : > { %1978 = vst.msk [vmem:[#allocation2 + $0x79] sm:$0xff] %vm277_vm15, %v1938_v2  ;;  %v2537_v2 = vpop.f32.mrf.mxu0  ;;  %10389 = vmatmul.msk.f32.gmra.mxu1 %vm479_vm0, %v3232_v48  ;;  %v3080_v7 = vrot.slane %v10336_v13, 1 }
 0x241   : > { %17313 = vst [vmem:[#allocation31_spill] sm:$0xff] %v13025_v46  ;;  %v13096_v46 = vadd.f32 %v2537_v2, %v2416_v39  ;;  %v10338_v2 = vld [vmem:[%s11350_s15 + $0x168] sm:$0xff]  ;;  %v10339_v39 = vld [vmem:[%s11350_s15 + $0x170] sm:$0xff] }
 0x242   : > { %1976 = vst.msk [vmem:[#allocation2 + $0x61] sm:$0xff] %vm277_vm15, %v1934_v47  ;;  %v13037_v47 = vpop.f32.mrf.mxu1 }
 0x243   : > { %1977 = vst.msk [vmem:[#allocation2 + $0x69] sm:$0xff] %vm277_vm15, %v1936_v35  ;;  %v3233_v35 = vrot.slane %v10335_v25, 2  ;;  %v1950_v44 = vpop.permute.xlu2 %1949  ;;  %v13045_v6 = vld [vmem:[#allocation2 + $0x30] sm:$0xff]  ;;  %v3081_v25 = vsel %vm436_vm1, %v3079_v49, %v3080_v7  ;;  %v2766_v49 = vsel %vm674_vm2, %v12456_v36, %v2765_v60 }
 0x244   : > { %1981 = vst.msk [vmem:[#allocation2 + $0x99] sm:$0xff] %vm277_vm15, %v1944_v28  ;;  %10315 = vmatmul.msk.f32.gmra.mxu2 %vm479_vm0, %v12469_v45  ;;  %v4194_v45 = vrot.slane %v13045_v6, 1  ;;  %v2385_v23 = vpop.f32.mrf.mxu3  ;;  %v4352_v1 = vrot.slane %v13045_v6, 2  ;;  %10373 = vmatmul.msk.f32.gmra.mxu0 %vm479_vm0, %v3081_v25 }
 0x245   : > { %1979 = vst.msk [vmem:[#allocation2 + $0x81] sm:$0xff] %vm277_vm15, %v1940_v8  ;;  %v13047_v5 = vld [vmem:[#allocation2 + $0x50] sm:$0xff]  ;;  %v13060_v8 = vld [vmem:[#allocation2 + $0x48] sm:$0xff]  ;;  %v3235_v48 = vsel %vm674_vm2, %v3233_v35, %v3234_v0 }
 0x246   : > { %17314 = vst [vmem:[#allocation32_spill] sm:$0xff] %v13037_v47  ;;  %v13042_v4 = vld [vmem:[#allocation2 + $0x38] sm:$0xff]  ;;  %v13067_v17 = vrot.slane %v13047_v5, 1  ;;  %v2247_v47 = vpop.f32.mrf.mxu2 }
 0x247   : > { %1980 = vst.msk [vmem:[#allocation2 + $0x91] sm:$0xff] %vm277_vm15, %v1942_v24  ;;  %v13053_v12 = vrot.slane %v13042_v4, 1  ;;  %v13058_v28 = vrot.slane %v13042_v4, 2  ;;  %v13062_v24 = vadd.f32 %v2534_v56, %v2415_v55  ;;  %v4199_v56 = vrot.slane %v13060_v8, 1  ;;  %10357 = vmatmul.msk.f32.gmra.mxu3 %vm479_vm0, %v10336_v13 }
 0x248   : > { %17315 = vst [vmem:[#allocation33_spill] sm:$0xff] %v13047_v5  ;;  %v2540_v11 = vpop.f32.mrf.mxu0  ;;  %v13076_v55 = vrot.slane %v13047_v5, 2  ;;  %10390 = vmatmul.msk.f32.gmra.mxu1 %vm479_vm0, %v3235_v48  ;;  %v2248_v63 = vadd.f32 %v2247_v47, %v12452_v14  ;;  %v4357_v5 = vrot.slane %v13060_v8, 2  ;;  %v3082_v14 = vrot.slane %v10337_v38, 1  ;;  %v1946_v47 = vpop.permute.xlu0 %1945 }
 0x249   : > { %1984 = vst.msk [vmem:[#allocation2 + $0xc1] sm:$0xff] %vm277_vm15, %v1950_v44  ;;  %v13080_v35 = vsel %vm436_vm1, %v4194_v45, %v13053_v12  ;;  %v13094_v45 = vsel %vm436_vm1, %v4199_v56, %v13067_v17 }
 0x24a   : > { %17316 = vst [vmem:[#allocation34_spill] sm:$0xff] %v13062_v24  ;;  %v13072_v44 = vpop.f32.mrf.mxu1  ;;  %v3236_v24 = vrot.slane %v10337_v38, 2  ;;  %v2417_v48 = vadd.f32 %v2385_v23, %v2248_v63  ;;  %v13102_v36 = vsel %vm674_vm2, %v4357_v5, %v13076_v55  ;;  %v13106_v25 = vld [vmem:[#allocation2 + $0x68] sm:$0xff]  ;;  %v3083_v23 = vsel %vm436_vm1, %v3080_v7, %v3082_v14  ;;  %v13111_v38 = vld [vmem:[#allocation2 + $0x60] sm:$0xff] }
 0x24b   : > { %17317 = vst [vmem:[#allocation35_spill] sm:$0xff] %v13072_v44  ;;  %v13088_v44 = vsel %vm674_vm2, %v4352_v1, %v13058_v28  ;;  %v13116_v5 = vrot.slane %v13106_v25, 1  ;;  %v4204_v7 = vrot.slane %v13111_v38, 1 }
 0x24c   : > { %17318 = vst [vmem:[#allocation36_spill] sm:$0xff] %v13076_v55  ;;  %10316 = vmatmul.msk.f32.gmra.mxu2 %vm479_vm0, %v2766_v49  ;;  %v3237_v60 = vsel %vm674_vm2, %v3234_v0, %v3236_v24  ;;  %v2388_v63 = vpop.f32.mrf.mxu3  ;;  %10374 = vmatmul.msk.f32.gmra.mxu0 %vm479_vm0, %v3083_v23  ;;  %v3238_v0 = vrot.slane %v10338_v2, 2  ;;  %v3239_v24 = vrot.slane %v10339_v39, 2  ;;  %v3085_v55 = vrot.slane %v10339_v39, 1 }
 0x24d   : > { %17319 = vst [vmem:[#allocation37_spill] sm:$0xff] %v13096_v46  ;;  %v13122_v46 = vadd.f32 %v2540_v11, %v2417_v48  ;;  %v4362_v11 = vrot.slane %v13111_v38, 2 }
 0x24e   : > { %1982 = vst.msk [vmem:[#allocation2 + $0xa9] sm:$0xff] %vm277_vm15, %v1946_v47  ;;  %v2250_v49 = vpop.f32.mrf.mxu2  ;;  %v3084_v47 = vrot.slane %v10338_v2, 1 }
 0x24f   : > { %17320 = vst [vmem:[#allocation38_spill] sm:$0xff] %v13106_v25  ;;  %v2251_v13 = vadd.f32 %v2250_v49, %v12481_v21  ;;  %v13128_v21 = vrot.slane %v13106_v25, 2  ;;  %10358 = vmatmul.msk.f32.gmra.mxu3 %vm479_vm0, %v10338_v2  ;;  %v3240_v49 = vsel %vm674_vm2, %v3238_v0, %v3239_v24 }
 0x250   : > { %v2543_v1 = vpop.f32.mrf.mxu0  ;;  %17322 = vst [vmem:[#allocation40_spill] sm:$0xff] %v13116_v5  ;;  %10391 = vmatmul.msk.f32.gmra.mxu1 %vm479_vm0, %v3237_v60  ;;  %v13132_v60 = vsel %vm436_vm1, %v4204_v7, %v13116_v5 }
 0x251   : > { %v2418_v14 = vadd.f32 %v2388_v63, %v2251_v13  ;;  %17323 = vst [vmem:[#allocation41_spill] sm:$0xff] %v13122_v46  ;;  %v11123_v63 = vld [vmem:[%s11350_s15 + $0x160] sm:$0x3]  ;;  %v13144_v7 = vsel %vm674_vm2, %v4362_v11, %v13128_v21 }
 0x252   : > { %v13113_v56 = vpop.f32.mrf.mxu1  ;;  %17324 = vst [vmem:[#allocation42_spill] sm:$0xff] %v13132_v60  ;;  %v2770_v23 = vrot.slane %v11123_v63, 2 }
 0x253   : > { %17321 = vst [vmem:[#allocation39_spill] sm:$0xff] %v13113_v56  ;;  %v1948_v56 = vpop.permute.xlu1 %1947  ;;  %v13151_v60 = vadd.f32 %v2543_v1, %v2418_v14  ;;  %v13161_v1 = vld [vmem:[#allocation2 + $0x80] sm:$0xff] }
 0x254   : > { %10317 = vmatmul.msk.f32.gmra.mxu2 %vm479_vm0, %v12517_v32  ;;  %1983 = vst.msk [vmem:[#allocation2 + $0xb1] sm:$0xff] %vm277_vm15, %v1948_v56  ;;  %v2391_v13 = vpop.f32.mrf.mxu3  ;;  %v3086_v32 = vsel %vm436_vm1, %v3084_v47, %v3085_v55  ;;  %v10340_v56 = vld [vmem:[%s11350_s15 + $0x178] sm:$0x3]  ;;  %v2771_v0 = vsel %vm674_vm2, %v12502_v15, %v2770_v23 }
 0x255   : > { %10375 = vmatmul.msk.f32.gmra.mxu0 %vm479_vm0, %v3086_v32  ;;  %v3241_v63 = vrot.slane %v10340_v56, 2  ;;  %v3087_v47 = vrot.slane %v10340_v56, 1 }
 0x256   : > { %v2253_v25 = vpop.f32.mrf.mxu2 }
 0x257   : > { %v2254_v2 = vadd.f32 %v2253_v25, %v12511_v62  ;;  %10359 = vmatmul.msk.f32.gmra.mxu3 %vm479_vm0, %v10339_v39  ;;  %v3242_v11 = vsel %vm674_vm2, %v3239_v24, %v3241_v63  ;;  %v3088_v62 = vsel %vm436_vm1, %v3085_v55, %v3087_v47  ;;  %v3243_v39 = vrot.slane %v12542_v40, 2  ;;  %v10343_v63 = vld [vmem:[%s11350_s15 + $0x190] sm:$0x3] }
 0x258   : > { %v2546_v48 = vpop.f32.mrf.mxu0  ;;  %10392 = vmatmul.msk.f32.gmra.mxu1 %vm479_vm0, %v3240_v49  ;;  %v13166_v24 = vrot.slane %v12545_v22, 2  ;;  %v11124_v22 = vld [vmem:[%s11350_s15 + $0x178] sm:$0x3] }
 0x259   : > { %v2419_v5 = vadd.f32 %v2391_v13, %v2254_v2  ;;  %v13168_v13 = vld [vmem:[#allocation2 + $0x78] sm:$0xff]  ;;  %v2775_v56 = vrot.slane %v11124_v22, 2  ;;  %v10471_v22 = vld [vmem:[%s17030_s3 + $0x10] sm:$0xf] }
 0x25a   : > { %v13140_v46 = vpop.f32.mrf.mxu1  ;;  %v1952_v55 = vpop.permute.xlu0 %1951  ;;  %v3245_v2 = vsel %vm674_vm2, %v3243_v39, %v13166_v24  ;;  %v13201_v39 = vld [vmem:[#allocation2 + $0x98] sm:$0xff]  ;;  %10472 = vmatpush.msk.msra.mxu2 %vm3696_vm14, %v10471_v22  ;;  %v10345_v22 = vld [vmem:[%s11350_s15 + $0x1a0] sm:$0xff] }
 0x25b   : > { %17325 = vst [vmem:[#allocation43_spill] sm:$0xff] %v13140_v46  ;;  %v13170_v32 = vadd.f32 %v2546_v48, %v2419_v5  ;;  %v13185_v5 = vrot.slane %v13161_v1, 2 }
 0x25c   : > { %10318 = vmatmul.msk.f32.gmra.mxu2 %vm479_vm0, %v2771_v0  ;;  %v2394_v49 = vpop.f32.mrf.mxu3  ;;  %1985 = vst.msk [vmem:[#allocation2 + $0xc9] sm:$0xff] %vm277_vm15, %v1952_v55  ;;  %v4209_v0 = vrot.slane %v13168_v13, 1  ;;  %v3246_v55 = vrot.slane %v10343_v63, 2 }
 0x25d   : > { %10376 = vmatmul.msk.f32.gmra.mxu0 %vm479_vm0, %v3088_v62  ;;  %17328 = vst [vmem:[#allocation46_spill] sm:$0xff] %v13185_v5 }
 0x25e   : > { %v2256_v15 = vpop.f32.mrf.mxu2  ;;  %17330 = vst [vmem:[#allocation48_spill] sm:$0xff] %v13201_v39 }
 0x25f   : > { %v2257_v23 = vadd.f32 %v2256_v15, %v12554_v29  ;;  %v13176_v29 = vrot.slane %v13161_v1, 1  ;;  %10360 = vmatmul.msk.f32.gmra.mxu3 %vm479_vm0, %v12542_v40  ;;  %v2776_v15 = vsel %vm674_vm2, %v12566_v53, %v2775_v56 }
 0x260   : > { %v2549_v46 = vpop.f32.mrf.mxu0  ;;  %10393 = vmatmul.msk.f32.gmra.mxu1 %vm479_vm0, %v3242_v11 }
 0x261   : > { %v2420_v14 = vadd.f32 %v2394_v49, %v2257_v23  ;;  %17327 = vst [vmem:[#allocation45_spill] sm:$0xff] %v13176_v29  ;;  %v4367_v49 = vrot.slane %v13168_v13, 2  ;;  %v13193_v40 = vsel %vm436_vm1, %v4209_v0, %v13176_v29  ;;  %v13199_v23 = vld [vmem:[#allocation2 + $0x90] sm:$0xff]  ;;  %v3092_v0 = vrot.slane %v10343_v63, 1  ;;  %v11125_v63 = vld [vmem:[%s11350_s15 + $0x188] sm:$0xff] }
 0x262   : > { %v13157_v25 = vpop.f32.mrf.mxu1  ;;  %v3095_v29 = vrot.slane %v10345_v22, 1 }
 0x263   : > { %17326 = vst [vmem:[#allocation44_spill] sm:$0xff] %v13157_v25  ;;  %v13213_v53 = vsel %vm674_vm2, %v4367_v49, %v13185_v5  ;;  %v13223_v25 = vrot.slane %v13201_v39, 1  ;;  %v3247_v49 = vsel %vm674_vm2, %v13166_v24, %v3246_v55 }
 0x264   : > { %10319 = vmatmul.msk.f32.gmra.mxu2 %vm479_vm0, %v12591_v51  ;;  %v2397_v51 = vpop.f32.mrf.mxu3  ;;  %17331 = vst [vmem:[#allocation49_spill] sm:$0xff] %v13213_v53 }
 0x265   : > { %10377 = vmatmul.msk.f32.gmra.mxu0 %vm479_vm0, %v12595_v57  ;;  %v13217_v57 = vadd.f32 %v2549_v46, %v2420_v14  ;;  %17333 = vst [vmem:[#allocation51_spill] sm:$0xff] %v13223_v25 }
 0x266   : > { %v2259_v11 = vpop.f32.mrf.mxu2 }
 0x267   : > { %v2260_v62 = vadd.f32 %v2259_v11, %v12615_v50  ;;  %v10489_v50 = vld [vmem:[%s17030_s3 + $0x14] sm:$0xf]  ;;  %17332 = vst [vmem:[#allocation50_spill] sm:$0xff] %v13217_v57  ;;  %v4214_v11 = vrot.slane %v13199_v23, 1  ;;  %10361 = vmatmul.msk.f32.gmra.mxu3 %vm479_vm0, %v11125_v63 }
 0x268   : > { %v2552_v48 = vpop.f32.mrf.mxu0  ;;  %10394 = vmatmul.msk.f32.gmra.mxu1 %vm479_vm0, %v3245_v2  ;;  %10490 = vmatpush.msk.msra.mxu3 %vm3696_vm14, %v10489_v50 }
 0x269   : > { %v2421_v56 = vadd.f32 %v2397_v51, %v2260_v62  ;;  %v13226_v51 = vrot.slane %v13201_v39, 2  ;;  %v3093_v62 = vsel %vm436_vm1, %v12570_v41, %v3092_v0  ;;  %v13240_v39 = vsel %vm436_vm1, %v4214_v11, %v13223_v25 }
 0x26a   : > { %v13188_v47 = vpop.f32.mrf.mxu1  ;;  %v3249_v0 = vrot.slane %v10345_v22, 2 }
 0x26b   : > { %17329 = vst [vmem:[#allocation47_spill] sm:$0xff] %v13188_v47  ;;  %v4372_v47 = vrot.slane %v13199_v23, 2  ;;  %v13249_v53 = vadd.f32 %v2552_v48, %v2421_v56 }
 0x26c   : > { %10320 = vmatmul.msk.f32.gmra.mxu2 %vm479_vm0, %v2776_v15  ;;  %17334 = vst [vmem:[#allocation52_spill] sm:$0xff] %v13226_v51  ;;  %v2400_v14 = vpop.f32.mrf.mxu3  ;;  %v10344_v15 = vld [vmem:[%s11350_s15 + $0x198] sm:$0xff] }
 0x26d   : > { %v13244_v63 = vsel %vm674_vm2, %v4372_v47, %v13226_v51  ;;  %10378 = vmatmul.msk.f32.gmra.mxu0 %vm479_vm0, %v3093_v62  ;;  %v3248_v41 = vrot.slane %v10344_v15, 2  ;;  %v2780_v47 = vrot.slane %v12601_v3, 2  ;;  %v10346_v62 = vld [vmem:[%s11350_s15 + $0x1a8] sm:$0x3]  ;;  %s9889_s15 = scalar_lea.sflag [#allocation5], %s269_s18 }
 0x26e   : > { %v2262_v5 = vpop.f32.mrf.mxu2 }
 0x26f   : > { %v2263_v55 = vadd.f32 %v2262_v5, %v12663_v27  ;;  %10362 = vmatmul.msk.f32.gmra.mxu3 %vm479_vm0, %v10344_v15  ;;  %v3250_v11 = vsel %vm674_vm2, %v3248_v41, %v3249_v0  ;;  %v10507_v27 = vld [vmem:[%s17030_s3 + $0x18] sm:$0xf]  ;;  %v3573_v41 = vld [vmem:[#allocation2] sm:$0xff] }
 0x270   : > { %v2555_v46 = vpop.f32.mrf.mxu0  ;;  %10395 = vmatmul.msk.f32.gmra.mxu1 %vm479_vm0, %v3247_v49  ;;  %10508 = vmatpush.msk.msra.mxu0 %vm3696_vm14, %v10507_v27  ;;  %v3574_v27 = vld [vmem:[#allocation2 + $0x8] sm:$0xff] }
 0x271   : > { %v2422_v57 = vadd.f32 %v2400_v14, %v2263_v55  ;;  %v3251_v55 = vrot.slane %v10346_v62, 2 }
 0x272   : > { %v13236_v50 = vpop.f32.mrf.mxu1 }
 0x273   : > { %17335 = vst [vmem:[#allocation53_spill] sm:$0xff] %v13236_v50  ;;  %v3094_v50 = vrot.slane %v10344_v15, 1  ;;  %v2781_v15 = vsel %vm674_vm2, %v13166_v24, %v2780_v47  ;;  %v13274_v25 = vadd.f32 %v2555_v46, %v2422_v57  ;;  %v3252_v47 = vsel %vm674_vm2, %v3249_v0, %v3251_v55 }
 0x274   : > { %10321 = vmatmul.msk.f32.gmra.mxu2 %vm479_vm0, %v3245_v2  ;;  %v2403_v49 = vpop.f32.mrf.mxu3  ;;  %v10525_v2 = vld [vmem:[%s17030_s3 + $0x1c] sm:$0xf] }
 0x275   : > { %v3096_v14 = vsel %vm436_vm1, %v3094_v50, %v3095_v29  ;;  %10526 = vmatpush.msk.msra.mxu1 %vm3696_vm14, %v10525_v2  ;;  %v2224_v50 = vadd.f32 %v12804_v19, %v12221_v42 }
 0x276   : > { %v2265_v3 = vpop.f32.mrf.mxu2  ;;  %10379 = vmatmul.msk.f32.gmra.mxu0 %vm479_vm0, %v3096_v14 }
 0x277   : > { %v2266_v56 = vadd.f32 %v2265_v3, %v12708_v58  ;;  %10363 = vmatmul.msk.f32.gmra.mxu3 %vm479_vm0, %v10345_v22  ;;  %v3622_v58 = vrot.slane %v3573_v41, 1  ;;  %v2409_v24 = vadd.f32 %v12798_v20, %v2224_v50  ;;  %v2227_v22 = vadd.f32 %v12834_v9, %v12239_v43 }
 0x278   : > { %v2558_v5 = vpop.f32.mrf.mxu0  ;;  %10396 = vmatmul.msk.f32.gmra.mxu1 %vm479_vm0, %v3250_v11  ;;  %v3623_v11 = vrot.slane %v3574_v27, 1 }
 0x279   : > { %v2423_v51 = vadd.f32 %v2403_v49, %v2266_v56  ;;  %v13284_v49 = vld [vmem:[#allocation2 + $0xb0] sm:$0xff]  ;;  %v2564_v0 = vadd.f32 %v12796_v33, %v2409_v24  ;;  %v13290_v56 = vld [vmem:[#allocation2 + $0xa8] sm:$0xff]  ;;  %v2410_v55 = vadd.f32 %v12828_v52, %v2227_v22 }
 0x27a   : > { %v13264_v48 = vpop.f32.mrf.mxu1  ;;  %v3624_v46 = vsel %vm436_vm1, %v3622_v58, %v3623_v11  ;;  %v13299_v43 = vrot.slane %v13284_v49, 2  ;;  %v4219_v33 = vrot.slane %v13290_v56, 1  ;;  %v4377_v50 = vrot.slane %v13290_v56, 2 }
 0x27b   : > { %17336 = vst [vmem:[#allocation54_spill] sm:$0xff] %v13264_v48  ;;  %v3097_v48 = vrot.slane %v10346_v62, 1  ;;  %v3575_v62 = vld [vmem:[#allocation2 + $0x10] sm:$0x3]  ;;  %v2726_v24 = vadd.f32 %v12776_v59, %v2564_v0  ;;  %v2565_v59 = vadd.f32 %v12826_v18, %v2410_v55  ;;  %v3578_v55 = vld [vmem:[#allocation2 + $0x28] sm:$0x3] }
 0x27c   : > { %10322 = vmatmul.msk.f32.gmra.mxu2 %vm479_vm0, %v2781_v15  ;;  %v2406_v19 = vpop.f32.mrf.mxu3  ;;  %v13292_v15 = vadd.f32 %v2558_v5, %v2423_v51  ;;  %v3625_v9 = vrot.slane %v3575_v62, 1 }
 0x27d   : > { %v3098_v14 = vsel %vm436_vm1, %v3095_v29, %v3097_v48  ;;  %v3865_v29 = vrot.slane %v3573_v41, 2  ;;  %v3866_v48 = vrot.slane %v3574_v27, 2  ;;  %v2727_v18 = vadd.f32 %v12802_v37, %v2565_v59 }
 0x27e   : > { %v2268_v2 = vpop.f32.mrf.mxu2  ;;  %10380 = vmatmul.msk.f32.gmra.mxu0 %vm479_vm0, %v3098_v14  ;;  %v3626_v52 = vsel %vm436_vm1, %v3623_v11, %v3625_v9 }
 0x27f   : > { %v2269_v57 = vadd.f32 %v2268_v2, %v12748_v34  ;;  %v13296_v34 = vrot.slane %v13284_v49, 1  ;;  %10419 = vmatmul.msk.f32.vlgmr.msrb.gmra.mxu3 %vm277_vm15, %v3573_v41  ;;  %v3867_v5 = vsel %vm674_vm2, %v3865_v29, %v3866_v48  ;;  %v13313_v41 = vsel %vm674_vm2, %v4377_v50, %v13299_v43  ;;  %v13327_v29 = vld [vmem:[%s17029_s2] ss:$0 sm:$0xff] }
 0x280   : > { %v2561_v42 = vpop.f32.mrf.mxu0  ;;  %10397 = vmatmul.msk.f32.gmra.mxu1 %vm479_vm0, %v3252_v47 }
 0x281   : > { %v2424_v3 = vadd.f32 %v2406_v19, %v2269_v57  ;;  %v13309_v19 = vsel %vm436_vm1, %v4219_v33, %v13296_v34  ;;  %v3868_v57 = vrot.slane %v3575_v62, 2 }
 0x282   : > { %v3303_v20 = vpop.f32.mrf.mxu1 }
 0x283   : > { %v3869_v62 = vsel %vm674_vm2, %v3866_v48, %v3868_v57 }
 0x284   : > { %10402 = vmatmul.msk.f32.vlgmr.msrb.gmra.mxu2 %vm277_vm15, %v3624_v46  ;;  %v2987_v51 = vpop.f32.mrf.mxu3  ;;  %v13320_v46 = vadd.f32 %v2561_v42, %v2424_v3  ;;  %v13334_v42 = vld [vmem:[%s17029_s2 + $0x1] ss:$0 sm:$0xff] }
 0x286   : > { %v2832_v47 = vpop.f32.mrf.mxu2  ;;  %10437 = vmatmul.msk.f32.vlgmr.msrb.gmra.mxu0 %vm277_vm15, %v3867_v5 }
 0x287   : > { %v2880_v14 = vadd.f32 %v2832_v47, %v2726_v24  ;;  %10420 = vmatmul.msk.f32.gmra.mxu3 %vm277_vm15, %v3574_v27 }
 0x288   : > { %v3149_v58 = vpop.f32.mrf.mxu0  ;;  %10455 = vmatmul.msk.f32.vlgmr.msrb.gmra.mxu1 %vm277_vm15, %v12897_v54 }
 0x289   : > { %v3035_v2 = vadd.f32 %v2987_v51, %v2880_v14  ;;  %v2728_v14 = vadd.f32 %v12832_v61, %v12930_v26 }
 0x28a   : > { %v3306_v22 = vpop.f32.mrf.mxu1 }
 0x28b   : > { %v3197_v0 = vadd.f32 %v3149_v58, %v3035_v2  ;;  %v3630_v2 = vrot.slane %v3578_v55, 1 }
 0x28c   : > { %10403 = vmatmul.msk.f32.gmra.mxu2 %vm277_vm15, %v3626_v52  ;;  %v2990_v33 = vpop.f32.mrf.mxu3 }
 0x28d   : > { %v3351_v11 = vadd.f32 %v3303_v20, %v3197_v0  ;;  %v13342_v20 = vld [vmem:[%s17029_s2 + $0x2] ss:$0 sm:$0xff] }
 0x28e   : > { %v2835_v3 = vpop.f32.mrf.mxu2  ;;  %10438 = vmatmul.msk.f32.gmra.mxu0 %vm277_vm15, %v3869_v62  ;;  %v3873_v62 = vrot.slane %v3578_v55, 2 }
 0x28f   : > { %v2881_v27 = vadd.f32 %v2835_v3, %v2727_v18  ;;  %v3371_v50 = vmul.f32 %v13327_v29, %v3351_v11  ;;  %10421 = vmatmul.msk.f32.gmra.mxu3 %vm277_vm15, %v12897_v54  ;;  %v17338_v11 = vld [vmem:[#allocation27_spill] sm:$0xff] }
 0x290   : > { %v3152_v9 = vpop.f32.mrf.mxu0  ;;  %10456 = vmatmul.msk.f32.gmra.mxu1 %vm277_vm15, %v12888_v10 }
 0x291   : > { %v3036_v37 = vadd.f32 %v2990_v33, %v2881_v27  ;;  %v3391_v48 = vadd.f32 %v13334_v42, %v3371_v50 }
 0x292   : > { %v3309_v5 = vpop.f32.mrf.mxu1 }
 0x293   : > { %v3198_v58 = vadd.f32 %v3152_v9, %v3036_v37  ;;  %vm3407_vm0 = vcmp.gt.f32.partialorder %v3391_v48, 0.0  ;;  %v3427_v51 = vmul.f32 %v13342_v20, %v3391_v48  ;;  %v17339_v9 = vld [vmem:[#allocation25_spill] sm:$0xff]  ;;  %v17340_v37 = vld [vmem:[#allocation11_spill] sm:$0xff] }
 0x294   : > { %10404 = vmatmul.msk.f32.gmra.mxu2 %vm277_vm15, %v12942_v16  ;;  %v2993_v57 = vpop.f32.mrf.mxu3  ;;  %v3631_v61 = vsel %vm436_vm1, %v17339_v9, %v3630_v2  ;;  %v3581_v2 = vld [vmem:[#allocation2 + $0x40] sm:$0x3] }
 0x295   : > { %v3352_v24 = vadd.f32 %v3306_v22, %v3198_v58  ;;  %v13353_v52 = vsel %vm3407_vm0, %v3391_v48, %v3427_v51  ;;  %v2729_v48 = vadd.f32 %v17340_v37, %v12966_v30 }
 0x296   : > { %17337 = vst [vmem:[#allocation55_spill] sm:$0xff] %v13353_v52  ;;  %v2838_v59 = vpop.f32.mrf.mxu2  ;;  %3508 = vrot.lane.b32.xlu1 %v13353_v52, %s11221_s23  ;;  %10439 = vmatmul.msk.f32.gmra.mxu0 %vm277_vm15, %v17338_v11 }
 0x297   : > { %v2882_v54 = vadd.f32 %v2838_v59, %v2728_v14  ;;  %v3372_v0 = vmul.f32 %v13327_v29, %v3352_v24  ;;  %10422 = vmatmul.msk.f32.gmra.mxu3 %vm277_vm15, %v12888_v10  ;;  %v17342_v10 = vld [vmem:[#allocation26_spill] sm:$0xff] }
 0x298   : > { %v3155_v47 = vpop.f32.mrf.mxu0  ;;  %10457 = vmatmul.msk.f32.gmra.mxu1 %vm277_vm15, %v13045_v6  ;;  %v3874_v55 = vsel %vm674_vm2, %v17342_v10, %v3873_v62  ;;  %v3635_v62 = vrot.slane %v3581_v2, 1 }
 0x299   : > { %v3037_v22 = vadd.f32 %v2993_v57, %v2882_v54  ;;  %v3392_v26 = vadd.f32 %v13334_v42, %v3372_v0 }
 0x29a   : > { %v3312_v3 = vpop.f32.mrf.mxu1 }
 0x29b   : > { %v3199_v33 = vadd.f32 %v3155_v47, %v3037_v22  ;;  %vm3408_vm9 = vcmp.gt.f32.partialorder %v3392_v26, 0.0  ;;  %v3428_v18 = vmul.f32 %v13342_v20, %v3392_v26 }
 0x29c   : > { %10405 = vmatmul.msk.f32.gmra.mxu2 %vm277_vm15, %v3631_v61  ;;  %v2996_v51 = vpop.f32.mrf.mxu3  ;;  %v17343_v61 = vld [vmem:[#allocation14_spill] sm:$0xff] }
 0x29d   : > { %v3353_v27 = vadd.f32 %v3309_v5, %v3199_v33  ;;  %v13371_v58 = vsel %vm3408_vm9, %v3392_v26, %v3428_v18  ;;  %v2730_v26 = vadd.f32 %v17343_v61, %v12996_v31  ;;  %v3636_v31 = vsel %vm436_vm1, %v13053_v12, %v3635_v62 }
 0x29e   : > { %17341 = vst [vmem:[#allocation27_spill] sm:$0xff] %v13371_v58  ;;  %v2841_v24 = vpop.f32.mrf.mxu2  ;;  %3510 = vrot.lane.b32.xlu2 %v13371_v58, %s11221_s23  ;;  %10440 = vmatmul.msk.f32.gmra.mxu0 %vm277_vm15, %v3874_v55 }
 0x29f   : > { %v2883_v47 = vadd.f32 %v2841_v24, %v2729_v48  ;;  %v3373_v5 = vmul.f32 %v13327_v29, %v3353_v27  ;;  %10423 = vmatmul.msk.f32.gmra.mxu3 %vm277_vm15, %v13045_v6 }
 0x2a0   : > { %v3158_v50 = vpop.f32.mrf.mxu0  ;;  %10458 = vmatmul.msk.f32.gmra.mxu1 %vm277_vm15, %v13042_v4 }
 0x2a1   : > { %v3038_v14 = vadd.f32 %v2996_v51, %v2883_v47  ;;  %v3393_v30 = vadd.f32 %v13334_v42, %v3373_v5  ;;  %v3878_v51 = vrot.slane %v3581_v2, 2 }
 0x2a2   : > { %v3315_v54 = vpop.f32.mrf.mxu1 }
 0x2a3   : > { %v3200_v57 = vadd.f32 %v3158_v50, %v3038_v14  ;;  %vm3409_vm10 = vcmp.gt.f32.partialorder %v3393_v30, 0.0  ;;  %v3429_v59 = vmul.f32 %v13342_v20, %v3393_v30  ;;  %v17345_v14 = vld [vmem:[#allocation31_spill] sm:$0xff] }
 0x2a4   : > { %10406 = vmatmul.msk.f32.gmra.mxu2 %vm277_vm15, %v13080_v35  ;;  %v2999_v18 = vpop.f32.mrf.mxu3 }
 0x2a5   : > { %v3354_v0 = vadd.f32 %v3312_v3, %v3200_v57  ;;  %v13389_v33 = vsel %vm3409_vm10, %v3393_v30, %v3429_v59  ;;  %v17346_v30 = vld [vmem:[#allocation28_spill] sm:$0xff] }
 0x2a6   : > { %17344 = vst [vmem:[#allocation25_spill] sm:$0xff] %v13389_v33  ;;  %v2844_v27 = vpop.f32.mrf.mxu2  ;;  %3512 = vrot.lane.b32.xlu0 %v13389_v33, %s11221_s23  ;;  %10441 = vmatmul.msk.f32.gmra.mxu0 %vm277_vm15, %v13088_v44  ;;  %v2731_v57 = vadd.f32 %v17346_v30, %v17345_v14 }
 0x2a7   : > { %v2884_v6 = vadd.f32 %v2844_v27, %v2730_v26  ;;  %v3374_v50 = vmul.f32 %v13327_v29, %v3354_v0  ;;  %10424 = vmatmul.msk.f32.gmra.mxu3 %vm277_vm15, %v13042_v4  ;;  %v3879_v4 = vsel %vm674_vm2, %v13058_v28, %v3878_v51 }
 0x2a8   : > { %v3161_v22 = vpop.f32.mrf.mxu0  ;;  %10459 = vmatmul.msk.f32.gmra.mxu1 %vm277_vm15, %v13060_v8 }
 0x2a9   : > { %v3039_v3 = vadd.f32 %v2999_v18, %v2884_v6  ;;  %v3394_v37 = vadd.f32 %v13334_v42, %v3374_v50  ;;  %v3584_v18 = vld [vmem:[#allocation2 + $0x58] sm:$0x3] }
 0x2aa   : > { %v3318_v55 = vpop.f32.mrf.mxu1 }
 0x2ab   : > { %v3201_v48 = vadd.f32 %v3161_v22, %v3039_v3  ;;  %vm3410_vm11 = vcmp.gt.f32.partialorder %v3394_v37, 0.0  ;;  %v3430_v24 = vmul.f32 %v13342_v20, %v3394_v37  ;;  %v17348_v22 = vld [vmem:[#allocation33_spill] sm:$0xff] }
 0x2ac   : > { %10407 = vmatmul.msk.f32.gmra.mxu2 %vm277_vm15, %v3636_v31  ;;  %v3002_v0 = vpop.f32.mrf.mxu3 }
 0x2ad   : > { %v3355_v47 = vadd.f32 %v3315_v54, %v3201_v48  ;;  %v13407_v59 = vsel %vm3410_vm11, %v3394_v37, %v3430_v24  ;;  %v17349_v37 = vld [vmem:[#allocation34_spill] sm:$0xff]  ;;  %v17350_v48 = vld [vmem:[#allocation29_spill] sm:$0xff] }
 0x2ae   : > { %17347 = vst [vmem:[#allocation11_spill] sm:$0xff] %v13407_v59  ;;  %v2847_v61 = vpop.f32.mrf.mxu2  ;;  %3514 = vrot.lane.b32.xlu1 %v13407_v59, %s11221_s23  ;;  %10442 = vmatmul.msk.f32.gmra.mxu0 %vm277_vm15, %v3879_v4  ;;  %v2732_v51 = vadd.f32 %v17350_v48, %v17349_v37  ;;  %v3883_v4 = vrot.slane %v3584_v18, 2 }
 0x2af   : > { %v2885_v2 = vadd.f32 %v2847_v61, %v2731_v57  ;;  %v3375_v54 = vmul.f32 %v13327_v29, %v3355_v47  ;;  %10425 = vmatmul.msk.f32.gmra.mxu3 %vm277_vm15, %v13060_v8  ;;  %v3640_v47 = vrot.slane %v3584_v18, 1 }
 0x2b0   : > { %v3164_v5 = vpop.f32.mrf.mxu0  ;;  %10460 = vmatmul.msk.f32.gmra.mxu1 %vm277_vm15, %v17348_v22 }
 0x2b1   : > { %v3040_v26 = vadd.f32 %v3002_v0, %v2885_v2  ;;  %v3395_v62 = vadd.f32 %v13334_v42, %v3375_v54  ;;  %v3641_v57 = vsel %vm436_vm1, %v13067_v17, %v3640_v47 }
 0x2b2   : > { %v3321_v50 = vpop.f32.mrf.mxu1 }
 0x2b3   : > { %v3202_v27 = vadd.f32 %v3164_v5, %v3040_v26  ;;  %vm3411_vm12 = vcmp.gt.f32.partialorder %v3395_v62, 0.0  ;;  %v3431_v6 = vmul.f32 %v13342_v20, %v3395_v62 }
 0x2b4   : > { %10408 = vmatmul.msk.f32.gmra.mxu2 %vm277_vm15, %v13094_v45  ;;  %v3005_v14 = vpop.f32.mrf.mxu3 }
 0x2b5   : > { %v3356_v3 = vadd.f32 %v3318_v55, %v3202_v27  ;;  %v13425_v24 = vsel %vm3411_vm12, %v3395_v62, %v3431_v6  ;;  %v17352_v27 = vld [vmem:[#allocation37_spill] sm:$0xff]  ;;  %v17353_v6 = vld [vmem:[#allocation30_spill] sm:$0xff] }
 0x2b6   : > { %17351 = vst [vmem:[#allocation26_spill] sm:$0xff] %v13425_v24  ;;  %v2850_v30 = vpop.f32.mrf.mxu2  ;;  %3516 = vrot.lane.b32.xlu2 %v13425_v24, %s11221_s23  ;;  %10443 = vmatmul.msk.f32.gmra.mxu0 %vm277_vm15, %v13102_v36 }
 0x2b7   : > { %v2886_v8 = vadd.f32 %v2850_v30, %v2732_v51  ;;  %v3376_v5 = vmul.f32 %v13327_v29, %v3356_v3  ;;  %10426 = vmatmul.msk.f32.gmra.mxu3 %vm277_vm15, %v17348_v22  ;;  %v2733_v3 = vadd.f32 %v17353_v6, %v17352_v27  ;;  %v17356_v22 = vld [vmem:[#allocation36_spill] sm:$0xff] }
 0x2b8   : > { %v3167_v31 = vpop.f32.mrf.mxu0  ;;  %10461 = vmatmul.msk.f32.gmra.mxu1 %vm277_vm15, %v13111_v38  ;;  %v3884_v18 = vsel %vm674_vm2, %v17356_v22, %v3883_v4 }
 0x2b9   : > { %v3041_v55 = vadd.f32 %v3005_v14, %v2886_v8  ;;  %v3396_v0 = vadd.f32 %v13334_v42, %v3376_v5  ;;  %v17357_v8 = vld [vmem:[#allocation42_spill] sm:$0xff]  ;;  %v3587_v5 = vld [vmem:[#allocation2 + $0x70] sm:$0x3] }
 0x2bb   : > { %v3203_v61 = vadd.f32 %v3167_v31, %v3041_v55  ;;  %vm3412_vm13 = vcmp.gt.f32.partialorder %v3396_v0, 0.0  ;;  %v3432_v2 = vmul.f32 %v13342_v20, %v3396_v0  ;;  %v17355_v31 = vld [vmem:[#allocation38_spill] sm:$0xff] }
 0x2bc   : > { %10409 = vmatmul.msk.f32.gmra.mxu2 %vm277_vm15, %v3641_v57  ;;  %v3008_v48 = vpop.f32.mrf.mxu3 }
 0x2bd   : > { %v3324_v54 = vpop.f32.mrf.mxu1  ;;  %v3357_v26 = vadd.f32 %v3321_v50, %v3203_v61  ;;  %v13443_v37 = vsel %vm3412_vm13, %v3396_v0, %v3432_v2  ;;  %v17358_v2 = vld [vmem:[#allocation41_spill] sm:$0xff] }
 0x2be   : > { %17354 = vst [vmem:[#allocation14_spill] sm:$0xff] %v13443_v37  ;;  %3518 = vrot.lane.b32.xlu0 %v13443_v37, %s11221_s23  ;;  %10444 = vmatmul.msk.f32.gmra.mxu0 %vm277_vm15, %v3884_v18  ;;  %v17361_v18 = vld [vmem:[#allocation40_spill] sm:$0xff] }
 0x2bf   : > { %v2853_v51 = vpop.f32.mrf.mxu2  ;;  %v3377_v50 = vmul.f32 %v13327_v29, %v3357_v26  ;;  %10427 = vmatmul.msk.f32.gmra.mxu3 %vm277_vm15, %v13111_v38  ;;  %v17359_v26 = vld [vmem:[#allocation32_spill] sm:$0xff] }
 0x2c0   : > { %v3170_v62 = vpop.f32.mrf.mxu0  ;;  %10462 = vmatmul.msk.f32.gmra.mxu1 %vm277_vm15, %v17355_v31  ;;  %v2887_v47 = vadd.f32 %v2853_v51, %v2733_v3  ;;  %v2734_v27 = vadd.f32 %v17359_v26, %v17358_v2  ;;  %v3645_v3 = vrot.slane %v3587_v5, 1  ;;  %v17362_v26 = vld [vmem:[#allocation35_spill] sm:$0xff] }
 0x2c1   : > { %v3397_v30 = vadd.f32 %v13334_v42, %v3377_v50 }
 0x2c2   : > { %v3042_v14 = vadd.f32 %v3008_v48, %v2887_v47  ;;  %v3646_v47 = vsel %vm436_vm1, %v17361_v18, %v3645_v3 }
 0x2c3   : > { %vm3413_vm3 = vcmp.gt.f32.partialorder %v3397_v30, 0.0  ;;  %v3433_v57 = vmul.f32 %v13342_v20, %v3397_v30 }
 0x2c4   : > { %10410 = vmatmul.msk.f32.gmra.mxu2 %vm277_vm15, %v17357_v8  ;;  %v3204_v55 = vadd.f32 %v3170_v62, %v3042_v14  ;;  %v3011_v48 = vpop.f32.mrf.mxu3 }
 0x2c5   : > { %v3327_v0 = vpop.f32.mrf.mxu1  ;;  %v13461_v6 = vsel %vm3413_vm3, %v3397_v30, %v3433_v57  ;;  %v3888_v30 = vrot.slane %v3587_v5, 2 }
 0x2c6   : > { %v3358_v61 = vadd.f32 %v3324_v54, %v3204_v55  ;;  %17360 = vst [vmem:[#allocation31_spill] sm:$0xff] %v13461_v6  ;;  %3520 = vrot.lane.b32.xlu1 %v13461_v6, %s11221_s23  ;;  %10445 = vmatmul.msk.f32.gmra.mxu0 %vm277_vm15, %v13144_v7  ;;  %v13822_v6 = vld [vmem:[#allocation2 + $0xa0] sm:$0x3] }
 0x2c7   : > { %v2856_v51 = vpop.f32.mrf.mxu2  ;;  %10428 = vmatmul.msk.f32.gmra.mxu3 %vm277_vm15, %v17355_v31  ;;  %v3889_v31 = vsel %vm674_vm2, %v13128_v21, %v3888_v30  ;;  %v17364_v30 = vld [vmem:[#allocation39_spill] sm:$0xff]  ;;  %17387 = vst [vmem:[#allocation40_spill] sm:$0xff] %v13822_v6 }
 0x2c8   : > { %v3173_v4 = vpop.f32.mrf.mxu0  ;;  %10463 = vmatmul.msk.f32.gmra.mxu1 %vm277_vm15, %v13168_v13  ;;  %v2888_v38 = vadd.f32 %v2856_v51, %v2734_v27  ;;  %v3378_v62 = vmul.f32 %v13327_v29, %v3358_v61  ;;  %v2735_v27 = vadd.f32 %v17362_v26, %v13151_v60 }
 0x2ca   : > { %v3043_v54 = vadd.f32 %v3011_v48, %v2888_v38  ;;  %v3398_v50 = vadd.f32 %v13334_v42, %v3378_v62  ;;  %v3590_v38 = vld [vmem:[#allocation2 + $0x88] sm:$0x3] }
 0x2cb   : > { %v3650_v26 = vrot.slane %v3590_v38, 1 }
 0x2cc   : > { %10411 = vmatmul.msk.f32.gmra.mxu2 %vm277_vm15, %v3646_v47  ;;  %v3205_v14 = vadd.f32 %v3173_v4, %v3043_v54  ;;  %vm3414_vm4 = vcmp.gt.f32.partialorder %v3398_v50, 0.0  ;;  %v3434_v55 = vmul.f32 %v13342_v20, %v3398_v50  ;;  %v3014_v3 = vpop.f32.mrf.mxu3 }
 0x2cd   : > { %v3330_v57 = vpop.f32.mrf.mxu1 }
 0x2ce   : > { %v3359_v61 = vadd.f32 %v3327_v0, %v3205_v14  ;;  %v13479_v48 = vsel %vm3414_vm4, %v3398_v50, %v3434_v55  ;;  %10446 = vmatmul.msk.f32.gmra.mxu0 %vm277_vm15, %v3889_v31  ;;  %v2736_v55 = vadd.f32 %v17364_v30, %v13170_v32  ;;  %v17367_v31 = vld [vmem:[#allocation45_spill] sm:$0xff]  ;;  %v17368_v30 = vld [vmem:[#allocation50_spill] sm:$0xff] }
 0x2cf   : > { %17363 = vst [vmem:[#allocation28_spill] sm:$0xff] %v13479_v48  ;;  %v2859_v51 = vpop.f32.mrf.mxu2  ;;  %3522 = vrot.lane.b32.xlu2 %v13479_v48, %s11221_s23  ;;  %10429 = vmatmul.msk.f32.gmra.mxu3 %vm277_vm15, %v13168_v13  ;;  %v3651_v32 = vsel %vm436_vm1, %v17367_v31, %v3650_v26 }
 0x2d0   : > { %v3176_v2 = vpop.f32.mrf.mxu0  ;;  %10464 = vmatmul.msk.f32.gmra.mxu1 %vm277_vm15, %v13161_v1  ;;  %v2889_v5 = vadd.f32 %v2859_v51, %v2735_v27  ;;  %v3379_v0 = vmul.f32 %v13327_v29, %v3359_v61  ;;  %v17366_v51 = vld [vmem:[#allocation49_spill] sm:$0xff] }
 0x2d2   : > { %v3044_v4 = vadd.f32 %v3014_v3, %v2889_v5  ;;  %v3399_v60 = vadd.f32 %v13334_v42, %v3379_v0 }
 0x2d4   : > { %10412 = vmatmul.msk.f32.gmra.mxu2 %vm277_vm15, %v13193_v40  ;;  %v3206_v62 = vadd.f32 %v3176_v2, %v3044_v4  ;;  %vm3415_vm5 = vcmp.gt.f32.partialorder %v3399_v60, 0.0  ;;  %v3435_v54 = vmul.f32 %v13342_v20, %v3399_v60  ;;  %v3017_v27 = vpop.f32.mrf.mxu3  ;;  %v3893_v4 = vrot.slane %v3590_v38, 2 }
 0x2d5   : > { %v3333_v47 = vpop.f32.mrf.mxu1 }
 0x2d6   : > { %v3360_v50 = vadd.f32 %v3330_v57, %v3206_v62  ;;  %v13497_v61 = vsel %vm3415_vm5, %v3399_v60, %v3435_v54  ;;  %10447 = vmatmul.msk.f32.gmra.mxu0 %vm277_vm15, %v17366_v51 }
 0x2d7   : > { %17365 = vst [vmem:[#allocation33_spill] sm:$0xff] %v13497_v61  ;;  %v2862_v3 = vpop.f32.mrf.mxu2  ;;  %3524 = vrot.lane.b32.xlu0 %v13497_v61, %s11221_s23  ;;  %10430 = vmatmul.msk.f32.gmra.mxu3 %vm277_vm15, %v13161_v1  ;;  %v17372_v1 = vld [vmem:[#allocation46_spill] sm:$0xff] }
 0x2d8   : > { %v3179_v14 = vpop.f32.mrf.mxu0  ;;  %10465 = vmatmul.msk.f32.gmra.mxu1 %vm277_vm15, %v13199_v23  ;;  %v2890_v13 = vadd.f32 %v2862_v3, %v2736_v55  ;;  %v3380_v2 = vmul.f32 %v13327_v29, %v3360_v50  ;;  %v17369_v55 = vld [vmem:[#allocation43_spill] sm:$0xff]  ;;  %v3894_v38 = vsel %vm674_vm2, %v17372_v1, %v3893_v4 }
 0x2d9   : > { %v3593_v4 = vld [vmem:[#allocation2 + $0xa0] sm:$0x3] }
 0x2da   : > { %v3045_v57 = vadd.f32 %v3017_v27, %v2890_v13  ;;  %v3400_v5 = vadd.f32 %v13334_v42, %v3380_v2  ;;  %v2737_v27 = vadd.f32 %v17369_v55, %v17368_v30 }
 0x2dc   : > { %10413 = vmatmul.msk.f32.gmra.mxu2 %vm277_vm15, %v3651_v32  ;;  %v3207_v0 = vadd.f32 %v3179_v14, %v3045_v57  ;;  %vm3416_vm6 = vcmp.gt.f32.partialorder %v3400_v5, 0.0  ;;  %v3436_v60 = vmul.f32 %v13342_v20, %v3400_v5  ;;  %v3020_v26 = vpop.f32.mrf.mxu3  ;;  %v17371_v14 = vld [vmem:[#allocation48_spill] sm:$0xff] }
 0x2dd   : > { %v3336_v62 = vpop.f32.mrf.mxu1 }
 0x2de   : > { %v3361_v54 = vadd.f32 %v3333_v47, %v3207_v0  ;;  %v13515_v3 = vsel %vm3416_vm6, %v3400_v5, %v3436_v60  ;;  %10448 = vmatmul.msk.f32.gmra.mxu0 %vm277_vm15, %v3894_v38 }
 0x2df   : > { %17370 = vst [vmem:[#allocation34_spill] sm:$0xff] %v13515_v3  ;;  %v2865_v13 = vpop.f32.mrf.mxu2  ;;  %3526 = vrot.lane.b32.xlu1 %v13515_v3, %s11221_s23  ;;  %10431 = vmatmul.msk.f32.gmra.mxu3 %vm277_vm15, %v13199_v23 }
 0x2e0   : > { %v3182_v50 = vpop.f32.mrf.mxu0  ;;  %10466 = vmatmul.msk.f32.gmra.mxu1 %vm277_vm15, %v17371_v14  ;;  %v2891_v2 = vadd.f32 %v2865_v13, %v2737_v27  ;;  %v3381_v47 = vmul.f32 %v13327_v29, %v3361_v54  ;;  %v17373_v54 = vld [vmem:[#allocation44_spill] sm:$0xff] }
 0x2e1   : > { %v2738_v27 = vadd.f32 %v17373_v54, %v13249_v53  ;;  %v10543_v53 = vld [vmem:[%s17030_s3 + $0x20] sm:$0xf]  ;;  %v10563_v54 = vld [vmem:[%s17030_s3 + $0x4] sm:$0xf] }
 0x2e2   : > { %v3046_v57 = vadd.f32 %v3020_v26, %v2891_v2  ;;  %v3401_v32 = vadd.f32 %v13334_v42, %v3381_v47  ;;  %v17375_v47 = vld [vmem:[#allocation51_spill] sm:$0xff]  ;;  %10544 = vmatpush.msk.msrb.mxu2 %vm3696_vm14, %v10543_v53  ;;  %10564 = vmatpush.msk.msrb.mxu3 %vm3696_vm14, %v10563_v54  ;;  %v17378_v53 = vld [vmem:[#allocation52_spill] sm:$0xff] }
 0x2e4   : > { %10414 = vmatmul.msk.f32.gmra.mxu2 %vm277_vm15, %v13240_v39  ;;  %v3208_v5 = vadd.f32 %v3182_v50, %v3046_v57  ;;  %vm3417_vm7 = vcmp.gt.f32.partialorder %v3401_v32, 0.0  ;;  %v3437_v0 = vmul.f32 %v13342_v20, %v3401_v32  ;;  %v3023_v13 = vpop.f32.mrf.mxu3  ;;  %v3655_v50 = vrot.slane %v3593_v4, 1 }
 0x2e5   : > { %v3339_v60 = vpop.f32.mrf.mxu1 }
 0x2e6   : > { %v3362_v30 = vadd.f32 %v3336_v62, %v3208_v5  ;;  %v13533_v26 = vsel %vm3417_vm7, %v3401_v32, %v3437_v0  ;;  %10449 = vmatmul.msk.f32.gmra.mxu0 %vm277_vm15, %v13244_v63  ;;  %v3656_v57 = vsel %vm436_vm1, %v17375_v47, %v3655_v50 }
 0x2e7   : > { %17374 = vst [vmem:[#allocation29_spill] sm:$0xff] %v13533_v26  ;;  %v2868_v38 = vpop.f32.mrf.mxu2  ;;  %3528 = vrot.lane.b32.xlu2 %v13533_v26, %s11221_s23  ;;  %10432 = vmatmul.msk.f32.gmra.mxu3 %vm277_vm15, %v17371_v14 }
 0x2e8   : > { %v3185_v55 = vpop.f32.mrf.mxu0  ;;  %10467 = vmatmul.msk.f32.gmra.mxu1 %vm277_vm15, %v13290_v56  ;;  %v2892_v23 = vadd.f32 %v2868_v38, %v2738_v27  ;;  %v3382_v2 = vmul.f32 %v13327_v29, %v3362_v30  ;;  %v3898_v38 = vrot.slane %v3593_v4, 2 }
 0x2ea   : > { %v3047_v62 = vadd.f32 %v3023_v13, %v2892_v23  ;;  %v3402_v32 = vadd.f32 %v13334_v42, %v3382_v2  ;;  %v17376_v23 = vld [vmem:[#allocation47_spill] sm:$0xff] }
 0x2eb   : > { %v2739_v50 = vadd.f32 %v17376_v23, %v13274_v25 }
 0x2ec   : > { %10415 = vmatmul.msk.f32.gmra.mxu2 %vm277_vm15, %v3656_v57  ;;  %v3209_v5 = vadd.f32 %v3185_v55, %v3047_v62  ;;  %vm3418_vm8 = vcmp.gt.f32.partialorder %v3402_v32, 0.0  ;;  %v3438_v0 = vmul.f32 %v13342_v20, %v3402_v32  ;;  %v3026_v55 = vpop.f32.mrf.mxu3 }
 0x2ed   : > { %v3342_v30 = vpop.f32.mrf.mxu1 }
 0x2ee   : > { %v3363_v27 = vadd.f32 %v3339_v60, %v3209_v5  ;;  %v13558_v2 = vsel %vm3418_vm8, %v3402_v32, %v3438_v0  ;;  %v3899_v60 = vsel %vm674_vm2, %v17378_v53, %v3898_v38  ;;  %v3596_v32 = vld [vmem:[#allocation2 + $0xb8] sm:$0x3]  ;;  %v10598_v38 = vld [vmem:[%s17030_s3 + $0x8] sm:$0xf] }
 0x2ef   : > { %17377 = vst [vmem:[#allocation37_spill] sm:$0xff] %v13558_v2  ;;  %v2871_v14 = vpop.f32.mrf.mxu2  ;;  %3530 = vrot.lane.b32.xlu0 %v13558_v2, %s11221_s23  ;;  %10450 = vmatmul.msk.f32.gmra.mxu0 %vm277_vm15, %v3899_v60  ;;  %v13587_v60 = vld [vmem:[#allocation2 + $0xc0] sm:$0xff] }
 0x2f0   : > { %v3188_v13 = vpop.f32.mrf.mxu0  ;;  %10468 = vmatmul.msk.f32.gmra.mxu1 %vm277_vm15, %v13284_v49  ;;  %v2893_v62 = vadd.f32 %v2871_v14, %v2739_v50  ;;  %v3383_v4 = vmul.f32 %v13327_v29, %v3363_v27  ;;  %10433 = vmatmul.msk.f32.gmra.mxu3 %vm277_vm15, %v13290_v56  ;;  %v5221_v27 = vld [vmem:[%s17030_s3] sm:$0xf]  ;;  %v3660_v56 = vrot.slane %v3596_v32, 1 }
 0x2f1   : > { %10581 = vmatpush.msk.msrb.mxu0 %vm3696_vm14, %v5221_v27  ;;  %10599 = vmatpush.msk.msrb.mxu1 %vm3696_vm14, %v10598_v38  ;;  %v3903_v38 = vrot.slane %v3596_v32, 2 }
 0x2f2   : > { %v3048_v25 = vadd.f32 %v3026_v55, %v2893_v62  ;;  %v3403_v57 = vadd.f32 %v13334_v42, %v3383_v4  ;;  %v17379_v55 = vld [vmem:[#allocation53_spill] sm:$0xff] }
 0x2f4   : > { %10416 = vmatmul.msk.f32.gmra.mxu2 %vm277_vm15, %v13309_v19  ;;  %v3210_v5 = vadd.f32 %v3188_v13, %v3048_v25  ;;  %vm3419_vm0 = vcmp.gt.f32.partialorder %v3403_v57, 0.0  ;;  %v3439_v0 = vmul.f32 %v13342_v20, %v3403_v57  ;;  %v2740_v13 = vadd.f32 %v17379_v55, %v13292_v15  ;;  %v3029_v62 = vpop.f32.mrf.mxu3 }
 0x2f5   : > { %v3345_v54 = vpop.f32.mrf.mxu1 }
 0x2f6   : > { %v3364_v23 = vadd.f32 %v3342_v30, %v3210_v5  ;;  %v13583_v14 = vsel %vm3419_vm0, %v3403_v57, %v3439_v0  ;;  %v3661_v5 = vsel %vm436_vm1, %v13296_v34, %v3660_v56  ;;  %v13608_v56 = vld [vmem:[#allocation2 + $0xc8] sm:$0xff] }
 0x2f7   : > { %17380 = vst [vmem:[#allocation30_spill] sm:$0xff] %v13583_v14  ;;  %v2874_v4 = vpop.f32.mrf.mxu2  ;;  %3532 = vrot.lane.b32.xlu1 %v13583_v14, %s11221_s23  ;;  %10451 = vmatmul.msk.f32.gmra.mxu0 %vm277_vm15, %v13313_v41 }
 0x2f8   : > { %v3191_v50 = vpop.f32.mrf.mxu0  ;;  %10469 = vmatmul.msk.f32.gmra.mxu1 %vm277_vm15, %v13587_v60  ;;  %v2894_v30 = vadd.f32 %v2874_v4, %v2740_v13  ;;  %v3384_v15 = vmul.f32 %v13327_v29, %v3364_v23  ;;  %v3511_v25 = vpop.permute.xlu2 %3510  ;;  %10434 = vmatmul.msk.f32.gmra.mxu3 %vm277_vm15, %v13284_v49  ;;  %v17381_v4 = vld [vmem:[#allocation54_spill] sm:$0xff]  ;;  %v3904_v49 = vsel %vm674_vm2, %v13299_v43, %v3903_v38 }
 0x2f9   : > { %3558 = vst.msk [vmem:[#allocation2 + $0xe1] sm:$0xff] %vm277_vm15, %v3511_v25 }
 0x2fa   : > { %v3049_v57 = vadd.f32 %v3029_v62, %v2894_v30  ;;  %v3404_v0 = vadd.f32 %v13334_v42, %v3384_v15  ;;  %v2741_v30 = vadd.f32 %v17381_v4, %v13320_v46 }
 0x2fc   : > { %10417 = vmatmul.msk.f32.gmra.mxu2 %vm277_vm15, %v3661_v5  ;;  %v3211_v27 = vadd.f32 %v3191_v50, %v3049_v57  ;;  %vm3420_vm9 = vcmp.gt.f32.partialorder %v3404_v0, 0.0  ;;  %v3440_v23 = vmul.f32 %v13342_v20, %v3404_v0  ;;  %v3032_v15 = vpop.f32.mrf.mxu3  ;;  %v4025_v57 = vld [vmem:[#allocation2 + $0x28] sm:$0x3] }
 0x2fd   : > { %v3348_v55 = vpop.f32.mrf.mxu1 }
 0x2fe   : > { %v3365_v13 = vadd.f32 %v3345_v54, %v3211_v27  ;;  %v13606_v25 = vsel %vm3420_vm9, %v3404_v0, %v3440_v23 }
 0x2ff   : > { %17382 = vst [vmem:[#allocation38_spill] sm:$0xff] %v13606_v25  ;;  %v2877_v5 = vpop.f32.mrf.mxu2  ;;  %3534 = vrot.lane.b32.xlu2 %v13606_v25, %s11221_s23  ;;  %10452 = vmatmul.msk.f32.gmra.mxu0 %vm277_vm15, %v3904_v49 }
 0x300   : > { %v3194_v62 = vpop.f32.mrf.mxu0  ;;  %10470 = vmatmul.msk.f32.gmra.mxu1 %vm277_vm15, %v13608_v56  ;;  %v2895_v32 = vadd.f32 %v2877_v5, %v2741_v30  ;;  %v3385_v54 = vmul.f32 %v13327_v29, %v3365_v13  ;;  %10491 = vmatmul.msk.f32.vlgmr.msra.gmra.mxu3 %vm277_vm15, %v17338_v11  ;;  %v4192_v30 = vrot.slane %v4025_v57, 1  ;;  %v13630_v11 = vld [vmem:[#allocation2 + $0x40] sm:$0x3] }
 0x302   : > { %v3050_v46 = vadd.f32 %v3032_v15, %v2895_v32  ;;  %v3405_v50 = vadd.f32 %v13334_v42, %v3385_v54  ;;  %v13633_v32 = vld [vmem:[#allocation2 + $0x30] sm:$0xff] }
 0x304   : > { %10473 = vmatmul.msk.f32.vlgmr.msra.gmra.mxu2 %vm277_vm15, %v12942_v16  ;;  %v3212_v0 = vadd.f32 %v3194_v62, %v3050_v46  ;;  %vm3421_vm10 = vcmp.gt.f32.partialorder %v3405_v50, 0.0  ;;  %v3441_v27 = vmul.f32 %v13342_v20, %v3405_v50  ;;  %v3817_v15 = vpop.f32.mrf.mxu3  ;;  %v4350_v16 = vrot.slane %v4025_v57, 2 }
 0x305   : > { %v4117_v38 = vpop.f32.mrf.mxu1  ;;  %v4193_v46 = vsel %vm436_vm1, %v17339_v9, %v4192_v30 }
 0x306   : > { %v3366_v23 = vadd.f32 %v3348_v55, %v3212_v0  ;;  %v13624_v13 = vsel %vm3421_vm10, %v3405_v50, %v3441_v27  ;;  %v4351_v57 = vsel %vm674_vm2, %v17342_v10, %v4350_v16  ;;  %v4675_v0 = vrot.slane %v13630_v11, 1  ;;  %v4028_v16 = vld [vmem:[#allocation2 + $0x40] sm:$0x3] }
 0x307   : > { %17383 = vst [vmem:[#allocation36_spill] sm:$0xff] %v13624_v13  ;;  %v3717_v5 = vpop.f32.mrf.mxu2  ;;  %3536 = vrot.lane.b32.xlu0 %v13624_v13, %s11221_s23  ;;  %10509 = vmatmul.msk.f32.vlgmr.msra.gmra.mxu0 %vm277_vm15, %v13633_v32 }
 0x308   : > { %v3959_v4 = vpop.f32.mrf.mxu0  ;;  %10527 = vmatmul.msk.f32.vlgmr.msra.gmra.mxu1 %vm277_vm15, %v13080_v35  ;;  %v3818_v62 = vadd.f32 %v3817_v15, %v3717_v5  ;;  %v3386_v49 = vmul.f32 %v13327_v29, %v3366_v23  ;;  %v3509_v55 = vpop.permute.xlu1 %3508  ;;  %10492 = vmatmul.msk.f32.gmra.mxu3 %vm277_vm15, %v4351_v57  ;;  %v4676_v9 = vsel %vm436_vm1, %v13053_v12, %v4675_v0  ;;  %v13654_v15 = vld [vmem:[#allocation2 + $0x38] sm:$0xff]  ;;  %v4355_v57 = vrot.slane %v4028_v16, 2 }
 0x309   : > { %3557 = vst.msk [vmem:[#allocation2 + $0xd9] sm:$0xff] %vm277_vm15, %v3509_v55  ;;  %v4197_v55 = vrot.slane %v4028_v16, 1 }
 0x30a   : > { %v4007_v54 = vadd.f32 %v3959_v4, %v3818_v62  ;;  %v3406_v50 = vadd.f32 %v13334_v42, %v3386_v49 }
 0x30c   : > { %10474 = vmatmul.msk.f32.gmra.mxu2 %vm277_vm15, %v4193_v46  ;;  %vm3422_vm11 = vcmp.gt.f32.partialorder %v3406_v50, 0.0  ;;  %v3442_v29 = vmul.f32 %v13342_v20, %v3406_v50  ;;  %v3820_v42 = vpop.f32.mrf.mxu3 }
 0x30d   : > { %v4120_v27 = vpop.f32.mrf.mxu1 }
 0x30e   : > { %v13647_v4 = vsel %vm3422_vm11, %v3406_v50, %v3442_v29  ;;  %v13667_v29 = vld [vmem:[#allocation2 + $0x58] sm:$0x3] }
 0x30f   : > { %17384 = vst [vmem:[#allocation42_spill] sm:$0xff] %v13647_v4  ;;  %v3720_v30 = vpop.f32.mrf.mxu2  ;;  %3538 = vrot.lane.b32.xlu1 %v13647_v4, %s11221_s23  ;;  %10510 = vmatmul.msk.f32.gmra.mxu0 %vm277_vm15, %v13654_v15 }
 0x310   : > { %v3962_v23 = vpop.f32.mrf.mxu0  ;;  %10528 = vmatmul.msk.f32.gmra.mxu1 %vm277_vm15, %v4676_v9  ;;  %v3821_v10 = vadd.f32 %v3820_v42, %v3720_v30  ;;  %v3517_v20 = vpop.permute.xlu2 %3516  ;;  %10493 = vmatmul.msk.f32.gmra.mxu3 %vm277_vm15, %v13088_v44  ;;  %v13673_v44 = vadd.f32 %v4117_v38, %v4007_v54  ;;  %v4198_v42 = vsel %vm436_vm1, %v13053_v12, %v4197_v55  ;;  %v13688_v55 = vld [vmem:[#allocation2 + $0x50] sm:$0xff] }
 0x311   : > { %3561 = vst.msk [vmem:[#allocation2 + $0x109] sm:$0xff] %vm277_vm15, %v3517_v20  ;;  %v4356_v30 = vsel %vm674_vm2, %v13058_v28, %v4355_v57  ;;  %v13695_v57 = vld [vmem:[#allocation2 + $0xe0] sm:$0xff] }
 0x312   : > { %v4008_v5 = vadd.f32 %v3962_v23, %v3821_v10  ;;  %v13669_v23 = vld [vmem:[#allocation2 + $0x48] sm:$0xff]  ;;  %v4680_v10 = vrot.slane %v13667_v29, 1 }
 0x314   : > { %10475 = vmatmul.msk.f32.gmra.mxu2 %vm277_vm15, %v13080_v35  ;;  %v3823_v46 = vpop.f32.mrf.mxu3  ;;  %v4681_v38 = vsel %vm436_vm1, %v13067_v17, %v4680_v10 }
 0x315   : > { %v13663_v62 = vpop.f32.mrf.mxu1 }
 0x317   : > { %v3723_v50 = vpop.f32.mrf.mxu2  ;;  %10511 = vmatmul.msk.f32.gmra.mxu0 %vm277_vm15, %v13669_v23 }
 0x318   : > { %v3965_v49 = vpop.f32.mrf.mxu0  ;;  %10529 = vmatmul.msk.f32.gmra.mxu1 %vm277_vm15, %v13094_v45  ;;  %v3824_v0 = vadd.f32 %v3823_v46, %v3723_v50  ;;  %v3513_v35 = vpop.permute.xlu0 %3512  ;;  %10494 = vmatmul.msk.f32.gmra.mxu3 %vm277_vm15, %v4356_v30  ;;  %v13692_v46 = vadd.f32 %v4120_v27, %v4008_v5  ;;  %v13706_v30 = vrot.slane %v13695_v57, 2 }
 0x319   : > { %3559 = vst.msk [vmem:[#allocation2 + $0xf1] sm:$0xff] %vm277_vm15, %v3513_v35  ;;  %v13701_v35 = vld [vmem:[#allocation2 + $0xe8] sm:$0x3] }
 0x31a   : > { %v4009_v9 = vadd.f32 %v3965_v49, %v3824_v0  ;;  %v4031_v0 = vld [vmem:[#allocation2 + $0x58] sm:$0x3] }
 0x31b   : > { %v4202_v5 = vrot.slane %v4031_v0, 1 }
 0x31c   : > { %10476 = vmatmul.msk.f32.gmra.mxu2 %vm277_vm15, %v4198_v42  ;;  %v3826_v54 = vpop.f32.mrf.mxu3 }
 0x31d   : > { %v13683_v20 = vpop.f32.mrf.mxu1 }
 0x31f   : > { %v3726_v49 = vpop.f32.mrf.mxu2  ;;  %10512 = vmatmul.msk.f32.gmra.mxu0 %vm277_vm15, %v13688_v55 }
 0x320   : > { %v3968_v16 = vpop.f32.mrf.mxu0  ;;  %10530 = vmatmul.msk.f32.gmra.mxu1 %vm277_vm15, %v4681_v38  ;;  %v3827_v12 = vadd.f32 %v3826_v54, %v3726_v49  ;;  %v3515_v28 = vpop.permute.xlu1 %3514  ;;  %10495 = vmatmul.msk.f32.gmra.mxu3 %vm277_vm15, %v13102_v36  ;;  %v4360_v38 = vrot.slane %v4031_v0, 2  ;;  %v4868_v54 = vrot.slane %v13701_v35, 2  ;;  %v13711_v49 = vld [vmem:[#allocation2 + $0x70] sm:$0x3]  ;;  %v13713_v36 = vld [vmem:[#allocation2 + $0x60] sm:$0xff]  ;;  %v4203_v0 = vsel %vm436_vm1, %v13067_v17, %v4202_v5  ;;  %v13734_v5 = vld [vmem:[#allocation2 + $0x68] sm:$0xff] }
 0x321   : > { %3560 = vst.msk [vmem:[#allocation2 + $0xf9] sm:$0xff] %vm277_vm15, %v3515_v28 }
 0x322   : > { %v4010_v50 = vadd.f32 %v3968_v16, %v3827_v12  ;;  %v13719_v28 = vsel %vm674_vm2, %v13706_v30, %v4868_v54 }
 0x323   : > { %17385 = vst [vmem:[#allocation41_spill] sm:$0xff] %v13719_v28  ;;  %v13887_v28 = vld [vmem:[#allocation2 + $0xb8] sm:$0x3] }
 0x324   : > { %10477 = vmatmul.msk.f32.gmra.mxu2 %vm277_vm15, %v13094_v45  ;;  %v3829_v10 = vpop.f32.mrf.mxu3  ;;  %17395 = vst [vmem:[#allocation46_spill] sm:$0xff] %v13887_v28 }
 0x325   : > { %v13703_v42 = vpop.f32.mrf.mxu1 }
 0x327   : > { %v3729_v16 = vpop.f32.mrf.mxu2  ;;  %10513 = vmatmul.msk.f32.gmra.mxu0 %vm277_vm15, %v13713_v36 }
 0x328   : > { %v3971_v27 = vpop.f32.mrf.mxu0  ;;  %10531 = vmatmul.msk.f32.gmra.mxu1 %vm277_vm15, %v17357_v8  ;;  %v3830_v45 = vadd.f32 %v3829_v10, %v3729_v16  ;;  %v4361_v10 = vsel %vm674_vm2, %v17356_v22, %v4360_v38  ;;  %v4685_v16 = vrot.slane %v13711_v49, 1  ;;  %v13739_v38 = vadd.f32 %v13663_v62, %v4009_v9  ;;  %v13750_v62 = vld [vmem:[#allocation2 + $0x88] sm:$0x3]  ;;  %v13752_v9 = vld [vmem:[#allocation2 + $0x78] sm:$0xff] }
 0x329   : > { %v3523_v12 = vpop.permute.xlu2 %3522  ;;  %10496 = vmatmul.msk.f32.gmra.mxu3 %vm277_vm15, %v4361_v10 }
 0x32a   : > { %v4011_v4 = vadd.f32 %v3971_v27, %v3830_v45  ;;  %3564 = vst.msk [vmem:[#allocation2 + $0x129] sm:$0xff] %vm277_vm15, %v3523_v12  ;;  %v4686_v27 = vsel %vm436_vm1, %v17361_v18, %v4685_v16 }
 0x32c   : > { %10478 = vmatmul.msk.f32.gmra.mxu2 %vm277_vm15, %v4203_v0  ;;  %v3832_v54 = vpop.f32.mrf.mxu3  ;;  %v4034_v0 = vld [vmem:[#allocation2 + $0x70] sm:$0x3]  ;;  %v13791_v26 = vadd.f32 %v13703_v42, %v4011_v4 }
 0x32d   : > { %v13729_v13 = vpop.f32.mrf.mxu1  ;;  %v4365_v14 = vrot.slane %v4034_v0, 2 }
 0x32f   : > { %v3732_v45 = vpop.f32.mrf.mxu2  ;;  %10514 = vmatmul.msk.f32.gmra.mxu0 %vm277_vm15, %v13734_v5 }
 0x330   : > { %v3974_v25 = vpop.f32.mrf.mxu0  ;;  %10532 = vmatmul.msk.f32.gmra.mxu1 %vm277_vm15, %v4686_v27  ;;  %v3833_v17 = vadd.f32 %v3832_v54, %v3732_v45  ;;  %v3519_v22 = vpop.permute.xlu0 %3518  ;;  %v4207_v27 = vrot.slane %v4034_v0, 1  ;;  %v4366_v0 = vsel %vm674_vm2, %v13128_v21, %v4365_v14 }
 0x331   : > { %3562 = vst.msk [vmem:[#allocation2 + $0x111] sm:$0xff] %vm277_vm15, %v3519_v22  ;;  %10497 = vmatmul.msk.f32.gmra.mxu3 %vm277_vm15, %v13144_v7  ;;  %v13757_v7 = vadd.f32 %v13683_v20, %v4010_v50  ;;  %v13771_v50 = vld [vmem:[#allocation2 + $0xf0] sm:$0xff] }
 0x332   : > { %v4012_v12 = vadd.f32 %v3974_v25, %v3833_v17  ;;  %v4208_v22 = vsel %vm436_vm1, %v17361_v18, %v4207_v27  ;;  %v5256_v2 = vrot.slane %v13771_v50, 1 }
 0x334   : > { %10479 = vmatmul.msk.f32.gmra.mxu2 %vm277_vm15, %v17357_v8  ;;  %v3835_v54 = vpop.f32.mrf.mxu3  ;;  %v13817_v48 = vadd.f32 %v13729_v13, %v4012_v12  ;;  %v4695_v13 = vrot.slane %v13822_v6, 1 }
 0x335   : > { %v13746_v10 = vpop.f32.mrf.mxu1 }
 0x337   : > { %v3735_v45 = vpop.f32.mrf.mxu2  ;;  %10515 = vmatmul.msk.f32.gmra.mxu0 %vm277_vm15, %v13752_v9 }
 0x338   : > { %v3977_v16 = vpop.f32.mrf.mxu0  ;;  %10533 = vmatmul.msk.f32.gmra.mxu1 %vm277_vm15, %v13193_v40  ;;  %v3836_v25 = vadd.f32 %v3835_v54, %v3735_v45  ;;  %v3521_v8 = vpop.permute.xlu1 %3520  ;;  %v4690_v54 = vrot.slane %v13750_v62, 1 }
 0x339   : > { %3563 = vst.msk [vmem:[#allocation2 + $0x121] sm:$0xff] %vm277_vm15, %v3521_v8  ;;  %10498 = vmatmul.msk.f32.gmra.mxu3 %vm277_vm15, %v4366_v0 }
 0x33a   : > { %v13759_v17 = vadd.f32 %v3977_v16, %v3836_v25  ;;  %v13773_v16 = vld [vmem:[#allocation2 + $0xf8] sm:$0xff]  ;;  %v4691_v25 = vsel %vm436_vm1, %v17367_v31, %v4690_v54  ;;  %v5497_v54 = vrot.slane %v13771_v50, 2 }
 0x33b   : > { %v13778_v21 = vrot.slane %v13773_v16, 1  ;;  %v13781_v14 = vrot.slane %v13773_v16, 2 }
 0x33c   : > { %10480 = vmatmul.msk.f32.gmra.mxu2 %vm277_vm15, %v4208_v22  ;;  %v3838_v18 = vpop.f32.mrf.mxu3  ;;  %v13784_v22 = vld [vmem:[#allocation2 + $0x80] sm:$0xff]  ;;  %v13854_v59 = vadd.f32 %v13746_v10, %v13759_v17 }
 0x33d   : > { %v13769_v45 = vpop.f32.mrf.mxu1  ;;  %v4040_v17 = vld [vmem:[#allocation2 + $0xa0] sm:$0x3] }
 0x33e   : > { %v4217_v6 = vrot.slane %v4040_v17, 1 }
 0x33f   : > { %v3738_v27 = vpop.f32.mrf.mxu2  ;;  %10516 = vmatmul.msk.f32.gmra.mxu0 %vm277_vm15, %v13784_v22 }
 0x340   : > { %v3980_v20 = vpop.f32.mrf.mxu0  ;;  %10534 = vmatmul.msk.f32.gmra.mxu1 %vm277_vm15, %v4691_v25  ;;  %v3839_v8 = vadd.f32 %v3838_v18, %v3738_v27  ;;  %v4037_v25 = vld [vmem:[#allocation2 + $0x88] sm:$0x3]  ;;  %v13800_v18 = vsel %vm674_vm2, %v5497_v54, %v13781_v14  ;;  %v13804_v27 = vsel %vm436_vm1, %v5256_v2, %v13778_v21  ;;  %v13812_v54 = vld [vmem:[#allocation2 + $0x90] sm:$0xff] }
 0x341   : > { %v3529_v0 = vpop.permute.xlu2 %3528  ;;  %10499 = vmatmul.msk.f32.gmra.mxu3 %vm277_vm15, %v17366_v51  ;;  %v4370_v61 = vrot.slane %v4037_v25, 2  ;;  %17386 = vst [vmem:[#allocation32_spill] sm:$0xff] %v13812_v54 }
 0x342   : > { %v13793_v3 = vadd.f32 %v3980_v20, %v3839_v8  ;;  %3567 = vst.msk [vmem:[#allocation2 + $0x151] sm:$0xff] %vm277_vm15, %v3529_v0  ;;  %v4212_v20 = vrot.slane %v4037_v25, 1 }
 0x344   : > { %10481 = vmatmul.msk.f32.gmra.mxu2 %vm277_vm15, %v13193_v40  ;;  %v3841_v8 = vpop.f32.mrf.mxu3  ;;  %v4213_v25 = vsel %vm436_vm1, %v17367_v31, %v4212_v20 }
 0x345   : > { %v13808_v4 = vpop.f32.mrf.mxu1 }
 0x347   : > { %v3741_v0 = vpop.f32.mrf.mxu2  ;;  %10517 = vmatmul.msk.f32.gmra.mxu0 %vm277_vm15, %v13812_v54  ;;  %v4700_v54 = vrot.slane %v13887_v28, 1  ;;  %v10616_v28 = vld [vmem:[%s17030_s3 + $0xc] sm:$0xf] }
 0x348   : > { %v3983_v42 = vpop.f32.mrf.mxu0  ;;  %10535 = vmatmul.msk.f32.gmra.mxu1 %vm277_vm15, %v13240_v39  ;;  %v3842_v40 = vadd.f32 %v3841_v8, %v3741_v0  ;;  %v4371_v8 = vsel %vm674_vm2, %v17372_v1, %v4370_v61  ;;  %10617 = vmatpush.msk.msra.mxu2 %vm3696_vm14, %v10616_v28 }
 0x349   : > { %v3525_v2 = vpop.permute.xlu0 %3524  ;;  %10500 = vmatmul.msk.f32.gmra.mxu3 %vm277_vm15, %v4371_v8  ;;  %v13846_v8 = vld [vmem:[#allocation2 + $0x98] sm:$0xff] }
 0x34a   : > { %v13819_v51 = vadd.f32 %v3983_v42, %v3842_v40  ;;  %3565 = vst.msk [vmem:[#allocation2 + $0x139] sm:$0xff] %vm277_vm15, %v3525_v2  ;;  %v13833_v42 = vld [vmem:[#allocation2 + $0x108] sm:$0xff]  ;;  %v13835_v40 = vld [vmem:[#allocation2 + $0x110] sm:$0xff]  ;;  %v4696_v2 = vsel %vm436_vm1, %v17375_v47, %v4695_v13 }
 0x34b   : > { %17388 = vst [vmem:[#allocation35_spill] sm:$0xff] %v13835_v40  ;;  %v13840_v61 = vrot.slane %v13835_v40, 1  ;;  %v13843_v1 = vrot.slane %v13835_v40, 2  ;;  %v5261_v24 = vrot.slane %v13833_v42, 1  ;;  %v5502_v13 = vrot.slane %v13833_v42, 2  ;;  %v13889_v40 = vld [vmem:[#allocation2 + $0xa8] sm:$0xff] }
 0x34c   : > { %10482 = vmatmul.msk.f32.gmra.mxu2 %vm277_vm15, %v4213_v25  ;;  %v3844_v31 = vpop.f32.mrf.mxu3  ;;  %17390 = vst [vmem:[#allocation49_spill] sm:$0xff] %v13846_v8 }
 0x34d   : > { %v13830_v0 = vpop.f32.mrf.mxu1  ;;  %17389 = vst [vmem:[#allocation39_spill] sm:$0xff] %v13843_v1 }
 0x34e   : > { %17396 = vst [vmem:[#allocation44_spill] sm:$0xff] %v13889_v40 }
 0x34f   : > { %v3744_v20 = vpop.f32.mrf.mxu2  ;;  %10518 = vmatmul.msk.f32.gmra.mxu0 %vm277_vm15, %v13846_v8  ;;  %v4375_v8 = vrot.slane %v4040_v17, 2 }
 0x350   : > { %v3986_v12 = vpop.f32.mrf.mxu0  ;;  %10536 = vmatmul.msk.f32.gmra.mxu1 %vm277_vm15, %v4696_v2  ;;  %v3845_v25 = vadd.f32 %v3844_v31, %v3744_v20  ;;  %v13863_v2 = vsel %vm674_vm2, %v5502_v13, %v13843_v1  ;;  %v13867_v31 = vsel %vm436_vm1, %v5261_v24, %v13840_v61  ;;  %v13873_v20 = vld [vmem:[#allocation2 + $0x120] sm:$0xff] }
 0x351   : > { %v3527_v37 = vpop.permute.xlu1 %3526  ;;  %10501 = vmatmul.msk.f32.gmra.mxu3 %vm277_vm15, %v13244_v63  ;;  %17391 = vst [vmem:[#allocation45_spill] sm:$0xff] %v13873_v20  ;;  %v5266_v13 = vrot.slane %v13873_v20, 1  ;;  %v5507_v24 = vrot.slane %v13873_v20, 2  ;;  %v13895_v20 = vadd.f32 %v13769_v45, %v13793_v3  ;;  %v13978_v28 = vld [vmem:[#allocation2 + $0x138] sm:$0xff] }
 0x352   : > { %v13856_v33 = vadd.f32 %v3986_v12, %v3845_v25  ;;  %3566 = vst.msk [vmem:[#allocation2 + $0x141] sm:$0xff] %vm277_vm15, %v3527_v37  ;;  %v13875_v37 = vld [vmem:[#allocation2 + $0x128] sm:$0xff] }
 0x353   : > { %17392 = vst [vmem:[#allocation50_spill] sm:$0xff] %v13875_v37  ;;  %v13879_v58 = vrot.slane %v13875_v37, 1  ;;  %v13883_v52 = vrot.slane %v13875_v37, 2 }
 0x354   : > { %10483 = vmatmul.msk.f32.gmra.mxu2 %vm277_vm15, %v13240_v39  ;;  %v3847_v39 = vpop.f32.mrf.mxu3  ;;  %17402 = vst [vmem:[#allocation56_spill] sm:$0xff] %v13978_v28 }
 0x355   : > { %v13871_v10 = vpop.f32.mrf.mxu1  ;;  %17393 = vst [vmem:[#allocation43_spill] sm:$0xff] %v13879_v58  ;;  %v13908_v17 = vsel %vm674_vm2, %v5507_v24, %v13883_v52  ;;  %v13912_v3 = vsel %vm436_vm1, %v5266_v13, %v13879_v58  ;;  %v13926_v24 = vadd.f32 %v13808_v4, %v13819_v51 }
 0x356   : > { %17394 = vst [vmem:[#allocation48_spill] sm:$0xff] %v13883_v52 }
 0x357   : > { %v3747_v25 = vpop.f32.mrf.mxu2  ;;  %10519 = vmatmul.msk.f32.gmra.mxu0 %vm277_vm15, %v13889_v40  ;;  %17397 = vst [vmem:[#allocation51_spill] sm:$0xff] %v13908_v17 }
 0x358   : > { %v3989_v12 = vpop.f32.mrf.mxu0  ;;  %10537 = vmatmul.msk.f32.gmra.mxu1 %vm277_vm15, %v13309_v19  ;;  %v3848_v63 = vadd.f32 %v3847_v39, %v3747_v25  ;;  %v4218_v39 = vsel %vm436_vm1, %v17375_v47, %v4217_v6  ;;  %v4376_v25 = vsel %vm674_vm2, %v17378_v53, %v4375_v8  ;;  %v4701_v47 = vsel %vm436_vm1, %v13296_v34, %v4700_v54 }
 0x359   : > { %v3535_v1 = vpop.permute.xlu2 %3534  ;;  %10502 = vmatmul.msk.f32.gmra.mxu3 %vm277_vm15, %v4376_v25  ;;  %17399 = vst [vmem:[#allocation52_spill] sm:$0xff] %v13926_v24  ;;  %v13932_v54 = vrot.slane %v13608_v56, 1  ;;  %v4224_v25 = vrot.slane %v13587_v60, 1 }
 0x35a   : > { %v13897_v37 = vadd.f32 %v3989_v12, %v3848_v63  ;;  %3570 = vst.msk [vmem:[#allocation2 + $0x171] sm:$0xff] %vm277_vm15, %v3535_v1  ;;  %v13920_v12 = vld [vmem:[#allocation2 + $0xb0] sm:$0xff] }
 0x35b   : > { %17398 = vst [vmem:[#allocation47_spill] sm:$0xff] %v13920_v12 }
 0x35c   : > { %10484 = vmatmul.msk.f32.gmra.mxu2 %vm277_vm15, %v4218_v39  ;;  %v3850_v53 = vpop.f32.mrf.mxu3  ;;  %v4043_v39 = vld [vmem:[#allocation2 + $0xb8] sm:$0x3]  ;;  %v14000_v52 = vadd.f32 %v13871_v10, %v13897_v37 }
 0x35d   : > { %v13915_v45 = vpop.f32.mrf.mxu1  ;;  %v4222_v51 = vrot.slane %v4043_v39, 1 }
 0x35e   : > { %17406 = vst [vmem:[#allocation60_spill] sm:$0xff] %v14000_v52 }
 0x35f   : > { %v3750_v1 = vpop.f32.mrf.mxu2  ;;  %10520 = vmatmul.msk.f32.gmra.mxu0 %vm277_vm15, %v13920_v12 }
 0x360   : > { %v3992_v6 = vpop.f32.mrf.mxu0  ;;  %10538 = vmatmul.msk.f32.gmra.mxu1 %vm277_vm15, %v4701_v47  ;;  %v3851_v8 = vadd.f32 %v3850_v53, %v3750_v1 }
 0x361   : > { %v3531_v13 = vpop.permute.xlu0 %3530  ;;  %10503 = vmatmul.msk.f32.gmra.mxu3 %vm277_vm15, %v13313_v41 }
 0x362   : > { %v13928_v63 = vadd.f32 %v3992_v6, %v3851_v8  ;;  %3568 = vst.msk [vmem:[#allocation2 + $0x159] sm:$0xff] %vm277_vm15, %v3531_v13  ;;  %v13943_v6 = vsel %vm436_vm1, %v4224_v25, %v13932_v54  ;;  %v4380_v8 = vrot.slane %v4043_v39, 2  ;;  %v13947_v13 = vld [vmem:[#allocation2 + $0xd0] sm:$0x3]  ;;  %v13956_v25 = vadd.f32 %v13830_v0, %v13856_v33 }
 0x363   : > { %17400 = vst [vmem:[#allocation53_spill] sm:$0xff] %v13947_v13  ;;  %v4223_v39 = vsel %vm436_vm1, %v13296_v34, %v4222_v51  ;;  %v10634_v0 = vld [vmem:[%s17030_s3 + $0x10] sm:$0xf] }
 0x364   : > { %10485 = vmatmul.msk.f32.gmra.mxu2 %vm277_vm15, %v13309_v19  ;;  %v3853_v53 = vpop.f32.mrf.mxu3  ;;  %17401 = vst [vmem:[#allocation54_spill] sm:$0xff] %v13956_v25  ;;  %10635 = vmatpush.msk.msra.mxu3 %vm3696_vm14, %v10634_v0  ;;  %v5512_v25 = vrot.slane %v13978_v28, 2 }
 0x365   : > { %v13939_v47 = vpop.f32.mrf.mxu1 }
 0x367   : > { %v3753_v1 = vpop.f32.mrf.mxu2  ;;  %10521 = vmatmul.msk.f32.gmra.mxu0 %vm277_vm15, %v13587_v60 }
 0x368   : > { %v3995_v4 = vpop.f32.mrf.mxu0  ;;  %10539 = vmatmul.msk.f32.gmra.mxu1 %vm277_vm15, %v13943_v6  ;;  %v3854_v19 = vadd.f32 %v3853_v53, %v3753_v1  ;;  %v4381_v53 = vsel %vm674_vm2, %v13299_v43, %v4380_v8  ;;  %v4705_v1 = vrot.slane %v13947_v13, 1  ;;  %v13980_v43 = vld [vmem:[#allocation2 + $0x140] sm:$0xff]  ;;  %v13992_v13 = vld [vmem:[#allocation2 + $0xd8] sm:$0xff] }
 0x369   : > { %v3533_v41 = vpop.permute.xlu1 %3532  ;;  %10504 = vmatmul.msk.f32.gmra.mxu3 %vm277_vm15, %v4381_v53  ;;  %17403 = vst [vmem:[#allocation57_spill] sm:$0xff] %v13980_v43  ;;  %v4382_v53 = vrot.slane %v13587_v60, 2 }
 0x36a   : > { %v13958_v40 = vadd.f32 %v3995_v4, %v3854_v19  ;;  %3569 = vst.msk [vmem:[#allocation2 + $0x169] sm:$0xff] %vm277_vm15, %v3533_v41  ;;  %v13975_v4 = vrot.slane %v13608_v56, 2  ;;  %v4706_v51 = vsel %vm436_vm1, %v13932_v54, %v4705_v1  ;;  %v13985_v41 = vrot.slane %v13980_v43, 1 }
 0x36b   : > { %v5271_v1 = vrot.slane %v13978_v28, 1 }
 0x36c   : > { %10486 = vmatmul.msk.f32.gmra.mxu2 %vm277_vm15, %v4223_v39  ;;  %v3856_v8 = vpop.f32.mrf.mxu3  ;;  %17404 = vst [vmem:[#allocation58_spill] sm:$0xff] %v13985_v41  ;;  %v13988_v39 = vrot.slane %v13980_v43, 2  ;;  %v14006_v12 = vsel %vm674_vm2, %v4382_v53, %v13975_v4  ;;  %v10670_v53 = vld [vmem:[%s17030_s3 + $0x18] sm:$0xf]  ;;  %v14079_v24 = vadd.f32 %v13939_v47, %v13958_v40 }
 0x36d   : > { %v13969_v33 = vpop.f32.mrf.mxu1  ;;  %v14020_v10 = vsel %vm436_vm1, %v5271_v1, %v13985_v41  ;;  %10671 = vmatpush.msk.msra.mxu1 %vm3696_vm14, %v10670_v53 }
 0x36e   : > { %17405 = vst [vmem:[#allocation59_spill] sm:$0xff] %v13988_v39  ;;  %v14016_v28 = vsel %vm674_vm2, %v5512_v25, %v13988_v39 }
 0x36f   : > { %v3756_v19 = vpop.f32.mrf.mxu2  ;;  %10522 = vmatmul.msk.f32.gmra.mxu0 %vm277_vm15, %v13608_v56  ;;  %17407 = vst [vmem:[#allocation61_spill] sm:$0xff] %v14016_v28 }
 0x370   : > { %v3998_v34 = vpop.f32.mrf.mxu0  ;;  %10540 = vmatmul.msk.f32.gmra.mxu1 %vm277_vm15, %v4706_v51  ;;  %v3857_v0 = vadd.f32 %v3856_v8, %v3756_v19  ;;  %v4707_v51 = vrot.slane %v13992_v13, 1  ;;  %v14010_v8 = vrot.slane %v13695_v57, 1  ;;  %v4046_v19 = vld [vmem:[#allocation2 + $0xd0] sm:$0x3]  ;;  %17408 = vst [vmem:[#allocation62_spill] sm:$0xff] %v14020_v10 }
 0x371   : > { %10505 = vmatmul.msk.f32.gmra.mxu3 %vm277_vm15, %v14006_v12  ;;  %v4227_v25 = vrot.slane %v4046_v19, 1  ;;  %v4385_v52 = vrot.slane %v4046_v19, 2  ;;  %17414 = vst [vmem:[#allocation68_spill] sm:$0xff] %v14079_v24 }
 0x372   : > { %v14002_v43 = vadd.f32 %v3998_v34, %v3857_v0  ;;  %v10652_v34 = vld [vmem:[%s17030_s3 + $0x14] sm:$0xf]  ;;  %v14036_v1 = vsel %vm436_vm1, %v4707_v51, %v14010_v8 }
 0x373   : > { %10653 = vmatpush.msk.msra.mxu0 %vm3696_vm14, %v10652_v34  ;;  %v14044_v34 = vadd.f32 %v13915_v45, %v13928_v63  ;;  %v4228_v51 = vsel %vm436_vm1, %v13932_v54, %v4227_v25  ;;  %v4386_v19 = vsel %vm674_vm2, %v13975_v4, %v4385_v52  ;;  %v4831_v63 = vrot.slane %v13654_v15, 2 }
 0x374   : > { %10487 = vmatmul.msk.f32.gmra.mxu2 %vm277_vm15, %v13943_v6  ;;  %v3859_v39 = vpop.f32.mrf.mxu3  ;;  %v4830_v15 = vrot.slane %v13633_v32, 2  ;;  %v5199_v32 = vld [vmem:[#allocation2 + $0xd0] sm:$0x3] }
 0x375   : > { %v14024_v37 = vpop.f32.mrf.mxu1  ;;  %17409 = vst [vmem:[#allocation63_spill] sm:$0xff] %v14044_v34 }
 0x377   : > { %v3759_v41 = vpop.f32.mrf.mxu2  ;;  %10523 = vmatmul.msk.f32.gmra.mxu0 %vm277_vm15, %v13992_v13 }
 0x378   : > { %v4001_v0 = vpop.f32.mrf.mxu0  ;;  %10541 = vmatmul.msk.f32.gmra.mxu1 %vm277_vm15, %v14036_v1  ;;  %v3860_v28 = vadd.f32 %v3859_v39, %v3759_v41  ;;  %v4710_v39 = vrot.slane %v13701_v35, 1 }
 0x379   : > { %v3537_v10 = vpop.permute.xlu0 %3536  ;;  %10506 = vmatmul.msk.f32.gmra.mxu3 %vm277_vm15, %v4386_v19 }
 0x37a   : > { %v14046_v53 = vadd.f32 %v4001_v0, %v3860_v28  ;;  %3571 = vst.msk [vmem:[#allocation2 + $0x181] sm:$0xff] %vm277_vm15, %v3537_v10  ;;  %v14059_v28 = vld [vmem:[#allocation2 + $0x150] sm:$0xff]  ;;  %v14061_v10 = vld [vmem:[#allocation2 + $0x158] sm:$0xff]  ;;  %v4711_v0 = vsel %vm436_vm1, %v14010_v8, %v4710_v39 }
 0x37b   : > { %17410 = vst [vmem:[#allocation64_spill] sm:$0xff] %v14059_v28  ;;  %v14069_v19 = vrot.slane %v14061_v10, 2  ;;  %v5276_v58 = vrot.slane %v14059_v28, 1  ;;  %v5517_v39 = vrot.slane %v14059_v28, 2 }
 0x37c   : > { %10488 = vmatmul.msk.f32.gmra.mxu2 %vm277_vm15, %v4228_v51  ;;  %17411 = vst [vmem:[#allocation65_spill] sm:$0xff] %v14061_v10  ;;  %v3862_v25 = vpop.f32.mrf.mxu3  ;;  %v14066_v51 = vrot.slane %v14061_v10, 1 }
 0x37d   : > { %v14055_v41 = vpop.f32.mrf.mxu1  ;;  %17413 = vst [vmem:[#allocation67_spill] sm:$0xff] %v14069_v19 }
 0x37e   : > { %17412 = vst [vmem:[#allocation66_spill] sm:$0xff] %v14066_v51 }
 0x37f   : > { %v3762_v52 = vpop.f32.mrf.mxu2  ;;  %10524 = vmatmul.msk.f32.gmra.mxu0 %vm277_vm15, %v13695_v57 }
 0x380   : > { %v4004_v45 = vpop.f32.mrf.mxu0  ;;  %10542 = vmatmul.msk.f32.gmra.mxu1 %vm277_vm15, %v4711_v0  ;;  %v3863_v35 = vadd.f32 %v3862_v25, %v3762_v52  ;;  %v4832_v0 = vsel %vm674_vm2, %v4830_v15, %v4831_v63  ;;  %v14086_v25 = vsel %vm674_vm2, %v5517_v39, %v14069_v19  ;;  %v14090_v52 = vsel %vm436_vm1, %v5276_v58, %v14066_v51  ;;  %v14101_v15 = vld [vmem:[#allocation2 + $0x170] sm:$0xff] }
 0x381   : > { %v3539_v34 = vpop.permute.xlu1 %3538  ;;  %17415 = vst [vmem:[#allocation69_spill] sm:$0xff] %v14090_v52  ;;  %10565 = vmatmul.msk.f32.vlgmr.msrb.gmra.mxu3 %vm277_vm15, %v13943_v6  ;;  %v14105_v58 = vrot.slane %v14101_v15, 1  ;;  %v14109_v19 = vrot.slane %v14101_v15, 2  ;;  %v14118_v51 = vadd.f32 %v13969_v33, %v14002_v43  ;;  %v4836_v43 = vrot.slane %v13688_v55, 2 }
 0x382   : > { %v4022_v17 = vadd.f32 %v4004_v45, %v3863_v35  ;;  %3572 = vst.msk [vmem:[#allocation2 + $0x189] sm:$0xff] %vm277_vm15, %v3539_v34  ;;  %v5249_v34 = vrot.slane %v5199_v32, 1  ;;  %v4833_v45 = vrot.slane %v13630_v11, 2  ;;  %v14099_v35 = vld [vmem:[#allocation2 + $0x168] sm:$0xff] }
 0x383   : > { %17416 = vst [vmem:[#allocation70_spill] sm:$0xff] %v14099_v35  ;;  %v5281_v10 = vrot.slane %v14099_v35, 1  ;;  %v5522_v6 = vrot.slane %v14099_v35, 2 }
 0x384   : > { %10545 = vmatmul.msk.f32.vlgmr.msrb.gmra.mxu2 %vm277_vm15, %v4832_v0  ;;  %17417 = vst [vmem:[#allocation71_spill] sm:$0xff] %v14101_v15  ;;  %v4441_v39 = vpop.f32.mrf.mxu3  ;;  %v4834_v24 = vsel %vm674_vm2, %v4831_v63, %v4833_v45  ;;  %v5250_v35 = vsel %vm436_vm1, %v13932_v54, %v5249_v34  ;;  %v5490_v15 = vrot.slane %v5199_v32, 2  ;;  %v14147_v34 = vadd.f32 %v14024_v37, %v14046_v53 }
 0x385   : > { %v14094_v40 = vpop.f32.mrf.mxu1  ;;  %17418 = vst [vmem:[#allocation72_spill] sm:$0xff] %v14105_v58 }
 0x386   : > { %17419 = vst [vmem:[#allocation73_spill] sm:$0xff] %v14109_v19  ;;  %v5491_v54 = vsel %vm674_vm2, %v13975_v4, %v5490_v15  ;;  %v5492_v4 = vrot.slane %v13992_v13, 2 }
 0x387   : > { %v4283_v0 = vpop.f32.mrf.mxu2  ;;  %10582 = vmatmul.msk.f32.vlgmr.msrb.gmra.mxu0 %vm277_vm15, %v13587_v60  ;;  %v14130_v60 = vsel %vm436_vm1, %v5281_v10, %v14105_v58  ;;  %v4835_v10 = vrot.slane %v13669_v23, 2 }
 0x388   : > { %v14096_v47 = vpop.f32.mrf.mxu0  ;;  %10600 = vmatmul.msk.f32.vlgmr.msrb.gmra.mxu1 %vm277_vm15, %v14006_v12  ;;  %v4331_v11 = vadd.f32 %v4283_v0, %v13673_v44  ;;  %v14126_v12 = vsel %vm674_vm2, %v5522_v6, %v14109_v19  ;;  %v14161_v37 = vsel %vm674_vm2, %v5492_v4, %v13706_v30  ;;  %v14169_v6 = vadd.f32 %v14055_v41, %v4022_v17 }
 0x389   : > { %17420 = vst [vmem:[#allocation74_spill] sm:$0xff] %v14126_v12  ;;  %10566 = vmatmul.msk.f32.gmra.mxu3 %vm277_vm15, %v5250_v35  ;;  %v4837_v55 = vsel %vm674_vm2, %v4835_v10, %v4836_v43  ;;  %v5202_v35 = vld [vmem:[#allocation2 + $0xe8] sm:$0x3]  ;;  %v4841_v17 = vrot.slane %v13734_v5, 2 }
 0x38a   : > { %v4489_v28 = vadd.f32 %v4441_v39, %v4331_v11  ;;  %v5254_v0 = vrot.slane %v5202_v35, 1  ;;  %v14183_v41 = vld [vmem:[#allocation2 + $0x188] sm:$0xff] }
 0x38b   : > { %17422 = vst [vmem:[#allocation76_spill] sm:$0xff] %v14183_v41  ;;  %v14188_v4 = vrot.slane %v14183_v41, 1 }
 0x38c   : > { %10546 = vmatmul.msk.f32.gmra.mxu2 %vm277_vm15, %v4834_v24  ;;  %v4444_v24 = vpop.f32.mrf.mxu3 }
 0x38d   : > { %v14133_v44 = vpop.f32.mrf.mxu1  ;;  %17423 = vst [vmem:[#allocation77_spill] sm:$0xff] %v14188_v4 }
 0x38f   : > { %v4286_v63 = vpop.f32.mrf.mxu2  ;;  %10583 = vmatmul.msk.f32.gmra.mxu0 %vm277_vm15, %v13608_v56  ;;  %v4838_v56 = vrot.slane %v13667_v29, 2 }
 0x390   : > { %v14135_v33 = vpop.f32.mrf.mxu0  ;;  %10601 = vmatmul.msk.f32.gmra.mxu1 %vm277_vm15, %v5491_v54  ;;  %v4332_v32 = vadd.f32 %v4286_v63, %v13692_v46  ;;  %v5255_v54 = vsel %vm436_vm1, %v14010_v8, %v5254_v0  ;;  %v14178_v63 = vld [vmem:[#allocation2 + $0x180] sm:$0xff] }
 0x391   : > { %10567 = vmatmul.msk.f32.gmra.mxu3 %vm277_vm15, %v14036_v1  ;;  %v4839_v29 = vsel %vm674_vm2, %v4836_v43, %v4838_v56  ;;  %17421 = vst [vmem:[#allocation75_spill] sm:$0xff] %v14178_v63  ;;  %v14191_v56 = vrot.slane %v14183_v41, 2  ;;  %v6319_v5 = vrot.slane %v14178_v63, 1 }
 0x392   : > { %v4490_v45 = vadd.f32 %v4444_v24, %v4332_v32 }
 0x393   : > { %17424 = vst [vmem:[#allocation78_spill] sm:$0xff] %v14191_v56 }
 0x394   : > { %10547 = vmatmul.msk.f32.gmra.mxu2 %vm277_vm15, %v4837_v55  ;;  %v4447_v53 = vpop.f32.mrf.mxu3 }
 0x395   : > { %v14154_v46 = vpop.f32.mrf.mxu1 }
 0x397   : > { %v4289_v15 = vpop.f32.mrf.mxu2  ;;  %10584 = vmatmul.msk.f32.gmra.mxu0 %vm277_vm15, %v13992_v13 }
 0x398   : > { %v14156_v23 = vpop.f32.mrf.mxu0  ;;  %10602 = vmatmul.msk.f32.gmra.mxu1 %vm277_vm15, %v14161_v37  ;;  %v4333_v39 = vadd.f32 %v4289_v15, %v13739_v38  ;;  %v5495_v38 = vrot.slane %v5202_v35, 2  ;;  %v6476_v15 = vrot.slane %v14178_v63, 2 }
 0x399   : > { %10568 = vmatmul.msk.f32.gmra.mxu3 %vm277_vm15, %v5255_v54 }
 0x39a   : > { %v4491_v11 = vadd.f32 %v4447_v53, %v4333_v39  ;;  %v5496_v43 = vsel %vm674_vm2, %v13706_v30, %v5495_v38  ;;  %v4840_v53 = vrot.slane %v13713_v36, 2  ;;  %v4648_v39 = vadd.f32 %v14096_v47, %v4489_v28 }
 0x39b   : > { %v14204_v54 = vsel %vm674_vm2, %v6476_v15, %v14191_v56  ;;  %v4843_v38 = vrot.slane %v13711_v49, 2 }
 0x39c   : > { %10548 = vmatmul.msk.f32.gmra.mxu2 %vm277_vm15, %v4839_v29  ;;  %v4450_v10 = vpop.f32.mrf.mxu3  ;;  %v4842_v29 = vsel %vm674_vm2, %v4840_v53, %v4841_v17  ;;  %17425 = vst [vmem:[#allocation79_spill] sm:$0xff] %v14204_v54  ;;  %v14212_v36 = vadd.f32 %v14094_v40, %v4648_v39  ;;  %v4649_v40 = vadd.f32 %v14135_v33, %v4490_v45 }
 0x39d   : > { %v14176_v24 = vpop.f32.mrf.mxu1 }
 0x39e   : > { %v14230_v39 = vadd.f32 %v14133_v44, %v4649_v40  ;;  %v4650_v44 = vadd.f32 %v14156_v23, %v4491_v11 }
 0x39f   : > { %v4292_v55 = vpop.f32.mrf.mxu2  ;;  %10585 = vmatmul.msk.f32.gmra.mxu0 %vm277_vm15, %v13695_v57  ;;  %v5205_v57 = vld [vmem:[#allocation2 + $0x100] sm:$0x3] }
 0x3a0   : > { %v14180_v32 = vpop.f32.mrf.mxu0  ;;  %10603 = vmatmul.msk.f32.gmra.mxu1 %vm277_vm15, %v5496_v43  ;;  %v4334_v35 = vadd.f32 %v4292_v55, %v13757_v7  ;;  %v14208_v7 = vsel %vm436_vm1, %v6319_v5, %v14188_v4  ;;  %v5259_v55 = vrot.slane %v5205_v57, 1  ;;  %v4844_v5 = vsel %vm674_vm2, %v4841_v17, %v4843_v38  ;;  %v17446_v4 = vld [vmem:[#allocation58_spill] sm:$0xff] }
 0x3a1   : > { %17426 = vst [vmem:[#allocation80_spill] sm:$0xff] %v14208_v7  ;;  %10569 = vmatmul.msk.f32.gmra.mxu3 %vm277_vm15, %v13804_v27  ;;  %v5500_v49 = vrot.slane %v5205_v57, 2  ;;  %v4845_v38 = vrot.slane %v13752_v9, 2 }
 0x3a2   : > { %v4492_v0 = vadd.f32 %v4450_v10, %v4334_v35  ;;  %v5260_v15 = vsel %vm436_vm1, %v13778_v21, %v5259_v55  ;;  %v5208_v55 = vld [vmem:[#allocation2 + $0x118] sm:$0x3] }
 0x3a3   : > { %v5501_v33 = vsel %vm674_vm2, %v13781_v14, %v5500_v49  ;;  %v5264_v23 = vrot.slane %v5208_v55, 1 }
 0x3a4   : > { %10549 = vmatmul.msk.f32.gmra.mxu2 %vm277_vm15, %v4842_v29  ;;  %v4453_v43 = vpop.f32.mrf.mxu3 }
 0x3a5   : > { %v14216_v28 = vpop.f32.mrf.mxu1  ;;  %v5265_v49 = vsel %vm436_vm1, %v13840_v61, %v5264_v23 }
 0x3a7   : > { %v4295_v10 = vpop.f32.mrf.mxu2  ;;  %10586 = vmatmul.msk.f32.gmra.mxu0 %vm277_vm15, %v13771_v50  ;;  %v4846_v50 = vrot.slane %v13784_v22, 2  ;;  %v14247_v22 = vadd.f32 %v14154_v46, %v4650_v44  ;;  %v4651_v46 = vadd.f32 %v14180_v32, %v4492_v0  ;;  %v17428_v32 = vld [vmem:[#allocation49_spill] sm:$0xff] }
 0x3a8   : > { %v4612_v47 = vpop.f32.mrf.mxu0  ;;  %10604 = vmatmul.msk.f32.gmra.mxu1 %vm277_vm15, %v13800_v18  ;;  %v4335_v35 = vadd.f32 %v4295_v10, %v13791_v26  ;;  %v4851_v0 = vrot.slane %v17428_v32, 2 }
 0x3a9   : > { %10570 = vmatmul.msk.f32.gmra.mxu3 %vm277_vm15, %v5260_v15  ;;  %v4847_v10 = vsel %vm674_vm2, %v4845_v38, %v4846_v50 }
 0x3aa   : > { %v4493_v53 = vadd.f32 %v4453_v43, %v4335_v35  ;;  %v4848_v35 = vrot.slane %v13750_v62, 2  ;;  %v5505_v62 = vrot.slane %v5208_v55, 2 }
 0x3ac   : > { %10550 = vmatmul.msk.f32.gmra.mxu2 %vm277_vm15, %v4844_v5  ;;  %v4456_v45 = vpop.f32.mrf.mxu3  ;;  %v4849_v15 = vsel %vm674_vm2, %v4846_v50, %v4848_v35  ;;  %v4652_v55 = vadd.f32 %v4612_v47, %v4493_v53  ;;  %v17432_v47 = vld [vmem:[#allocation52_spill] sm:$0xff] }
 0x3ad   : > { %v14233_v26 = vpop.f32.mrf.mxu1 }
 0x3af   : > { %v4298_v17 = vpop.f32.mrf.mxu2  ;;  %10587 = vmatmul.msk.f32.gmra.mxu0 %vm277_vm15, %v13773_v16 }
 0x3b0   : > { %v4615_v29 = vpop.f32.mrf.mxu0  ;;  %10605 = vmatmul.msk.f32.gmra.mxu1 %vm277_vm15, %v5501_v33  ;;  %v4336_v57 = vadd.f32 %v4298_v17, %v13817_v48  ;;  %v14265_v33 = vadd.f32 %v14176_v24, %v4651_v46  ;;  %v17430_v24 = vld [vmem:[#allocation35_spill] sm:$0xff] }
 0x3b1   : > { %10571 = vmatmul.msk.f32.gmra.mxu3 %vm277_vm15, %v13867_v31 }
 0x3b2   : > { %v4494_v43 = vadd.f32 %v4456_v45, %v4336_v57  ;;  %v17429_v57 = vld [vmem:[#allocation39_spill] sm:$0xff] }
 0x3b3   : > { %v5506_v50 = vsel %vm674_vm2, %v17429_v57, %v5505_v62  ;;  %v17433_v62 = vld [vmem:[#allocation40_spill] sm:$0xff] }
 0x3b4   : > { %10551 = vmatmul.msk.f32.gmra.mxu2 %vm277_vm15, %v4847_v10  ;;  %v4459_v16 = vpop.f32.mrf.mxu3  ;;  %v4653_v32 = vadd.f32 %v4615_v29, %v4494_v43  ;;  %v17437_v29 = vld [vmem:[#allocation48_spill] sm:$0xff] }
 0x3b5   : > { %v14251_v48 = vpop.f32.mrf.mxu1 }
 0x3b7   : > { %v4301_v40 = vpop.f32.mrf.mxu2  ;;  %10588 = vmatmul.msk.f32.gmra.mxu0 %vm277_vm15, %v13833_v42  ;;  %v17427_v42 = vld [vmem:[#allocation32_spill] sm:$0xff] }
 0x3b8   : > { %v4618_v9 = vpop.f32.mrf.mxu0  ;;  %10606 = vmatmul.msk.f32.gmra.mxu1 %vm277_vm15, %v13863_v2  ;;  %v4337_v11 = vadd.f32 %v4301_v40, %v13854_v59  ;;  %v4850_v17 = vrot.slane %v17427_v42, 2  ;;  %v14281_v40 = vadd.f32 %v14216_v28, %v4652_v55  ;;  %v4853_v42 = vrot.slane %v17433_v62, 2 }
 0x3b9   : > { %10572 = vmatmul.msk.f32.gmra.mxu3 %vm277_vm15, %v5265_v49  ;;  %v17431_v49 = vld [vmem:[#allocation51_spill] sm:$0xff] }
 0x3ba   : > { %v4495_v5 = vadd.f32 %v4459_v16, %v4337_v11  ;;  %v4852_v16 = vsel %vm674_vm2, %v4850_v17, %v4851_v0  ;;  %v17434_v17 = vld [vmem:[#allocation45_spill] sm:$0xff] }
 0x3bc   : > { %10552 = vmatmul.msk.f32.gmra.mxu2 %vm277_vm15, %v4849_v15  ;;  %v4462_v38 = vpop.f32.mrf.mxu3 }
 0x3bd   : > { %v14268_v59 = vpop.f32.mrf.mxu1 }
 0x3bf   : > { %v4304_v44 = vpop.f32.mrf.mxu2  ;;  %10589 = vmatmul.msk.f32.gmra.mxu0 %vm277_vm15, %v17430_v24  ;;  %v14300_v24 = vadd.f32 %v14233_v26, %v4653_v32  ;;  %v4654_v32 = vadd.f32 %v4618_v9, %v4495_v5 }
 0x3c0   : > { %v4621_v45 = vpop.f32.mrf.mxu0  ;;  %10607 = vmatmul.msk.f32.gmra.mxu1 %vm277_vm15, %v5506_v50  ;;  %v4338_v10 = vadd.f32 %v4304_v44, %v13895_v20  ;;  %v5211_v20 = vld [vmem:[#allocation2 + $0x130] sm:$0x3]  ;;  %v17435_v44 = vld [vmem:[#allocation43_spill] sm:$0xff] }
 0x3c1   : > { %10573 = vmatmul.msk.f32.gmra.mxu3 %vm277_vm15, %v13912_v3  ;;  %v5269_v28 = vrot.slane %v5211_v20, 1 }
 0x3c2   : > { %v4496_v35 = vadd.f32 %v4462_v38, %v4338_v10  ;;  %v4854_v38 = vsel %vm674_vm2, %v4851_v0, %v4853_v42 }
 0x3c3   : > { %v5270_v10 = vsel %vm436_vm1, %v17435_v44, %v5269_v28  ;;  %v17440_v28 = vld [vmem:[#allocation50_spill] sm:$0xff] }
 0x3c4   : > { %10553 = vmatmul.msk.f32.gmra.mxu2 %vm277_vm15, %v4852_v16  ;;  %v4465_v46 = vpop.f32.mrf.mxu3  ;;  %v5510_v16 = vrot.slane %v5211_v20, 2 }
 0x3c5   : > { %v14285_v23 = vpop.f32.mrf.mxu1 }
 0x3c6   : > { %v5511_v43 = vsel %vm674_vm2, %v17437_v29, %v5510_v16  ;;  %v17441_v16 = vld [vmem:[#allocation62_spill] sm:$0xff] }
 0x3c7   : > { %v4307_v15 = vpop.f32.mrf.mxu2  ;;  %10590 = vmatmul.msk.f32.gmra.mxu0 %vm277_vm15, %v17434_v17  ;;  %v17439_v17 = vld [vmem:[#allocation44_spill] sm:$0xff] }
 0x3c8   : > { %v14287_v11 = vpop.f32.mrf.mxu0  ;;  %10608 = vmatmul.msk.f32.gmra.mxu1 %vm277_vm15, %v17431_v49  ;;  %v4339_v53 = vadd.f32 %v4307_v15, %v17432_v47  ;;  %v17436_v47 = vld [vmem:[#allocation47_spill] sm:$0xff]  ;;  %v4855_v26 = vrot.slane %v17439_v17, 2 }
 0x3c9   : > { %10574 = vmatmul.msk.f32.gmra.mxu3 %vm277_vm15, %v5270_v10  ;;  %v4856_v62 = vrot.slane %v17436_v47, 2  ;;  %v14316_v10 = vadd.f32 %v14251_v48, %v4654_v32  ;;  %v5214_v47 = vld [vmem:[#allocation2 + $0x148] sm:$0x3]  ;;  %v4655_v32 = vadd.f32 %v4621_v45, %v4496_v35  ;;  %v17447_v35 = vld [vmem:[#allocation59_spill] sm:$0xff] }
 0x3ca   : > { %v4497_v50 = vadd.f32 %v4465_v46, %v4339_v53  ;;  %v17438_v53 = vld [vmem:[#allocation54_spill] sm:$0xff]  ;;  %v5274_v5 = vrot.slane %v5214_v47, 1  ;;  %v17445_v48 = vld [vmem:[#allocation56_spill] sm:$0xff]  ;;  %v5515_v7 = vrot.slane %v5214_v47, 2  ;;  %v17448_v47 = vld [vmem:[#allocation63_spill] sm:$0xff] }
 0x3cb   : > { %v4857_v20 = vsel %vm674_vm2, %v4855_v26, %v4856_v62 }
 0x3cc   : > { %10554 = vmatmul.msk.f32.gmra.mxu2 %vm277_vm15, %v4854_v38  ;;  %v4468_v0 = vpop.f32.mrf.mxu3  ;;  %v5275_v54 = vsel %vm436_vm1, %v17446_v4, %v5274_v5  ;;  %v11139_v5 = vld [vmem:[#allocation2 + $0xc0] sm:$0xff] }
 0x3cd   : > { %v14303_v55 = vpop.f32.mrf.mxu1 }
 0x3cf   : > { %v4310_v46 = vpop.f32.mrf.mxu2  ;;  %10591 = vmatmul.msk.f32.gmra.mxu0 %vm277_vm15, %v17440_v28 }
 0x3d0   : > { %v4627_v15 = vpop.f32.mrf.mxu0  ;;  %10609 = vmatmul.msk.f32.gmra.mxu1 %vm277_vm15, %v5511_v43  ;;  %v4340_v42 = vadd.f32 %v4310_v46, %v17438_v53  ;;  %v17442_v53 = vld [vmem:[#allocation46_spill] sm:$0xff] }
 0x3d1   : > { %10575 = vmatmul.msk.f32.gmra.mxu3 %vm277_vm15, %v17441_v16  ;;  %v4858_v17 = vrot.slane %v17442_v53, 2  ;;  %v14335_v53 = vadd.f32 %v14268_v59, %v4655_v32  ;;  %v4860_v59 = vrot.slane %v11139_v5, 2 }
 0x3d2   : > { %v4498_v38 = vadd.f32 %v4468_v0, %v4340_v42  ;;  %v17443_v0 = vld [vmem:[#allocation61_spill] sm:$0xff]  ;;  %v17444_v42 = vld [vmem:[#allocation60_spill] sm:$0xff] }
 0x3d3   : > { %v4859_v56 = vsel %vm674_vm2, %v4856_v62, %v4858_v17  ;;  %v5516_v62 = vsel %vm674_vm2, %v17447_v35, %v5515_v7 }
 0x3d4   : > { %10555 = vmatmul.msk.f32.gmra.mxu2 %vm277_vm15, %v4857_v20  ;;  %v4471_v28 = vpop.f32.mrf.mxu3 }
 0x3d5   : > { %v14320_v43 = vpop.f32.mrf.mxu1 }
 0x3d7   : > { %v4313_v9 = vpop.f32.mrf.mxu2  ;;  %10592 = vmatmul.msk.f32.gmra.mxu0 %vm277_vm15, %v17445_v48 }
 0x3d8   : > { %v14322_v46 = vpop.f32.mrf.mxu0  ;;  %10610 = vmatmul.msk.f32.gmra.mxu1 %vm277_vm15, %v17443_v0  ;;  %v4341_v26 = vadd.f32 %v4313_v9, %v17444_v42  ;;  %v11138_v42 = vld [vmem:[#allocation2 + $0xc8] sm:$0xff] }
 0x3d9   : > { %10576 = vmatmul.msk.f32.gmra.mxu3 %vm277_vm15, %v5275_v54  ;;  %v4861_v45 = vrot.slane %v11138_v42, 2  ;;  %v4656_v54 = vadd.f32 %v14287_v11, %v4497_v50  ;;  %v5217_v42 = vld [vmem:[#allocation2 + $0x160] sm:$0x3]  ;;  %v17451_v50 = vld [vmem:[#allocation68_spill] sm:$0xff] }
 0x3da   : > { %v4499_v20 = vadd.f32 %v4471_v28, %v4341_v26  ;;  %v17449_v26 = vld [vmem:[#allocation57_spill] sm:$0xff]  ;;  %v5279_v11 = vrot.slane %v5217_v42, 1  ;;  %v5520_v4 = vrot.slane %v5217_v42, 2 }
 0x3db   : > { %v4862_v63 = vsel %vm674_vm2, %v4860_v59, %v4861_v45  ;;  %v14352_v7 = vadd.f32 %v14285_v23, %v4656_v54  ;;  %v10688_v23 = vld [vmem:[%s17030_s3 + $0x1c] sm:$0xf] }
 0x3dc   : > { %10556 = vmatmul.msk.f32.gmra.mxu2 %vm277_vm15, %v4859_v56  ;;  %v4474_v17 = vpop.f32.mrf.mxu3 }
 0x3dd   : > { %v14338_v41 = vpop.f32.mrf.mxu1  ;;  %10689 = vmatpush.msk.msrb.mxu2 %vm3696_vm14, %v10688_v23 }
 0x3df   : > { %v4316_v28 = vpop.f32.mrf.mxu2  ;;  %10593 = vmatmul.msk.f32.gmra.mxu0 %vm277_vm15, %v17449_v26 }
 0x3e0   : > { %v14340_v9 = vpop.f32.mrf.mxu0  ;;  %10611 = vmatmul.msk.f32.gmra.mxu1 %vm277_vm15, %v5516_v62  ;;  %v4342_v56 = vadd.f32 %v4316_v28, %v17448_v47  ;;  %v17450_v47 = vld [vmem:[#allocation53_spill] sm:$0xff] }
 0x3e1   : > { %10577 = vmatmul.msk.f32.gmra.mxu3 %vm277_vm15, %v14090_v52  ;;  %v4863_v5 = vrot.slane %v17450_v47, 2  ;;  %v17453_v47 = vld [vmem:[#allocation66_spill] sm:$0xff] }
 0x3e2   : > { %v4500_v32 = vadd.f32 %v4474_v17, %v4342_v56  ;;  %v17452_v17 = vld [vmem:[#allocation64_spill] sm:$0xff]  ;;  %v4657_v56 = vadd.f32 %v4627_v15, %v4498_v38  ;;  %v5280_v52 = vsel %vm436_vm1, %v17453_v47, %v5279_v11  ;;  %v10706_v15 = vld [vmem:[%s17030_s3 + $0x20] sm:$0xf]  ;;  %v17455_v11 = vld [vmem:[#allocation65_spill] sm:$0xff] }
 0x3e3   : > { %v4864_v54 = vsel %vm674_vm2, %v4861_v45, %v4863_v5  ;;  %10707 = vmatpush.msk.msrb.mxu3 %vm3696_vm14, %v10706_v15  ;;  %v17454_v45 = vld [vmem:[#allocation67_spill] sm:$0xff] }
 0x3e4   : > { %10557 = vmatmul.msk.f32.gmra.mxu2 %vm277_vm15, %v4862_v63  ;;  %v4477_v26 = vpop.f32.mrf.mxu3  ;;  %v5521_v5 = vsel %vm674_vm2, %v17454_v45, %v5520_v4 }
 0x3e5   : > { %v14356_v62 = vpop.f32.mrf.mxu1 }
 0x3e7   : > { %v4319_v35 = vpop.f32.mrf.mxu2  ;;  %10594 = vmatmul.msk.f32.gmra.mxu0 %vm277_vm15, %v17452_v17 }
 0x3e8   : > { %v4636_v28 = vpop.f32.mrf.mxu0  ;;  %10612 = vmatmul.msk.f32.gmra.mxu1 %vm277_vm15, %v14086_v25  ;;  %v4343_v63 = vadd.f32 %v4319_v35, %v17451_v50  ;;  %v14373_v35 = vadd.f32 %v14303_v55, %v4657_v56  ;;  %v5220_v56 = vld [vmem:[#allocation2 + $0x178] sm:$0x3] }
 0x3e9   : > { %10578 = vmatmul.msk.f32.gmra.mxu3 %vm277_vm15, %v5280_v52  ;;  %v4658_v52 = vadd.f32 %v14322_v46, %v4499_v20  ;;  %v6833_v46 = vld [vmem:[%s17032_s5] sm:$0xf] }
 0x3ea   : > { %v4501_v59 = vadd.f32 %v4477_v26, %v4343_v63  ;;  %10744 = vmatpush.msk.msrb.mxu1 %vm3696_vm14, %v6833_v46 }
 0x3eb   : > { %v14392_v23 = vadd.f32 %v14320_v43, %v4658_v52 }
 0x3ec   : > { %10558 = vmatmul.msk.f32.gmra.mxu2 %vm277_vm15, %v4864_v54  ;;  %v4480_v42 = vpop.f32.mrf.mxu3 }
 0x3ed   : > { %v14376_v50 = vpop.f32.mrf.mxu1 }
 0x3ef   : > { %v4322_v26 = vpop.f32.mrf.mxu2  ;;  %10595 = vmatmul.msk.f32.gmra.mxu0 %vm277_vm15, %v17455_v11 }
 0x3f0   : > { %v4639_v38 = vpop.f32.mrf.mxu0  ;;  %10613 = vmatmul.msk.f32.gmra.mxu1 %vm277_vm15, %v5521_v5  ;;  %v4344_v55 = vadd.f32 %v4322_v26, %v14118_v51  ;;  %v10726_v51 = vld [vmem:[%s17032_s5 + $0x4] sm:$0xf]  ;;  %v17456_v5 = vld [vmem:[#allocation70_spill] sm:$0xff]  ;;  %v4659_v26 = vadd.f32 %v14340_v9, %v4500_v32 }
 0x3f1   : > { %10579 = vmatmul.msk.f32.gmra.mxu3 %vm277_vm15, %v14130_v60  ;;  %10727 = vmatpush.msk.msrb.mxu0 %vm3696_vm14, %v10726_v51  ;;  %v17457_v51 = vld [vmem:[#allocation41_spill] sm:$0xff] }
 0x3f2   : > { %v4502_v63 = vadd.f32 %v4480_v42, %v4344_v55  ;;  %v5284_v42 = vrot.slane %v5220_v56, 1  ;;  %v14419_v46 = vadd.f32 %v14338_v41, %v4659_v26  ;;  %v4660_v41 = vadd.f32 %v4636_v28, %v4501_v59 }
 0x3f4   : > { %10559 = vmatmul.msk.f32.gmra.mxu2 %vm277_vm15, %v14161_v37  ;;  %v4483_v43 = vpop.f32.mrf.mxu3  ;;  %v5285_v52 = vsel %vm436_vm1, %v14105_v58, %v5284_v42  ;;  %v17458_v42 = vld [vmem:[#allocation71_spill] sm:$0xff] }
 0x3f5   : > { %v14396_v4 = vpop.f32.mrf.mxu1 }
 0x3f7   : > { %v4325_v54 = vpop.f32.mrf.mxu2  ;;  %10596 = vmatmul.msk.f32.gmra.mxu0 %vm277_vm15, %v17456_v5 }
 0x3f8   : > { %v14404_v20 = vpop.f32.mrf.mxu0  ;;  %10614 = vmatmul.msk.f32.gmra.mxu1 %vm277_vm15, %v14126_v12  ;;  %v4345_v15 = vadd.f32 %v4325_v54, %v14147_v34  ;;  %v5525_v34 = vrot.slane %v5220_v56, 2  ;;  %v14435_v56 = vadd.f32 %v14356_v62, %v4660_v41 }
 0x3f9   : > { %10580 = vmatmul.msk.f32.gmra.mxu3 %vm277_vm15, %v5285_v52 }
 0x3fa   : > { %v4503_v55 = vadd.f32 %v4483_v43, %v4345_v15  ;;  %v5526_v9 = vsel %vm674_vm2, %v14109_v19, %v5525_v34  ;;  %v5646_v34 = vld [vmem:[#allocation2 + $0xe8] sm:$0x3] }
 0x3fb   : > { %v5812_v62 = vrot.slane %v5646_v34, 1 }
 0x3fc   : > { %10560 = vmatmul.msk.f32.gmra.mxu2 %vm277_vm15, %v17457_v51  ;;  %v4486_v32 = vpop.f32.mrf.mxu3 }
 0x3fd   : > { %v14422_v12 = vpop.f32.mrf.mxu1 }
 0x3ff   : > { %v4328_v43 = vpop.f32.mrf.mxu2  ;;  %10597 = vmatmul.msk.f32.gmra.mxu0 %vm277_vm15, %v17458_v42  ;;  %v11141_v42 = vld [vmem:[#allocation2 + $0xe0] sm:$0xff] }
 0x400   : > { %v14424_v54 = vpop.f32.mrf.mxu0  ;;  %10615 = vmatmul.msk.f32.gmra.mxu1 %vm277_vm15, %v5526_v9  ;;  %v4346_v15 = vadd.f32 %v4328_v43, %v14169_v6  ;;  %v14444_v6 = vld [vmem:[%s17031_s4] ss:$0 sm:$0xff]  ;;  %v11140_v9 = vld [vmem:[#allocation2 + $0xf0] sm:$0xff] }
 0x401   : > { %10636 = vmatmul.msk.f32.vlgmr.msra.gmra.mxu3 %vm277_vm15, %v14036_v1  ;;  %v14451_v1 = vld [vmem:[%s17031_s4 + $0x1] ss:$0 sm:$0xff] }
 0x402   : > { %v4504_v26 = vadd.f32 %v4486_v32, %v4346_v15  ;;  %v4661_v32 = vadd.f32 %v4639_v38, %v4502_v63  ;;  %v14459_v15 = vld [vmem:[%s17031_s4 + $0x2] ss:$0 sm:$0xff] }
 0x404   : > { %10618 = vmatmul.msk.f32.vlgmr.msra.gmra.mxu2 %vm277_vm15, %v13992_v13  ;;  %v5339_v28 = vpop.f32.mrf.mxu3  ;;  %v14465_v41 = vadd.f32 %v14376_v50, %v4661_v32 }
 0x405   : > { %v14439_v52 = vpop.f32.mrf.mxu1 }
 0x407   : > { %v4924_v59 = vpop.f32.mrf.mxu2  ;;  %10654 = vmatmul.msk.f32.vlgmr.msra.gmra.mxu0 %vm277_vm15, %v14161_v37 }
 0x408   : > { %v5439_v51 = vpop.f32.mrf.mxu0  ;;  %10672 = vmatmul.msk.f32.vlgmr.msra.gmra.mxu1 %vm277_vm15, %v11140_v9  ;;  %v4972_v13 = vadd.f32 %v4924_v59, %v14212_v36  ;;  %v5813_v36 = vsel %vm436_vm1, %v14010_v8, %v5812_v62  ;;  %v5969_v59 = vrot.slane %v5646_v34, 2  ;;  %v11142_v8 = vld [vmem:[#allocation2 + $0xf8] sm:$0xff]  ;;  %v4662_v34 = vadd.f32 %v14404_v20, %v4503_v55 }
 0x409   : > { %10637 = vmatmul.msk.f32.gmra.mxu3 %vm277_vm15, %v5813_v36 }
 0x40a   : > { %v4992_v43 = vmul.f32 %v14444_v6, %v4972_v13  ;;  %v5970_v50 = vsel %vm674_vm2, %v13706_v30, %v5969_v59  ;;  %v14485_v36 = vadd.f32 %v14396_v4, %v4662_v34 }
 0x40c   : > { %10619 = vmatmul.msk.f32.gmra.mxu2 %vm277_vm15, %v11141_v42  ;;  %v5013_v37 = vadd.f32 %v14451_v1, %v4992_v43  ;;  %v5342_v19 = vpop.f32.mrf.mxu3 }
 0x40d   : > { %v14469_v38 = vpop.f32.mrf.mxu1 }
 0x40e   : > { %vm5029_vm12 = vcmp.gt.f32.partialorder %v5013_v37, 0.0  ;;  %v5050_v13 = vmul.f32 %v14459_v15, %v5013_v37 }
 0x40f   : > { %v4927_v58 = vpop.f32.mrf.mxu2  ;;  %10655 = vmatmul.msk.f32.gmra.mxu0 %vm277_vm15, %v5970_v50 }
 0x410   : > { %v5442_v63 = vpop.f32.mrf.mxu0  ;;  %10673 = vmatmul.msk.f32.gmra.mxu1 %vm277_vm15, %v11142_v8  ;;  %v4973_v62 = vadd.f32 %v4927_v58, %v14230_v39  ;;  %v14476_v32 = vsel %vm5029_vm12, %v5013_v37, %v5050_v13  ;;  %v5649_v58 = vld [vmem:[#allocation2 + $0x100] sm:$0x3]  ;;  %v5440_v13 = vadd.f32 %v5439_v51, %v5339_v28 }
 0x411   : > { %17459 = vst [vmem:[#allocation32_spill] sm:$0xff] %v14476_v32  ;;  %5131 = vrot.lane.b32.xlu2 %v14476_v32, %s11223_s22  ;;  %10638 = vmatmul.msk.f32.gmra.mxu3 %vm277_vm15, %v13804_v27  ;;  %v5817_v59 = vrot.slane %v5649_v58, 1 }
 0x412   : > { %v4993_v43 = vmul.f32 %v14444_v6, %v4973_v62  ;;  %v4663_v62 = vadd.f32 %v14424_v54, %v4504_v26 }
 0x413   : > { %v5818_v51 = vsel %vm436_vm1, %v13778_v21, %v5817_v59 }
 0x414   : > { %10620 = vmatmul.msk.f32.gmra.mxu2 %vm277_vm15, %v11140_v9  ;;  %v5014_v30 = vadd.f32 %v14451_v1, %v4993_v43  ;;  %v5345_v20 = vpop.f32.mrf.mxu3  ;;  %v11143_v9 = vld [vmem:[#allocation2 + $0x108] sm:$0xff]  ;;  %v14507_v28 = vadd.f32 %v14422_v12, %v4663_v62  ;;  %v5974_v43 = vrot.slane %v5649_v58, 2 }
 0x415   : > { %v14490_v39 = vpop.f32.mrf.mxu1 }
 0x416   : > { %vm5030_vm13 = vcmp.gt.f32.partialorder %v5014_v30, 0.0  ;;  %v5051_v37 = vmul.f32 %v14459_v15, %v5014_v30  ;;  %v5975_v12 = vsel %vm674_vm2, %v13781_v14, %v5974_v43 }
 0x417   : > { %v4930_v55 = vpop.f32.mrf.mxu2  ;;  %10656 = vmatmul.msk.f32.gmra.mxu0 %vm277_vm15, %v13800_v18 }
 0x418   : > { %v5445_v42 = vpop.f32.mrf.mxu0  ;;  %10674 = vmatmul.msk.f32.gmra.mxu1 %vm277_vm15, %v11143_v9  ;;  %v4974_v4 = vadd.f32 %v4930_v55, %v14247_v22  ;;  %v14495_v50 = vsel %vm5030_vm13, %v5014_v30, %v5051_v37  ;;  %v14512_v30 = vadd.f32 %v14439_v52, %v5440_v13 }
 0x419   : > { %17460 = vst [vmem:[#allocation49_spill] sm:$0xff] %v14495_v50  ;;  %5133 = vrot.lane.b32.xlu0 %v14495_v50, %s11223_s22  ;;  %10639 = vmatmul.msk.f32.gmra.mxu3 %vm277_vm15, %v5818_v51  ;;  %v17482_v50 = vld [vmem:[#allocation79_spill] sm:$0xff] }
 0x41a   : > { %v4994_v34 = vmul.f32 %v14444_v6, %v4974_v4  ;;  %v5443_v4 = vadd.f32 %v5442_v63, %v5342_v19  ;;  %v5652_v63 = vld [vmem:[#allocation2 + $0x118] sm:$0x3] }
 0x41c   : > { %10621 = vmatmul.msk.f32.gmra.mxu2 %vm277_vm15, %v11142_v8  ;;  %v5015_v22 = vadd.f32 %v14451_v1, %v4994_v34  ;;  %v5348_v55 = vpop.f32.mrf.mxu3  ;;  %v11144_v8 = vld [vmem:[#allocation2 + $0x110] sm:$0xff]  ;;  %v14530_v13 = vadd.f32 %v14469_v38, %v5443_v4 }
 0x41d   : > { %v5589_v37 = vpop.f32.mrf.mxu1 }
 0x41e   : > { %vm5031_vm3 = vcmp.gt.f32.partialorder %v5015_v22, 0.0  ;;  %v5052_v26 = vmul.f32 %v14459_v15, %v5015_v22 }
 0x41f   : > { %v4933_v59 = vpop.f32.mrf.mxu2  ;;  %10657 = vmatmul.msk.f32.gmra.mxu0 %vm277_vm15, %v5975_v12  ;;  %v11145_v12 = vld [vmem:[#allocation2 + $0x120] sm:$0xff] }
 0x420   : > { %v5448_v54 = vpop.f32.mrf.mxu0  ;;  %10675 = vmatmul.msk.f32.gmra.mxu1 %vm277_vm15, %v11144_v8  ;;  %v4975_v62 = vadd.f32 %v4933_v59, %v14265_v33  ;;  %v14519_v58 = vsel %vm5031_vm3, %v5015_v22, %v5052_v26  ;;  %v5822_v26 = vrot.slane %v5652_v63, 1  ;;  %v5446_v59 = vadd.f32 %v5445_v42, %v5345_v20 }
 0x421   : > { %17461 = vst [vmem:[#allocation39_spill] sm:$0xff] %v14519_v58  ;;  %5135 = vrot.lane.b32.xlu1 %v14519_v58, %s11223_s22  ;;  %10640 = vmatmul.msk.f32.gmra.mxu3 %vm277_vm15, %v13867_v31  ;;  %v11146_v58 = vld [vmem:[#allocation2 + $0x128] sm:$0xff] }
 0x422   : > { %v4995_v52 = vmul.f32 %v14444_v6, %v4975_v62  ;;  %v5823_v4 = vsel %vm436_vm1, %v13840_v61, %v5822_v26  ;;  %v14548_v20 = vadd.f32 %v14490_v39, %v5446_v59 }
 0x424   : > { %10622 = vmatmul.msk.f32.gmra.mxu2 %vm277_vm15, %v11143_v9  ;;  %v5016_v19 = vadd.f32 %v14451_v1, %v4995_v52  ;;  %v5351_v22 = vpop.f32.mrf.mxu3 }
 0x425   : > { %v5592_v33 = vpop.f32.mrf.mxu1 }
 0x426   : > { %vm5032_vm4 = vcmp.gt.f32.partialorder %v5016_v19, 0.0  ;;  %v5053_v51 = vmul.f32 %v14459_v15, %v5016_v19 }
 0x427   : > { %v4936_v43 = vpop.f32.mrf.mxu2  ;;  %10658 = vmatmul.msk.f32.gmra.mxu0 %vm277_vm15, %v13863_v2 }
 0x428   : > { %v5451_v34 = vpop.f32.mrf.mxu0  ;;  %10676 = vmatmul.msk.f32.gmra.mxu1 %vm277_vm15, %v11145_v12  ;;  %v4976_v9 = vadd.f32 %v4936_v43, %v14281_v40  ;;  %v14535_v62 = vsel %vm5032_vm4, %v5016_v19, %v5053_v51  ;;  %v5979_v40 = vrot.slane %v5652_v63, 2 }
 0x429   : > { %17462 = vst [vmem:[#allocation35_spill] sm:$0xff] %v14535_v62  ;;  %5137 = vrot.lane.b32.xlu2 %v14535_v62, %s11223_s22  ;;  %10641 = vmatmul.msk.f32.gmra.mxu3 %vm277_vm15, %v5823_v4  ;;  %v5449_v62 = vadd.f32 %v5448_v54, %v5348_v55  ;;  %v5655_v4 = vld [vmem:[#allocation2 + $0x130] sm:$0x3] }
 0x42a   : > { %v4996_v38 = vmul.f32 %v14444_v6, %v4976_v9 }
 0x42b   : > { %v14565_v55 = vadd.f32 %v5589_v37, %v5449_v62  ;;  %v5827_v37 = vrot.slane %v5655_v4, 1 }
 0x42c   : > { %10623 = vmatmul.msk.f32.gmra.mxu2 %vm277_vm15, %v11144_v8  ;;  %v5017_v42 = vadd.f32 %v14451_v1, %v4996_v38  ;;  %v5354_v43 = vpop.f32.mrf.mxu3  ;;  %v5980_v8 = vsel %vm674_vm2, %v17429_v57, %v5979_v40 }
 0x42d   : > { %v5595_v52 = vpop.f32.mrf.mxu1 }
 0x42e   : > { %vm5033_vm5 = vcmp.gt.f32.partialorder %v5017_v42, 0.0  ;;  %v5054_v51 = vmul.f32 %v14459_v15, %v5017_v42 }
 0x42f   : > { %v4939_v9 = vpop.f32.mrf.mxu2  ;;  %10659 = vmatmul.msk.f32.gmra.mxu0 %vm277_vm15, %v5980_v8  ;;  %v5828_v8 = vsel %vm436_vm1, %v17435_v44, %v5827_v37 }
 0x430   : > { %v5454_v19 = vpop.f32.mrf.mxu0  ;;  %10677 = vmatmul.msk.f32.gmra.mxu1 %vm277_vm15, %v11146_v58  ;;  %v4977_v26 = vadd.f32 %v4939_v9, %v14300_v24  ;;  %v14555_v63 = vsel %vm5033_vm5, %v5017_v42, %v5054_v51  ;;  %v5452_v51 = vadd.f32 %v5451_v34, %v5351_v22 }
 0x431   : > { %17463 = vst [vmem:[#allocation51_spill] sm:$0xff] %v14555_v63  ;;  %5139 = vrot.lane.b32.xlu0 %v14555_v63, %s11223_s22  ;;  %10642 = vmatmul.msk.f32.gmra.mxu3 %vm277_vm15, %v13912_v3 }
 0x432   : > { %v4997_v39 = vmul.f32 %v14444_v6, %v4977_v26  ;;  %v5984_v26 = vrot.slane %v5655_v4, 2  ;;  %v11148_v4 = vld [vmem:[#allocation2 + $0x138] sm:$0xff] }
 0x434   : > { %10624 = vmatmul.msk.f32.gmra.mxu2 %vm277_vm15, %v11145_v12  ;;  %v5018_v54 = vadd.f32 %v14451_v1, %v4997_v39  ;;  %v5357_v42 = vpop.f32.mrf.mxu3 }
 0x435   : > { %v5598_v59 = vpop.f32.mrf.mxu1 }
 0x436   : > { %vm5034_vm6 = vcmp.gt.f32.partialorder %v5018_v54, 0.0  ;;  %v5055_v38 = vmul.f32 %v14459_v15, %v5018_v54 }
 0x437   : > { %v4942_v40 = vpop.f32.mrf.mxu2  ;;  %10660 = vmatmul.msk.f32.gmra.mxu0 %vm277_vm15, %v17431_v49 }
 0x438   : > { %v5457_v24 = vpop.f32.mrf.mxu0  ;;  %10678 = vmatmul.msk.f32.gmra.mxu1 %vm277_vm15, %v17445_v48  ;;  %v4978_v12 = vadd.f32 %v4942_v40, %v14316_v10  ;;  %v14571_v9 = vsel %vm5034_vm6, %v5018_v54, %v5055_v38  ;;  %v14583_v10 = vadd.f32 %v5592_v33, %v5452_v51  ;;  %v5455_v40 = vadd.f32 %v5454_v19, %v5354_v43  ;;  %v5658_v43 = vld [vmem:[#allocation2 + $0x148] sm:$0x3] }
 0x439   : > { %17464 = vst [vmem:[#allocation52_spill] sm:$0xff] %v14571_v9  ;;  %5141 = vrot.lane.b32.xlu1 %v14571_v9, %s11223_s22  ;;  %10643 = vmatmul.msk.f32.gmra.mxu3 %vm277_vm15, %v5828_v8 }
 0x43a   : > { %v4998_v62 = vmul.f32 %v14444_v6, %v4978_v12  ;;  %v11147_v12 = vld [vmem:[#allocation2 + $0x140] sm:$0xff]  ;;  %v14600_v51 = vadd.f32 %v5595_v52, %v5455_v40  ;;  %v17467_v40 = vld [vmem:[#allocation58_spill] sm:$0xff] }
 0x43c   : > { %10625 = vmatmul.msk.f32.gmra.mxu2 %vm277_vm15, %v11146_v58  ;;  %v5019_v48 = vadd.f32 %v14451_v1, %v4998_v62  ;;  %v5360_v54 = vpop.f32.mrf.mxu3  ;;  %v5985_v58 = vsel %vm674_vm2, %v17437_v29, %v5984_v26 }
 0x43d   : > { %v5601_v34 = vpop.f32.mrf.mxu1 }
 0x43e   : > { %vm5035_vm7 = vcmp.gt.f32.partialorder %v5019_v48, 0.0  ;;  %v5056_v39 = vmul.f32 %v14459_v15, %v5019_v48 }
 0x43f   : > { %v4945_v38 = vpop.f32.mrf.mxu2  ;;  %10661 = vmatmul.msk.f32.gmra.mxu0 %vm277_vm15, %v5985_v58  ;;  %v5458_v58 = vadd.f32 %v5457_v24, %v5357_v42 }
 0x440   : > { %v5460_v22 = vpop.f32.mrf.mxu0  ;;  %10679 = vmatmul.msk.f32.gmra.mxu1 %vm277_vm15, %v11147_v12  ;;  %v4979_v37 = vadd.f32 %v4945_v38, %v14335_v53  ;;  %v14590_v62 = vsel %vm5035_vm7, %v5019_v48, %v5056_v39  ;;  %v5832_v38 = vrot.slane %v5658_v43, 1 }
 0x441   : > { %17465 = vst [vmem:[#allocation40_spill] sm:$0xff] %v14590_v62  ;;  %5143 = vrot.lane.b32.xlu2 %v14590_v62, %s11223_s22  ;;  %10644 = vmatmul.msk.f32.gmra.mxu3 %vm277_vm15, %v17441_v16 }
 0x442   : > { %v4999_v33 = vmul.f32 %v14444_v6, %v4979_v37 }
 0x444   : > { %10626 = vmatmul.msk.f32.gmra.mxu2 %vm277_vm15, %v11148_v4  ;;  %v5020_v19 = vadd.f32 %v14451_v1, %v4999_v33  ;;  %v5363_v26 = vpop.f32.mrf.mxu3  ;;  %v5833_v4 = vsel %vm436_vm1, %v17467_v40, %v5832_v38  ;;  %v17468_v38 = vld [vmem:[#allocation59_spill] sm:$0xff] }
 0x445   : > { %v5604_v53 = vpop.f32.mrf.mxu1 }
 0x446   : > { %vm5036_vm8 = vcmp.gt.f32.partialorder %v5020_v19, 0.0  ;;  %v5057_v48 = vmul.f32 %v14459_v15, %v5020_v19 }
 0x447   : > { %v4948_v39 = vpop.f32.mrf.mxu2  ;;  %10662 = vmatmul.msk.f32.gmra.mxu0 %vm277_vm15, %v17443_v0 }
 0x448   : > { %v5463_v8 = vpop.f32.mrf.mxu0  ;;  %10680 = vmatmul.msk.f32.gmra.mxu1 %vm277_vm15, %v17452_v17  ;;  %v4980_v37 = vadd.f32 %v4948_v39, %v14352_v7  ;;  %v14606_v33 = vsel %vm5036_vm8, %v5020_v19, %v5057_v48  ;;  %v5989_v7 = vrot.slane %v5658_v43, 2  ;;  %v14618_v17 = vadd.f32 %v5598_v59, %v5458_v58  ;;  %v11149_v43 = vld [vmem:[#allocation2 + $0x150] sm:$0xff] }
 0x449   : > { %17466 = vst [vmem:[#allocation45_spill] sm:$0xff] %v14606_v33  ;;  %5145 = vrot.lane.b32.xlu0 %v14606_v33, %s11223_s22  ;;  %10645 = vmatmul.msk.f32.gmra.mxu3 %vm277_vm15, %v5833_v4 }
 0x44a   : > { %v5000_v52 = vmul.f32 %v14444_v6, %v4980_v37  ;;  %v5461_v37 = vadd.f32 %v5460_v22, %v5360_v54  ;;  %v5661_v54 = vld [vmem:[#allocation2 + $0x160] sm:$0x3] }
 0x44c   : > { %10627 = vmatmul.msk.f32.gmra.mxu2 %vm277_vm15, %v11147_v12  ;;  %v5021_v24 = vadd.f32 %v14451_v1, %v5000_v52  ;;  %v5366_v39 = vpop.f32.mrf.mxu3  ;;  %v5990_v12 = vsel %vm674_vm2, %v17468_v38, %v5989_v7  ;;  %v14636_v58 = vadd.f32 %v5601_v34, %v5461_v37 }
 0x44d   : > { %v5607_v42 = vpop.f32.mrf.mxu1 }
 0x44e   : > { %vm5037_vm0 = vcmp.gt.f32.partialorder %v5021_v24, 0.0  ;;  %v5058_v48 = vmul.f32 %v14459_v15, %v5021_v24 }
 0x44f   : > { %v4951_v33 = vpop.f32.mrf.mxu2  ;;  %10663 = vmatmul.msk.f32.gmra.mxu0 %vm277_vm15, %v5990_v12  ;;  %v5837_v12 = vrot.slane %v5661_v54, 1 }
 0x450   : > { %v5466_v19 = vpop.f32.mrf.mxu0  ;;  %10681 = vmatmul.msk.f32.gmra.mxu1 %vm277_vm15, %v17455_v11  ;;  %v4981_v52 = vadd.f32 %v4951_v33, %v14373_v35  ;;  %v14626_v4 = vsel %vm5037_vm0, %v5021_v24, %v5058_v48  ;;  %v17470_v11 = vld [vmem:[#allocation69_spill] sm:$0xff] }
 0x451   : > { %17469 = vst [vmem:[#allocation43_spill] sm:$0xff] %v14626_v4  ;;  %5147 = vrot.lane.b32.xlu1 %v14626_v4, %s11223_s22  ;;  %10646 = vmatmul.msk.f32.gmra.mxu3 %vm277_vm15, %v17470_v11  ;;  %v5838_v37 = vsel %vm436_vm1, %v17453_v47, %v5837_v12  ;;  %v11150_v4 = vld [vmem:[#allocation2 + $0x158] sm:$0xff]  ;;  %v11151_v12 = vld [vmem:[#allocation2 + $0x170] sm:$0xff] }
 0x452   : > { %v5001_v59 = vmul.f32 %v14444_v6, %v4981_v52  ;;  %v5464_v52 = vadd.f32 %v5463_v8, %v5363_v26 }
 0x454   : > { %10628 = vmatmul.msk.f32.gmra.mxu2 %vm277_vm15, %v11149_v43  ;;  %v5022_v22 = vadd.f32 %v14451_v1, %v5001_v59  ;;  %v5369_v7 = vpop.f32.mrf.mxu3  ;;  %v14656_v8 = vadd.f32 %v5604_v53, %v5464_v52  ;;  %v11152_v52 = vld [vmem:[#allocation2 + $0x168] sm:$0xff] }
 0x455   : > { %v14638_v35 = vpop.f32.mrf.mxu1 }
 0x456   : > { %vm5038_vm9 = vcmp.gt.f32.partialorder %v5022_v22, 0.0  ;;  %v5059_v24 = vmul.f32 %v14459_v15, %v5022_v22 }
 0x457   : > { %v4954_v48 = vpop.f32.mrf.mxu2  ;;  %10664 = vmatmul.msk.f32.gmra.mxu0 %vm277_vm15, %v14086_v25 }
 0x458   : > { %v5469_v33 = vpop.f32.mrf.mxu0  ;;  %10682 = vmatmul.msk.f32.gmra.mxu1 %vm277_vm15, %v17456_v5  ;;  %v4982_v59 = vadd.f32 %v4954_v48, %v14392_v23  ;;  %v14644_v43 = vsel %vm5038_vm9, %v5022_v22, %v5059_v24  ;;  %v5994_v23 = vrot.slane %v5661_v54, 2 }
 0x459   : > { %17471 = vst [vmem:[#allocation47_spill] sm:$0xff] %v14644_v43  ;;  %5149 = vrot.lane.b32.xlu2 %v14644_v43, %s11223_s22  ;;  %10647 = vmatmul.msk.f32.gmra.mxu3 %vm277_vm15, %v5838_v37  ;;  %v5467_v43 = vadd.f32 %v5466_v19, %v5366_v39 }
 0x45a   : > { %v5002_v34 = vmul.f32 %v14444_v6, %v4982_v59 }
 0x45b   : > { %v14675_v39 = vadd.f32 %v5607_v42, %v5467_v43  ;;  %v10761_v42 = vld [vmem:[%s17032_s5 + $0x8] sm:$0xf]  ;;  %v17475_v43 = vld [vmem:[#allocation74_spill] sm:$0xff] }
 0x45c   : > { %10629 = vmatmul.msk.f32.gmra.mxu2 %vm277_vm15, %v11150_v4  ;;  %v5023_v5 = vadd.f32 %v14451_v1, %v5002_v34  ;;  %v5372_v48 = vpop.f32.mrf.mxu3  ;;  %v5995_v4 = vsel %vm674_vm2, %v17454_v45, %v5994_v23  ;;  %v5664_v23 = vld [vmem:[#allocation2 + $0x178] sm:$0x3] }
 0x45d   : > { %v14658_v26 = vpop.f32.mrf.mxu1  ;;  %10762 = vmatpush.msk.msra.mxu2 %vm3696_vm14, %v10761_v42 }
 0x45e   : > { %vm5039_vm10 = vcmp.gt.f32.partialorder %v5023_v5, 0.0  ;;  %v5060_v24 = vmul.f32 %v14459_v15, %v5023_v5 }
 0x45f   : > { %v4957_v59 = vpop.f32.mrf.mxu2  ;;  %10665 = vmatmul.msk.f32.gmra.mxu0 %vm277_vm15, %v5995_v4  ;;  %v5470_v4 = vadd.f32 %v5469_v33, %v5369_v7  ;;  %v17476_v7 = vld [vmem:[#allocation72_spill] sm:$0xff] }
 0x460   : > { %v5472_v22 = vpop.f32.mrf.mxu0  ;;  %10683 = vmatmul.msk.f32.gmra.mxu1 %vm277_vm15, %v11151_v12  ;;  %v4983_v34 = vadd.f32 %v4957_v59, %v14419_v46  ;;  %v14665_v54 = vsel %vm5039_vm10, %v5023_v5, %v5060_v24 }
 0x461   : > { %17472 = vst [vmem:[#allocation48_spill] sm:$0xff] %v14665_v54  ;;  %5151 = vrot.lane.b32.xlu0 %v14665_v54, %s11223_s22  ;;  %10648 = vmatmul.msk.f32.gmra.mxu3 %vm277_vm15, %v14130_v60  ;;  %v5842_v54 = vrot.slane %v5664_v23, 1 }
 0x462   : > { %v5003_v53 = vmul.f32 %v14444_v6, %v4983_v34  ;;  %v17473_v34 = vld [vmem:[#allocation75_spill] sm:$0xff] }
 0x464   : > { %10630 = vmatmul.msk.f32.gmra.mxu2 %vm277_vm15, %v11152_v52  ;;  %v5024_v19 = vadd.f32 %v14451_v1, %v5003_v53  ;;  %v5375_v24 = vpop.f32.mrf.mxu3 }
 0x465   : > { %v14677_v46 = vpop.f32.mrf.mxu1 }
 0x466   : > { %vm5040_vm11 = vcmp.gt.f32.partialorder %v5024_v19, 0.0  ;;  %v5061_v5 = vmul.f32 %v14459_v15, %v5024_v19 }
 0x467   : > { %v4960_v59 = vpop.f32.mrf.mxu2  ;;  %10666 = vmatmul.msk.f32.gmra.mxu0 %vm277_vm15, %v17475_v43 }
 0x468   : > { %v5475_v37 = vpop.f32.mrf.mxu0  ;;  %10684 = vmatmul.msk.f32.gmra.mxu1 %vm277_vm15, %v17473_v34  ;;  %v4984_v53 = vadd.f32 %v4960_v59, %v14435_v56  ;;  %v14683_v52 = vsel %vm5040_vm11, %v5024_v19, %v5061_v5  ;;  %v5843_v56 = vsel %vm436_vm1, %v17476_v7, %v5842_v54  ;;  %v14701_v59 = vadd.f32 %v14638_v35, %v5470_v4  ;;  %v17478_v35 = vld [vmem:[#allocation73_spill] sm:$0xff] }
 0x469   : > { %17474 = vst [vmem:[#allocation54_spill] sm:$0xff] %v14683_v52  ;;  %5153 = vrot.lane.b32.xlu1 %v14683_v52, %s11223_s22  ;;  %10649 = vmatmul.msk.f32.gmra.mxu3 %vm277_vm15, %v5843_v56  ;;  %v5999_v54 = vrot.slane %v5664_v23, 2  ;;  %v5473_v52 = vadd.f32 %v5472_v22, %v5372_v48  ;;  %v17480_v48 = vld [vmem:[#allocation80_spill] sm:$0xff] }
 0x46a   : > { %v5004_v33 = vmul.f32 %v14444_v6, %v4984_v53  ;;  %v10779_v53 = vld [vmem:[%s17032_s5 + $0xc] sm:$0xf] }
 0x46b   : > { %v5132_v19 = vpop.permute.xlu2 %5131  ;;  %10780 = vmatpush.msk.msra.mxu3 %vm3696_vm14, %v10779_v53  ;;  %v6000_v4 = vsel %vm674_vm2, %v17478_v35, %v5999_v54  ;;  %v11153_v53 = vld [vmem:[#allocation2 + $0x180] sm:$0xff]  ;;  %v5667_v54 = vld [vmem:[#allocation2 + $0x190] sm:$0x3] }
 0x46c   : > { %10631 = vmatmul.msk.f32.gmra.mxu2 %vm277_vm15, %v11151_v12  ;;  %v5025_v5 = vadd.f32 %v14451_v1, %v5004_v33  ;;  %5180 = vst.msk [vmem:[#allocation3 + $0x19] sm:$0xff] %vm277_vm15, %v5132_v19  ;;  %v5378_v33 = vpop.f32.mrf.mxu3  ;;  %v17477_v19 = vld [vmem:[#allocation76_spill] sm:$0xff] }
 0x46d   : > { %v14703_v34 = vpop.f32.mrf.mxu1 }
 0x46e   : > { %vm5041_vm12 = vcmp.gt.f32.partialorder %v5025_v5, 0.0  ;;  %v5062_v12 = vmul.f32 %v14459_v15, %v5025_v5 }
 0x46f   : > { %v4963_v56 = vpop.f32.mrf.mxu2  ;;  %10667 = vmatmul.msk.f32.gmra.mxu0 %vm277_vm15, %v6000_v4 }
 0x470   : > { %v5478_v42 = vpop.f32.mrf.mxu0  ;;  %10685 = vmatmul.msk.f32.gmra.mxu1 %vm277_vm15, %v17477_v19  ;;  %v4985_v62 = vadd.f32 %v4963_v56, %v14465_v41  ;;  %v14715_v9 = vsel %vm5041_vm12, %v5025_v5, %v5062_v12  ;;  %v14726_v41 = vadd.f32 %v14658_v26, %v5473_v52  ;;  %v14730_v12 = vld [vmem:[#allocation2 + $0x198] sm:$0xff]  ;;  %v10815_v56 = vld [vmem:[%s17032_s5 + $0x14] sm:$0xf] }
 0x471   : > { %17479 = vst [vmem:[#allocation44_spill] sm:$0xff] %v14715_v9  ;;  %5155 = vrot.lane.b32.xlu2 %v14715_v9, %s11223_s22  ;;  %10650 = vmatmul.msk.f32.gmra.mxu3 %vm277_vm15, %v17480_v48  ;;  %v11154_v48 = vld [vmem:[#allocation2 + $0x188] sm:$0xff] }
 0x472   : > { %v5005_v23 = vmul.f32 %v14444_v6, %v4985_v62  ;;  %v10797_v62 = vld [vmem:[%s17032_s5 + $0x10] sm:$0xf]  ;;  %10816 = vmatpush.msk.msra.mxu1 %vm3696_vm14, %v10815_v56 }
 0x473   : > { %10798 = vmatpush.msk.msra.mxu0 %vm3696_vm14, %v10797_v62  ;;  %v17483_v56 = vld [vmem:[#allocation77_spill] sm:$0xff] }
 0x474   : > { %10632 = vmatmul.msk.f32.gmra.mxu2 %vm277_vm15, %v11153_v53  ;;  %v5026_v22 = vadd.f32 %v14451_v1, %v5005_v23  ;;  %v5381_v26 = vpop.f32.mrf.mxu3  ;;  %v5847_v23 = vrot.slane %v5667_v54, 1  ;;  %v5476_v53 = vadd.f32 %v5475_v37, %v5375_v24 }
 0x475   : > { %v14728_v5 = vpop.f32.mrf.mxu1 }
 0x476   : > { %vm5042_vm13 = vcmp.gt.f32.partialorder %v5026_v22, 0.0  ;;  %v5063_v4 = vmul.f32 %v14459_v15, %v5026_v22  ;;  %v5848_v32 = vsel %vm436_vm1, %v17483_v56, %v5847_v23  ;;  %v14757_v24 = vadd.f32 %v14677_v46, %v5476_v53  ;;  %v14764_v56 = vld [vmem:[#allocation3 + $0x8] sm:$0xff] }
 0x477   : > { %v4966_v52 = vpop.f32.mrf.mxu2  ;;  %10668 = vmatmul.msk.f32.gmra.mxu0 %vm277_vm15, %v17482_v50 }
 0x478   : > { %v5481_v19 = vpop.f32.mrf.mxu0  ;;  %10686 = vmatmul.msk.f32.gmra.mxu1 %vm277_vm15, %v14730_v12  ;;  %v4986_v9 = vadd.f32 %v4966_v52, %v14485_v36  ;;  %v14744_v63 = vsel %vm5042_vm13, %v5026_v22, %v5063_v4  ;;  %v6004_v36 = vrot.slane %v5667_v54, 2  ;;  %17484 = vst [vmem:[#allocation62_spill] sm:$0xff] %v14757_v24  ;;  %v14761_v4 = vld [vmem:[#allocation2 + $0x1a0] sm:$0xff] }
 0x479   : > { %17481 = vst [vmem:[#allocation50_spill] sm:$0xff] %v14744_v63  ;;  %5157 = vrot.lane.b32.xlu0 %v14744_v63, %s11223_s22  ;;  %10651 = vmatmul.msk.f32.gmra.mxu3 %vm277_vm15, %v5848_v32  ;;  %v17485_v32 = vld [vmem:[#allocation78_spill] sm:$0xff] }
 0x47a   : > { %v5006_v62 = vmul.f32 %v14444_v6, %v4986_v9  ;;  %v6005_v46 = vsel %vm674_vm2, %v17485_v32, %v6004_v36 }
 0x47c   : > { %10633 = vmatmul.msk.f32.gmra.mxu2 %vm277_vm15, %v11154_v48  ;;  %v5027_v37 = vadd.f32 %v14451_v1, %v5006_v62  ;;  %v5384_v23 = vpop.f32.mrf.mxu3  ;;  %v5479_v48 = vadd.f32 %v5478_v42, %v5378_v33  ;;  %v14776_v62 = vld [vmem:[#allocation3] sm:$0xff]  ;;  %v6859_v33 = vrot.slane %v14764_v56, 1 }
 0x47d   : > { %v14759_v22 = vpop.f32.mrf.mxu1  ;;  %v6858_v42 = vrot.slane %v14776_v62, 1 }
 0x47e   : > { %vm5043_vm3 = vcmp.gt.f32.partialorder %v5027_v37, 0.0  ;;  %v5064_v9 = vmul.f32 %v14459_v15, %v5027_v37 }
 0x47f   : > { %v4969_v63 = vpop.f32.mrf.mxu2  ;;  %10669 = vmatmul.msk.f32.gmra.mxu0 %vm277_vm15, %v6005_v46 }
 0x480   : > { %v5484_v52 = vpop.f32.mrf.mxu0  ;;  %10687 = vmatmul.msk.f32.gmra.mxu1 %vm277_vm15, %v14761_v4  ;;  %v4987_v54 = vadd.f32 %v4969_v63, %v14507_v28  ;;  %v14771_v53 = vsel %vm5043_vm3, %v5027_v37, %v5064_v9  ;;  %v6126_v28 = vld [vmem:[#allocation2 + $0x100] sm:$0x3]  ;;  %v14788_v37 = vadd.f32 %v14703_v34, %v5479_v48  ;;  %v6860_v9 = vsel %vm436_vm1, %v6858_v42, %v6859_v33 }
 0x481   : > { %17486 = vst [vmem:[#allocation46_spill] sm:$0xff] %v14771_v53  ;;  %5159 = vrot.lane.b32.xlu1 %v14771_v53, %s11223_s22  ;;  %10708 = vmatmul.msk.f32.vlgmr.msrb.gmra.mxu3 %vm277_vm15, %v13800_v18  ;;  %v6292_v46 = vrot.slane %v6126_v28, 1  ;;  %v14796_v53 = vld [vmem:[#allocation3 + $0x10] sm:$0x3]  ;;  %v5482_v18 = vadd.f32 %v5481_v19, %v5381_v26 }
 0x482   : > { %v5007_v24 = vmul.f32 %v14444_v6, %v4987_v54  ;;  %v6861_v42 = vrot.slane %v14796_v53, 1 }
 0x483   : > { %v5138_v50 = vpop.permute.xlu2 %5137  ;;  %v6293_v48 = vsel %vm436_vm1, %v13778_v21, %v6292_v46  ;;  %v5485_v46 = vadd.f32 %v5484_v52, %v5384_v23 }
 0x484   : > { %10690 = vmatmul.msk.f32.vlgmr.msrb.gmra.mxu2 %vm277_vm15, %v13804_v27  ;;  %v5028_v63 = vadd.f32 %v14451_v1, %v5007_v24  ;;  %5183 = vst.msk [vmem:[#allocation3 + $0x39] sm:$0xff] %vm277_vm15, %v5138_v50  ;;  %v5902_v54 = vpop.f32.mrf.mxu3  ;;  %v6449_v24 = vrot.slane %v6126_v28, 2  ;;  %v6862_v21 = vsel %vm436_vm1, %v6859_v33, %v6861_v42  ;;  %v6129_v33 = vld [vmem:[#allocation2 + $0x118] sm:$0x3] }
 0x485   : > { %v14790_v6 = vpop.f32.mrf.mxu1  ;;  %v14840_v23 = vadd.f32 %v14759_v22, %v5485_v46 }
 0x486   : > { %vm5044_vm4 = vcmp.gt.f32.partialorder %v5028_v63, 0.0  ;;  %v5065_v27 = vmul.f32 %v14459_v15, %v5028_v63  ;;  %v6450_v19 = vsel %vm674_vm2, %v13781_v14, %v6449_v24 }
 0x487   : > { %v5737_v1 = vpop.f32.mrf.mxu2  ;;  %10728 = vmatmul.msk.f32.vlgmr.msrb.gmra.mxu0 %vm277_vm15, %v6860_v9 }
 0x488   : > { %v14792_v36 = vpop.f32.mrf.mxu0  ;;  %10745 = vmatmul.msk.f32.vlgmr.msrb.gmra.mxu1 %vm277_vm15, %v14776_v62  ;;  %v5785_v50 = vadd.f32 %v5737_v1, %v14512_v30  ;;  %v14801_v34 = vsel %vm5044_vm4, %v5028_v63, %v5065_v27  ;;  %v14815_v30 = vadd.f32 %v14728_v5, %v5482_v18 }
 0x489   : > { %17487 = vst [vmem:[#allocation61_spill] sm:$0xff] %v14801_v34  ;;  %5161 = vrot.lane.b32.xlu2 %v14801_v34, %s11223_s22  ;;  %10709 = vmatmul.msk.f32.gmra.mxu3 %vm277_vm15, %v6450_v19  ;;  %v6454_v19 = vrot.slane %v6129_v33, 2 }
 0x48a   : > { %v5950_v15 = vadd.f32 %v5902_v54, %v5785_v50  ;;  %v14826_v54 = vld [vmem:[#allocation3 + $0x18] sm:$0xff] }
 0x48b   : > { %v5134_v26 = vpop.permute.xlu0 %5133  ;;  %v6863_v52 = vrot.slane %v14826_v54, 1 }
 0x48c   : > { %10691 = vmatmul.msk.f32.gmra.mxu2 %vm277_vm15, %v6293_v48  ;;  %5181 = vst.msk [vmem:[#allocation3 + $0x21] sm:$0xff] %vm277_vm15, %v5134_v26  ;;  %v5905_v9 = vpop.f32.mrf.mxu3  ;;  %v6297_v48 = vrot.slane %v6129_v33, 1 }
 0x48d   : > { %v14817_v28 = vpop.f32.mrf.mxu1 }
 0x48f   : > { %v5740_v27 = vpop.f32.mrf.mxu2  ;;  %10729 = vmatmul.msk.f32.gmra.mxu0 %vm277_vm15, %v6862_v21 }
 0x490   : > { %v14819_v63 = vpop.f32.mrf.mxu0  ;;  %10746 = vmatmul.msk.f32.gmra.mxu1 %vm277_vm15, %v14764_v56  ;;  %v5786_v14 = vadd.f32 %v5740_v27, %v14530_v13  ;;  %v6455_v27 = vsel %vm674_vm2, %v17429_v57, %v6454_v19 }
 0x491   : > { %10710 = vmatmul.msk.f32.gmra.mxu3 %vm277_vm15, %v13863_v2 }
 0x492   : > { %v5951_v5 = vadd.f32 %v5905_v9, %v5786_v14  ;;  %v6298_v9 = vsel %vm436_vm1, %v13840_v61, %v6297_v48 }
 0x493   : > { %v5136_v1 = vpop.permute.xlu1 %5135  ;;  %v14830_v24 = vld [vmem:[#allocation3 + $0x20] sm:$0xff]  ;;  %v14855_v22 = vld [vmem:[#allocation3 + $0x28] sm:$0x3] }
 0x494   : > { %10692 = vmatmul.msk.f32.gmra.mxu2 %vm277_vm15, %v13867_v31  ;;  %5182 = vst.msk [vmem:[#allocation3 + $0x31] sm:$0xff] %vm277_vm15, %v5136_v1  ;;  %v14837_v13 = vrot.slane %v14830_v24, 1  ;;  %v5908_v2 = vpop.f32.mrf.mxu3 }
 0x495   : > { %v14842_v18 = vpop.f32.mrf.mxu1 }
 0x496   : > { %v14848_v31 = vsel %vm436_vm1, %v6863_v52, %v14837_v13 }
 0x497   : > { %v5743_v42 = vpop.f32.mrf.mxu2  ;;  %10730 = vmatmul.msk.f32.gmra.mxu0 %vm277_vm15, %v14848_v31 }
 0x498   : > { %v14844_v50 = vpop.f32.mrf.mxu0  ;;  %10747 = vmatmul.msk.f32.gmra.mxu1 %vm277_vm15, %v14826_v54  ;;  %v5787_v26 = vadd.f32 %v5743_v42, %v14548_v20  ;;  %v6866_v20 = vrot.slane %v14855_v22, 1  ;;  %v6107_v42 = vadd.f32 %v14792_v36, %v5950_v15  ;;  %v6132_v36 = vld [vmem:[#allocation2 + $0x130] sm:$0x3] }
 0x499   : > { %10711 = vmatmul.msk.f32.gmra.mxu3 %vm277_vm15, %v6455_v27 }
 0x49a   : > { %v5952_v21 = vadd.f32 %v5908_v2, %v5787_v26  ;;  %v6867_v57 = vsel %vm436_vm1, %v14837_v13, %v6866_v20 }
 0x49b   : > { %v5144_v46 = vpop.permute.xlu2 %5143  ;;  %v14875_v48 = vld [vmem:[#allocation3 + $0x30] sm:$0xff]  ;;  %v14877_v2 = vld [vmem:[#allocation3 + $0x38] sm:$0xff] }
 0x49c   : > { %10693 = vmatmul.msk.f32.gmra.mxu2 %vm277_vm15, %v6298_v9  ;;  %5186 = vst.msk [vmem:[#allocation3 + $0x61] sm:$0xff] %vm277_vm15, %v5144_v46  ;;  %v5911_v33 = vpop.f32.mrf.mxu3  ;;  %v14883_v9 = vadd.f32 %v14790_v6, %v6107_v42  ;;  %v14890_v27 = vrot.slane %v14877_v2, 1 }
 0x49d   : > { %v14865_v14 = vpop.f32.mrf.mxu1 }
 0x49f   : > { %v5746_v52 = vpop.f32.mrf.mxu2  ;;  %10731 = vmatmul.msk.f32.gmra.mxu0 %vm277_vm15, %v6867_v57 }
 0x4a0   : > { %v14867_v1 = vpop.f32.mrf.mxu0  ;;  %10748 = vmatmul.msk.f32.gmra.mxu1 %vm277_vm15, %v14830_v24  ;;  %v5788_v61 = vadd.f32 %v5746_v52, %v14565_v55  ;;  %v6868_v55 = vrot.slane %v14875_v48, 1  ;;  %v6459_v52 = vrot.slane %v6132_v36, 2 }
 0x4a1   : > { %10712 = vmatmul.msk.f32.gmra.mxu3 %vm277_vm15, %v17431_v49 }
 0x4a2   : > { %v5953_v19 = vadd.f32 %v5911_v33, %v5788_v61  ;;  %v14901_v49 = vsel %vm436_vm1, %v6868_v55, %v14890_v27  ;;  %v6302_v33 = vrot.slane %v6132_v36, 1  ;;  %v6108_v61 = vadd.f32 %v14819_v63, %v5951_v5 }
 0x4a3   : > { %v5140_v26 = vpop.permute.xlu0 %5139 }
 0x4a4   : > { %10694 = vmatmul.msk.f32.gmra.mxu2 %vm277_vm15, %v13912_v3  ;;  %5184 = vst.msk [vmem:[#allocation3 + $0x49] sm:$0xff] %vm277_vm15, %v5140_v26  ;;  %v5914_v20 = vpop.f32.mrf.mxu3  ;;  %v6303_v42 = vsel %vm436_vm1, %v17435_v44, %v6302_v33  ;;  %v6460_v26 = vsel %vm674_vm2, %v17437_v29, %v6459_v52  ;;  %v14914_v55 = vadd.f32 %v14817_v28, %v6108_v61  ;;  %v6135_v61 = vld [vmem:[#allocation2 + $0x148] sm:$0x3] }
 0x4a5   : > { %v14892_v46 = vpop.f32.mrf.mxu1 }
 0x4a7   : > { %v5749_v3 = vpop.f32.mrf.mxu2  ;;  %10732 = vmatmul.msk.f32.gmra.mxu0 %vm277_vm15, %v14901_v49 }
 0x4a8   : > { %v14894_v15 = vpop.f32.mrf.mxu0  ;;  %10749 = vmatmul.msk.f32.gmra.mxu1 %vm277_vm15, %v14875_v48  ;;  %v5789_v6 = vadd.f32 %v5749_v3, %v14583_v10  ;;  %v14911_v10 = vld [vmem:[#allocation3 + $0x40] sm:$0x3] }
 0x4a9   : > { %17488 = vst [vmem:[#allocation60_spill] sm:$0xff] %v14911_v10  ;;  %10713 = vmatmul.msk.f32.gmra.mxu3 %vm277_vm15, %v6460_v26  ;;  %v6871_v44 = vrot.slane %v14911_v10, 1 }
 0x4aa   : > { %v5954_v57 = vadd.f32 %v5914_v20, %v5789_v6 }
 0x4ab   : > { %v5142_v34 = vpop.permute.xlu1 %5141  ;;  %v6872_v28 = vsel %vm436_vm1, %v14890_v27, %v6871_v44  ;;  %v14929_v3 = vld [vmem:[#allocation3 + $0x48] sm:$0xff] }
 0x4ac   : > { %10695 = vmatmul.msk.f32.gmra.mxu2 %vm277_vm15, %v6303_v42  ;;  %5185 = vst.msk [vmem:[#allocation3 + $0x51] sm:$0xff] %vm277_vm15, %v5142_v34  ;;  %v5917_v36 = vpop.f32.mrf.mxu3  ;;  %v6109_v34 = vadd.f32 %v14844_v50, %v5952_v21 }
 0x4ad   : > { %v14918_v63 = vpop.f32.mrf.mxu1 }
 0x4ae   : > { %v14937_v42 = vadd.f32 %v14842_v18, %v6109_v34  ;;  %v6307_v18 = vrot.slane %v6135_v61, 1 }
 0x4af   : > { %v5752_v29 = vpop.f32.mrf.mxu2  ;;  %10733 = vmatmul.msk.f32.gmra.mxu0 %vm277_vm15, %v6872_v28  ;;  %v6110_v28 = vadd.f32 %v14867_v1, %v5953_v19 }
 0x4b0   : > { %v14920_v5 = vpop.f32.mrf.mxu0  ;;  %10750 = vmatmul.msk.f32.gmra.mxu1 %vm277_vm15, %v14877_v2  ;;  %v5790_v20 = vadd.f32 %v5752_v29, %v14600_v51  ;;  %v6873_v51 = vrot.slane %v14929_v3, 1  ;;  %v6464_v29 = vrot.slane %v6135_v61, 2 }
 0x4b1   : > { %10714 = vmatmul.msk.f32.gmra.mxu3 %vm277_vm15, %v17443_v0  ;;  %v14968_v10 = vadd.f32 %v14865_v14, %v6110_v28 }
 0x4b2   : > { %v5955_v6 = vadd.f32 %v5917_v36, %v5790_v20 }
 0x4b3   : > { %v5150_v33 = vpop.permute.xlu2 %5149  ;;  %v14934_v52 = vld [vmem:[#allocation3 + $0x50] sm:$0xff]  ;;  %v14959_v20 = vld [vmem:[#allocation3 + $0x58] sm:$0x3] }
 0x4b4   : > { %10696 = vmatmul.msk.f32.gmra.mxu2 %vm277_vm15, %v17441_v16  ;;  %5189 = vst.msk [vmem:[#allocation3 + $0x81] sm:$0xff] %vm277_vm15, %v5150_v33  ;;  %v14944_v50 = vrot.slane %v14934_v52, 1  ;;  %v5920_v44 = vpop.f32.mrf.mxu3  ;;  %v6308_v33 = vsel %vm436_vm1, %v17467_v40, %v6307_v18 }
 0x4b5   : > { %v14946_v21 = vpop.f32.mrf.mxu1 }
 0x4b6   : > { %v14952_v16 = vsel %vm436_vm1, %v6873_v51, %v14944_v50  ;;  %v6465_v51 = vsel %vm674_vm2, %v17468_v38, %v6464_v29 }
 0x4b7   : > { %v5755_v36 = vpop.f32.mrf.mxu2  ;;  %10734 = vmatmul.msk.f32.gmra.mxu0 %vm277_vm15, %v14952_v16 }
 0x4b8   : > { %v14948_v26 = vpop.f32.mrf.mxu0  ;;  %10751 = vmatmul.msk.f32.gmra.mxu1 %vm277_vm15, %v14929_v3  ;;  %v5791_v0 = vadd.f32 %v5755_v36, %v14618_v17  ;;  %v6876_v17 = vrot.slane %v14959_v20, 1  ;;  %v6111_v36 = vadd.f32 %v14894_v15, %v5954_v57 }
 0x4b9   : > { %10715 = vmatmul.msk.f32.gmra.mxu3 %vm277_vm15, %v6465_v51 }
 0x4ba   : > { %v5956_v34 = vadd.f32 %v5920_v44, %v5791_v0  ;;  %v6877_v14 = vsel %vm436_vm1, %v14944_v50, %v6876_v17  ;;  %v14983_v44 = vld [vmem:[#allocation3 + $0x60] sm:$0xff] }
 0x4bb   : > { %v5146_v61 = vpop.permute.xlu0 %5145  ;;  %v6878_v51 = vrot.slane %v14983_v44, 1 }
 0x4bc   : > { %10697 = vmatmul.msk.f32.gmra.mxu2 %vm277_vm15, %v6308_v33  ;;  %5187 = vst.msk [vmem:[#allocation3 + $0x69] sm:$0xff] %vm277_vm15, %v5146_v61  ;;  %v5923_v40 = vpop.f32.mrf.mxu3  ;;  %v6138_v33 = vld [vmem:[#allocation2 + $0x160] sm:$0x3] }
 0x4bd   : > { %v14973_v1 = vpop.f32.mrf.mxu1 }
 0x4bf   : > { %v5758_v18 = vpop.f32.mrf.mxu2  ;;  %10735 = vmatmul.msk.f32.gmra.mxu0 %vm277_vm15, %v6877_v14  ;;  %v6112_v14 = vadd.f32 %v14920_v5, %v5955_v6 }
 0x4c0   : > { %v14975_v19 = vpop.f32.mrf.mxu0  ;;  %10752 = vmatmul.msk.f32.gmra.mxu1 %vm277_vm15, %v14934_v52  ;;  %v5792_v38 = vadd.f32 %v5758_v18, %v14636_v58  ;;  %v14993_v58 = vadd.f32 %v14892_v46, %v6111_v36  ;;  %v6312_v46 = vrot.slane %v6138_v33, 1  ;;  %v6469_v18 = vrot.slane %v6138_v33, 2 }
 0x4c1   : > { %10716 = vmatmul.msk.f32.gmra.mxu3 %vm277_vm15, %v14086_v25 }
 0x4c2   : > { %v14986_v29 = vadd.f32 %v5923_v40, %v5792_v38  ;;  %v6470_v33 = vsel %vm674_vm2, %v17454_v45, %v6469_v18 }
 0x4c3   : > { %v5148_v0 = vpop.permute.xlu1 %5147  ;;  %v14990_v28 = vld [vmem:[#allocation3 + $0x68] sm:$0xff]  ;;  %v15015_v38 = vld [vmem:[#allocation3 + $0x70] sm:$0x3] }
 0x4c4   : > { %10698 = vmatmul.msk.f32.gmra.mxu2 %vm277_vm15, %v17470_v11  ;;  %5188 = vst.msk [vmem:[#allocation3 + $0x79] sm:$0xff] %vm277_vm15, %v5148_v0  ;;  %v15000_v15 = vrot.slane %v14990_v28, 1  ;;  %v5926_v17 = vpop.f32.mrf.mxu3  ;;  %v6313_v0 = vsel %vm436_vm1, %v17453_v47, %v6312_v46  ;;  %v6881_v5 = vrot.slane %v15015_v38, 1 }
 0x4c5   : > { %v15002_v57 = vpop.f32.mrf.mxu1  ;;  %17489 = vst [vmem:[#allocation56_spill] sm:$0xff] %v15015_v38 }
 0x4c6   : > { %v15008_v11 = vsel %vm436_vm1, %v6878_v51, %v15000_v15 }
 0x4c7   : > { %v5761_v40 = vpop.f32.mrf.mxu2  ;;  %10736 = vmatmul.msk.f32.gmra.mxu0 %vm277_vm15, %v15008_v11 }
 0x4c8   : > { %v15004_v61 = vpop.f32.mrf.mxu0  ;;  %10753 = vmatmul.msk.f32.gmra.mxu1 %vm277_vm15, %v14983_v44  ;;  %v5793_v25 = vadd.f32 %v5761_v40, %v14656_v8  ;;  %v15026_v8 = vadd.f32 %v14918_v63, %v6112_v14  ;;  %v6882_v63 = vsel %vm436_vm1, %v15000_v15, %v6881_v5  ;;  %v6481_v14 = vrot.slane %v14730_v12, 2 }
 0x4c9   : > { %10717 = vmatmul.msk.f32.gmra.mxu3 %vm277_vm15, %v6470_v33  ;;  %v6324_v5 = vrot.slane %v14730_v12, 1 }
 0x4ca   : > { %v15018_v36 = vadd.f32 %v5926_v17, %v5793_v25  ;;  %v6113_v25 = vadd.f32 %v14948_v26, %v5956_v34 }
 0x4cb   : > { %v5156_v51 = vpop.permute.xlu2 %5155  ;;  %v15041_v40 = vld [vmem:[#allocation3 + $0x78] sm:$0xff]  ;;  %v15043_v18 = vld [vmem:[#allocation3 + $0x80] sm:$0xff] }
 0x4cc   : > { %10699 = vmatmul.msk.f32.gmra.mxu2 %vm277_vm15, %v6313_v0  ;;  %5192 = vst.msk [vmem:[#allocation3 + $0xa9] sm:$0xff] %vm277_vm15, %v5156_v51  ;;  %v5929_v47 = vpop.f32.mrf.mxu3  ;;  %v17186_v0 = vrot.slane %v14761_v4, 2  ;;  %v6883_v26 = vrot.slane %v15041_v40, 1  ;;  %v15062_v34 = vrot.slane %v15043_v18, 1 }
 0x4cd   : > { %v15031_v6 = vpop.f32.mrf.mxu1  ;;  %17490 = vst [vmem:[#allocation63_spill] sm:$0xff] %v15041_v40 }
 0x4ce   : > { %17491 = vst [vmem:[#allocation57_spill] sm:$0xff] %v15062_v34  ;;  %v15071_v12 = vsel %vm674_vm2, %v6481_v14, %v17186_v0  ;;  %v6114_v0 = vadd.f32 %v14975_v19, %v14986_v29 }
 0x4cf   : > { %v5764_v46 = vpop.f32.mrf.mxu2  ;;  %10737 = vmatmul.msk.f32.gmra.mxu0 %vm277_vm15, %v6882_v63 }
 0x4d0   : > { %v15033_v17 = vpop.f32.mrf.mxu0  ;;  %10754 = vmatmul.msk.f32.gmra.mxu1 %vm277_vm15, %v14990_v28  ;;  %v5794_v45 = vadd.f32 %v5764_v46, %v14675_v39  ;;  %v15053_v39 = vadd.f32 %v14946_v21, %v6113_v25  ;;  %v17189_v46 = vrot.slane %v14761_v4, 1  ;;  %v15078_v25 = vsel %vm436_vm1, %v6883_v26, %v15062_v34 }
 0x4d1   : > { %10718 = vmatmul.msk.f32.gmra.mxu3 %vm277_vm15, %v17475_v43  ;;  %17492 = vst [vmem:[#allocation53_spill] sm:$0xff] %v15078_v25 }
 0x4d2   : > { %v15048_v33 = vadd.f32 %v5929_v47, %v5794_v45  ;;  %v15083_v38 = vsel %vm436_vm1, %v6324_v5, %v17189_v46  ;;  %v15096_v5 = vld [vmem:[#allocation3 + $0x88] sm:$0x3]  ;;  %v15099_v46 = vadd.f32 %v14973_v1, %v6114_v0 }
 0x4d3   : > { %v5152_v51 = vpop.permute.xlu0 %5151  ;;  %17493 = vst [vmem:[#allocation68_spill] sm:$0xff] %v15096_v5 }
 0x4d4   : > { %10700 = vmatmul.msk.f32.gmra.mxu2 %vm277_vm15, %v14130_v60  ;;  %5190 = vst.msk [vmem:[#allocation3 + $0x91] sm:$0xff] %vm277_vm15, %v5152_v51  ;;  %v6141_v60 = vld [vmem:[#allocation2 + $0x178] sm:$0x3]  ;;  %v5932_v21 = vpop.f32.mrf.mxu3 }
 0x4d5   : > { %v15064_v47 = vpop.f32.mrf.mxu1  ;;  %v6317_v51 = vrot.slane %v6141_v60, 1  ;;  %v6474_v14 = vrot.slane %v6141_v60, 2 }
 0x4d7   : > { %v5767_v63 = vpop.f32.mrf.mxu2  ;;  %10738 = vmatmul.msk.f32.gmra.mxu0 %vm277_vm15, %v15078_v25  ;;  %v6475_v26 = vsel %vm674_vm2, %v17478_v35, %v6474_v14  ;;  %v17501_v25 = vld [vmem:[#allocation77_spill] sm:$0xff] }
 0x4d8   : > { %v15066_v45 = vpop.f32.mrf.mxu0  ;;  %10755 = vmatmul.msk.f32.gmra.mxu1 %vm277_vm15, %v15041_v40  ;;  %v5795_v43 = vadd.f32 %v5767_v63, %v14701_v59  ;;  %v6318_v59 = vsel %vm436_vm1, %v17476_v7, %v6317_v51  ;;  %v6886_v7 = vrot.slane %v15096_v5, 1  ;;  %v10833_v5 = vld [vmem:[%s17032_s5 + $0x18] sm:$0xf] }
 0x4d9   : > { %10719 = vmatmul.msk.f32.gmra.mxu3 %vm277_vm15, %v6475_v26  ;;  %10834 = vmatpush.msk.msrb.mxu2 %vm3696_vm14, %v10833_v5 }
 0x4da   : > { %v15089_v40 = vadd.f32 %v5932_v21, %v5795_v43  ;;  %v6887_v1 = vsel %vm436_vm1, %v15062_v34, %v6886_v7  ;;  %v6115_v43 = vadd.f32 %v15004_v61, %v15018_v36  ;;  %v17496_v7 = vld [vmem:[#allocation79_spill] sm:$0xff] }
 0x4db   : > { %v5154_v63 = vpop.permute.xlu1 %5153  ;;  %v15114_v0 = vld [vmem:[#allocation3 + $0x90] sm:$0xff] }
 0x4dc   : > { %10701 = vmatmul.msk.f32.gmra.mxu2 %vm277_vm15, %v6318_v59  ;;  %5191 = vst.msk [vmem:[#allocation3 + $0x99] sm:$0xff] %vm277_vm15, %v5154_v63  ;;  %v5935_v60 = vpop.f32.mrf.mxu3  ;;  %v17495_v59 = vld [vmem:[#allocation80_spill] sm:$0xff]  ;;  %v6144_v63 = vld [vmem:[#allocation2 + $0x190] sm:$0x3] }
 0x4dd   : > { %v15103_v19 = vpop.f32.mrf.mxu1  ;;  %17494 = vst [vmem:[#allocation64_spill] sm:$0xff] %v15114_v0 }
 0x4df   : > { %v5770_v35 = vpop.f32.mrf.mxu2  ;;  %10739 = vmatmul.msk.f32.gmra.mxu0 %vm277_vm15, %v6887_v1 }
 0x4e0   : > { %v15105_v29 = vpop.f32.mrf.mxu0  ;;  %10756 = vmatmul.msk.f32.gmra.mxu1 %vm277_vm15, %v15043_v18  ;;  %v5796_v21 = vadd.f32 %v5770_v35, %v14726_v41  ;;  %v15125_v41 = vadd.f32 %v15002_v57, %v6115_v43  ;;  %v6888_v35 = vrot.slane %v15114_v0, 1  ;;  %v6322_v57 = vrot.slane %v6144_v63, 1 }
 0x4e1   : > { %10720 = vmatmul.msk.f32.gmra.mxu3 %vm277_vm15, %v17496_v7  ;;  %v17499_v7 = vld [vmem:[#allocation62_spill] sm:$0xff] }
 0x4e2   : > { %v15118_v51 = vadd.f32 %v5935_v60, %v5796_v21 }
 0x4e3   : > { %v5162_v14 = vpop.permute.xlu2 %5161  ;;  %v15122_v26 = vld [vmem:[#allocation3 + $0x98] sm:$0xff]  ;;  %v15150_v34 = vld [vmem:[#allocation3 + $0xa0] sm:$0x3] }
 0x4e4   : > { %10702 = vmatmul.msk.f32.gmra.mxu2 %vm277_vm15, %v17495_v59  ;;  %5195 = vst.msk [vmem:[#allocation3 + $0xc9] sm:$0xff] %vm277_vm15, %v5162_v14  ;;  %v15132_v61 = vrot.slane %v15122_v26, 1  ;;  %v5938_v1 = vpop.f32.mrf.mxu3  ;;  %v6479_v59 = vrot.slane %v6144_v63, 2 }
 0x4e5   : > { %v15134_v36 = vpop.f32.mrf.mxu1  ;;  %17500 = vst [vmem:[#allocation65_spill] sm:$0xff] %v15150_v34 }
 0x4e6   : > { %17497 = vst [vmem:[#allocation66_spill] sm:$0xff] %v15132_v61  ;;  %v15140_v21 = vsel %vm436_vm1, %v6888_v35, %v15132_v61  ;;  %v6116_v35 = vadd.f32 %v15033_v17, %v15048_v33  ;;  %v6891_v17 = vrot.slane %v15150_v34, 1 }
 0x4e7   : > { %17498 = vst [vmem:[#allocation67_spill] sm:$0xff] %v15140_v21  ;;  %v5773_v43 = vpop.f32.mrf.mxu2  ;;  %10740 = vmatmul.msk.f32.gmra.mxu0 %vm277_vm15, %v15140_v21 }
 0x4e8   : > { %v15136_v60 = vpop.f32.mrf.mxu0  ;;  %10757 = vmatmul.msk.f32.gmra.mxu1 %vm277_vm15, %v15114_v0  ;;  %v5797_v14 = vadd.f32 %v5773_v43, %v17499_v7  ;;  %v6323_v0 = vsel %vm436_vm1, %v17501_v25, %v6322_v57  ;;  %v6480_v43 = vsel %vm674_vm2, %v17485_v32, %v6479_v59  ;;  %v15163_v21 = vadd.f32 %v15031_v6, %v6116_v35  ;;  %v10851_v25 = vld [vmem:[%s17032_s5 + $0x1c] sm:$0xf]  ;;  %v6147_v35 = vld [vmem:[#allocation2 + $0x1a8] sm:$0x3] }
 0x4e9   : > { %10721 = vmatmul.msk.f32.gmra.mxu3 %vm277_vm15, %v6480_v43  ;;  %v6892_v57 = vsel %vm436_vm1, %v15132_v61, %v6891_v17  ;;  %v6117_v59 = vadd.f32 %v15066_v45, %v15089_v40  ;;  %v6327_v45 = vrot.slane %v6147_v35, 1 }
 0x4ea   : > { %v15155_v63 = vadd.f32 %v5938_v1, %v5797_v14  ;;  %10852 = vmatpush.msk.msrb.mxu3 %vm3696_vm14, %v10851_v25  ;;  %v15182_v1 = vld [vmem:[#allocation3 + $0xa8] sm:$0xff] }
 0x4eb   : > { %v5158_v7 = vpop.permute.xlu0 %5157  ;;  %v6893_v17 = vrot.slane %v15182_v1, 1 }
 0x4ec   : > { %10703 = vmatmul.msk.f32.gmra.mxu2 %vm277_vm15, %v6323_v0  ;;  %5193 = vst.msk [vmem:[#allocation3 + $0xb1] sm:$0xff] %vm277_vm15, %v5158_v7  ;;  %v5941_v32 = vpop.f32.mrf.mxu3 }
 0x4ed   : > { %v15168_v33 = vpop.f32.mrf.mxu1 }
 0x4ef   : > { %v5776_v0 = vpop.f32.mrf.mxu2  ;;  %10741 = vmatmul.msk.f32.gmra.mxu0 %vm277_vm15, %v6892_v57 }
 0x4f0   : > { %v15173_v5 = vpop.f32.mrf.mxu0  ;;  %10758 = vmatmul.msk.f32.gmra.mxu1 %vm277_vm15, %v15122_v26  ;;  %v5798_v6 = vadd.f32 %v5776_v0, %v14788_v37  ;;  %v15193_v37 = vadd.f32 %v15064_v47, %v6117_v59  ;;  %v10889_v47 = vld [vmem:[%s17032_s5 + $0x4] sm:$0xf] }
 0x4f1   : > { %10722 = vmatmul.msk.f32.gmra.mxu3 %vm277_vm15, %v15071_v12  ;;  %10890 = vmatpush.msk.msrb.mxu1 %vm3696_vm14, %v10889_v47  ;;  %v6118_v47 = vadd.f32 %v15105_v29, %v15118_v51 }
 0x4f2   : > { %v15186_v14 = vadd.f32 %v5941_v32, %v5798_v6  ;;  %v6484_v32 = vrot.slane %v6147_v35, 2  ;;  %v17502_v35 = vrot.slane %v14761_v4, 1 }
 0x4f3   : > { %v5160_v43 = vpop.permute.xlu1 %5159  ;;  %v15190_v7 = vld [vmem:[#allocation3 + $0xb0] sm:$0xff]  ;;  %v15229_v34 = vld [vmem:[#allocation3 + $0xb8] sm:$0x3] }
 0x4f4   : > { %10704 = vmatmul.msk.f32.gmra.mxu2 %vm277_vm15, %v15083_v38  ;;  %5194 = vst.msk [vmem:[#allocation3 + $0xc1] sm:$0xff] %vm277_vm15, %v5160_v43  ;;  %v15200_v40 = vrot.slane %v15190_v7, 1  ;;  %v10869_v38 = vld [vmem:[%s17032_s5 + $0x20] sm:$0xf]  ;;  %v5944_v6 = vpop.f32.mrf.mxu3  ;;  %v6328_v43 = vsel %vm436_vm1, %v17502_v35, %v6327_v45  ;;  %v7100_v45 = vrot.slane %v14776_v62, 2 }
 0x4f5   : > { %v15202_v25 = vpop.f32.mrf.mxu1  ;;  %10870 = vmatpush.msk.msrb.mxu0 %vm3696_vm14, %v10869_v38 }
 0x4f6   : > { %v15214_v0 = vsel %vm436_vm1, %v6893_v17, %v15200_v40  ;;  %v17503_v17 = vrot.slane %v14761_v4, 2  ;;  %v7101_v4 = vrot.slane %v14764_v56, 2  ;;  %v6119_v56 = vadd.f32 %v15136_v60, %v15155_v63 }
 0x4f7   : > { %v5779_v57 = vpop.f32.mrf.mxu2  ;;  %10742 = vmatmul.msk.f32.gmra.mxu0 %vm277_vm15, %v15214_v0 }
 0x4f8   : > { %v15210_v12 = vpop.f32.mrf.mxu0  ;;  %10759 = vmatmul.msk.f32.gmra.mxu1 %vm277_vm15, %v15182_v1  ;;  %v5799_v59 = vadd.f32 %v5779_v57, %v14815_v30  ;;  %v6485_v38 = vsel %vm674_vm2, %v17503_v17, %v6484_v32  ;;  %v15235_v30 = vadd.f32 %v15103_v19, %v6118_v47  ;;  %v6896_v57 = vrot.slane %v15229_v34, 1 }
 0x4f9   : > { %10723 = vmatmul.msk.f32.gmra.mxu3 %vm277_vm15, %v6485_v38  ;;  %v7102_v51 = vsel %vm674_vm2, %v7100_v45, %v7101_v4  ;;  %v7105_v38 = vrot.slane %v14826_v54, 2 }
 0x4fa   : > { %v5964_v61 = vadd.f32 %v5944_v6, %v5799_v59  ;;  %v6897_v62 = vsel %vm436_vm1, %v15200_v40, %v6896_v57  ;;  %v15257_v59 = vrot.slane %v14830_v24, 2 }
 0x4fc   : > { %10705 = vmatmul.msk.f32.gmra.mxu2 %vm277_vm15, %v6328_v43  ;;  %v5947_v17 = vpop.f32.mrf.mxu3  ;;  %v15261_v43 = vadd.f32 %v15134_v36, %v6119_v56  ;;  %v7584_v63 = vsel %vm674_vm2, %v7105_v38, %v15257_v59 }
 0x4fd   : > { %v15241_v32 = vpop.f32.mrf.mxu1 }
 0x4ff   : > { %v5782_v29 = vpop.f32.mrf.mxu2  ;;  %10743 = vmatmul.msk.f32.gmra.mxu0 %vm277_vm15, %v6897_v62  ;;  %v15288_v62 = vld [vmem:[%s17031_s4 + $0x1] ss:$0 sm:$0xff] }
 0x500   : > { %v15243_v35 = vpop.f32.mrf.mxu0  ;;  %10760 = vmatmul.msk.f32.gmra.mxu1 %vm277_vm15, %v15190_v7  ;;  %v5800_v19 = vadd.f32 %v5782_v29, %v14840_v23  ;;  %v7103_v23 = vrot.slane %v14796_v53, 2  ;;  %v7260_v53 = vld [vmem:[#allocation3 + $0x28] sm:$0x3]  ;;  %v6120_v29 = vadd.f32 %v15173_v5, %v15186_v14  ;;  %v15300_v5 = vld [vmem:[%s17031_s4 + $0x2] ss:$0 sm:$0xff] }
 0x501   : > { %10781 = vmatmul.msk.f32.vlgmr.msra.gmra.mxu3 %vm277_vm15, %v14826_v54 }
 0x502   : > { %v15254_v6 = vadd.f32 %v5947_v17, %v5800_v19  ;;  %v15278_v17 = vld [vmem:[%s17031_s4] ss:$0 sm:$0xff]  ;;  %v7104_v54 = vsel %vm674_vm2, %v7101_v4, %v7103_v23 }
 0x504   : > { %10763 = vmatmul.msk.f32.vlgmr.msra.gmra.mxu2 %vm277_vm15, %v7102_v51  ;;  %v6539_v45 = vpop.f32.mrf.mxu3  ;;  %v15292_v51 = vadd.f32 %v15168_v33, %v6120_v29 }
 0x505   : > { %v15267_v47 = vpop.f32.mrf.mxu1 }
 0x507   : > { %v6382_v57 = vpop.f32.mrf.mxu2  ;;  %10799 = vmatmul.msk.f32.vlgmr.msra.gmra.mxu0 %vm277_vm15, %v14848_v31  ;;  %v7427_v31 = vrot.slane %v7260_v53, 1 }
 0x508   : > { %v15269_v60 = vpop.f32.mrf.mxu0  ;;  %10817 = vmatmul.msk.f32.vlgmr.msra.gmra.mxu1 %vm277_vm15, %v7584_v63  ;;  %v6430_v36 = vadd.f32 %v6382_v57, %v14883_v9  ;;  %v7585_v9 = vrot.slane %v7260_v53, 2  ;;  %v15314_v53 = vld [vmem:[#allocation3 + $0xc8] sm:$0xff] }
 0x509   : > { %10782 = vmatmul.msk.f32.gmra.mxu3 %vm277_vm15, %v14830_v24  ;;  %v7428_v57 = vsel %vm436_vm1, %v14837_v13, %v7427_v31  ;;  %v15320_v29 = vrot.slane %v15314_v53, 2  ;;  %v15327_v13 = vrot.slane %v14877_v2, 2 }
 0x50a   : > { %v6587_v19 = vadd.f32 %v6539_v45, %v6430_v36  ;;  %v7586_v33 = vsel %vm674_vm2, %v15257_v59, %v7585_v9 }
 0x50c   : > { %10764 = vmatmul.msk.f32.gmra.mxu2 %vm277_vm15, %v7104_v54  ;;  %v6607_v4 = vmul.f32 %v15278_v17, %v6587_v19  ;;  %v6542_v38 = vpop.f32.mrf.mxu3  ;;  %v15316_v54 = vld [vmem:[#allocation3 + $0xd0] sm:$0x3]  ;;  %v6121_v19 = vadd.f32 %v15210_v12, %v5964_v61 }
 0x50d   : > { %v15302_v14 = vpop.f32.mrf.mxu1 }
 0x50e   : > { %v6627_v23 = vadd.f32 %v15288_v62, %v6607_v4  ;;  %v15333_v31 = vadd.f32 %v15202_v25, %v6121_v19  ;;  %v7108_v25 = vrot.slane %v14855_v22, 2  ;;  %v6122_v19 = vadd.f32 %v15243_v35, %v15254_v6  ;;  %v7263_v22 = vld [vmem:[#allocation3 + $0x40] sm:$0x3] }
 0x50f   : > { %v6385_v45 = vpop.f32.mrf.mxu2  ;;  %10800 = vmatmul.msk.f32.gmra.mxu0 %vm277_vm15, %v7428_v57  ;;  %v7590_v6 = vrot.slane %v7263_v22, 2 }
 0x510   : > { %v15304_v56 = vpop.f32.mrf.mxu0  ;;  %10818 = vmatmul.msk.f32.gmra.mxu1 %vm277_vm15, %v7586_v33  ;;  %v6431_v24 = vadd.f32 %v6385_v45, %v14914_v55  ;;  %vm6643_vm5 = vcmp.gt.f32.partialorder %v6627_v23, 0.0  ;;  %v6663_v36 = vmul.f32 %v15300_v5, %v6627_v23  ;;  %v7110_v55 = vrot.slane %v14875_v48, 2 }
 0x511   : > { %v8647_v33 = vrot.slane %v15316_v54, 2  ;;  %10783 = vmatmul.msk.f32.gmra.mxu3 %vm277_vm15, %v14875_v48 }
 0x512   : > { %v6588_v9 = vadd.f32 %v6542_v38, %v6431_v24  ;;  %v15323_v4 = vsel %vm6643_vm5, %v6627_v23, %v6663_v36  ;;  %v7589_v45 = vsel %vm674_vm2, %v7110_v55, %v15327_v13  ;;  %v7109_v55 = vsel %vm674_vm2, %v15257_v59, %v7108_v25 }
 0x513   : > { %6744 = vrot.lane.b32.xlu0 %v15323_v4, %s11223_s22  ;;  %v15343_v23 = vsel %vm674_vm2, %v15320_v29, %v8647_v33  ;;  %v7591_v25 = vsel %vm674_vm2, %v15327_v13, %v7590_v6 }
 0x514   : > { %10765 = vmatmul.msk.f32.gmra.mxu2 %vm277_vm15, %v7584_v63  ;;  %v6608_v61 = vmul.f32 %v15278_v17, %v6588_v9  ;;  %17504 = vst [vmem:[#allocation70_spill] sm:$0xff] %v15343_v23  ;;  %v6545_v24 = vpop.f32.mrf.mxu3  ;;  %v17539_v23 = vld [vmem:[#allocation55_spill] sm:$0xff] }
 0x515   : > { %v15339_v12 = vpop.f32.mrf.mxu1 }
 0x516   : > { %v6628_v63 = vadd.f32 %v15288_v62, %v6608_v61 }
 0x517   : > { %v6388_v57 = vpop.f32.mrf.mxu2  ;;  %10801 = vmatmul.msk.f32.gmra.mxu0 %vm277_vm15, %v14901_v49 }
 0x518   : > { %v15345_v38 = vpop.f32.mrf.mxu0  ;;  %10819 = vmatmul.msk.f32.gmra.mxu1 %vm277_vm15, %v7589_v45  ;;  %v6432_v48 = vadd.f32 %v6388_v57, %v14937_v42  ;;  %vm6644_vm6 = vcmp.gt.f32.partialorder %v6628_v63, 0.0  ;;  %v6664_v36 = vmul.f32 %v15300_v5, %v6628_v63  ;;  %v15366_v42 = vadd.f32 %v15241_v32, %v6122_v19 }
 0x519   : > { %10784 = vmatmul.msk.f32.gmra.mxu3 %vm277_vm15, %v14877_v2 }
 0x51a   : > { %v6589_v9 = vadd.f32 %v6545_v24, %v6432_v48  ;;  %v15358_v33 = vsel %vm6644_vm6, %v6628_v63, %v6664_v36  ;;  %v7432_v63 = vrot.slane %v7263_v22, 1 }
 0x51b   : > { %6746 = vrot.lane.b32.xlu1 %v15358_v33, %s11223_s22 }
 0x51c   : > { %10766 = vmatmul.msk.f32.gmra.mxu2 %vm277_vm15, %v7109_v55  ;;  %v6609_v49 = vmul.f32 %v15278_v17, %v6589_v9  ;;  %v6548_v24 = vpop.f32.mrf.mxu3  ;;  %v7433_v2 = vsel %vm436_vm1, %v14890_v27, %v7432_v63  ;;  %v15387_v9 = vrot.slane %v14934_v52, 2  ;;  %v7115_v27 = vrot.slane %v14929_v3, 2 }
 0x51d   : > { %v15371_v35 = vpop.f32.mrf.mxu1 }
 0x51e   : > { %v6629_v59 = vadd.f32 %v15288_v62, %v6609_v49  ;;  %v7594_v6 = vsel %vm674_vm2, %v7115_v27, %v15387_v9 }
 0x51f   : > { %v6391_v57 = vpop.f32.mrf.mxu2  ;;  %10802 = vmatmul.msk.f32.gmra.mxu0 %vm277_vm15, %v7433_v2 }
 0x520   : > { %v15373_v61 = vpop.f32.mrf.mxu0  ;;  %10820 = vmatmul.msk.f32.gmra.mxu1 %vm277_vm15, %v7591_v25  ;;  %v6433_v32 = vadd.f32 %v6391_v57, %v14968_v10  ;;  %vm6645_vm7 = vcmp.gt.f32.partialorder %v6629_v59, 0.0  ;;  %v6665_v48 = vmul.f32 %v15300_v5, %v6629_v59  ;;  %v7266_v25 = vld [vmem:[#allocation3 + $0x58] sm:$0x3] }
 0x521   : > { %10785 = vmatmul.msk.f32.gmra.mxu3 %vm277_vm15, %v14929_v3  ;;  %v17506_v3 = vld [vmem:[#allocation60_spill] sm:$0xff] }
 0x522   : > { %v6590_v36 = vadd.f32 %v6548_v24, %v6433_v32  ;;  %v15384_v19 = vsel %vm6645_vm7, %v6629_v59, %v6665_v48  ;;  %v7113_v57 = vrot.slane %v17506_v3, 2 }
 0x523   : > { %17505 = vst [vmem:[#allocation41_spill] sm:$0xff] %v15384_v19  ;;  %6748 = vrot.lane.b32.xlu2 %v15384_v19, %s11223_s22 }
 0x524   : > { %10767 = vmatmul.msk.f32.gmra.mxu2 %vm277_vm15, %v7589_v45  ;;  %v6610_v10 = vmul.f32 %v15278_v17, %v6590_v36  ;;  %v6551_v63 = vpop.f32.mrf.mxu3  ;;  %v7114_v48 = vsel %vm674_vm2, %v15327_v13, %v7113_v57  ;;  %v7595_v36 = vrot.slane %v7266_v25, 2  ;;  %v15435_v57 = vrot.slane %v14990_v28, 2 }
 0x525   : > { %v15396_v22 = vpop.f32.mrf.mxu1 }
 0x526   : > { %v6630_v49 = vadd.f32 %v15288_v62, %v6610_v10  ;;  %v7437_v10 = vrot.slane %v7266_v25, 1  ;;  %v7596_v13 = vsel %vm674_vm2, %v15387_v9, %v7595_v36 }
 0x527   : > { %v6394_v59 = vpop.f32.mrf.mxu2  ;;  %10803 = vmatmul.msk.f32.gmra.mxu0 %vm277_vm15, %v14952_v16 }
 0x528   : > { %v15398_v55 = vpop.f32.mrf.mxu0  ;;  %10821 = vmatmul.msk.f32.gmra.mxu1 %vm277_vm15, %v7594_v6  ;;  %v6434_v45 = vadd.f32 %v6394_v59, %v14993_v58  ;;  %vm6646_vm8 = vcmp.gt.f32.partialorder %v6630_v49, 0.0  ;;  %v6666_v24 = vmul.f32 %v15300_v5, %v6630_v49 }
 0x529   : > { %10786 = vmatmul.msk.f32.gmra.mxu3 %vm277_vm15, %v14934_v52 }
 0x52a   : > { %v6591_v32 = vadd.f32 %v6551_v63, %v6434_v45  ;;  %v15409_v2 = vsel %vm6646_vm8, %v6630_v49, %v6666_v24  ;;  %v7438_v24 = vsel %vm436_vm1, %v14944_v50, %v7437_v10  ;;  %v7120_v50 = vrot.slane %v14983_v44, 2 }
 0x52b   : > { %17507 = vst [vmem:[#allocation71_spill] sm:$0xff] %v15409_v2  ;;  %6750 = vrot.lane.b32.xlu0 %v15409_v2, %s11223_s22 }
 0x52c   : > { %10768 = vmatmul.msk.f32.gmra.mxu2 %vm277_vm15, %v7114_v48  ;;  %v6611_v58 = vmul.f32 %v15278_v17, %v6591_v32  ;;  %v6554_v63 = vpop.f32.mrf.mxu3  ;;  %v7599_v10 = vsel %vm674_vm2, %v7120_v50, %v15435_v57 }
 0x52d   : > { %v15419_v27 = vpop.f32.mrf.mxu1 }
 0x52e   : > { %v6631_v49 = vadd.f32 %v15288_v62, %v6611_v58  ;;  %v7118_v58 = vrot.slane %v14959_v20, 2 }
 0x52f   : > { %v6397_v59 = vpop.f32.mrf.mxu2  ;;  %10804 = vmatmul.msk.f32.gmra.mxu0 %vm277_vm15, %v7438_v24 }
 0x530   : > { %v15421_v16 = vpop.f32.mrf.mxu0  ;;  %10822 = vmatmul.msk.f32.gmra.mxu1 %vm277_vm15, %v7596_v13  ;;  %v6435_v45 = vadd.f32 %v6397_v59, %v15026_v8  ;;  %vm6647_vm0 = vcmp.gt.f32.partialorder %v6631_v49, 0.0  ;;  %v6667_v52 = vmul.f32 %v15300_v5, %v6631_v49  ;;  %v7119_v20 = vsel %vm674_vm2, %v15387_v9, %v7118_v58 }
 0x531   : > { %10787 = vmatmul.msk.f32.gmra.mxu3 %vm277_vm15, %v14983_v44 }
 0x532   : > { %v6592_v25 = vadd.f32 %v6554_v63, %v6435_v45  ;;  %v15432_v3 = vsel %vm6647_vm0, %v6631_v49, %v6667_v52  ;;  %v7269_v63 = vld [vmem:[#allocation3 + $0x70] sm:$0x3] }
 0x533   : > { %17508 = vst [vmem:[#allocation58_spill] sm:$0xff] %v15432_v3  ;;  %6752 = vrot.lane.b32.xlu1 %v15432_v3, %s11223_s22  ;;  %v7600_v24 = vrot.slane %v7269_v63, 2  ;;  %v7442_v52 = vrot.slane %v7269_v63, 1  ;;  %v17511_v63 = vld [vmem:[#allocation63_spill] sm:$0xff] }
 0x534   : > { %10769 = vmatmul.msk.f32.gmra.mxu2 %vm277_vm15, %v7594_v6  ;;  %v6612_v8 = vmul.f32 %v15278_v17, %v6592_v25  ;;  %v6557_v49 = vpop.f32.mrf.mxu3 }
 0x535   : > { %v15444_v32 = vpop.f32.mrf.mxu1  ;;  %v7601_v9 = vsel %vm674_vm2, %v15435_v57, %v7600_v24 }
 0x536   : > { %v6632_v36 = vadd.f32 %v15288_v62, %v6612_v8 }
 0x537   : > { %v6400_v6 = vpop.f32.mrf.mxu2  ;;  %10805 = vmatmul.msk.f32.gmra.mxu0 %vm277_vm15, %v15008_v11 }
 0x538   : > { %v15446_v48 = vpop.f32.mrf.mxu0  ;;  %10823 = vmatmul.msk.f32.gmra.mxu1 %vm277_vm15, %v7599_v10  ;;  %v6436_v13 = vadd.f32 %v6400_v6, %v15053_v39  ;;  %vm6648_vm9 = vcmp.gt.f32.partialorder %v6632_v36, 0.0  ;;  %v6668_v44 = vmul.f32 %v15300_v5, %v6632_v36 }
 0x539   : > { %10788 = vmatmul.msk.f32.gmra.mxu3 %vm277_vm15, %v14990_v28 }
 0x53a   : > { %v6593_v59 = vadd.f32 %v6557_v49, %v6436_v13  ;;  %v15457_v45 = vsel %vm6648_vm9, %v6632_v36, %v6668_v44  ;;  %v7443_v49 = vsel %vm436_vm1, %v15000_v15, %v7442_v52  ;;  %v7125_v44 = vrot.slane %v17511_v63, 2 }
 0x53b   : > { %17509 = vst [vmem:[#allocation59_spill] sm:$0xff] %v15457_v45  ;;  %6754 = vrot.lane.b32.xlu2 %v15457_v45, %s11223_s22 }
 0x53c   : > { %10770 = vmatmul.msk.f32.gmra.mxu2 %vm277_vm15, %v7119_v20  ;;  %v6613_v39 = vmul.f32 %v15278_v17, %v6593_v59  ;;  %v6560_v50 = vpop.f32.mrf.mxu3  ;;  %v15484_v59 = vrot.slane %v15043_v18, 2 }
 0x53d   : > { %v15467_v25 = vpop.f32.mrf.mxu1 }
 0x53e   : > { %v6633_v8 = vadd.f32 %v15288_v62, %v6613_v39  ;;  %v17512_v39 = vld [vmem:[#allocation56_spill] sm:$0xff] }
 0x53f   : > { %v6403_v36 = vpop.f32.mrf.mxu2  ;;  %10806 = vmatmul.msk.f32.gmra.mxu0 %vm277_vm15, %v7443_v49  ;;  %v7123_v52 = vrot.slane %v17512_v39, 2 }
 0x540   : > { %v15469_v11 = vpop.f32.mrf.mxu0  ;;  %10824 = vmatmul.msk.f32.gmra.mxu1 %vm277_vm15, %v7601_v9  ;;  %v6437_v58 = vadd.f32 %v6403_v36, %v15099_v46  ;;  %vm6649_vm10 = vcmp.gt.f32.partialorder %v6633_v8, 0.0  ;;  %v6669_v28 = vmul.f32 %v15300_v5, %v6633_v8 }
 0x541   : > { %10789 = vmatmul.msk.f32.gmra.mxu3 %vm277_vm15, %v17511_v63  ;;  %v7124_v63 = vsel %vm674_vm2, %v15435_v57, %v7123_v52 }
 0x542   : > { %v6594_v6 = vadd.f32 %v6560_v50, %v6437_v58  ;;  %v15480_v13 = vsel %vm6649_vm10, %v6633_v8, %v6669_v28  ;;  %v7604_v8 = vsel %vm674_vm2, %v7125_v44, %v15484_v59  ;;  %v17513_v58 = vld [vmem:[#allocation53_spill] sm:$0xff]  ;;  %v7272_v28 = vld [vmem:[#allocation3 + $0x88] sm:$0x3] }
 0x543   : > { %17510 = vst [vmem:[#allocation69_spill] sm:$0xff] %v15480_v13  ;;  %6756 = vrot.lane.b32.xlu0 %v15480_v13, %s11223_s22 }
 0x544   : > { %10771 = vmatmul.msk.f32.gmra.mxu2 %vm277_vm15, %v7599_v10  ;;  %v6614_v15 = vmul.f32 %v15278_v17, %v6594_v6  ;;  %v6563_v9 = vpop.f32.mrf.mxu3 }
 0x545   : > { %v15492_v46 = vpop.f32.mrf.mxu1 }
 0x546   : > { %v6634_v24 = vadd.f32 %v15288_v62, %v6614_v15  ;;  %v7605_v15 = vrot.slane %v7272_v28, 2 }
 0x547   : > { %v6406_v50 = vpop.f32.mrf.mxu2  ;;  %10807 = vmatmul.msk.f32.gmra.mxu0 %vm277_vm15, %v17513_v58 }
 0x548   : > { %v15494_v20 = vpop.f32.mrf.mxu0  ;;  %10825 = vmatmul.msk.f32.gmra.mxu1 %vm277_vm15, %v7604_v8  ;;  %v6438_v10 = vadd.f32 %v6406_v50, %v15125_v41  ;;  %vm6650_vm11 = vcmp.gt.f32.partialorder %v6634_v24, 0.0  ;;  %v6670_v36 = vmul.f32 %v15300_v5, %v6634_v24  ;;  %v7606_v57 = vsel %vm674_vm2, %v15484_v59, %v7605_v15 }
 0x549   : > { %10790 = vmatmul.msk.f32.gmra.mxu3 %vm277_vm15, %v15043_v18 }
 0x54a   : > { %v6595_v49 = vadd.f32 %v6563_v9, %v6438_v10  ;;  %v15505_v6 = vsel %vm6650_vm11, %v6634_v24, %v6670_v36  ;;  %v7447_v24 = vrot.slane %v7272_v28, 1  ;;  %v17515_v36 = vld [vmem:[#allocation57_spill] sm:$0xff] }
 0x54b   : > { %17514 = vst [vmem:[#allocation75_spill] sm:$0xff] %v15505_v6  ;;  %6758 = vrot.lane.b32.xlu1 %v15505_v6, %s11223_s22 }
 0x54c   : > { %10772 = vmatmul.msk.f32.gmra.mxu2 %vm277_vm15, %v7124_v63  ;;  %v6615_v41 = vmul.f32 %v15278_v17, %v6595_v49  ;;  %v6566_v52 = vpop.f32.mrf.mxu3  ;;  %v7448_v18 = vsel %vm436_vm1, %v17515_v36, %v7447_v24  ;;  %v15531_v63 = vrot.slane %v15122_v26, 2  ;;  %v7275_v36 = vld [vmem:[#allocation3 + $0xa0] sm:$0x3] }
 0x54d   : > { %v15515_v44 = vpop.f32.mrf.mxu1  ;;  %v7610_v6 = vrot.slane %v7275_v36, 2 }
 0x54e   : > { %v6635_v9 = vadd.f32 %v15288_v62, %v6615_v41  ;;  %v17517_v41 = vld [vmem:[#allocation64_spill] sm:$0xff] }
 0x54f   : > { %v6409_v50 = vpop.f32.mrf.mxu2  ;;  %10808 = vmatmul.msk.f32.gmra.mxu0 %vm277_vm15, %v7448_v18  ;;  %v7130_v15 = vrot.slane %v17517_v41, 2 }
 0x550   : > { %v15517_v39 = vpop.f32.mrf.mxu0  ;;  %10826 = vmatmul.msk.f32.gmra.mxu1 %vm277_vm15, %v7606_v57  ;;  %v6439_v10 = vadd.f32 %v6409_v50, %v15163_v21  ;;  %vm6651_vm12 = vcmp.gt.f32.partialorder %v6635_v9, 0.0  ;;  %v6671_v58 = vmul.f32 %v15300_v5, %v6635_v9 }
 0x551   : > { %10791 = vmatmul.msk.f32.gmra.mxu3 %vm277_vm15, %v17517_v41  ;;  %v17519_v41 = vld [vmem:[#allocation67_spill] sm:$0xff] }
 0x552   : > { %v6596_v49 = vadd.f32 %v6566_v52, %v6439_v10  ;;  %v15528_v28 = vsel %vm6651_vm12, %v6635_v9, %v6671_v58  ;;  %v7609_v52 = vsel %vm674_vm2, %v7130_v15, %v15531_v63  ;;  %v17518_v58 = vld [vmem:[#allocation68_spill] sm:$0xff] }
 0x553   : > { %17516 = vst [vmem:[#allocation74_spill] sm:$0xff] %v15528_v28  ;;  %6760 = vrot.lane.b32.xlu2 %v15528_v28, %s11223_s22 }
 0x554   : > { %10773 = vmatmul.msk.f32.gmra.mxu2 %vm277_vm15, %v7604_v8  ;;  %v6616_v21 = vmul.f32 %v15278_v17, %v6596_v49  ;;  %v6569_v50 = vpop.f32.mrf.mxu3  ;;  %v7128_v49 = vrot.slane %v17518_v58, 2 }
 0x555   : > { %v15540_v24 = vpop.f32.mrf.mxu1 }
 0x556   : > { %v6636_v9 = vadd.f32 %v15288_v62, %v6616_v21  ;;  %v7129_v15 = vsel %vm674_vm2, %v15484_v59, %v7128_v49  ;;  %v7611_v59 = vsel %vm674_vm2, %v15531_v63, %v7610_v6  ;;  %v7135_v6 = vrot.slane %v15182_v1, 2 }
 0x557   : > { %v6412_v10 = vpop.f32.mrf.mxu2  ;;  %10809 = vmatmul.msk.f32.gmra.mxu0 %vm277_vm15, %v17519_v41 }
 0x558   : > { %v15542_v57 = vpop.f32.mrf.mxu0  ;;  %10827 = vmatmul.msk.f32.gmra.mxu1 %vm277_vm15, %v7609_v52  ;;  %v6440_v8 = vadd.f32 %v6412_v10, %v15193_v37  ;;  %vm6652_vm13 = vcmp.gt.f32.partialorder %v6636_v9, 0.0  ;;  %v6672_v18 = vmul.f32 %v15300_v5, %v6636_v9  ;;  %v7452_v10 = vrot.slane %v7275_v36, 1 }
 0x559   : > { %10792 = vmatmul.msk.f32.gmra.mxu3 %vm277_vm15, %v15122_v26 }
 0x55a   : > { %v6597_v28 = vadd.f32 %v6569_v50, %v6440_v8  ;;  %v15553_v21 = vsel %vm6652_vm13, %v6636_v9, %v6672_v18 }
 0x55b   : > { %17520 = vst [vmem:[#allocation72_spill] sm:$0xff] %v15553_v21  ;;  %6762 = vrot.lane.b32.xlu0 %v15553_v21, %s11223_s22 }
 0x55c   : > { %10774 = vmatmul.msk.f32.gmra.mxu2 %vm277_vm15, %v7129_v15  ;;  %v6617_v37 = vmul.f32 %v15278_v17, %v6597_v28  ;;  %v6572_v8 = vpop.f32.mrf.mxu3  ;;  %v17521_v28 = vld [vmem:[#allocation66_spill] sm:$0xff] }
 0x55d   : > { %v15563_v58 = vpop.f32.mrf.mxu1  ;;  %v7453_v41 = vsel %vm436_vm1, %v17521_v28, %v7452_v10 }
 0x55e   : > { %v6637_v9 = vadd.f32 %v15288_v62, %v6617_v37  ;;  %v15579_v37 = vrot.slane %v15190_v7, 2 }
 0x55f   : > { %v6415_v18 = vpop.f32.mrf.mxu2  ;;  %10810 = vmatmul.msk.f32.gmra.mxu0 %vm277_vm15, %v7453_v41 }
 0x560   : > { %v15565_v50 = vpop.f32.mrf.mxu0  ;;  %10828 = vmatmul.msk.f32.gmra.mxu1 %vm277_vm15, %v7611_v59  ;;  %v6441_v49 = vadd.f32 %v6415_v18, %v15235_v30  ;;  %vm6653_vm3 = vcmp.gt.f32.partialorder %v6637_v9, 0.0  ;;  %v6673_v26 = vmul.f32 %v15300_v5, %v6637_v9 }
 0x561   : > { %10793 = vmatmul.msk.f32.gmra.mxu3 %vm277_vm15, %v15182_v1 }
 0x562   : > { %v6598_v36 = vadd.f32 %v6572_v8, %v6441_v49  ;;  %v15576_v15 = vsel %vm6653_vm3, %v6637_v9, %v6673_v26  ;;  %v17523_v8 = vld [vmem:[#allocation65_spill] sm:$0xff]  ;;  %v7614_v49 = vsel %vm674_vm2, %v7135_v6, %v15579_v37  ;;  %v7278_v26 = vld [vmem:[#allocation3 + $0xb8] sm:$0x3] }
 0x563   : > { %17522 = vst [vmem:[#allocation76_spill] sm:$0xff] %v15576_v15  ;;  %6764 = vrot.lane.b32.xlu1 %v15576_v15, %s11223_s22  ;;  %v7133_v18 = vrot.slane %v17523_v8, 2 }
 0x564   : > { %10775 = vmatmul.msk.f32.gmra.mxu2 %vm277_vm15, %v7609_v52  ;;  %v6618_v30 = vmul.f32 %v15278_v17, %v6598_v36  ;;  %v6575_v28 = vpop.f32.mrf.mxu3  ;;  %v8378_v36 = vld [vmem:[%s17032_s5] sm:$0xf] }
 0x565   : > { %v15588_v10 = vpop.f32.mrf.mxu1  ;;  %10907 = vmatpush.msk.msra.mxu2 %vm3696_vm14, %v8378_v36  ;;  %v7134_v8 = vsel %vm674_vm2, %v15531_v63, %v7133_v18  ;;  %v15630_v36 = vld [vmem:[#allocation3 + $0xc0] sm:$0xff] }
 0x566   : > { %v6638_v9 = vadd.f32 %v15288_v62, %v6618_v30 }
 0x567   : > { %v6418_v52 = vpop.f32.mrf.mxu2  ;;  %10811 = vmatmul.msk.f32.gmra.mxu0 %vm277_vm15, %v15214_v0  ;;  %v7457_v0 = vrot.slane %v7278_v26, 1 }
 0x568   : > { %v15590_v59 = vpop.f32.mrf.mxu0  ;;  %10829 = vmatmul.msk.f32.gmra.mxu1 %vm277_vm15, %v7614_v49  ;;  %v6442_v41 = vadd.f32 %v6418_v52, %v15261_v43  ;;  %vm6654_vm4 = vcmp.gt.f32.partialorder %v6638_v9, 0.0  ;;  %v6674_v1 = vmul.f32 %v15300_v5, %v6638_v9  ;;  %v7615_v43 = vrot.slane %v7278_v26, 2 }
 0x569   : > { %10794 = vmatmul.msk.f32.gmra.mxu3 %vm277_vm15, %v15190_v7  ;;  %v7458_v26 = vsel %vm436_vm1, %v15200_v40, %v7457_v0  ;;  %v7459_v40 = vrot.slane %v15630_v36, 1  ;;  %v15645_v0 = vrot.slane %v15314_v53, 1 }
 0x56a   : > { %v6599_v30 = vadd.f32 %v6575_v28, %v6442_v41  ;;  %v15605_v6 = vsel %vm6654_vm4, %v6638_v9, %v6674_v1  ;;  %v10924_v9 = vld [vmem:[%s17032_s5 + $0x8] sm:$0xf]  ;;  %v7616_v18 = vsel %vm674_vm2, %v15579_v37, %v7615_v43  ;;  %v7617_v43 = vrot.slane %v15630_v36, 2 }
 0x56b   : > { %17524 = vst [vmem:[#allocation73_spill] sm:$0xff] %v15605_v6  ;;  %6766 = vrot.lane.b32.xlu2 %v15605_v6, %s11223_s22  ;;  %10925 = vmatpush.msk.msra.mxu3 %vm3696_vm14, %v10924_v9 }
 0x56c   : > { %10776 = vmatmul.msk.f32.gmra.mxu2 %vm277_vm15, %v7134_v8  ;;  %v6619_v52 = vmul.f32 %v15278_v17, %v6599_v30  ;;  %v6578_v41 = vpop.f32.mrf.mxu3 }
 0x56d   : > { %v15615_v15 = vpop.f32.mrf.mxu1 }
 0x56e   : > { %v6639_v63 = vadd.f32 %v15288_v62, %v6619_v52 }
 0x56f   : > { %v6421_v1 = vpop.f32.mrf.mxu2  ;;  %10812 = vmatmul.msk.f32.gmra.mxu0 %vm277_vm15, %v7458_v26 }
 0x570   : > { %v15620_v28 = vpop.f32.mrf.mxu0  ;;  %10830 = vmatmul.msk.f32.gmra.mxu1 %vm277_vm15, %v7616_v18  ;;  %v6443_v7 = vadd.f32 %v6421_v1, %v15292_v51  ;;  %vm6655_vm5 = vcmp.gt.f32.partialorder %v6639_v63, 0.0  ;;  %v6675_v30 = vmul.f32 %v15300_v5, %v6639_v63  ;;  %v7138_v1 = vrot.slane %v15229_v34, 2 }
 0x571   : > { %10795 = vmatmul.msk.f32.gmra.mxu3 %vm277_vm15, %v15630_v36 }
 0x572   : > { %v6600_v8 = vadd.f32 %v6578_v41, %v6443_v7  ;;  %v15634_v52 = vsel %vm6655_vm5, %v6639_v63, %v6675_v30  ;;  %v10942_v63 = vld [vmem:[%s17032_s5 + $0xc] sm:$0xf]  ;;  %v15663_v7 = vsel %vm674_vm2, %v7617_v43, %v15320_v29  ;;  %v7281_v43 = vld [vmem:[#allocation3 + $0xd0] sm:$0x3] }
 0x573   : > { %17525 = vst [vmem:[#allocation78_spill] sm:$0xff] %v15634_v52  ;;  %6768 = vrot.lane.b32.xlu1 %v15634_v52, %s11223_s22  ;;  %10943 = vmatpush.msk.msra.mxu0 %vm3696_vm14, %v10942_v63  ;;  %v7139_v52 = vsel %vm674_vm2, %v15579_v37, %v7138_v1  ;;  %v7462_v1 = vrot.slane %v7281_v43, 1 }
 0x574   : > { %10777 = vmatmul.msk.f32.gmra.mxu2 %vm277_vm15, %v7614_v49  ;;  %v6620_v51 = vmul.f32 %v15278_v17, %v6600_v8  ;;  %v10960_v49 = vld [vmem:[%s17032_s5 + $0x10] sm:$0xf]  ;;  %v6581_v26 = vpop.f32.mrf.mxu3 }
 0x575   : > { %v15647_v9 = vpop.f32.mrf.mxu1  ;;  %10961 = vmatpush.msk.msra.mxu1 %vm3696_vm14, %v10960_v49 }
 0x576   : > { %v6640_v41 = vadd.f32 %v15288_v62, %v6620_v51  ;;  %v15670_v51 = vsel %vm436_vm1, %v7459_v40, %v15645_v0  ;;  %v7741_v40 = vld [vmem:[#allocation3 + $0x30] sm:$0xff] }
 0x577   : > { %v6424_v30 = vpop.f32.mrf.mxu2  ;;  %10813 = vmatmul.msk.f32.gmra.mxu0 %vm277_vm15, %v15670_v51  ;;  %v7907_v6 = vrot.slane %v7741_v40, 1 }
 0x578   : > { %v15655_v18 = vpop.f32.mrf.mxu0  ;;  %10831 = vmatmul.msk.f32.gmra.mxu1 %vm277_vm15, %v15663_v7  ;;  %v6444_v8 = vadd.f32 %v6424_v30, %v15333_v31  ;;  %vm6656_vm6 = vcmp.gt.f32.partialorder %v6640_v41, 0.0  ;;  %v6676_v34 = vmul.f32 %v15300_v5, %v6640_v41  ;;  %v15685_v30 = vld [vmem:[#allocation3 + $0x38] sm:$0xff] }
 0x579   : > { %10796 = vmatmul.msk.f32.gmra.mxu3 %vm277_vm15, %v15314_v53  ;;  %v7908_v21 = vrot.slane %v15685_v30, 1 }
 0x57a   : > { %v6601_v63 = vadd.f32 %v6581_v26, %v6444_v8  ;;  %v15675_v49 = vsel %vm6656_vm6, %v6640_v41, %v6676_v34  ;;  %v7620_v41 = vrot.slane %v7281_v43, 2  ;;  %v17527_v34 = vld [vmem:[#allocation16_spill] sm:$0xff] }
 0x57b   : > { %17526 = vst [vmem:[#allocation80_spill] sm:$0xff] %v15675_v49  ;;  %6770 = vrot.lane.b32.xlu2 %v15675_v49, %s11223_s22 }
 0x57c   : > { %10778 = vmatmul.msk.f32.gmra.mxu2 %vm277_vm15, %v7139_v52  ;;  %v6621_v31 = vmul.f32 %v15278_v17, %v6601_v63  ;;  %v7621_v63 = vsel %vm674_vm2, %v15320_v29, %v7620_v41  ;;  %v6584_v53 = vpop.f32.mrf.mxu3  ;;  %v7909_v41 = vsel %vm436_vm1, %v7907_v6, %v7908_v21  ;;  %v7053_v6 = vadd.f32 %v15267_v47, %v15269_v60 }
 0x57d   : > { %v15687_v26 = vpop.f32.mrf.mxu1  ;;  %v6749_v8 = vpop.permute.xlu2 %6748  ;;  %1872 = vxpose.xlu0.b32.start [1/16] (narrow) %v17527_v34, 8  ;;  %v7463_v34 = vsel %vm436_vm1, %v15645_v0, %v7462_v1  ;;  %v8066_v1 = vrot.slane %v15685_v30, 2 }
 0x57e   : > { %6795 = vst.msk [vmem:[#allocation3 + $0xf1] sm:$0xff] %vm277_vm15, %v6749_v8  ;;  %v6641_v52 = vadd.f32 %v15288_v62, %v6621_v31 }
 0x57f   : > { %v6427_v49 = vpop.f32.mrf.mxu2  ;;  %10814 = vmatmul.msk.f32.gmra.mxu0 %vm277_vm15, %v7463_v34 }
 0x580   : > { %v15690_v37 = vpop.f32.mrf.mxu0  ;;  %10832 = vmatmul.msk.f32.gmra.mxu1 %vm277_vm15, %v7621_v63  ;;  %v6445_v13 = vadd.f32 %v6427_v49, %v15366_v42  ;;  %vm6657_vm7 = vcmp.gt.f32.partialorder %v6641_v52, 0.0  ;;  %v6677_v43 = vmul.f32 %v15300_v5, %v6641_v52  ;;  %v8065_v49 = vrot.slane %v7741_v40, 2 }
 0x581   : > { %10853 = vmatmul.msk.f32.vlgmr.msrb.gmra.mxu3 %vm277_vm15, %v7909_v41 }
 0x582   : > { %v6602_v31 = vadd.f32 %v6584_v53, %v6445_v13  ;;  %v15703_v8 = vsel %vm6657_vm7, %v6641_v52, %v6677_v43  ;;  %v17529_v13 = vld [vmem:[#allocation17_spill] sm:$0xff]  ;;  %v8067_v41 = vsel %vm674_vm2, %v8065_v49, %v8066_v1  ;;  %v8406_v49 = vrot.slane %v15316_v54, 1 }
 0x583   : > { %17528 = vst [vmem:[#allocation79_spill] sm:$0xff] %v15703_v8  ;;  %6772 = vrot.lane.b32.xlu2 %v15703_v8, %s11223_s22  ;;  %v7743_v53 = vld [vmem:[#allocation3 + $0x40] sm:$0x3] }
 0x584   : > { %10835 = vmatmul.msk.f32.vlgmr.msrb.gmra.mxu2 %vm277_vm15, %v7741_v40  ;;  %v6622_v42 = vmul.f32 %v15278_v17, %v6602_v31  ;;  %v7352_v43 = vpop.f32.mrf.mxu3  ;;  %v7910_v47 = vrot.slane %v7743_v53, 1 }
 0x585   : > { %v15712_v63 = vpop.f32.mrf.mxu1  ;;  %v6745_v34 = vpop.permute.xlu0 %6744  ;;  %1873 = vxpose.xlu0.b32.cont [2/16] (narrow) %v17529_v13, 8 }
 0x586   : > { %6793 = vst.msk [vmem:[#allocation3 + $0xd9] sm:$0xff] %vm277_vm15, %v6745_v34  ;;  %v6642_v17 = vadd.f32 %v15288_v62, %v6622_v42  ;;  %v7911_v62 = vsel %vm436_vm1, %v7908_v21, %v7910_v47  ;;  %v15736_v42 = vld [vmem:[#allocation3 + $0x50] sm:$0xff]  ;;  %v7056_v21 = vadd.f32 %v15302_v14, %v15304_v56 }
 0x587   : > { %v7194_v31 = vpop.f32.mrf.mxu2  ;;  %10871 = vmatmul.msk.f32.vlgmr.msrb.gmra.mxu0 %vm277_vm15, %v8067_v41  ;;  %v7913_v47 = vrot.slane %v15736_v42, 1 }
 0x588   : > { %v15717_v52 = vpop.f32.mrf.mxu0  ;;  %10891 = vmatmul.msk.f32.vlgmr.msrb.gmra.mxu1 %vm277_vm15, %v15670_v51  ;;  %v7242_v40 = vadd.f32 %v7194_v31, %v7053_v6  ;;  %vm6658_vm8 = vcmp.gt.f32.partialorder %v6642_v17, 0.0  ;;  %v6678_v13 = vmul.f32 %v15300_v5, %v6642_v17  ;;  %v17531_v6 = vld [vmem:[#allocation15_spill] sm:$0xff]  ;;  %v8068_v31 = vrot.slane %v7743_v53, 2 }
 0x589   : > { %10854 = vmatmul.msk.f32.gmra.mxu3 %vm277_vm15, %v7911_v62 }
 0x58a   : > { %v15726_v60 = vadd.f32 %v7352_v43, %v7242_v40  ;;  %v15728_v34 = vsel %vm6658_vm8, %v6642_v17, %v6678_v13  ;;  %v8407_v40 = vsel %vm436_vm1, %v15645_v0, %v8406_v49  ;;  %v8069_v62 = vsel %vm674_vm2, %v8066_v1, %v8068_v31  ;;  %v17532_v1 = vld [vmem:[#allocation19_spill] sm:$0xff] }
 0x58b   : > { %17530 = vst [vmem:[#allocation62_spill] sm:$0xff] %v15728_v34  ;;  %6774 = vrot.lane.b32.xlu2 %v15728_v34, %s11223_s22  ;;  %v8071_v49 = vrot.slane %v15736_v42, 2  ;;  %s9903_s22 = sshll.u32 %s9900_s9, 4  ;;  %s9904_s22 = int_to_ptr.hbm [resolvable:$true] %s9903_s22 }
 0x58c   : > { %10836 = vmatmul.msk.f32.gmra.mxu2 %vm277_vm15, %v15685_v30  ;;  %v7744_v30 = vld [vmem:[#allocation3 + $0x48] sm:$0xff]  ;;  %v7355_v41 = vpop.f32.mrf.mxu3  ;;  %s11171_s23 = sshra.s32 %s9904_s22, 4  ;;  %s11172_s23 = int_to_ptr.hbm [resolvable:$true] %s11171_s23 }
 0x58d   : > { %v15738_v5 = vpop.f32.mrf.mxu1  ;;  %1874 = vxpose.xlu0.b32.cont [3/16] (narrow) %v17531_v6, 8  ;;  %v6747_v17 = vpop.permute.xlu1 %6746  ;;  %v7912_v14 = vrot.slane %v7744_v30, 1  ;;  %v15757_v6 = vld [vmem:[#allocation3 + $0xd8] sm:$0xff]  ;;  %s11173_s14 = scalar_lea.hbm %s11172_s23, 32  ;;  %p11178_p0 = scmp.lt.s32.totalorder %s11172_s23, %s17034_s7 }
 0x58e   : > { %6794 = vst.msk [vmem:[#allocation3 + $0xe1] sm:$0xff] %vm277_vm15, %v6747_v17  ;;  %v7746_v17 = vld [vmem:[#allocation3 + $0x58] sm:$0x3]  ;;  %p11174_p11 = scmp.ne.s32.totalorder %s11172_s23, %s11173_s14  ;;  %p11179_p1 = scmp.lt.s32.totalorder %s11177_s17, %s11173_s14 }
 0x58f   : > { %v7197_v13 = vpop.f32.mrf.mxu2  ;;  %10872 = vmatmul.msk.f32.gmra.mxu0 %vm277_vm15, %v8069_v62  ;;  %v7914_v53 = vsel %vm436_vm1, %v7912_v14, %v7913_v47  ;;  %v8408_v62 = vrot.slane %v15757_v6, 1  ;;  %v7915_v8 = vrot.slane %v7746_v17, 1 }
 0x590   : > { %v15744_v43 = vpop.f32.mrf.mxu0  ;;  %10892 = vmatmul.msk.f32.gmra.mxu1 %vm277_vm15, %v8407_v40  ;;  %v7243_v54 = vadd.f32 %v7197_v13, %v7056_v21  ;;  %p11175_p12 = pnand %p11174_p11, %p11304_p5  ;;  %p11180_p2 = por %p11179_p1, %p11178_p0 }
 0x591   : > { %10855 = vmatmul.msk.f32.gmra.mxu3 %vm277_vm15, %v7914_v53 }
 0x592   : > { %v15753_v56 = vadd.f32 %v7355_v41, %v7243_v54  ;;  %v7059_v41 = vadd.f32 %v15339_v12, %v15345_v38  ;;  %v8070_v54 = vrot.slane %v7744_v30, 2  ;;  %p11176_p13 = pneg %p11175_p12 }
 0x594   : > { %10837 = vmatmul.msk.f32.gmra.mxu2 %vm277_vm15, %v7744_v30  ;;  %v7358_v53 = vpop.f32.mrf.mxu3  ;;  %v7916_v30 = vsel %vm436_vm1, %v7913_v47, %v7915_v8  ;;  %v7747_v8 = vld [vmem:[#allocation3 + $0x60] sm:$0xff]  ;;  %p11181_p3 = pnand %p11180_p2, %p11176_p13 }
 0x595   : > { %v15761_v40 = vpop.f32.mrf.mxu1  ;;  %v6755_v21 = vpop.permute.xlu2 %6754  ;;  %1875 = vxpose.xlu0.b32.cont [4/16] (narrow) %v17532_v1, 8  ;;  %v15764_v31 = vld [vmem:[#allocation3 + $0xe0] sm:$0xff]  ;;  %v8072_v1 = vsel %vm674_vm2, %v8070_v54, %v8071_v49  ;;  %v15783_v12 = vld [vmem:[#allocation3 + $0xe8] sm:$0x3] }
 0x596   : > { %6798 = vst.msk [vmem:[#allocation3 + $0x111] sm:$0xff] %vm277_vm15, %v6755_v21  ;;  %v15773_v14 = vrot.slane %v15764_v31, 1  ;;  %v15791_v21 = vld [vmem:[#allocation3 + $0x68] sm:$0xff] }
 0x597   : > { %v7200_v34 = vpop.f32.mrf.mxu2  ;;  %10873 = vmatmul.msk.f32.gmra.mxu0 %vm277_vm15, %v8072_v1  ;;  %17533 = vst [vmem:[#allocation77_spill] sm:$0xff] %v15783_v12  ;;  %v17534_v1 = vld [vmem:[#allocation20_spill] sm:$0xff] }
 0x598   : > { %v15768_v13 = vpop.f32.mrf.mxu0  ;;  %v7244_v45 = vadd.f32 %v7200_v34, %v7059_v41  ;;  %v15778_v3 = vsel %vm436_vm1, %v8408_v62, %v15773_v14  ;;  %v8073_v34 = vrot.slane %v7746_v17, 2  ;;  %v8411_v41 = vrot.slane %v15783_v12, 1 }
 0x599   : > { %10893 = vmatmul.msk.f32.gmra.mxu1 %vm277_vm15, %v15778_v3  ;;  %10856 = vmatmul.msk.f32.gmra.mxu3 %vm277_vm15, %v7916_v30  ;;  %v7918_v17 = vrot.slane %v15791_v21, 1 }
 0x59a   : > { %v15785_v38 = vadd.f32 %v7358_v53, %v7244_v45  ;;  %v7062_v45 = vadd.f32 %v15371_v35, %v15373_v61  ;;  %v8074_v12 = vsel %vm674_vm2, %v8071_v49, %v8073_v34  ;;  %v8412_v2 = vsel %vm436_vm1, %v15773_v14, %v8411_v41  ;;  %v7749_v34 = vld [vmem:[#allocation3 + $0x70] sm:$0x3]  ;;  %v17537_v41 = vld [vmem:[#allocation22_spill] sm:$0xff] }
 0x59b   : > { %v7566_v35 = vadd.f32 %v15717_v52, %v15726_v60 }
 0x59c   : > { %10838 = vmatmul.msk.f32.gmra.mxu2 %vm277_vm15, %v15736_v42  ;;  %v7361_v42 = vpop.f32.mrf.mxu3 }
 0x59d   : > { %v15794_v54 = vpop.f32.mrf.mxu1  ;;  %v6751_v62 = vpop.permute.xlu0 %6750  ;;  %1876 = vxpose.xlu0.b32.cont [5/16] (narrow) %v17534_v1, 8  ;;  %v7917_v1 = vrot.slane %v7747_v8, 1  ;;  %v15817_v49 = vadd.f32 %v15712_v63, %v7566_v35  ;;  %v8075_v63 = vrot.slane %v7747_v8, 2 }
 0x59e   : > { %6796 = vst.msk [vmem:[#allocation3 + $0xf9] sm:$0xff] %vm277_vm15, %v6751_v62 }
 0x59f   : > { %v7203_v47 = vpop.f32.mrf.mxu2  ;;  %10874 = vmatmul.msk.f32.gmra.mxu0 %vm277_vm15, %v8074_v12  ;;  %v7919_v62 = vsel %vm436_vm1, %v7917_v1, %v7918_v17  ;;  %17536 = vst [vmem:[#allocation63_spill] sm:$0xff] %v15817_v49  ;;  %v8076_v12 = vrot.slane %v15791_v21, 2  ;;  %v7920_v49 = vrot.slane %v7749_v34, 1 }
 0x5a0   : > { %v15799_v53 = vpop.f32.mrf.mxu0  ;;  %v7245_v30 = vadd.f32 %v7203_v47, %v7062_v45  ;;  %v15814_v45 = vld [vmem:[#allocation3 + $0xf0] sm:$0xff] }
 0x5a1   : > { %10894 = vmatmul.msk.f32.gmra.mxu1 %vm277_vm15, %v8412_v2  ;;  %17535 = vst [vmem:[#allocation60_spill] sm:$0xff] %v15814_v45  ;;  %10857 = vmatmul.msk.f32.gmra.mxu3 %vm277_vm15, %v7919_v62  ;;  %v8077_v19 = vsel %vm674_vm2, %v8075_v63, %v8076_v12  ;;  %v15856_v63 = vrot.slane %v15764_v31, 2 }
 0x5a2   : > { %v15810_v61 = vadd.f32 %v7361_v42, %v7245_v30  ;;  %v7065_v42 = vadd.f32 %v15396_v22, %v15398_v55  ;;  %v8413_v30 = vrot.slane %v15814_v45, 1  ;;  %v7567_v55 = vadd.f32 %v15744_v43, %v15753_v56  ;;  %v7750_v56 = vld [vmem:[#allocation3 + $0x78] sm:$0xff] }
 0x5a3   : > { %v8078_v43 = vrot.slane %v7749_v34, 2 }
 0x5a4   : > { %10839 = vmatmul.msk.f32.gmra.mxu2 %vm277_vm15, %v7747_v8  ;;  %v7364_v35 = vpop.f32.mrf.mxu3 }
 0x5a5   : > { %v15821_v2 = vpop.f32.mrf.mxu1  ;;  %1877 = vxpose.xlu0.b32.cont [6/16] (narrow) %v17537_v41, 8  ;;  %v6753_v52 = vpop.permute.xlu1 %6752  ;;  %v15824_v60 = vld [vmem:[#allocation3 + $0xf8] sm:$0xff] }
 0x5a6   : > { %6797 = vst.msk [vmem:[#allocation3 + $0x109] sm:$0xff] %vm277_vm15, %v6753_v52  ;;  %v15833_v1 = vrot.slane %v15824_v60, 1  ;;  %v15848_v52 = vld [vmem:[#allocation3 + $0x100] sm:$0x3] }
 0x5a7   : > { %v7206_v62 = vpop.f32.mrf.mxu2  ;;  %10875 = vmatmul.msk.f32.gmra.mxu0 %vm277_vm15, %v8077_v19  ;;  %17541 = vst [vmem:[#allocation57_spill] sm:$0xff] %v15848_v52  ;;  %v15859_v19 = vadd.f32 %v15738_v5, %v7567_v55 }
 0x5a8   : > { %v15828_v47 = vpop.f32.mrf.mxu0  ;;  %17538 = vst [vmem:[#allocation56_spill] sm:$0xff] %v15833_v1  ;;  %v7246_v41 = vadd.f32 %v7206_v62, %v7065_v42  ;;  %3459 = vxpose.xlu1.b32.start [1/16] (narrow) %v17539_v23, 8  ;;  %v15839_v22 = vsel %vm436_vm1, %v8413_v30, %v15833_v1  ;;  %v15850_v42 = vld [vmem:[#allocation3 + $0xe8] sm:$0x3]  ;;  %v7921_v23 = vsel %vm436_vm1, %v7918_v17, %v7920_v49  ;;  %v15862_v30 = vld [vmem:[#allocation3 + $0x80] sm:$0xff] }
 0x5a9   : > { %17540 = vst [vmem:[#allocation53_spill] sm:$0xff] %v15839_v22  ;;  %10895 = vmatmul.msk.f32.gmra.mxu1 %vm277_vm15, %v15839_v22  ;;  %10858 = vmatmul.msk.f32.gmra.mxu3 %vm277_vm15, %v7921_v23  ;;  %v17544_v49 = vld [vmem:[#allocation21_spill] sm:$0xff]  ;;  %v7922_v23 = vrot.slane %v7750_v56, 1  ;;  %v7923_v22 = vrot.slane %v15862_v30, 1 }
 0x5aa   : > { %v15846_v8 = vadd.f32 %v7364_v35, %v7246_v41  ;;  %17542 = vst [vmem:[#allocation64_spill] sm:$0xff] %v15850_v42  ;;  %v9126_v35 = vrot.slane %v15850_v42, 2  ;;  %v7068_v41 = vadd.f32 %v15419_v27, %v15421_v16  ;;  %v17547_v27 = vld [vmem:[#allocation32_spill] sm:$0xff] }
 0x5ab   : > { %17543 = vst [vmem:[#allocation68_spill] sm:$0xff] %v15859_v19 }
 0x5ac   : > { %10840 = vmatmul.msk.f32.gmra.mxu2 %vm277_vm15, %v15791_v21  ;;  %v8416_v21 = vrot.slane %v15848_v52, 1  ;;  %v7367_v34 = vpop.f32.mrf.mxu3  ;;  %v15877_v45 = vsel %vm674_vm2, %v15856_v63, %v9126_v35  ;;  %v17546_v52 = vld [vmem:[#allocation27_spill] sm:$0xff] }
 0x5ad   : > { %v15865_v62 = vpop.f32.mrf.mxu1  ;;  %v6761_v17 = vpop.permute.xlu2 %6760  ;;  %1878 = vxpose.xlu0.b32.cont [7/16] (narrow) %v17544_v49, 8  ;;  %17545 = vst [vmem:[#allocation67_spill] sm:$0xff] %v15877_v45  ;;  %v8079_v49 = vsel %vm674_vm2, %v8076_v12, %v8078_v43  ;;  %v15890_v35 = vld [vmem:[#allocation3 + $0x108] sm:$0xff]  ;;  %v7924_v12 = vsel %vm436_vm1, %v7922_v23, %v7923_v22  ;;  %v8080_v43 = vrot.slane %v7750_v56, 2  ;;  %v7071_v23 = vadd.f32 %v15444_v32, %v15446_v48 }
 0x5ae   : > { %6801 = vst.msk [vmem:[#allocation3 + $0x139] sm:$0xff] %vm277_vm15, %v6761_v17  ;;  %v8417_v16 = vsel %vm436_vm1, %v15833_v1, %v8416_v21  ;;  %v7568_v17 = vadd.f32 %v15768_v13, %v15785_v38  ;;  %v8081_v13 = vrot.slane %v15862_v30, 2  ;;  %v17550_v21 = vld [vmem:[#allocation23_spill] sm:$0xff]  ;;  %v7569_v48 = vadd.f32 %v15799_v53, %v15810_v61  ;;  %v15939_v53 = vld [vmem:[#allocation3 + $0x98] sm:$0xff] }
 0x5af   : > { %v7209_v55 = vpop.f32.mrf.mxu2  ;;  %10876 = vmatmul.msk.f32.gmra.mxu0 %vm277_vm15, %v8079_v49  ;;  %17548 = vst [vmem:[#allocation66_spill] sm:$0xff] %v15890_v35  ;;  %v15941_v61 = vld [vmem:[#allocation3 + $0x118] sm:$0x3] }
 0x5b0   : > { %v15871_v5 = vpop.f32.mrf.mxu0  ;;  %v7247_v19 = vadd.f32 %v7209_v55, %v7068_v41  ;;  %3460 = vxpose.xlu1.b32.cont [2/16] (narrow) %v17546_v52, 8  ;;  %v15892_v41 = vld [vmem:[#allocation3 + $0x110] sm:$0xff]  ;;  %v15897_v52 = vadd.f32 %v15761_v40, %v7568_v17  ;;  %v8082_v17 = vsel %vm674_vm2, %v8080_v43, %v8081_v13  ;;  %v15927_v43 = vld [vmem:[#allocation3 + $0x100] sm:$0x3]  ;;  %17556 = vst [vmem:[#allocation19_spill] sm:$0xff] %v15941_v61 }
 0x5b1   : > { %5082 = vxpose.xlu2.b32.start [1/16] (narrow) %v17547_v27, 8  ;;  %10896 = vmatmul.msk.f32.gmra.mxu1 %vm277_vm15, %v8417_v16  ;;  %17549 = vst [vmem:[#allocation65_spill] sm:$0xff] %v15892_v41  ;;  %v15906_v55 = vrot.slane %v15892_v41, 1 }
 0x5b2   : > { %v15887_v42 = vadd.f32 %v7367_v34, %v7247_v19  ;;  %10859 = vmatmul.msk.f32.gmra.mxu3 %vm277_vm15, %v7924_v12  ;;  %v8418_v34 = vrot.slane %v15890_v35, 1  ;;  %v17552_v12 = vld [vmem:[#allocation25_spill] sm:$0xff] }
 0x5b3   : > { %17551 = vst [vmem:[#allocation16_spill] sm:$0xff] %v15906_v55 }
 0x5b4   : > { %10841 = vmatmul.msk.f32.gmra.mxu2 %vm277_vm15, %v7750_v56  ;;  %v7752_v56 = vld [vmem:[#allocation3 + $0x88] sm:$0x3]  ;;  %v7370_v49 = vpop.f32.mrf.mxu3  ;;  %v15919_v32 = vsel %vm436_vm1, %v8418_v34, %v15906_v55  ;;  %v15936_v34 = vrot.slane %v15824_v60, 2 }
 0x5b5   : > { %v15901_v38 = vpop.f32.mrf.mxu1  ;;  %v6757_v19 = vpop.permute.xlu0 %6756  ;;  %1879 = vxpose.xlu0.b32.cont [8/16] (narrow) %v17550_v21, 8  ;;  %v17553_v21 = vld [vmem:[#allocation49_spill] sm:$0xff]  ;;  %v7925_v45 = vrot.slane %v7752_v56, 1  ;;  %17554 = vst [vmem:[#allocation17_spill] sm:$0xff] %v15919_v32 }
 0x5b6   : > { %6799 = vst.msk [vmem:[#allocation3 + $0x121] sm:$0xff] %vm277_vm15, %v6757_v19 }
 0x5b7   : > { %v7212_v27 = vpop.f32.mrf.mxu2  ;;  %10877 = vmatmul.msk.f32.gmra.mxu0 %vm277_vm15, %v8082_v17  ;;  %v8083_v17 = vrot.slane %v7752_v56, 2  ;;  %v17560_v56 = vld [vmem:[#allocation39_spill] sm:$0xff] }
 0x5b8   : > { %v15910_v40 = vpop.f32.mrf.mxu0  ;;  %v7248_v16 = vadd.f32 %v7212_v27, %v7071_v23  ;;  %3461 = vxpose.xlu1.b32.cont [3/16] (narrow) %v17552_v12, 8  ;;  %v7926_v23 = vsel %vm436_vm1, %v7923_v22, %v7925_v45  ;;  %v15933_v27 = vadd.f32 %v15794_v54, %v7569_v48  ;;  %v9131_v22 = vrot.slane %v15927_v43, 2  ;;  %v7753_v12 = vld [vmem:[#allocation3 + $0x90] sm:$0xff] }
 0x5b9   : > { %5083 = vxpose.xlu2.b32.cont [2/16] (narrow) %v17553_v21, 8  ;;  %10897 = vmatmul.msk.f32.gmra.mxu1 %vm277_vm15, %v15919_v32  ;;  %v7074_v54 = vadd.f32 %v15467_v25, %v15469_v11  ;;  %v8421_v32 = vrot.slane %v15941_v61, 1  ;;  %v17559_v25 = vld [vmem:[#allocation11_spill] sm:$0xff]  ;;  %v15960_v11 = vld [vmem:[#allocation3 + $0x118] sm:$0x3]  ;;  %v7570_v61 = vadd.f32 %v15828_v47, %v15846_v8  ;;  %v8086_v47 = vrot.slane %v15939_v53, 2 }
 0x5ba   : > { %v15923_v19 = vadd.f32 %v7370_v49, %v7248_v16  ;;  %17555 = vst [vmem:[#allocation15_spill] sm:$0xff] %v15933_v27  ;;  %10860 = vmatmul.msk.f32.gmra.mxu3 %vm277_vm15, %v7926_v23  ;;  %v17557_v16 = vld [vmem:[#allocation24_spill] sm:$0xff]  ;;  %v7928_v23 = vrot.slane %v15939_v53, 1  ;;  %v8084_v27 = vsel %vm674_vm2, %v8081_v13, %v8083_v17  ;;  %v15979_v17 = vrot.slane %v15892_v41, 2  ;;  %v7755_v8 = vld [vmem:[#allocation3 + $0xa0] sm:$0x3] }
 0x5bb   : > { %v8422_v1 = vsel %vm436_vm1, %v15906_v55, %v8421_v32  ;;  %v9136_v32 = vrot.slane %v15960_v11, 2  ;;  %v7930_v55 = vrot.slane %v7755_v8, 1 }
 0x5bc   : > { %10842 = vmatmul.msk.f32.gmra.mxu2 %vm277_vm15, %v15862_v30  ;;  %v7373_v21 = vpop.f32.mrf.mxu3 }
 0x5bd   : > { %v15943_v49 = vpop.f32.mrf.mxu1  ;;  %1880 = vxpose.xlu0.b32.cont [9/16] (narrow) %v17557_v16, 8  ;;  %v6759_v45 = vpop.permute.xlu1 %6758  ;;  %v15956_v16 = vsel %vm674_vm2, %v15936_v34, %v9131_v22 }
 0x5be   : > { %6800 = vst.msk [vmem:[#allocation3 + $0x129] sm:$0xff] %vm277_vm15, %v6759_v45  ;;  %v7927_v45 = vrot.slane %v7753_v12, 1 }
 0x5bf   : > { %v7215_v48 = vpop.f32.mrf.mxu2  ;;  %17558 = vst [vmem:[#allocation20_spill] sm:$0xff] %v15956_v16  ;;  %10878 = vmatmul.msk.f32.gmra.mxu0 %vm277_vm15, %v8084_v27  ;;  %v15976_v27 = vadd.f32 %v15821_v2, %v7570_v61  ;;  %v15991_v2 = vsel %vm674_vm2, %v15979_v17, %v9136_v32  ;;  %v7077_v61 = vadd.f32 %v15492_v46, %v15494_v20  ;;  %v17565_v20 = vld [vmem:[#allocation35_spill] sm:$0xff] }
 0x5c0   : > { %v15949_v30 = vpop.f32.mrf.mxu0  ;;  %v7249_v35 = vadd.f32 %v7215_v48, %v7074_v54  ;;  %3462 = vxpose.xlu1.b32.cont [4/16] (narrow) %v17559_v25, 8  ;;  %v7929_v13 = vsel %vm436_vm1, %v7927_v45, %v7928_v23  ;;  %v15973_v54 = vld [vmem:[#allocation3 + $0x120] sm:$0xff]  ;;  %17562 = vst [vmem:[#allocation22_spill] sm:$0xff] %v15991_v2  ;;  %v17564_v2 = vld [vmem:[#allocation26_spill] sm:$0xff] }
 0x5c1   : > { %5084 = vxpose.xlu2.b32.cont [3/16] (narrow) %v17560_v56, 8  ;;  %10898 = vmatmul.msk.f32.gmra.mxu1 %vm277_vm15, %v8422_v1  ;;  %v8085_v56 = vrot.slane %v7753_v12, 2  ;;  %v8423_v45 = vrot.slane %v15973_v54, 1 }
 0x5c2   : > { %v15968_v22 = vadd.f32 %v7373_v21, %v7249_v35  ;;  %10861 = vmatmul.msk.f32.gmra.mxu3 %vm277_vm15, %v7929_v13  ;;  %v17561_v35 = vld [vmem:[#allocation12_spill] sm:$0xff] }
 0x5c3   : > { %v8087_v32 = vsel %vm674_vm2, %v8085_v56, %v8086_v47  ;;  %v8088_v56 = vrot.slane %v7755_v8, 2 }
 0x5c4   : > { %10843 = vmatmul.msk.f32.gmra.mxu2 %vm277_vm15, %v7753_v12  ;;  %v7571_v12 = vadd.f32 %v15871_v5, %v15887_v42  ;;  %v17567_v5 = vld [vmem:[#allocation10_spill] sm:$0xff] }
 0x5c5   : > { %v15984_v1 = vpop.f32.mrf.mxu1  ;;  %1881 = vxpose.xlu0.b32.cont [10/16] (narrow) %v17561_v35, 8  ;;  %v6767_v21 = vpop.permute.xlu2 %6766  ;;  %v15987_v48 = vld [vmem:[#allocation3 + $0x128] sm:$0xff] }
 0x5c6   : > { %6804 = vst.msk [vmem:[#allocation3 + $0x159] sm:$0xff] %vm277_vm15, %v6767_v21  ;;  %v16000_v13 = vrot.slane %v15987_v48, 1  ;;  %v7376_v35 = vpop.f32.mrf.mxu3 }
 0x5c7   : > { %v7218_v16 = vpop.f32.mrf.mxu2  ;;  %10879 = vmatmul.msk.f32.gmra.mxu0 %vm277_vm15, %v8087_v32 }
 0x5c8   : > { %v15995_v25 = vpop.f32.mrf.mxu0  ;;  %17563 = vst [vmem:[#allocation55_spill] sm:$0xff] %v16000_v13  ;;  %v7250_v41 = vadd.f32 %v7218_v16, %v7077_v61  ;;  %3463 = vxpose.xlu1.b32.cont [5/16] (narrow) %v17564_v2, 8  ;;  %v16006_v46 = vsel %vm436_vm1, %v8423_v45, %v16000_v13  ;;  %v16016_v16 = vld [vmem:[#allocation3 + $0x130] sm:$0x3]  ;;  %v7931_v2 = vsel %vm436_vm1, %v7928_v23, %v7930_v55 }
 0x5c9   : > { %5085 = vxpose.xlu2.b32.cont [4/16] (narrow) %v17565_v20, 8  ;;  %10899 = vmatmul.msk.f32.gmra.mxu1 %vm277_vm15, %v16006_v46  ;;  %17566 = vst [vmem:[#allocation21_spill] sm:$0xff] %v16016_v16  ;;  %v16022_v61 = vadd.f32 %v15865_v62, %v7571_v12  ;;  %v16025_v45 = vld [vmem:[#allocation3 + $0xb0] sm:$0xff]  ;;  %v7080_v55 = vadd.f32 %v15515_v44, %v15517_v39  ;;  %v7756_v62 = vld [vmem:[#allocation3 + $0xa8] sm:$0xff] }
 0x5ca   : > { %v16012_v21 = vadd.f32 %v7376_v35, %v7250_v41  ;;  %10862 = vmatmul.msk.f32.gmra.mxu3 %vm277_vm15, %v7931_v2  ;;  %v8426_v35 = vrot.slane %v16016_v16, 1  ;;  %v7933_v8 = vrot.slane %v16025_v45, 1  ;;  %v8089_v12 = vsel %vm674_vm2, %v8086_v47, %v8088_v56  ;;  %v17568_v2 = vld [vmem:[#allocation14_spill] sm:$0xff]  ;;  %v16050_v47 = vld [vmem:[#allocation3 + $0x138] sm:$0xff] }
 0x5cb   : > { %v7932_v16 = vrot.slane %v7756_v62, 1  ;;  %v7572_v39 = vadd.f32 %v15910_v40, %v15923_v19  ;;  %17570 = vst [vmem:[#allocation27_spill] sm:$0xff] %v16050_v47  ;;  %v17572_v40 = vld [vmem:[#allocation8_spill] sm:$0xff] }
 0x5cc   : > { %10844 = vmatmul.msk.f32.gmra.mxu2 %vm277_vm15, %v15939_v53  ;;  %v8427_v44 = vsel %vm436_vm1, %v16000_v13, %v8426_v35  ;;  %v8091_v35 = vrot.slane %v16025_v45, 2 }
 0x5cd   : > { %v16027_v42 = vpop.f32.mrf.mxu1  ;;  %1882 = vxpose.xlu0.b32.cont [11/16] (narrow) %v17567_v5, 8  ;;  %v6763_v41 = vpop.permute.xlu0 %6762  ;;  %v17569_v5 = vld [vmem:[#allocation51_spill] sm:$0xff]  ;;  %v16053_v56 = vadd.f32 %v15901_v38, %v7572_v39 }
 0x5ce   : > { %6802 = vst.msk [vmem:[#allocation3 + $0x141] sm:$0xff] %vm277_vm15, %v6763_v41  ;;  %v7379_v53 = vpop.f32.mrf.mxu3 }
 0x5cf   : > { %v7221_v32 = vpop.f32.mrf.mxu2  ;;  %10880 = vmatmul.msk.f32.gmra.mxu0 %vm277_vm15, %v8089_v12  ;;  %17571 = vst [vmem:[#allocation32_spill] sm:$0xff] %v16053_v56 }
 0x5d0   : > { %v16033_v23 = vpop.f32.mrf.mxu0  ;;  %v7251_v20 = vadd.f32 %v7221_v32, %v7080_v55  ;;  %3464 = vxpose.xlu1.b32.cont [6/16] (narrow) %v17568_v2, 8  ;;  %v7934_v55 = vsel %vm436_vm1, %v7932_v16, %v7933_v8  ;;  %v7758_v32 = vld [vmem:[#allocation3 + $0xb8] sm:$0x3]  ;;  %v7083_v16 = vadd.f32 %v15540_v24, %v15542_v57  ;;  %v8090_v2 = vrot.slane %v7756_v62, 2  ;;  %v17573_v24 = vld [vmem:[#allocation31_spill] sm:$0xff] }
 0x5d1   : > { %5086 = vxpose.xlu2.b32.cont [5/16] (narrow) %v17569_v5, 8  ;;  %10900 = vmatmul.msk.f32.gmra.mxu1 %vm277_vm15, %v8427_v44  ;;  %v8428_v5 = vrot.slane %v16050_v47, 1 }
 0x5d2   : > { %v16045_v41 = vadd.f32 %v7379_v53, %v7251_v20  ;;  %10863 = vmatmul.msk.f32.gmra.mxu3 %vm277_vm15, %v7934_v55  ;;  %v8092_v56 = vsel %vm674_vm2, %v8090_v2, %v8091_v35 }
 0x5d4   : > { %10845 = vmatmul.msk.f32.gmra.mxu2 %vm277_vm15, %v7756_v62  ;;  %v17574_v62 = vld [vmem:[#allocation52_spill] sm:$0xff] }
 0x5d5   : > { %v16057_v12 = vpop.f32.mrf.mxu1  ;;  %1883 = vxpose.xlu0.b32.cont [12/16] (narrow) %v17572_v40, 8  ;;  %v6771_v19 = vpop.permute.xlu2 %6770  ;;  %v16060_v53 = vld [vmem:[#allocation3 + $0x140] sm:$0xff]  ;;  %v7935_v40 = vrot.slane %v7758_v32, 1 }
 0x5d6   : > { %6806 = vst.msk [vmem:[#allocation3 + $0x171] sm:$0xff] %vm277_vm15, %v6771_v19  ;;  %v6765_v38 = vpop.permute.xlu1 %6764  ;;  %v16069_v44 = vrot.slane %v16060_v53, 1  ;;  %v7382_v39 = vpop.f32.mrf.mxu3  ;;  %v7573_v19 = vadd.f32 %v15949_v30, %v15968_v22  ;;  %v8093_v30 = vrot.slane %v7758_v32, 2 }
 0x5d7   : > { %6803 = vst.msk [vmem:[#allocation3 + $0x151] sm:$0xff] %vm277_vm15, %v6765_v38  ;;  %v7224_v55 = vpop.f32.mrf.mxu2  ;;  %10881 = vmatmul.msk.f32.gmra.mxu0 %vm277_vm15, %v8092_v56  ;;  %v16088_v38 = vld [vmem:[#allocation3 + $0x130] sm:$0x3]  ;;  %v7936_v2 = vsel %vm436_vm1, %v7933_v8, %v7935_v40 }
 0x5d8   : > { %v16064_v20 = vpop.f32.mrf.mxu0  ;;  %v7252_v13 = vadd.f32 %v7224_v55, %v7083_v16  ;;  %3465 = vxpose.xlu1.b32.cont [7/16] (narrow) %v17573_v24, 8  ;;  %v16076_v57 = vsel %vm436_vm1, %v8428_v5, %v16069_v44  ;;  %v16086_v16 = vld [vmem:[#allocation3 + $0x148] sm:$0x3]  ;;  %v16094_v56 = vadd.f32 %v15943_v49, %v7573_v19  ;;  %v16097_v5 = vrot.slane %v15987_v48, 2 }
 0x5d9   : > { %5087 = vxpose.xlu2.b32.cont [6/16] (narrow) %v17574_v62, 8  ;;  %10901 = vmatmul.msk.f32.gmra.mxu1 %vm277_vm15, %v16076_v57  ;;  %v8431_v55 = vrot.slane %v16086_v16, 1  ;;  %v9141_v8 = vrot.slane %v16088_v38, 2  ;;  %v8094_v19 = vsel %vm674_vm2, %v8091_v35, %v8093_v30 }
 0x5da   : > { %v16082_v47 = vadd.f32 %v7382_v39, %v7252_v13  ;;  %10864 = vmatmul.msk.f32.gmra.mxu3 %vm277_vm15, %v7936_v2  ;;  %v17575_v13 = vld [vmem:[#allocation13_spill] sm:$0xff]  ;;  %v17577_v2 = vld [vmem:[#allocation28_spill] sm:$0xff] }
 0x5db   : > { %v16112_v32 = vsel %vm674_vm2, %v16097_v5, %v9141_v8 }
 0x5dc   : > { %10846 = vmatmul.msk.f32.gmra.mxu2 %vm277_vm15, %v16025_v45  ;;  %v7086_v45 = vadd.f32 %v15563_v58, %v15565_v50  ;;  %17576 = vst [vmem:[#allocation23_spill] sm:$0xff] %v16112_v32  ;;  %v8432_v58 = vsel %vm436_vm1, %v16069_v44, %v8431_v55  ;;  %v7574_v50 = vadd.f32 %v15995_v25, %v16012_v21  ;;  %v17580_v25 = vld [vmem:[#allocation7_spill] sm:$0xff] }
 0x5dd   : > { %v16100_v22 = vpop.f32.mrf.mxu1  ;;  %1884 = vxpose.xlu0.b32.cont [13/16] (narrow) %v17575_v13, 8  ;;  %v6773_v39 = vpop.permute.xlu2 %6772  ;;  %v17578_v13 = vld [vmem:[#allocation40_spill] sm:$0xff] }
 0x5de   : > { %6807 = vst.msk [vmem:[#allocation3 + $0x181] sm:$0xff] %vm277_vm15, %v6773_v39  ;;  %v7385_v40 = vpop.f32.mrf.mxu3  ;;  %v16125_v8 = vld [vmem:[#allocation3 + $0x150] sm:$0xff]  ;;  %v16132_v35 = vadd.f32 %v15984_v1, %v7574_v50 }
 0x5df   : > { %v7227_v24 = vpop.f32.mrf.mxu2  ;;  %10882 = vmatmul.msk.f32.gmra.mxu0 %vm277_vm15, %v8094_v19  ;;  %v8433_v55 = vrot.slane %v16125_v8, 1 }
 0x5e0   : > { %v16107_v49 = vpop.f32.mrf.mxu0  ;;  %v7253_v62 = vadd.f32 %v7227_v24, %v7086_v45  ;;  %3466 = vxpose.xlu1.b32.cont [8/16] (narrow) %v17577_v2, 8  ;;  %v16127_v45 = vld [vmem:[#allocation3 + $0x158] sm:$0xff]  ;;  %v7089_v24 = vadd.f32 %v15588_v10, %v15590_v59  ;;  %v10978_v2 = vld [vmem:[%s17032_s5 + $0x14] sm:$0xf] }
 0x5e1   : > { %5088 = vxpose.xlu2.b32.cont [7/16] (narrow) %v17578_v13, 8  ;;  %10902 = vmatmul.msk.f32.gmra.mxu1 %vm277_vm15, %v8432_v58  ;;  %17579 = vst [vmem:[#allocation25_spill] sm:$0xff] %v16127_v45  ;;  %v17582_v58 = vld [vmem:[#allocation33_spill] sm:$0xff] }
 0x5e2   : > { %v16122_v39 = vadd.f32 %v7385_v40, %v7253_v62  ;;  %10865 = vmatmul.msk.f32.gmra.mxu3 %vm277_vm15, %v15670_v51  ;;  %v16141_v40 = vrot.slane %v16127_v45, 1  ;;  %v7761_v62 = vld [vmem:[#allocation3 + $0xd0] sm:$0x3]  ;;  %10979 = vmatpush.msk.msrb.mxu2 %vm3696_vm14, %v10978_v2  ;;  %v17583_v10 = vld [vmem:[#allocation45_spill] sm:$0xff] }
 0x5e3   : > { %v7940_v59 = vrot.slane %v7761_v62, 1  ;;  %v17586_v2 = vld [vmem:[#allocation9_spill] sm:$0xff] }
 0x5e4   : > { %10847 = vmatmul.msk.f32.gmra.mxu2 %vm277_vm15, %v15630_v36  ;;  %17581 = vst [vmem:[#allocation49_spill] sm:$0xff] %v16141_v40  ;;  %v16159_v50 = vsel %vm436_vm1, %v8433_v55, %v16141_v40 }
 0x5e5   : > { %v16136_v30 = vpop.f32.mrf.mxu1  ;;  %1885 = vxpose.xlu0.b32.cont [14/16] (narrow) %v17580_v25, 8  ;;  %v6775_v21 = vpop.permute.xlu2 %6774  ;;  %17584 = vst [vmem:[#allocation24_spill] sm:$0xff] %v16159_v50  ;;  %v7575_v25 = vadd.f32 %v16033_v23, %v16045_v41  ;;  %v16179_v23 = vrot.slane %v16060_v53, 2  ;;  %v16182_v41 = vld [vmem:[#allocation3 + $0x160] sm:$0x3] }
 0x5e6   : > { %6808 = vst.msk [vmem:[#allocation3 + $0x189] sm:$0xff] %vm277_vm15, %v6775_v21  ;;  %v6769_v1 = vpop.permute.xlu1 %6768  ;;  %v7388_v51 = vpop.f32.mrf.mxu3 }
 0x5e7   : > { %6805 = vst.msk [vmem:[#allocation3 + $0x169] sm:$0xff] %vm277_vm15, %v6769_v1  ;;  %v7230_v19 = vpop.f32.mrf.mxu2  ;;  %10883 = vmatmul.msk.f32.gmra.mxu0 %vm277_vm15, %v15663_v7  ;;  %v7941_v1 = vsel %vm436_vm1, %v15645_v0, %v7940_v59  ;;  %v16176_v55 = vadd.f32 %v16027_v42, %v7575_v25  ;;  %v10996_v0 = vld [vmem:[%s17032_s5 + $0x18] sm:$0xf]  ;;  %v7092_v42 = vadd.f32 %v15615_v15, %v15620_v28 }
 0x5e8   : > { %v16145_v36 = vpop.f32.mrf.mxu0  ;;  %v7254_v13 = vadd.f32 %v7230_v19, %v7089_v24  ;;  %3467 = vxpose.xlu1.b32.cont [9/16] (narrow) %v17582_v58, 8  ;;  %v16167_v24 = vld [vmem:[#allocation3 + $0x148] sm:$0x3]  ;;  %17585 = vst [vmem:[#allocation11_spill] sm:$0xff] %v16182_v41  ;;  %10997 = vmatpush.msk.msrb.mxu3 %vm3696_vm14, %v10996_v0 }
 0x5e9   : > { %5089 = vxpose.xlu2.b32.cont [8/16] (narrow) %v17583_v10, 8  ;;  %10903 = vmatmul.msk.f32.gmra.mxu1 %vm277_vm15, %v16159_v50  ;;  %v16171_v19 = vld [vmem:[#allocation3 + $0xc8] sm:$0xff]  ;;  %v8098_v10 = vrot.slane %v7761_v62, 2  ;;  %v17589_v62 = vld [vmem:[#allocation43_spill] sm:$0xff] }
 0x5ea   : > { %v16163_v21 = vadd.f32 %v7388_v51, %v7254_v13  ;;  %10866 = vmatmul.msk.f32.gmra.mxu3 %vm277_vm15, %v7941_v1  ;;  %v9146_v13 = vrot.slane %v16167_v24, 2  ;;  %v8436_v1 = vrot.slane %v16182_v41, 1  ;;  %v17588_v28 = vld [vmem:[#allocation34_spill] sm:$0xff]  ;;  %v7576_v41 = vadd.f32 %v16064_v20, %v16082_v47 }
 0x5eb   : > { %v8099_v15 = vsel %vm674_vm2, %v15320_v29, %v8098_v10  ;;  %v7764_v47 = vld [vmem:[#allocation3 + $0xe8] sm:$0x3] }
 0x5ec   : > { %10848 = vmatmul.msk.f32.gmra.mxu2 %vm277_vm15, %v16171_v19  ;;  %v16202_v32 = vsel %vm674_vm2, %v16179_v23, %v9146_v13  ;;  %v8437_v0 = vsel %vm436_vm1, %v16141_v40, %v8436_v1  ;;  %v16214_v13 = vld [vmem:[#allocation3 + $0x160] sm:$0x3]  ;;  %v16229_v1 = vrot.slane %v16127_v45, 2  ;;  %v17594_v45 = vld [vmem:[#allocation47_spill] sm:$0xff] }
 0x5ed   : > { %v16184_v51 = vpop.f32.mrf.mxu1  ;;  %1886 = vxpose.xlu0.b32.cont [15/16] (narrow) %v17586_v2, 8  ;;  %v11014_v2 = vld [vmem:[%s17032_s5 + $0x1c] sm:$0xf]  ;;  %17587 = vst [vmem:[#allocation39_spill] sm:$0xff] %v16202_v32  ;;  %v9151_v20 = vrot.slane %v16214_v13, 2 }
 0x5ee   : > { %v7391_v59 = vpop.f32.mrf.mxu3  ;;  %11015 = vmatpush.msk.msrb.mxu0 %vm3696_vm14, %v11014_v2  ;;  %v16219_v29 = vld [vmem:[#allocation3 + $0x168] sm:$0xff]  ;;  %v16221_v10 = vld [vmem:[#allocation3 + $0x170] sm:$0xff] }
 0x5ef   : > { %v7233_v25 = vpop.f32.mrf.mxu2  ;;  %10884 = vmatmul.msk.f32.gmra.mxu0 %vm277_vm15, %v8099_v15  ;;  %17590 = vst [vmem:[#allocation12_spill] sm:$0xff] %v16219_v29  ;;  %v8438_v2 = vrot.slane %v16219_v29, 1  ;;  %v16239_v15 = vrot.slane %v16221_v10, 1  ;;  %v7945_v29 = vrot.slane %v7764_v47, 1 }
 0x5f0   : > { %v16193_v58 = vpop.f32.mrf.mxu0  ;;  %v7255_v50 = vadd.f32 %v7233_v25, %v7092_v42  ;;  %3468 = vxpose.xlu1.b32.cont [10/16] (narrow) %v17588_v28, 8  ;;  %v16226_v25 = vadd.f32 %v16057_v12, %v7576_v41  ;;  %v7095_v12 = vadd.f32 %v15647_v9, %v15655_v18  ;;  %v8100_v28 = vrot.slane %v15757_v6, 2  ;;  %v17593_v18 = vld [vmem:[#allocation29_spill] sm:$0xff] }
 0x5f1   : > { %5090 = vxpose.xlu2.b32.cont [9/16] (narrow) %v17589_v62, 8  ;;  %10904 = vmatmul.msk.f32.gmra.mxu1 %vm277_vm15, %v8437_v0  ;;  %v11032_v62 = vld [vmem:[%s17032_s5 + $0x20] sm:$0xf]  ;;  %v16251_v0 = vsel %vm674_vm2, %v16229_v1, %v9151_v20  ;;  %v16264_v20 = vsel %vm436_vm1, %v8438_v2, %v16239_v15  ;;  %v16278_v2 = vld [vmem:[#allocation3 + $0x178] sm:$0x3] }
 0x5f2   : > { %v16216_v42 = vadd.f32 %v7391_v59, %v7255_v50  ;;  %10867 = vmatmul.msk.f32.gmra.mxu3 %vm277_vm15, %v15778_v3  ;;  %v17591_v59 = vld [vmem:[#allocation18_spill] sm:$0xff]  ;;  %17592 = vst [vmem:[#allocation26_spill] sm:$0xff] %v16251_v0  ;;  %11033 = vmatpush.msk.msrb.mxu1 %vm3696_vm14, %v11032_v62  ;;  %v16256_v9 = vsel %vm674_vm2, %v8100_v28, %v15856_v63 }
 0x5f3   : > { %v7577_v0 = vadd.f32 %v16107_v49, %v16122_v39  ;;  %v7098_v49 = vadd.f32 %v15687_v26, %v15690_v37  ;;  %v7578_v26 = vadd.f32 %v16145_v36, %v16163_v21 }
 0x5f4   : > { %10849 = vmatmul.msk.f32.gmra.mxu2 %vm277_vm15, %v15757_v6 }
 0x5f5   : > { %v16234_v50 = vpop.f32.mrf.mxu1  ;;  %1887 = vxpose.xlu0.b32.end [16/16] (narrow) %v17591_v59, 8 }
 0x5f6   : > { %v7394_v59 = vpop.f32.mrf.mxu3 }
 0x5f7   : > { %v7236_v32 = vpop.f32.mrf.mxu2  ;;  %10885 = vmatmul.msk.f32.gmra.mxu0 %vm277_vm15, %v16256_v9 }
 0x5f8   : > { %v16243_v41 = vpop.f32.mrf.mxu0  ;;  %v7256_v40 = vadd.f32 %v7236_v32, %v7095_v12  ;;  %3469 = vxpose.xlu1.b32.cont [11/16] (narrow) %v17593_v18, 8  ;;  %v7946_v32 = vsel %vm436_vm1, %v15773_v14, %v7945_v29  ;;  %v16275_v12 = vadd.f32 %v16100_v22, %v7577_v0  ;;  %v17596_v18 = vld [vmem:[#allocation48_spill] sm:$0xff] }
 0x5f9   : > { %5091 = vxpose.xlu2.b32.cont [10/16] (narrow) %v17594_v45, 8  ;;  %10905 = vmatmul.msk.f32.gmra.mxu1 %vm277_vm15, %v16264_v20  ;;  %v8103_v45 = vrot.slane %v7764_v47, 2  ;;  %v17595_v47 = vld [vmem:[#allocation37_spill] sm:$0xff] }
 0x5fa   : > { %v7414_v62 = vadd.f32 %v7394_v59, %v7256_v40  ;;  %10868 = vmatmul.msk.f32.gmra.mxu3 %vm277_vm15, %v7946_v32  ;;  %v8441_v59 = vrot.slane %v16278_v2, 1  ;;  %v16298_v32 = vld [vmem:[#allocation3 + $0x178] sm:$0x3] }
 0x5fb   : > { %v8104_v0 = vsel %vm674_vm2, %v15856_v63, %v8103_v45  ;;  %v16302_v45 = vadd.f32 %v16136_v30, %v7578_v26  ;;  %v9156_v36 = vrot.slane %v16298_v32, 2  ;;  %v17598_v30 = vld [vmem:[#allocation30_spill] sm:$0xff]  ;;  %v17602_v26 = vld [vmem:[#allocation64_spill] sm:$0xff] }
 0x5fc   : > { %10850 = vmatmul.msk.f32.gmra.mxu2 %vm277_vm15, %v15764_v31 }
 0x5fd   : > { %v16280_v28 = vpop.f32.mrf.mxu1  ;;  %6695 = vxpose.xlu0.b32.start [1/16] (narrow) %v15323_v4, 8  ;;  %v8442_v4 = vsel %vm436_vm1, %v16239_v15, %v8441_v59 }
 0x5fe   : > { %v7397_v40 = vpop.f32.mrf.mxu3 }
 0x5ff   : > { %v7239_v29 = vpop.f32.mrf.mxu2  ;;  %10886 = vmatmul.msk.f32.gmra.mxu0 %vm277_vm15, %v8104_v0 }
 0x600   : > { %v16285_v39 = vpop.f32.mrf.mxu0  ;;  %v7257_v22 = vadd.f32 %v7239_v29, %v7098_v49  ;;  %3470 = vxpose.xlu1.b32.cont [12/16] (narrow) %v17595_v47, 8  ;;  %v11156_v49 = vld [vmem:[#allocation3 + $0xc0] sm:$0xff]  ;;  %v16305_v29 = vrot.slane %v16221_v10, 2  ;;  %v17599_v47 = vld [vmem:[#allocation54_spill] sm:$0xff] }
 0x601   : > { %5092 = vxpose.xlu2.b32.cont [11/16] (narrow) %v17596_v18, 8  ;;  %10906 = vmatmul.msk.f32.gmra.mxu1 %vm277_vm15, %v8442_v4  ;;  %v17600_v18 = vld [vmem:[#allocation70_spill] sm:$0xff]  ;;  %v17601_v4 = vld [vmem:[#allocation41_spill] sm:$0xff] }
 0x602   : > { %v7415_v37 = vadd.f32 %v7397_v40, %v7257_v22  ;;  %10926 = vmatmul.msk.f32.vlgmr.msra.gmra.mxu3 %vm277_vm15, %v15663_v7  ;;  %v16315_v0 = vsel %vm674_vm2, %v16305_v29, %v9156_v36  ;;  %v7579_v7 = vadd.f32 %v16193_v58, %v16216_v42  ;;  %v17603_v58 = vld [vmem:[#allocation63_spill] sm:$0xff] }
 0x603   : > { %17597 = vst [vmem:[#allocation35_spill] sm:$0xff] %v16315_v0  ;;  %v17604_v0 = vld [vmem:[#allocation38_spill] sm:$0xff] }
 0x604   : > { %10908 = vmatmul.msk.f32.vlgmr.msra.gmra.mxu2 %vm277_vm15, %v11156_v49  ;;  %v8969_v49 = vrot.slane %v17602_v26, 1 }
 0x605   : > { %v16309_v59 = vpop.f32.mrf.mxu1  ;;  %6696 = vxpose.xlu0.b32.cont [2/16] (narrow) %v15358_v33, 8  ;;  %v16328_v33 = vadd.f32 %v16184_v51, %v7579_v7  ;;  %v7580_v7 = vadd.f32 %v16243_v41, %v7414_v62  ;;  %v16359_v62 = vld [vmem:[%s17033_s6] ss:$0 sm:$0xff] }
 0x606   : > { %v8001_v40 = vpop.f32.mrf.mxu3  ;;  %v8970_v51 = vsel %vm436_vm1, %v15773_v14, %v8969_v49  ;;  %v17608_v49 = vld [vmem:[#allocation68_spill] sm:$0xff] }
 0x607   : > { %v7835_v22 = vpop.f32.mrf.mxu2  ;;  %10944 = vmatmul.msk.f32.vlgmr.msra.gmra.mxu0 %vm277_vm15, %v15757_v6 }
 0x608   : > { %v8159_v21 = vpop.f32.mrf.mxu0  ;;  %3471 = vxpose.xlu1.b32.cont [13/16] (narrow) %v17598_v30, 8  ;;  %v7883_v42 = vadd.f32 %v7835_v22, %v17603_v58  ;;  %v16348_v22 = vadd.f32 %v16234_v50, %v7580_v7  ;;  %v17609_v50 = vld [vmem:[#allocation77_spill] sm:$0xff] }
 0x609   : > { %5093 = vxpose.xlu2.b32.cont [12/16] (narrow) %v17599_v47, 8  ;;  %10962 = vmatmul.msk.f32.vlgmr.msra.gmra.mxu1 %vm277_vm15, %v15778_v3  ;;  %v8652_v58 = vrot.slane %v17609_v50, 2  ;;  %v17613_v7 = vld [vmem:[#allocation53_spill] sm:$0xff] }
 0x60a   : > { %10927 = vmatmul.msk.f32.gmra.mxu3 %vm277_vm15, %v17600_v18  ;;  %v8049_v18 = vadd.f32 %v8001_v40, %v7883_v42  ;;  %v17610_v42 = vld [vmem:[#allocation36_spill] sm:$0xff] }
 0x60c   : > { %10909 = vmatmul.msk.f32.gmra.mxu2 %vm277_vm15, %v16171_v19  ;;  %v17605_v19 = vld [vmem:[#allocation44_spill] sm:$0xff]  ;;  %v8207_v14 = vadd.f32 %v8159_v21, %v8049_v18  ;;  %v7581_v21 = vadd.f32 %v16285_v39, %v7415_v37  ;;  %v8653_v18 = vsel %vm674_vm2, %v15856_v63, %v8652_v58  ;;  %v17614_v39 = vld [vmem:[#allocation58_spill] sm:$0xff]  ;;  %v8974_v37 = vrot.slane %v15927_v43, 1 }
 0x60d   : > { %6697 = vxpose.xlu0.b32.cont [3/16] (narrow) %v17601_v4, 8  ;;  %v16334_v36 = vpop.f32.mrf.mxu1  ;;  %v17617_v43 = vld [vmem:[#allocation46_spill] sm:$0xff] }
 0x60e   : > { %v8004_v47 = vpop.f32.mrf.mxu3  ;;  %v16380_v50 = vadd.f32 %v16280_v28, %v7581_v21  ;;  %v16392_v28 = vld [vmem:[%s17033_s6 + $0x2] ss:$0 sm:$0xff] }
 0x60f   : > { %v7838_v3 = vpop.f32.mrf.mxu2  ;;  %10945 = vmatmul.msk.f32.gmra.mxu0 %vm277_vm15, %v15764_v31 }
 0x610   : > { %v8162_v30 = vpop.f32.mrf.mxu0  ;;  %3472 = vxpose.xlu1.b32.cont [14/16] (narrow) %v17604_v0, 8  ;;  %v17606_v0 = vld [vmem:[#allocation71_spill] sm:$0xff]  ;;  %v7884_v41 = vadd.f32 %v7838_v3, %v17608_v49 }
 0x611   : > { %5094 = vxpose.xlu2.b32.cont [13/16] (narrow) %v17605_v19, 8  ;;  %10963 = vmatmul.msk.f32.gmra.mxu1 %vm277_vm15, %v8970_v51  ;;  %v17611_v19 = vld [vmem:[#allocation60_spill] sm:$0xff]  ;;  %v17612_v51 = vld [vmem:[#allocation50_spill] sm:$0xff]  ;;  %v16377_v49 = vld [vmem:[%s17033_s6 + $0x1] ss:$0 sm:$0xff] }
 0x612   : > { %10928 = vmatmul.msk.f32.gmra.mxu3 %vm277_vm15, %v16256_v9  ;;  %v8050_v3 = vadd.f32 %v8004_v47, %v7884_v41  ;;  %v9128_v21 = vrot.slane %v17611_v19, 2 }
 0x614   : > { %10910 = vmatmul.msk.f32.gmra.mxu2 %vm277_vm15, %v15757_v6 }
 0x615   : > { %6698 = vxpose.xlu0.b32.cont [4/16] (narrow) %v17606_v0, 8  ;;  %v8227_v0 = vmul.f32 %v16359_v62, %v8207_v14 }
 0x616   : > { %v16353_v26 = vpop.f32.mrf.mxu1  ;;  %v8007_v6 = vpop.f32.mrf.mxu3 }
 0x617   : > { %17607 = vst [vmem:[#allocation10_spill] sm:$0xff] %v16353_v26  ;;  %v7841_v40 = vpop.f32.mrf.mxu2  ;;  %10946 = vmatmul.msk.f32.gmra.mxu0 %vm277_vm15, %v17611_v19  ;;  %v17624_v26 = vld [vmem:[#allocation61_spill] sm:$0xff] }
 0x618   : > { %v8165_v4 = vpop.f32.mrf.mxu0  ;;  %3473 = vxpose.xlu1.b32.cont [15/16] (narrow) %v17610_v42, 8  ;;  %v7885_v14 = vadd.f32 %v7841_v40, %v15897_v52  ;;  %v8248_v42 = vadd.f32 %v16377_v49, %v8227_v0  ;;  %v17619_v0 = vld [vmem:[#allocation59_spill] sm:$0xff] }
 0x619   : > { %5095 = vxpose.xlu2.b32.cont [14/16] (narrow) %v17612_v51, 8  ;;  %10964 = vmatmul.msk.f32.gmra.mxu1 %vm277_vm15, %v17613_v7  ;;  %v17616_v51 = vld [vmem:[#allocation42_spill] sm:$0xff] }
 0x61a   : > { %10929 = vmatmul.msk.f32.gmra.mxu3 %vm277_vm15, %v8653_v18  ;;  %v8051_v7 = vadd.f32 %v8007_v6, %v7885_v14  ;;  %v8285_v18 = vmul.f32 %v16392_v28, %v8248_v42  ;;  %vm8264_vm14 = vcmp.gt.f32.partialorder %v8248_v42, 0.0 }
 0x61c   : > { %10911 = vmatmul.msk.f32.gmra.mxu2 %vm277_vm15, %v15764_v31  ;;  %v8208_v31 = vadd.f32 %v8162_v30, %v8050_v3  ;;  %v17618_v30 = vld [vmem:[#allocation56_spill] sm:$0xff]  ;;  %v16405_v3 = vsel %vm674_vm2, %v9128_v21, %v15936_v34  ;;  %v8209_v14 = vadd.f32 %v8165_v4, %v8051_v7  ;;  %v8979_v7 = vrot.slane %v15960_v11, 1 }
 0x61d   : > { %6699 = vxpose.xlu0.b32.cont [5/16] (narrow) %v17614_v39, 8  ;;  %v8975_v52 = vsel %vm436_vm1, %v17618_v30, %v8974_v37 }
 0x61e   : > { %v16385_v47 = vpop.f32.mrf.mxu1  ;;  %v8010_v41 = vpop.f32.mrf.mxu3  ;;  %v8228_v40 = vmul.f32 %v16359_v62, %v8208_v31  ;;  %v17621_v31 = vld [vmem:[#allocation57_spill] sm:$0xff] }
 0x61f   : > { %17615 = vst [vmem:[#allocation14_spill] sm:$0xff] %v16385_v47  ;;  %v7844_v58 = vpop.f32.mrf.mxu2  ;;  %10947 = vmatmul.msk.f32.gmra.mxu0 %vm277_vm15, %v15824_v60  ;;  %v8657_v6 = vrot.slane %v17621_v31, 2  ;;  %v17623_v47 = vld [vmem:[#allocation66_spill] sm:$0xff] }
 0x620   : > { %v8168_v63 = vpop.f32.mrf.mxu0  ;;  %3474 = vxpose.xlu1.b32.end [16/16] (narrow) %v17616_v51, 8  ;;  %v17622_v51 = vld [vmem:[#allocation15_spill] sm:$0xff] }
 0x621   : > { %5096 = vxpose.xlu2.b32.cont [15/16] (narrow) %v17617_v43, 8  ;;  %10965 = vmatmul.msk.f32.gmra.mxu1 %vm277_vm15, %v8975_v52  ;;  %v7886_v21 = vadd.f32 %v7844_v58, %v17622_v51  ;;  %v8301_v52 = vsel %vm8264_vm14, %v8248_v42, %v8285_v18  ;;  %v8658_v4 = vsel %vm674_vm2, %v15936_v34, %v8657_v6  ;;  %v17626_v42 = vld [vmem:[#allocation69_spill] sm:$0xff] }
 0x622   : > { %10930 = vmatmul.msk.f32.gmra.mxu3 %vm277_vm15, %v16405_v3 }
 0x623   : > { %v8052_v31 = vadd.f32 %v8010_v41, %v7886_v21  ;;  %v17627_v21 = vld [vmem:[#allocation65_spill] sm:$0xff] }
 0x624   : > { %10912 = vmatmul.msk.f32.gmra.mxu2 %vm277_vm15, %v17611_v19  ;;  %v8249_v19 = vadd.f32 %v16377_v49, %v8228_v40 }
 0x625   : > { %6700 = vxpose.xlu0.b32.cont [6/16] (narrow) %v17619_v0, 8  ;;  %v17625_v0 = vld [vmem:[#allocation17_spill] sm:$0xff]  ;;  %v8210_v18 = vadd.f32 %v8168_v63, %v8052_v31 }
 0x626   : > { %v16413_v37 = vpop.f32.mrf.mxu1  ;;  %v8013_v43 = vpop.f32.mrf.mxu3  ;;  %v8286_v58 = vmul.f32 %v16392_v28, %v8249_v19  ;;  %vm8265_vm0 = vcmp.gt.f32.partialorder %v8249_v19, 0.0 }
 0x627   : > { %17620 = vst [vmem:[#allocation51_spill] sm:$0xff] %v16413_v37  ;;  %v7847_v30 = vpop.f32.mrf.mxu2  ;;  %10948 = vmatmul.msk.f32.gmra.mxu0 %vm277_vm15, %v17623_v47  ;;  %v8229_v37 = vmul.f32 %v16359_v62, %v8209_v14  ;;  %v8230_v11 = vmul.f32 %v16359_v62, %v8210_v18 }
 0x628   : > { %v8171_v39 = vpop.f32.mrf.mxu0  ;;  %8317 = vxpose.xlu1.b32.start [1/16] (narrow) %v8301_v52, 8  ;;  %v7887_v41 = vadd.f32 %v7847_v30, %v15976_v27  ;;  %v8302_v6 = vsel %vm8265_vm0, %v8249_v19, %v8286_v58  ;;  %v17628_v52 = vld [vmem:[#allocation16_spill] sm:$0xff]  ;;  %v17629_v30 = vld [vmem:[#allocation75_spill] sm:$0xff] }
 0x629   : > { %5097 = vxpose.xlu2.b32.end [16/16] (narrow) %v17624_v26, 8  ;;  %10966 = vmatmul.msk.f32.gmra.mxu1 %vm277_vm15, %v17625_v0  ;;  %v9133_v26 = vrot.slane %v17623_v47, 2  ;;  %v8980_v0 = vsel %vm436_vm1, %v17628_v52, %v8979_v7 }
 0x62a   : > { %10931 = vmatmul.msk.f32.gmra.mxu3 %vm277_vm15, %v8658_v4  ;;  %v8053_v63 = vadd.f32 %v8013_v43, %v7887_v41 }
 0x62b   : > { %v16445_v27 = vsel %vm674_vm2, %v9133_v26, %v15979_v17  ;;  %v8251_v26 = vadd.f32 %v16377_v49, %v8230_v11 }
 0x62c   : > { %10913 = vmatmul.msk.f32.gmra.mxu2 %vm277_vm15, %v15824_v60  ;;  %v8250_v60 = vadd.f32 %v16377_v49, %v8229_v37  ;;  %v8211_v31 = vadd.f32 %v8171_v39, %v8053_v63 }
 0x62d   : > { %6701 = vxpose.xlu0.b32.cont [7/16] (narrow) %v17626_v42, 8  ;;  %vm8267_vm10 = vcmp.gt.f32.partialorder %v8251_v26, 0.0 }
 0x62e   : > { %v8016_v14 = vpop.f32.mrf.mxu3  ;;  %v16434_v34 = vpop.f32.mrf.mxu1  ;;  %v8287_v37 = vmul.f32 %v16392_v28, %v8250_v60  ;;  %vm8266_vm9 = vcmp.gt.f32.partialorder %v8250_v60, 0.0  ;;  %v8231_v39 = vmul.f32 %v16359_v62, %v8211_v31  ;;  %v17633_v31 = vld [vmem:[#allocation55_spill] sm:$0xff] }
 0x62f   : > { %v7850_v51 = vpop.f32.mrf.mxu2  ;;  %10949 = vmatmul.msk.f32.gmra.mxu0 %vm277_vm15, %v17627_v21 }
 0x630   : > { %v8174_v40 = vpop.f32.mrf.mxu0  ;;  %8318 = vxpose.xlu1.b32.cont [2/16] (narrow) %v8302_v6, 8  ;;  %v7888_v4 = vadd.f32 %v7850_v51, %v16022_v61  ;;  %v8303_v42 = vsel %vm8266_vm9, %v8250_v60, %v8287_v37  ;;  %v8288_v6 = vmul.f32 %v16392_v28, %v8251_v26  ;;  %v17631_v60 = vld [vmem:[#allocation74_spill] sm:$0xff]  ;;  %v8984_v51 = vrot.slane %v16088_v38, 1 }
 0x631   : > { %10967 = vmatmul.msk.f32.gmra.mxu1 %vm277_vm15, %v8980_v0  ;;  %v17632_v0 = vld [vmem:[#allocation32_spill] sm:$0xff]  ;;  %v8252_v37 = vadd.f32 %v16377_v49, %v8231_v39 }
 0x632   : > { %10932 = vmatmul.msk.f32.gmra.mxu3 %vm277_vm15, %v16445_v27  ;;  %v8054_v41 = vadd.f32 %v8016_v14, %v7888_v4  ;;  %v8985_v38 = vsel %vm436_vm1, %v17633_v31, %v8984_v51 }
 0x633   : > { %vm8268_vm11 = vcmp.gt.f32.partialorder %v8252_v37, 0.0 }
 0x634   : > { %10914 = vmatmul.msk.f32.gmra.mxu2 %vm277_vm15, %v17623_v47  ;;  %v17630_v47 = vld [vmem:[#allocation19_spill] sm:$0xff] }
 0x635   : > { %6702 = vxpose.xlu0.b32.cont [8/16] (narrow) %v17629_v30, 8  ;;  %v8662_v18 = vrot.slane %v17630_v47, 2  ;;  %v9138_v30 = vrot.slane %v15973_v54, 2 }
 0x636   : > { %v8019_v43 = vpop.f32.mrf.mxu3  ;;  %v16454_v58 = vpop.f32.mrf.mxu1 }
 0x637   : > { %v7853_v7 = vpop.f32.mrf.mxu2  ;;  %10950 = vmatmul.msk.f32.gmra.mxu0 %vm277_vm15, %v15973_v54  ;;  %v8663_v61 = vsel %vm674_vm2, %v15979_v17, %v8662_v18  ;;  %v8304_v17 = vsel %vm8267_vm10, %v8251_v26, %v8288_v6  ;;  %v8289_v26 = vmul.f32 %v16392_v28, %v8252_v37  ;;  %v17635_v18 = vld [vmem:[#allocation21_spill] sm:$0xff] }
 0x638   : > { %v8177_v19 = vpop.f32.mrf.mxu0  ;;  %8319 = vxpose.xlu1.b32.cont [3/16] (narrow) %v8303_v42, 8  ;;  %v7889_v11 = vadd.f32 %v7853_v7, %v17632_v0  ;;  %v16484_v42 = vsel %vm674_vm2, %v9138_v30, %v16097_v5  ;;  %v17634_v7 = vld [vmem:[#allocation72_spill] sm:$0xff]  ;;  %v8667_v39 = vrot.slane %v17635_v18, 2  ;;  %v8672_v18 = vrot.slane %v16086_v16, 2 }
 0x639   : > { %10968 = vmatmul.msk.f32.gmra.mxu1 %vm277_vm15, %v16006_v46  ;;  %v8212_v46 = vadd.f32 %v8174_v40, %v8054_v41 }
 0x63a   : > { %10933 = vmatmul.msk.f32.gmra.mxu3 %vm277_vm15, %v8663_v61  ;;  %v8055_v4 = vadd.f32 %v8019_v43, %v7889_v11 }
 0x63b   : > { %v8232_v40 = vmul.f32 %v16359_v62, %v8212_v46  ;;  %v17636_v46 = vld [vmem:[#allocation27_spill] sm:$0xff] }
 0x63c   : > { %10915 = vmatmul.msk.f32.gmra.mxu2 %vm277_vm15, %v17627_v21  ;;  %v8213_v41 = vadd.f32 %v8177_v19, %v8055_v4 }
 0x63d   : > { %6703 = vxpose.xlu0.b32.cont [9/16] (narrow) %v17631_v60, 8  ;;  %v8305_v60 = vsel %vm8268_vm11, %v8252_v37, %v8289_v26  ;;  %v8989_v37 = vrot.slane %v16167_v24, 1 }
 0x63e   : > { %v8022_v14 = vpop.f32.mrf.mxu3  ;;  %v16472_v63 = vpop.f32.mrf.mxu1  ;;  %v8233_v0 = vmul.f32 %v16359_v62, %v8213_v41 }
 0x63f   : > { %v7856_v21 = vpop.f32.mrf.mxu2  ;;  %10951 = vmatmul.msk.f32.gmra.mxu0 %vm277_vm15, %v15987_v48  ;;  %v8990_v24 = vsel %vm436_vm1, %v16069_v44, %v8989_v37 }
 0x640   : > { %v8180_v52 = vpop.f32.mrf.mxu0  ;;  %8320 = vxpose.xlu1.b32.cont [4/16] (narrow) %v8304_v17, 8  ;;  %v7890_v43 = vadd.f32 %v7856_v21, %v16094_v56  ;;  %v8668_v56 = vsel %vm674_vm2, %v16097_v5, %v8667_v39  ;;  %v17637_v17 = vld [vmem:[#allocation76_spill] sm:$0xff] }
 0x641   : > { %10969 = vmatmul.msk.f32.gmra.mxu1 %vm277_vm15, %v8985_v38  ;;  %v8254_v38 = vadd.f32 %v16377_v49, %v8233_v0 }
 0x642   : > { %10934 = vmatmul.msk.f32.gmra.mxu3 %vm277_vm15, %v16484_v42  ;;  %v8056_v11 = vadd.f32 %v8022_v14, %v7890_v43 }
 0x643   : > { %v8291_v26 = vmul.f32 %v16392_v28, %v8254_v38  ;;  %vm8270_vm13 = vcmp.gt.f32.partialorder %v8254_v38, 0.0 }
 0x644   : > { %10916 = vmatmul.msk.f32.gmra.mxu2 %vm277_vm15, %v15973_v54  ;;  %v8253_v54 = vadd.f32 %v16377_v49, %v8232_v40  ;;  %v9143_v40 = vrot.slane %v17636_v46, 2 }
 0x645   : > { %6704 = vxpose.xlu0.b32.cont [10/16] (narrow) %v17634_v7, 8  ;;  %v17638_v7 = vld [vmem:[#allocation73_spill] sm:$0xff] }
 0x646   : > { %v8025_v61 = vpop.f32.mrf.mxu3  ;;  %v16494_v6 = vpop.f32.mrf.mxu1  ;;  %v8290_v19 = vmul.f32 %v16392_v28, %v8253_v54  ;;  %vm8269_vm12 = vcmp.gt.f32.partialorder %v8253_v54, 0.0  ;;  %v16523_v4 = vsel %vm674_vm2, %v9143_v40, %v16179_v23 }
 0x647   : > { %v7859_v51 = vpop.f32.mrf.mxu2  ;;  %10952 = vmatmul.msk.f32.gmra.mxu0 %vm277_vm15, %v17636_v46 }
 0x648   : > { %v8183_v47 = vpop.f32.mrf.mxu0  ;;  %8321 = vxpose.xlu1.b32.cont [5/16] (narrow) %v8305_v60, 8  ;;  %v7891_v30 = vadd.f32 %v7859_v51, %v16132_v35  ;;  %v8306_v5 = vsel %vm8269_vm12, %v8253_v54, %v8290_v19  ;;  %v8307_v60 = vsel %vm8270_vm13, %v8254_v38, %v8291_v26  ;;  %v17641_v38 = vld [vmem:[#allocation25_spill] sm:$0xff] }
 0x649   : > { %10970 = vmatmul.msk.f32.gmra.mxu1 %vm277_vm15, %v16076_v57  ;;  %v8214_v57 = vadd.f32 %v8180_v52, %v8056_v11  ;;  %v17640_v11 = vld [vmem:[#allocation78_spill] sm:$0xff] }
 0x64a   : > { %10935 = vmatmul.msk.f32.gmra.mxu3 %vm277_vm15, %v8668_v56  ;;  %v8057_v52 = vadd.f32 %v8025_v61, %v7891_v30  ;;  %v9148_v56 = vrot.slane %v16125_v8, 2 }
 0x64b   : > { %v8234_v35 = vmul.f32 %v16359_v62, %v8214_v57 }
 0x64c   : > { %10917 = vmatmul.msk.f32.gmra.mxu2 %vm277_vm15, %v15987_v48  ;;  %v8215_v39 = vadd.f32 %v8183_v47, %v8057_v52 }
 0x64d   : > { %6705 = vxpose.xlu0.b32.cont [11/16] (narrow) %v17637_v17, 8  ;;  %v8255_v54 = vadd.f32 %v16377_v49, %v8234_v35  ;;  %v8994_v17 = vrot.slane %v16214_v13, 1  ;;  %v17643_v35 = vld [vmem:[#allocation80_spill] sm:$0xff] }
 0x64e   : > { %v8028_v14 = vpop.f32.mrf.mxu3  ;;  %v16511_v31 = vpop.f32.mrf.mxu1  ;;  %v8235_v0 = vmul.f32 %v16359_v62, %v8215_v39 }
 0x64f   : > { %v7862_v48 = vpop.f32.mrf.mxu2  ;;  %10953 = vmatmul.msk.f32.gmra.mxu0 %vm277_vm15, %v16060_v53  ;;  %v8292_v47 = vmul.f32 %v16392_v28, %v8255_v54  ;;  %vm8271_vm3 = vcmp.gt.f32.partialorder %v8255_v54, 0.0 }
 0x650   : > { %v8186_v21 = vpop.f32.mrf.mxu0  ;;  %8322 = vxpose.xlu1.b32.cont [6/16] (narrow) %v8306_v5, 8  ;;  %v7892_v41 = vadd.f32 %v7862_v48, %v16176_v55  ;;  %v8673_v55 = vsel %vm674_vm2, %v16179_v23, %v8672_v18  ;;  %v17642_v48 = vld [vmem:[#allocation49_spill] sm:$0xff] }
 0x651   : > { %10971 = vmatmul.msk.f32.gmra.mxu1 %vm277_vm15, %v8990_v24  ;;  %v8995_v40 = vsel %vm436_vm1, %v17642_v48, %v8994_v17 }
 0x652   : > { %10936 = vmatmul.msk.f32.gmra.mxu3 %vm277_vm15, %v16523_v4  ;;  %v8058_v16 = vadd.f32 %v8028_v14, %v7892_v41  ;;  %v8308_v14 = vsel %vm8271_vm3, %v8255_v54, %v8292_v47  ;;  %v17645_v54 = vld [vmem:[#allocation11_spill] sm:$0xff] }
 0x654   : > { %10918 = vmatmul.msk.f32.gmra.mxu2 %vm277_vm15, %v17636_v46  ;;  %v17639_v46 = vld [vmem:[#allocation24_spill] sm:$0xff]  ;;  %v8216_v37 = vadd.f32 %v8186_v21, %v8058_v16  ;;  %v17646_v16 = vld [vmem:[#allocation79_spill] sm:$0xff] }
 0x655   : > { %6706 = vxpose.xlu0.b32.cont [12/16] (narrow) %v17638_v7, 8 }
 0x656   : > { %v8031_v43 = vpop.f32.mrf.mxu3  ;;  %v16533_v61 = vpop.f32.mrf.mxu1  ;;  %v8236_v13 = vmul.f32 %v16359_v62, %v8216_v37 }
 0x657   : > { %v7865_v51 = vpop.f32.mrf.mxu2  ;;  %10954 = vmatmul.msk.f32.gmra.mxu0 %vm277_vm15, %v16125_v8 }
 0x658   : > { %v8189_v44 = vpop.f32.mrf.mxu0  ;;  %8323 = vxpose.xlu1.b32.cont [7/16] (narrow) %v8307_v60, 8  ;;  %v7893_v57 = vadd.f32 %v7865_v51, %v16226_v25  ;;  %v16562_v25 = vsel %vm674_vm2, %v9148_v56, %v16229_v1  ;;  %v8677_v51 = vrot.slane %v17645_v54, 2 }
 0x659   : > { %10972 = vmatmul.msk.f32.gmra.mxu1 %vm277_vm15, %v17639_v46 }
 0x65a   : > { %10937 = vmatmul.msk.f32.gmra.mxu3 %vm277_vm15, %v8673_v55  ;;  %v8059_v21 = vadd.f32 %v8031_v43, %v7893_v57  ;;  %v8257_v43 = vadd.f32 %v16377_v49, %v8236_v13 }
 0x65c   : > { %10919 = vmatmul.msk.f32.gmra.mxu2 %vm277_vm15, %v16060_v53  ;;  %v8256_v53 = vadd.f32 %v16377_v49, %v8235_v0  ;;  %v8217_v26 = vadd.f32 %v8189_v44, %v8059_v21  ;;  %v8294_v0 = vmul.f32 %v16392_v28, %v8257_v43  ;;  %vm8273_vm5 = vcmp.gt.f32.partialorder %v8257_v43, 0.0 }
 0x65d   : > { %6707 = vxpose.xlu0.b32.cont [13/16] (narrow) %v17640_v11, 8 }
 0x65e   : > { %v8034_v30 = vpop.f32.mrf.mxu3  ;;  %v16551_v23 = vpop.f32.mrf.mxu1  ;;  %v8293_v24 = vmul.f32 %v16392_v28, %v8256_v53  ;;  %vm8272_vm4 = vcmp.gt.f32.partialorder %v8256_v53, 0.0  ;;  %v8237_v44 = vmul.f32 %v16359_v62, %v8217_v26  ;;  %v8310_v37 = vsel %vm8273_vm5, %v8257_v43, %v8294_v0 }
 0x65f   : > { %v7868_v5 = vpop.f32.mrf.mxu2  ;;  %10955 = vmatmul.msk.f32.gmra.mxu0 %vm277_vm15, %v17641_v38  ;;  %v8682_v43 = vrot.slane %v16278_v2, 2 }
 0x660   : > { %v8192_v19 = vpop.f32.mrf.mxu0  ;;  %8324 = vxpose.xlu1.b32.cont [8/16] (narrow) %v8308_v14, 8  ;;  %v7894_v7 = vadd.f32 %v7868_v5, %v16275_v12  ;;  %v8309_v41 = vsel %vm8272_vm4, %v8256_v53, %v8293_v24  ;;  %v8678_v12 = vsel %vm674_vm2, %v16229_v1, %v8677_v51  ;;  %v8258_v57 = vadd.f32 %v16377_v49, %v8237_v44  ;;  %v16607_v5 = vld [vmem:[#allocation3 + $0x180] sm:$0xff] }
 0x661   : > { %10973 = vmatmul.msk.f32.gmra.mxu1 %vm277_vm15, %v8995_v40  ;;  %v9001_v13 = vrot.slane %v16607_v5, 1  ;;  %v8683_v54 = vsel %vm674_vm2, %v16305_v29, %v8682_v43 }
 0x662   : > { %10938 = vmatmul.msk.f32.gmra.mxu3 %vm277_vm15, %v16562_v25  ;;  %v8060_v46 = vadd.f32 %v8034_v30, %v7894_v7  ;;  %vm8274_vm6 = vcmp.gt.f32.partialorder %v8258_v57, 0.0 }
 0x664   : > { %10920 = vmatmul.msk.f32.gmra.mxu2 %vm277_vm15, %v16125_v8  ;;  %v17644_v8 = vld [vmem:[#allocation12_spill] sm:$0xff]  ;;  %v8218_v11 = vadd.f32 %v8192_v19, %v8060_v46 }
 0x665   : > { %6708 = vxpose.xlu0.b32.cont [14/16] (narrow) %v17643_v35, 8  ;;  %v9153_v55 = vrot.slane %v17644_v8, 2 }
 0x666   : > { %v8037_v18 = vpop.f32.mrf.mxu3  ;;  %v16571_v39 = vpop.f32.mrf.mxu1 }
 0x667   : > { %v7871_v60 = vpop.f32.mrf.mxu2  ;;  %10956 = vmatmul.msk.f32.gmra.mxu0 %vm277_vm15, %v17644_v8  ;;  %v16603_v53 = vsel %vm674_vm2, %v9153_v55, %v16305_v29 }
 0x668   : > { %v8195_v52 = vpop.f32.mrf.mxu0  ;;  %8325 = vxpose.xlu1.b32.cont [9/16] (narrow) %v8309_v41, 8  ;;  %v7895_v56 = vadd.f32 %v7871_v60, %v16302_v45  ;;  %v8238_v45 = vmul.f32 %v16359_v62, %v8218_v11  ;;  %v9282_v11 = vld [vmem:[#allocation3 + $0xf8] sm:$0xff] }
 0x669   : > { %10974 = vmatmul.msk.f32.gmra.mxu1 %vm277_vm15, %v16264_v20  ;;  %v8999_v20 = vrot.slane %v16298_v32, 1  ;;  %v16598_v32 = vld [vmem:[#allocation3 + $0x188] sm:$0xff] }
 0x66a   : > { %10939 = vmatmul.msk.f32.gmra.mxu3 %vm277_vm15, %v8678_v12  ;;  %v8061_v19 = vadd.f32 %v8037_v18, %v7895_v56  ;;  %v16614_v48 = vrot.slane %v16598_v32, 1  ;;  %v8259_v18 = vadd.f32 %v16377_v49, %v8238_v45  ;;  %v9281_v56 = vld [vmem:[#allocation3 + $0xf0] sm:$0xff] }
 0x66b   : > { %v9000_v14 = vsel %vm436_vm1, %v16239_v15, %v8999_v20  ;;  %v17647_v15 = vld [vmem:[#allocation62_spill] sm:$0xff] }
 0x66c   : > { %10921 = vmatmul.msk.f32.gmra.mxu2 %vm277_vm15, %v17641_v38  ;;  %v8295_v38 = vmul.f32 %v16392_v28, %v8258_v57  ;;  %v8219_v21 = vadd.f32 %v8195_v52, %v8061_v19  ;;  %v16626_v60 = vsel %vm436_vm1, %v9001_v13, %v16614_v48  ;;  %v8296_v2 = vmul.f32 %v16392_v28, %v8259_v18 }
 0x66d   : > { %6709 = vxpose.xlu0.b32.cont [15/16] (narrow) %v17646_v16, 8  ;;  %vm8275_vm7 = vcmp.gt.f32.partialorder %v8259_v18, 0.0 }
 0x66e   : > { %v8040_v17 = vpop.f32.mrf.mxu3  ;;  %v16590_v1 = vpop.f32.mrf.mxu1  ;;  %v8311_v7 = vsel %vm8274_vm6, %v8258_v57, %v8295_v38  ;;  %v8239_v52 = vmul.f32 %v16359_v62, %v8219_v21  ;;  %v8312_v55 = vsel %vm8275_vm7, %v8259_v18, %v8296_v2  ;;  %v9604_v57 = vrot.slane %v9282_v11, 2 }
 0x66f   : > { %v7874_v30 = vpop.f32.mrf.mxu2  ;;  %10957 = vmatmul.msk.f32.gmra.mxu0 %vm277_vm15, %v16221_v10 }
 0x670   : > { %v8198_v47 = vpop.f32.mrf.mxu0  ;;  %8326 = vxpose.xlu1.b32.cont [10/16] (narrow) %v8310_v37, 8  ;;  %v7896_v24 = vadd.f32 %v7874_v30, %v16328_v33  ;;  %v16630_v33 = vld [vmem:[#allocation3 + $0x190] sm:$0x3]  ;;  %v8260_v29 = vadd.f32 %v16377_v49, %v8239_v52  ;;  %v9447_v37 = vrot.slane %v9282_v11, 1  ;;  %v9446_v30 = vrot.slane %v9281_v56, 1 }
 0x671   : > { %10975 = vmatmul.msk.f32.gmra.mxu1 %vm277_vm15, %v9000_v14  ;;  %v9004_v51 = vrot.slane %v16630_v33, 1  ;;  %v9603_v14 = vrot.slane %v9281_v56, 2  ;;  %v17648_v52 = vld [vmem:[#allocation67_spill] sm:$0xff] }
 0x672   : > { %10940 = vmatmul.msk.f32.gmra.mxu3 %vm277_vm15, %v16603_v53  ;;  %vm8276_vm8 = vcmp.gt.f32.partialorder %v8260_v29, 0.0 }
 0x673   : > { %v9605_v18 = vsel %vm674_vm2, %v9603_v14, %v9604_v57 }
 0x674   : > { %10922 = vmatmul.msk.f32.gmra.mxu2 %vm277_vm15, %v17644_v8  ;;  %v8062_v8 = vadd.f32 %v8040_v17, %v7896_v24  ;;  %v8297_v17 = vmul.f32 %v16392_v28, %v8260_v29 }
 0x675   : > { %6710 = vxpose.xlu0.b32.end [16/16] (narrow) %v17647_v15, 8 }
 0x676   : > { %v8043_v35 = vpop.f32.mrf.mxu3  ;;  %v16618_v26 = vpop.f32.mrf.mxu1  ;;  %v8220_v46 = vadd.f32 %v8198_v47, %v8062_v8  ;;  %v8313_v21 = vsel %vm8276_vm8, %v8260_v29, %v8297_v17 }
 0x677   : > { %v7877_v41 = vpop.f32.mrf.mxu2  ;;  %10958 = vmatmul.msk.f32.gmra.mxu0 %vm277_vm15, %v16607_v5 }
 0x678   : > { %v8201_v40 = vpop.f32.mrf.mxu0  ;;  %8327 = vxpose.xlu1.b32.cont [11/16] (narrow) %v8311_v7, 8  ;;  %v7897_v12 = vadd.f32 %v7877_v41, %v16348_v22  ;;  %v8240_v47 = vmul.f32 %v16359_v62, %v8220_v46  ;;  %v9283_v41 = vld [vmem:[#allocation3 + $0x100] sm:$0x3] }
 0x679   : > { %10976 = vmatmul.msk.f32.gmra.mxu1 %vm277_vm15, %v16626_v60 }
 0x67a   : > { %10941 = vmatmul.msk.f32.gmra.mxu3 %vm277_vm15, %v8683_v54  ;;  %v8063_v22 = vadd.f32 %v8043_v35, %v7897_v12  ;;  %v9448_v35 = vsel %vm436_vm1, %v9446_v30, %v9447_v37  ;;  %v9606_v54 = vrot.slane %v9283_v41, 2 }
 0x67c   : > { %10923 = vmatmul.msk.f32.gmra.mxu2 %vm277_vm15, %v16221_v10  ;;  %v9005_v10 = vsel %vm436_vm1, %v16614_v48, %v9004_v51  ;;  %v8221_v19 = vadd.f32 %v8201_v40, %v8063_v22  ;;  %v9285_v22 = vld [vmem:[#allocation3 + $0x110] sm:$0xff] }
 0x67d   : > { %v9609_v14 = vrot.slane %v9285_v22, 2 }
 0x67e   : > { %v8046_v0 = vpop.f32.mrf.mxu3  ;;  %v16641_v16 = vpop.f32.mrf.mxu1 }
 0x67f   : > { %v7880_v20 = vpop.f32.mrf.mxu2  ;;  %10959 = vmatmul.msk.f32.gmra.mxu0 %vm277_vm15, %v16598_v32 }
 0x680   : > { %v8204_v44 = vpop.f32.mrf.mxu0  ;;  %8328 = vxpose.xlu1.b32.cont [12/16] (narrow) %v8312_v55, 8  ;;  %v7898_v38 = vadd.f32 %v7880_v20, %v16380_v50  ;;  %v8241_v50 = vmul.f32 %v16359_v62, %v8221_v19 }
 0x681   : > { %10977 = vmatmul.msk.f32.gmra.mxu1 %vm277_vm15, %v9005_v10 }
 0x682   : > { %10998 = vmatmul.msk.f32.vlgmr.msrb.gmra.mxu3 %vm277_vm15, %v9281_v56  ;;  %v8064_v40 = vadd.f32 %v8046_v0, %v7898_v38  ;;  %v8262_v0 = vadd.f32 %v16377_v49, %v8241_v50 }
 0x684   : > { %10980 = vmatmul.msk.f32.vlgmr.msrb.gmra.mxu2 %vm277_vm15, %v16256_v9  ;;  %v8261_v9 = vadd.f32 %v16377_v49, %v8240_v47  ;;  %v8222_v51 = vadd.f32 %v8204_v44, %v8064_v40  ;;  %v9607_v47 = vsel %vm674_vm2, %v9604_v57, %v9606_v54  ;;  %v8299_v17 = vmul.f32 %v16392_v28, %v8262_v0 }
 0x685   : > { %vm8278_vm0 = vcmp.gt.f32.partialorder %v8262_v0, 0.0 }
 0x686   : > { %v8737_v15 = vpop.f32.mrf.mxu3  ;;  %v16657_v13 = vpop.f32.mrf.mxu1  ;;  %v8298_v8 = vmul.f32 %v16392_v28, %v8261_v9  ;;  %vm8277_vm14 = vcmp.gt.f32.partialorder %v8261_v9, 0.0  ;;  %v8242_v44 = vmul.f32 %v16359_v62, %v8222_v51 }
 0x687   : > { %v8596_v24 = vpop.f32.mrf.mxu2  ;;  %11016 = vmatmul.msk.f32.vlgmr.msrb.gmra.mxu0 %vm277_vm15, %v9448_v35 }
 0x688   : > { %v16654_v45 = vpop.f32.mrf.mxu0  ;;  %8329 = vxpose.xlu1.b32.cont [13/16] (narrow) %v8313_v21, 8  ;;  %v8597_v7 = vadd.f32 %v8596_v24, %v16309_v59  ;;  %v9449_v59 = vrot.slane %v9283_v41, 1  ;;  %v8314_v55 = vsel %vm8277_vm14, %v8261_v9, %v8298_v8  ;;  %v8263_v62 = vadd.f32 %v16377_v49, %v8242_v44  ;;  %v17649_v9 = vld [vmem:[#allocation10_spill] sm:$0xff]  ;;  %v9286_v41 = vld [vmem:[#allocation3 + $0x118] sm:$0x3] }
 0x689   : > { %11034 = vmatmul.msk.f32.vlgmr.msrb.gmra.mxu1 %vm277_vm15, %v9605_v18  ;;  %v17650_v18 = vld [vmem:[#allocation20_spill] sm:$0xff]  ;;  %v9454_v40 = vrot.slane %v9286_v41, 1  ;;  %v9611_v54 = vrot.slane %v9286_v41, 2 }
 0x68a   : > { %v16666_v43 = vadd.f32 %v8737_v15, %v8597_v7  ;;  %10999 = vmatmul.msk.f32.gmra.mxu3 %vm277_vm15, %v9282_v11  ;;  %v9450_v20 = vsel %vm436_vm1, %v9447_v37, %v9449_v59  ;;  %v9284_v11 = vld [vmem:[#allocation3 + $0x108] sm:$0xff]  ;;  %v8315_v15 = vsel %vm8278_vm0, %v8262_v0, %v8299_v17  ;;  %v8300_v50 = vmul.f32 %v16392_v28, %v8263_v62 }
 0x68b   : > { %v9451_v37 = vrot.slane %v9284_v11, 1  ;;  %v9608_v30 = vrot.slane %v9284_v11, 2  ;;  %vm8279_vm9 = vcmp.gt.f32.partialorder %v8263_v62, 0.0  ;;  %v9612_v28 = vsel %vm674_vm2, %v9609_v14, %v9611_v54 }
 0x68c   : > { %10981 = vmatmul.msk.f32.gmra.mxu2 %vm277_vm15, %v17648_v52  ;;  %v8316_v59 = vsel %vm8279_vm9, %v8263_v62, %v8300_v50 }
 0x68d   : > { %v9610_v35 = vsel %vm674_vm2, %v9608_v30, %v9609_v14 }
 0x68e   : > { %v8740_v46 = vpop.f32.mrf.mxu3  ;;  %v16674_v12 = vpop.f32.mrf.mxu1 }
 0x68f   : > { %v8599_v29 = vpop.f32.mrf.mxu2  ;;  %11017 = vmatmul.msk.f32.gmra.mxu0 %vm277_vm15, %v9450_v20  ;;  %v8942_v20 = vadd.f32 %v16654_v45, %v16666_v43 }
 0x690   : > { %v16672_v2 = vpop.f32.mrf.mxu0  ;;  %8330 = vxpose.xlu1.b32.cont [14/16] (narrow) %v8314_v55, 8  ;;  %v8600_v10 = vadd.f32 %v8599_v29, %v16334_v36  ;;  %v9452_v36 = vrot.slane %v9285_v22, 1  ;;  %v17651_v55 = vld [vmem:[#allocation14_spill] sm:$0xff] }
 0x691   : > { %11035 = vmatmul.msk.f32.gmra.mxu1 %vm277_vm15, %v9607_v47  ;;  %v9288_v29 = vld [vmem:[#allocation3 + $0x128] sm:$0xff]  ;;  %v16715_v47 = vadd.f32 %v16657_v13, %v8942_v20  ;;  %v9289_v13 = vld [vmem:[#allocation3 + $0x130] sm:$0x3] }
 0x692   : > { %v8786_v56 = vadd.f32 %v8740_v46, %v8600_v10  ;;  %11000 = vmatmul.msk.f32.gmra.mxu3 %vm277_vm15, %v9284_v11  ;;  %v9455_v46 = vsel %vm436_vm1, %v9452_v36, %v9454_v40  ;;  %v9287_v11 = vld [vmem:[#allocation3 + $0x120] sm:$0xff]  ;;  %v9614_v44 = vrot.slane %v9288_v29, 2 }
 0x693   : > { %v9456_v17 = vrot.slane %v9287_v11, 1 }
 0x694   : > { %10982 = vmatmul.msk.f32.gmra.mxu2 %vm277_vm15, %v16405_v3  ;;  %v9453_v3 = vsel %vm436_vm1, %v9451_v37, %v9452_v36  ;;  %v9613_v36 = vrot.slane %v9287_v11, 2  ;;  %v8943_v62 = vadd.f32 %v16672_v2, %v8786_v56 }
 0x696   : > { %v8743_v57 = vpop.f32.mrf.mxu3  ;;  %v16689_v38 = vpop.f32.mrf.mxu1 }
 0x697   : > { %v8602_v21 = vpop.f32.mrf.mxu2  ;;  %11018 = vmatmul.msk.f32.gmra.mxu0 %vm277_vm15, %v9453_v3  ;;  %v17653_v3 = vld [vmem:[#allocation22_spill] sm:$0xff] }
 0x698   : > { %v16687_v19 = vpop.f32.mrf.mxu0  ;;  %8331 = vxpose.xlu1.b32.cont [15/16] (narrow) %v8315_v15, 8  ;;  %v8603_v24 = vadd.f32 %v8602_v21, %v17649_v9  ;;  %v16731_v9 = vadd.f32 %v16674_v12, %v8943_v62  ;;  %v9291_v12 = vld [vmem:[#allocation3 + $0x140] sm:$0xff]  ;;  %v9294_v62 = vld [vmem:[#allocation3 + $0x158] sm:$0xff] }
 0x699   : > { %11036 = vmatmul.msk.f32.gmra.mxu1 %vm277_vm15, %v9610_v35  ;;  %v9616_v35 = vrot.slane %v9289_v13, 2 }
 0x69a   : > { %v8787_v7 = vadd.f32 %v8743_v57, %v8603_v24  ;;  %11001 = vmatmul.msk.f32.gmra.mxu3 %vm277_vm15, %v9285_v22  ;;  %v9457_v22 = vrot.slane %v9288_v29, 1  ;;  %v17652_v57 = vld [vmem:[#allocation51_spill] sm:$0xff]  ;;  %v9459_v24 = vrot.slane %v9289_v13, 1 }
 0x69b   : > { %v9293_v13 = vld [vmem:[#allocation3 + $0x150] sm:$0xff] }
 0x69c   : > { %10983 = vmatmul.msk.f32.gmra.mxu2 %vm277_vm15, %v17650_v18  ;;  %v9458_v14 = vsel %vm436_vm1, %v9456_v17, %v9457_v22  ;;  %v9460_v2 = vsel %vm436_vm1, %v9457_v22, %v9459_v24 }
 0x69e   : > { %v8746_v52 = vpop.f32.mrf.mxu3  ;;  %v16703_v8 = vpop.f32.mrf.mxu1 }
 0x69f   : > { %v8605_v51 = vpop.f32.mrf.mxu2  ;;  %11019 = vmatmul.msk.f32.gmra.mxu0 %vm277_vm15, %v9455_v46 }
 0x6a0   : > { %v16701_v49 = vpop.f32.mrf.mxu0  ;;  %8332 = vxpose.xlu1.b32.end [16/16] (narrow) %v8316_v59, 8  ;;  %v8606_v0 = vadd.f32 %v8605_v51, %v17651_v55  ;;  %v8944_v59 = vadd.f32 %v16687_v19, %v8787_v7  ;;  %v9290_v51 = vld [vmem:[#allocation3 + $0x138] sm:$0xff]  ;;  %v9619_v55 = vrot.slane %v9291_v12, 2 }
 0x6a1   : > { %11037 = vmatmul.msk.f32.gmra.mxu1 %vm277_vm15, %v9612_v28 }
 0x6a2   : > { %v8788_v10 = vadd.f32 %v8746_v52, %v8606_v0  ;;  %11002 = vmatmul.msk.f32.gmra.mxu3 %vm277_vm15, %v9287_v11  ;;  %v9617_v52 = vsel %vm674_vm2, %v9614_v44, %v9616_v35  ;;  %v16747_v46 = vadd.f32 %v16689_v38, %v8944_v59  ;;  %v9461_v0 = vrot.slane %v9290_v51, 1  ;;  %v9292_v38 = vld [vmem:[#allocation3 + $0x148] sm:$0x3] }
 0x6a4   : > { %10984 = vmatmul.msk.f32.gmra.mxu2 %vm277_vm15, %v16445_v27  ;;  %v9615_v27 = vsel %vm674_vm2, %v9613_v36, %v9614_v44  ;;  %v8945_v44 = vadd.f32 %v16701_v49, %v8788_v10  ;;  %v17654_v36 = vld [vmem:[#allocation23_spill] sm:$0xff] }
 0x6a6   : > { %v8749_v30 = vpop.f32.mrf.mxu3  ;;  %v16720_v45 = vpop.f32.mrf.mxu1 }
 0x6a7   : > { %v8608_v43 = vpop.f32.mrf.mxu2  ;;  %11020 = vmatmul.msk.f32.gmra.mxu0 %vm277_vm15, %v9458_v14 }
 0x6a8   : > { %v16718_v37 = vpop.f32.mrf.mxu0  ;;  %v8609_v15 = vadd.f32 %v8608_v43, %v17652_v57  ;;  %v9464_v43 = vrot.slane %v9292_v38, 1 }
 0x6a9   : > { %11038 = vmatmul.msk.f32.gmra.mxu1 %vm277_vm15, %v9615_v27 }
 0x6aa   : > { %v8789_v21 = vadd.f32 %v8749_v30, %v8609_v15  ;;  %11003 = vmatmul.msk.f32.gmra.mxu3 %vm277_vm15, %v9288_v29  ;;  %v9618_v29 = vrot.slane %v9290_v51, 2  ;;  %v16763_v30 = vadd.f32 %v16703_v8, %v8945_v44 }
 0x6ac   : > { %10985 = vmatmul.msk.f32.gmra.mxu2 %vm277_vm15, %v17653_v3  ;;  %v8946_v3 = vadd.f32 %v16718_v37, %v8789_v21 }
 0x6ae   : > { %v8752_v41 = vpop.f32.mrf.mxu3  ;;  %v16736_v50 = vpop.f32.mrf.mxu1  ;;  %v16779_v35 = vadd.f32 %v16720_v45, %v8946_v3  ;;  %v17656_v3 = vld [vmem:[#allocation26_spill] sm:$0xff] }
 0x6af   : > { %v8611_v40 = vpop.f32.mrf.mxu2  ;;  %11021 = vmatmul.msk.f32.gmra.mxu0 %vm277_vm15, %v9460_v2  ;;  %v9624_v2 = vrot.slane %v9294_v62, 2 }
 0x6b0   : > { %v16734_v18 = vpop.f32.mrf.mxu0  ;;  %v8612_v56 = vadd.f32 %v8611_v40, %v16434_v34  ;;  %v9462_v34 = vrot.slane %v9291_v12, 1  ;;  %v9623_v40 = vrot.slane %v9293_v13, 2 }
 0x6b1   : > { %11039 = vmatmul.msk.f32.gmra.mxu1 %vm277_vm15, %v9617_v52 }
 0x6b2   : > { %v8790_v54 = vadd.f32 %v8752_v41, %v8612_v56  ;;  %11004 = vmatmul.msk.f32.gmra.mxu3 %vm277_vm15, %v9290_v51  ;;  %v9463_v11 = vsel %vm436_vm1, %v9461_v0, %v9462_v34  ;;  %v9465_v49 = vsel %vm436_vm1, %v9462_v34, %v9464_v43  ;;  %v9467_v41 = vrot.slane %v9294_v62, 1  ;;  %v17655_v34 = vld [vmem:[#allocation39_spill] sm:$0xff] }
 0x6b4   : > { %10986 = vmatmul.msk.f32.gmra.mxu2 %vm277_vm15, %v16484_v42  ;;  %v9620_v42 = vsel %vm674_vm2, %v9618_v29, %v9619_v55  ;;  %v8947_v45 = vadd.f32 %v16734_v18, %v8790_v54 }
 0x6b6   : > { %v8755_v20 = vpop.f32.mrf.mxu3  ;;  %v16752_v19 = vpop.f32.mrf.mxu1  ;;  %v16795_v0 = vadd.f32 %v16736_v50, %v8947_v45 }
 0x6b7   : > { %v8614_v7 = vpop.f32.mrf.mxu2  ;;  %11022 = vmatmul.msk.f32.gmra.mxu0 %vm277_vm15, %v9463_v11 }
 0x6b8   : > { %v16750_v28 = vpop.f32.mrf.mxu0  ;;  %v8615_v22 = vadd.f32 %v8614_v7, %v16454_v58  ;;  %v9621_v58 = vrot.slane %v9292_v38, 2  ;;  %v9297_v38 = vld [vmem:[#allocation3 + $0x170] sm:$0xff] }
 0x6b9   : > { %11040 = vmatmul.msk.f32.gmra.mxu1 %vm277_vm15, %v9620_v42  ;;  %v9296_v42 = vld [vmem:[#allocation3 + $0x168] sm:$0xff] }
 0x6ba   : > { %v8791_v17 = vadd.f32 %v8755_v20, %v8615_v22  ;;  %11005 = vmatmul.msk.f32.gmra.mxu3 %vm277_vm15, %v9291_v12  ;;  %v9622_v8 = vsel %vm674_vm2, %v9619_v55, %v9621_v58  ;;  %v9295_v55 = vld [vmem:[#allocation3 + $0x160] sm:$0x3]  ;;  %v9472_v58 = vrot.slane %v9297_v38, 1 }
 0x6bb   : > { %v9626_v11 = vrot.slane %v9295_v55, 2 }
 0x6bc   : > { %10987 = vmatmul.msk.f32.gmra.mxu2 %vm277_vm15, %v17654_v36  ;;  %v8948_v44 = vadd.f32 %v16750_v28, %v8791_v17 }
 0x6bd   : > { %v9627_v50 = vsel %vm674_vm2, %v9624_v2, %v9626_v11 }
 0x6be   : > { %v8758_v57 = vpop.f32.mrf.mxu3  ;;  %v16768_v15 = vpop.f32.mrf.mxu1  ;;  %v16811_v43 = vadd.f32 %v16752_v19, %v8948_v44 }
 0x6bf   : > { %v8617_v27 = vpop.f32.mrf.mxu2  ;;  %11023 = vmatmul.msk.f32.gmra.mxu0 %vm277_vm15, %v9465_v49 }
 0x6c0   : > { %v16766_v14 = vpop.f32.mrf.mxu0  ;;  %v8618_v10 = vadd.f32 %v8617_v27, %v16472_v63  ;;  %v9466_v63 = vrot.slane %v9293_v13, 1  ;;  %v9629_v27 = vrot.slane %v9297_v38, 2 }
 0x6c1   : > { %11041 = vmatmul.msk.f32.gmra.mxu1 %vm277_vm15, %v9622_v8 }
 0x6c2   : > { %v8792_v24 = vadd.f32 %v8758_v57, %v8618_v10  ;;  %11006 = vmatmul.msk.f32.gmra.mxu3 %vm277_vm15, %v9293_v13  ;;  %v9468_v21 = vsel %vm436_vm1, %v9466_v63, %v9467_v41  ;;  %v9628_v57 = vrot.slane %v9296_v42, 2  ;;  %v9298_v63 = vld [vmem:[#allocation3 + $0x178] sm:$0x3] }
 0x6c4   : > { %10988 = vmatmul.msk.f32.gmra.mxu2 %vm277_vm15, %v16523_v4  ;;  %v9625_v4 = vsel %vm674_vm2, %v9623_v40, %v9624_v2  ;;  %v8949_v19 = vadd.f32 %v16766_v14, %v8792_v24 }
 0x6c6   : > { %v8761_v52 = vpop.f32.mrf.mxu3  ;;  %v16784_v12 = vpop.f32.mrf.mxu1 }
 0x6c7   : > { %v8620_v37 = vpop.f32.mrf.mxu2  ;;  %11024 = vmatmul.msk.f32.gmra.mxu0 %vm277_vm15, %v9468_v21 }
 0x6c8   : > { %v16782_v56 = vpop.f32.mrf.mxu0  ;;  %v8621_v59 = vadd.f32 %v8620_v37, %v16494_v6  ;;  %v9469_v6 = vrot.slane %v9295_v55, 1  ;;  %v9631_v37 = vrot.slane %v9298_v63, 2  ;;  %v9158_v55 = vrot.slane %v16607_v5, 2 }
 0x6c9   : > { %11042 = vmatmul.msk.f32.gmra.mxu1 %vm277_vm15, %v9625_v4 }
 0x6ca   : > { %v8793_v51 = vadd.f32 %v8761_v52, %v8621_v59  ;;  %11007 = vmatmul.msk.f32.gmra.mxu3 %vm277_vm15, %v9294_v62  ;;  %v9470_v54 = vsel %vm436_vm1, %v9467_v41, %v9469_v6  ;;  %v16825_v41 = vadd.f32 %v16768_v15, %v8949_v19  ;;  %v9632_v59 = vsel %vm674_vm2, %v9629_v27, %v9631_v37 }
 0x6cc   : > { %10989 = vmatmul.msk.f32.gmra.mxu2 %vm277_vm15, %v17655_v34  ;;  %v8950_v15 = vadd.f32 %v16782_v56, %v8793_v51 }
 0x6ce   : > { %v8764_v20 = vpop.f32.mrf.mxu3  ;;  %v16800_v7 = vpop.f32.mrf.mxu1  ;;  %v16841_v45 = vadd.f32 %v16784_v12, %v8950_v15  ;;  %v9301_v12 = vld [vmem:[#allocation3 + $0x190] sm:$0x3] }
 0x6cf   : > { %v8623_v18 = vpop.f32.mrf.mxu2  ;;  %11025 = vmatmul.msk.f32.gmra.mxu0 %vm277_vm15, %v9470_v54  ;;  %v17657_v54 = vld [vmem:[#allocation35_spill] sm:$0xff] }
 0x6d0   : > { %v16798_v29 = vpop.f32.mrf.mxu0  ;;  %v8624_v22 = vadd.f32 %v8623_v18, %v16511_v31  ;;  %v9471_v31 = vrot.slane %v9296_v42, 1 }
 0x6d1   : > { %11043 = vmatmul.msk.f32.gmra.mxu1 %vm277_vm15, %v9627_v50 }
 0x6d2   : > { %v8794_v36 = vadd.f32 %v8764_v20, %v8624_v22  ;;  %11008 = vmatmul.msk.f32.gmra.mxu3 %vm277_vm15, %v9296_v42  ;;  %v9473_v17 = vsel %vm436_vm1, %v9471_v31, %v9472_v58  ;;  %v9636_v22 = vrot.slane %v9301_v12, 2  ;;  %v9302_v31 = vld [vmem:[#allocation3 + $0x198] sm:$0xff] }
 0x6d4   : > { %10990 = vmatmul.msk.f32.gmra.mxu2 %vm277_vm15, %v16562_v25  ;;  %v9630_v25 = vsel %vm674_vm2, %v9628_v57, %v9629_v27  ;;  %v8951_v11 = vadd.f32 %v16798_v29, %v8794_v36 }
 0x6d6   : > { %v8767_v10 = vpop.f32.mrf.mxu3  ;;  %v16814_v13 = vpop.f32.mrf.mxu1 }
 0x6d7   : > { %v8626_v28 = vpop.f32.mrf.mxu2  ;;  %11026 = vmatmul.msk.f32.gmra.mxu0 %vm277_vm15, %v9473_v17 }
 0x6d8   : > { %v8924_v49 = vpop.f32.mrf.mxu0  ;;  %v8627_v8 = vadd.f32 %v8626_v28, %v16533_v61  ;;  %v9474_v61 = vrot.slane %v9298_v63, 1 }
 0x6d9   : > { %11044 = vmatmul.msk.f32.gmra.mxu1 %vm277_vm15, %v9630_v25 }
 0x6da   : > { %v8795_v62 = vadd.f32 %v8767_v10, %v8627_v8  ;;  %11009 = vmatmul.msk.f32.gmra.mxu3 %vm277_vm15, %v9297_v38  ;;  %v9475_v24 = vsel %vm436_vm1, %v9472_v58, %v9474_v61  ;;  %v9303_v38 = vld [vmem:[#allocation3 + $0x1a0] sm:$0xff]  ;;  %v9638_v10 = vrot.slane %v9302_v31, 2 }
 0x6db   : > { %v9482_v57 = vrot.slane %v9303_v38, 1  ;;  %v9639_v28 = vrot.slane %v9303_v38, 2 }
 0x6dc   : > { %10991 = vmatmul.msk.f32.gmra.mxu2 %vm277_vm15, %v17656_v3  ;;  %v8952_v58 = vadd.f32 %v8924_v49, %v8795_v62  ;;  %v9304_v62 = vld [vmem:[#allocation3 + $0x1a8] sm:$0x3] }
 0x6dd   : > { %v9640_v19 = vsel %vm674_vm2, %v9638_v10, %v9639_v28  ;;  %v9641_v37 = vrot.slane %v9304_v62, 2 }
 0x6de   : > { %v8770_v2 = vpop.f32.mrf.mxu3  ;;  %v16830_v52 = vpop.f32.mrf.mxu1  ;;  %v16872_v17 = vadd.f32 %v16814_v13, %v8952_v58 }
 0x6df   : > { %v8629_v14 = vpop.f32.mrf.mxu2  ;;  %11027 = vmatmul.msk.f32.gmra.mxu0 %vm277_vm15, %v9475_v24 }
 0x6e0   : > { %v16828_v40 = vpop.f32.mrf.mxu0  ;;  %v8630_v21 = vadd.f32 %v8629_v14, %v16551_v23  ;;  %v9634_v23 = vrot.slane %v16598_v32, 2 }
 0x6e1   : > { %11045 = vmatmul.msk.f32.gmra.mxu1 %vm277_vm15, %v9632_v59 }
 0x6e2   : > { %v8796_v4 = vadd.f32 %v8770_v2, %v8630_v21  ;;  %11010 = vmatmul.msk.f32.gmra.mxu3 %vm277_vm15, %v16607_v5  ;;  %v16860_v5 = vadd.f32 %v16800_v7, %v8951_v11  ;;  %v9637_v7 = vsel %vm674_vm2, %v9634_v23, %v9636_v22  ;;  %v9484_v2 = vrot.slane %v9304_v62, 1 }
 0x6e4   : > { %10992 = vmatmul.msk.f32.gmra.mxu2 %vm277_vm15, %v16603_v53  ;;  %v9635_v53 = vsel %vm674_vm2, %v9158_v55, %v9634_v23  ;;  %v8953_v13 = vadd.f32 %v16828_v40, %v8796_v4  ;;  %v9642_v40 = vsel %vm674_vm2, %v9639_v28, %v9641_v37 }
 0x6e6   : > { %v8773_v6 = vpop.f32.mrf.mxu3  ;;  %v16849_v56 = vpop.f32.mrf.mxu1  ;;  %v16885_v14 = vadd.f32 %v16830_v52, %v8953_v13 }
 0x6e7   : > { %v8632_v51 = vpop.f32.mrf.mxu2  ;;  %11028 = vmatmul.msk.f32.gmra.mxu0 %vm277_vm15, %v16626_v60 }
 0x6e8   : > { %v16846_v34 = vpop.f32.mrf.mxu0  ;;  %v8633_v20 = vadd.f32 %v8632_v51, %v16571_v39  ;;  %v9479_v39 = vrot.slane %v9301_v12, 1 }
 0x6e9   : > { %11046 = vmatmul.msk.f32.gmra.mxu1 %vm277_vm15, %v9635_v53 }
 0x6ea   : > { %v8797_v18 = vadd.f32 %v8773_v6, %v8633_v20  ;;  %11011 = vmatmul.msk.f32.gmra.mxu3 %vm277_vm15, %v16598_v32  ;;  %v9480_v29 = vsel %vm436_vm1, %v16614_v48, %v9479_v39  ;;  %v9481_v32 = vrot.slane %v9302_v31, 1  ;;  %v9161_v48 = vrot.slane %v16630_v33, 2 }
 0x6ec   : > { %10993 = vmatmul.msk.f32.gmra.mxu2 %vm277_vm15, %v17657_v54  ;;  %v9483_v8 = vsel %vm436_vm1, %v9481_v32, %v9482_v57  ;;  %v9162_v61 = vsel %vm674_vm2, %v9634_v23, %v9161_v48  ;;  %v8954_v23 = vadd.f32 %v16846_v34, %v8797_v18  ;;  %v16903_v34 = vld [vmem:[%s17033_s6] ss:$0 sm:$0xff] }
 0x6ee   : > { %v8776_v42 = vpop.f32.mrf.mxu3  ;;  %v9098_v50 = vpop.f32.mrf.mxu1  ;;  %v16895_v55 = vadd.f32 %v16849_v56, %v8954_v23 }
 0x6ef   : > { %v8635_v44 = vpop.f32.mrf.mxu2  ;;  %11029 = vmatmul.msk.f32.gmra.mxu0 %vm277_vm15, %v9480_v29 }
 0x6f0   : > { %v8933_v60 = vpop.f32.mrf.mxu0  ;;  %v8636_v36 = vadd.f32 %v8635_v44, %v16590_v1  ;;  %v16915_v44 = vld [vmem:[%s17033_s6 + $0x2] ss:$0 sm:$0xff] }
 0x6f1   : > { %11047 = vmatmul.msk.f32.gmra.mxu1 %vm277_vm15, %v9637_v7 }
 0x6f2   : > { %v8798_v27 = vadd.f32 %v8776_v42, %v8636_v36  ;;  %11012 = vmatmul.msk.f32.gmra.mxu3 %vm277_vm15, %v9302_v31 }
 0x6f4   : > { %10994 = vmatmul.msk.f32.gmra.mxu2 %vm277_vm15, %v9635_v53  ;;  %v8955_v11 = vadd.f32 %v8933_v60, %v8798_v27 }
 0x6f6   : > { %v8779_v49 = vpop.f32.mrf.mxu3  ;;  %v9101_v25 = vpop.f32.mrf.mxu1  ;;  %v16898_v39 = vadd.f32 %v9098_v50, %v8955_v11 }
 0x6f7   : > { %v8638_v3 = vpop.f32.mrf.mxu2  ;;  %11030 = vmatmul.msk.f32.gmra.mxu0 %vm277_vm15, %v9483_v8 }
 0x6f8   : > { %v8936_v1 = vpop.f32.mrf.mxu0  ;;  %v8639_v63 = vadd.f32 %v8638_v3, %v16618_v26  ;;  %v9485_v26 = vsel %vm436_vm1, %v9482_v57, %v9484_v2 }
 0x6f9   : > { %11048 = vmatmul.msk.f32.gmra.mxu1 %vm277_vm15, %v9640_v19 }
 0x6fa   : > { %v8799_v33 = vadd.f32 %v8779_v49, %v8639_v63  ;;  %11013 = vmatmul.msk.f32.gmra.mxu3 %vm277_vm15, %v9303_v38  ;;  %v16908_v38 = vld [vmem:[%s17033_s6 + $0x1] ss:$0 sm:$0xff] }
 0x6fc   : > { %10995 = vmatmul.msk.f32.gmra.mxu2 %vm277_vm15, %v9162_v61  ;;  %v8956_v29 = vadd.f32 %v8936_v1, %v8799_v33 }
 0x6fe   : > { %v8782_v21 = vpop.f32.mrf.mxu3  ;;  %v9104_v59 = vpop.f32.mrf.mxu1  ;;  %v16918_v31 = vadd.f32 %v9101_v25, %v8956_v29 }
 0x6ff   : > { %v8641_v15 = vpop.f32.mrf.mxu2  ;;  %11031 = vmatmul.msk.f32.gmra.mxu0 %vm277_vm15, %v9485_v26 }
 0x700   : > { %v8939_v24 = vpop.f32.mrf.mxu0  ;;  %v8642_v4 = vadd.f32 %v8641_v15, %v16641_v16 }
 0x701   : > { %11049 = vmatmul.msk.f32.gmra.mxu1 %vm277_vm15, %v9642_v40 }
 0x702   : > { %v8800_v52 = vadd.f32 %v8782_v21, %v8642_v4 }
 0x704   : > { %v8957_v49 = vadd.f32 %v8939_v24, %v8800_v52 }
 0x706   : > { %v9374_v51 = vpop.f32.mrf.mxu3  ;;  %v9696_v20 = vpop.f32.mrf.mxu1  ;;  %v16924_v62 = vadd.f32 %v9104_v59, %v8957_v49 }
 0x707   : > { %v9216_v53 = vpop.f32.mrf.mxu2 }
 0x708   : > { %v9539_v6 = vpop.f32.mrf.mxu0  ;;  %v9264_v12 = vadd.f32 %v9216_v53, %v16715_v47 }
 0x70a   : > { %v9422_v54 = vadd.f32 %v9374_v51, %v9264_v12 }
 0x70c   : > { %v9587_v16 = vadd.f32 %v9539_v6, %v9422_v54 }
 0x70e   : > { %v9744_v22 = vadd.f32 %v9696_v20, %v9587_v16  ;;  %v9377_v56 = vpop.f32.mrf.mxu3  ;;  %v9699_v42 = vpop.f32.mrf.mxu1 }
 0x70f   : > { %v9219_v47 = vpop.f32.mrf.mxu2 }
 0x710   : > { %v9542_v18 = vpop.f32.mrf.mxu0  ;;  %v9265_v60 = vadd.f32 %v9219_v47, %v16731_v9  ;;  %v9764_v50 = vmul.f32 %v16903_v34, %v9744_v22 }
 0x712   : > { %v9423_v36 = vadd.f32 %v9377_v56, %v9265_v60  ;;  %v9784_v7 = vadd.f32 %v16908_v38, %v9764_v50 }
 0x714   : > { %v9588_v58 = vadd.f32 %v9542_v18, %v9423_v36  ;;  %vm9800_vm1 = vcmp.gt.f32.partialorder %v9784_v7, 0.0  ;;  %v9820_v32 = vmul.f32 %v16915_v44, %v9784_v7 }
 0x716   : > { %v9745_v27 = vadd.f32 %v9699_v42, %v9588_v58  ;;  %v9380_v9 = vpop.f32.mrf.mxu3  ;;  %v9702_v10 = vpop.f32.mrf.mxu1  ;;  %v9836_v28 = vsel %vm9800_vm1, %v9784_v7, %v9820_v32 }
 0x717   : > { %v9222_v48 = vpop.f32.mrf.mxu2  ;;  %9852 = vxpose.xlu2.b32.start [1/16] (narrow) %v9836_v28, 8 }
 0x718   : > { %v9545_v57 = vpop.f32.mrf.mxu0  ;;  %v9266_v8 = vadd.f32 %v9222_v48, %v16747_v46  ;;  %v9765_v1 = vmul.f32 %v16903_v34, %v9745_v27 }
 0x71a   : > { %v9424_v19 = vadd.f32 %v9380_v9, %v9266_v8  ;;  %v9785_v25 = vadd.f32 %v16908_v38, %v9765_v1 }
 0x71c   : > { %v9589_v3 = vadd.f32 %v9545_v57, %v9424_v19  ;;  %vm9801_vm2 = vcmp.gt.f32.partialorder %v9785_v25, 0.0  ;;  %v9821_v63 = vmul.f32 %v16915_v44, %v9785_v25 }
 0x71e   : > { %v9746_v61 = vadd.f32 %v9702_v10, %v9589_v3  ;;  %v9383_v2 = vpop.f32.mrf.mxu3  ;;  %v9705_v33 = vpop.f32.mrf.mxu1  ;;  %v9837_v37 = vsel %vm9801_vm2, %v9785_v25, %v9821_v63 }
 0x71f   : > { %v9225_v26 = vpop.f32.mrf.mxu2  ;;  %9853 = vxpose.xlu2.b32.cont [2/16] (narrow) %v9837_v37, 8 }
 0x720   : > { %v9548_v13 = vpop.f32.mrf.mxu0  ;;  %v9267_v46 = vadd.f32 %v9225_v26, %v16763_v30  ;;  %v9766_v24 = vmul.f32 %v16903_v34, %v9746_v61 }
 0x722   : > { %v9425_v21 = vadd.f32 %v9383_v2, %v9267_v46  ;;  %v9786_v40 = vadd.f32 %v16908_v38, %v9766_v24 }
 0x724   : > { %v9590_v59 = vadd.f32 %v9548_v13, %v9425_v21  ;;  %vm9802_vm15 = vcmp.gt.f32.partialorder %v9786_v40, 0.0  ;;  %v9822_v15 = vmul.f32 %v16915_v44, %v9786_v40 }
 0x726   : > { %v9747_v23 = vadd.f32 %v9705_v33, %v9590_v59  ;;  %v9386_v52 = vpop.f32.mrf.mxu3  ;;  %v9708_v6 = vpop.f32.mrf.mxu1  ;;  %v9838_v51 = vsel %vm9802_vm15, %v9786_v40, %v9822_v15 }
 0x727   : > { %v9228_v20 = vpop.f32.mrf.mxu2  ;;  %9854 = vxpose.xlu2.b32.cont [3/16] (narrow) %v9838_v51, 8 }
 0x728   : > { %v9551_v4 = vpop.f32.mrf.mxu0  ;;  %v9268_v53 = vadd.f32 %v9228_v20, %v16779_v35  ;;  %v9767_v30 = vmul.f32 %v16903_v34, %v9747_v23 }
 0x72a   : > { %v9426_v12 = vadd.f32 %v9386_v52, %v9268_v53  ;;  %v9787_v11 = vadd.f32 %v16908_v38, %v9767_v30 }
 0x72c   : > { %v9591_v54 = vadd.f32 %v9551_v4, %v9426_v12  ;;  %vm9803_vm10 = vcmp.gt.f32.partialorder %v9787_v11, 0.0  ;;  %v9823_v16 = vmul.f32 %v16915_v44, %v9787_v11 }
 0x72e   : > { %v9748_v22 = vadd.f32 %v9708_v6, %v9591_v54  ;;  %v9389_v56 = vpop.f32.mrf.mxu3  ;;  %v9711_v42 = vpop.f32.mrf.mxu1  ;;  %v9839_v47 = vsel %vm9803_vm10, %v9787_v11, %v9823_v16 }
 0x72f   : > { %v9231_v60 = vpop.f32.mrf.mxu2  ;;  %9855 = vxpose.xlu2.b32.cont [4/16] (narrow) %v9839_v47, 8 }
 0x730   : > { %v9554_v18 = vpop.f32.mrf.mxu0  ;;  %v9269_v50 = vadd.f32 %v9231_v60, %v16795_v0  ;;  %v9768_v35 = vmul.f32 %v16903_v34, %v9748_v22 }
 0x732   : > { %v9427_v29 = vadd.f32 %v9389_v56, %v9269_v50  ;;  %v9788_v36 = vadd.f32 %v16908_v38, %v9768_v35 }
 0x734   : > { %v9592_v7 = vadd.f32 %v9554_v18, %v9427_v29  ;;  %vm9804_vm11 = vcmp.gt.f32.partialorder %v9788_v36, 0.0  ;;  %v9824_v58 = vmul.f32 %v16915_v44, %v9788_v36 }
 0x736   : > { %v9749_v57 = vadd.f32 %v9711_v42, %v9592_v7  ;;  %v9392_v27 = vpop.f32.mrf.mxu3  ;;  %v9714_v9 = vpop.f32.mrf.mxu1  ;;  %v9840_v10 = vsel %vm9804_vm11, %v9788_v36, %v9824_v58 }
 0x737   : > { %v9234_v28 = vpop.f32.mrf.mxu2  ;;  %9856 = vxpose.xlu2.b32.cont [5/16] (narrow) %v9840_v10, 8 }
 0x738   : > { %v9557_v32 = vpop.f32.mrf.mxu0  ;;  %v9270_v48 = vadd.f32 %v9234_v28, %v16811_v43  ;;  %v9769_v0 = vmul.f32 %v16903_v34, %v9749_v57 }
 0x73a   : > { %v9428_v8 = vadd.f32 %v9392_v27, %v9270_v48  ;;  %v9789_v1 = vadd.f32 %v16908_v38, %v9769_v0 }
 0x73c   : > { %v9593_v49 = vadd.f32 %v9557_v32, %v9428_v8  ;;  %vm9805_vm12 = vcmp.gt.f32.partialorder %v9789_v1, 0.0  ;;  %v9825_v19 = vmul.f32 %v16915_v44, %v9789_v1 }
 0x73e   : > { %v9750_v3 = vadd.f32 %v9714_v9, %v9593_v49  ;;  %v9395_v63 = vpop.f32.mrf.mxu3  ;;  %v9717_v13 = vpop.f32.mrf.mxu1  ;;  %v9841_v61 = vsel %vm9805_vm12, %v9789_v1, %v9825_v19 }
 0x73f   : > { %v9237_v2 = vpop.f32.mrf.mxu2  ;;  %9857 = vxpose.xlu2.b32.cont [6/16] (narrow) %v9841_v61, 8 }
 0x740   : > { %v9560_v25 = vpop.f32.mrf.mxu0  ;;  %v9271_v33 = vadd.f32 %v9237_v2, %v16825_v41  ;;  %v9770_v43 = vmul.f32 %v16903_v34, %v9750_v3 }
 0x742   : > { %v9429_v37 = vadd.f32 %v9395_v63, %v9271_v33  ;;  %v9790_v26 = vadd.f32 %v16908_v38, %v9770_v43 }
 0x744   : > { %v9594_v46 = vadd.f32 %v9560_v25, %v9429_v37  ;;  %vm9806_vm13 = vcmp.gt.f32.partialorder %v9790_v26, 0.0  ;;  %v9826_v24 = vmul.f32 %v16915_v44, %v9790_v26 }
 0x746   : > { %v9751_v40 = vadd.f32 %v9717_v13, %v9594_v46  ;;  %v9398_v59 = vpop.f32.mrf.mxu3  ;;  %v9720_v15 = vpop.f32.mrf.mxu1  ;;  %v9842_v4 = vsel %vm9806_vm13, %v9790_v26, %v9826_v24 }
 0x747   : > { %v9240_v23 = vpop.f32.mrf.mxu2  ;;  %9858 = vxpose.xlu2.b32.cont [7/16] (narrow) %v9842_v4, 8 }
 0x748   : > { %v9563_v21 = vpop.f32.mrf.mxu0  ;;  %v9272_v52 = vadd.f32 %v9240_v23, %v16841_v45  ;;  %v9771_v41 = vmul.f32 %v16903_v34, %v9751_v40 }
 0x74a   : > { %v9430_v6 = vadd.f32 %v9398_v59, %v9272_v52  ;;  %v9791_v51 = vadd.f32 %v16908_v38, %v9771_v41 }
 0x74c   : > { %v9595_v20 = vadd.f32 %v9563_v21, %v9430_v6  ;;  %vm9807_vm3 = vcmp.gt.f32.partialorder %v9791_v51, 0.0  ;;  %v9827_v53 = vmul.f32 %v16915_v44, %v9791_v51  ;;  %v5098_v6 = vpop.trf.xlu2 }
 0x74d   : > { %5114 = vst [vmem:[%s16972_s20 + $0x10] sm:$0xf] %v5098_v6 }
 0x74e   : > { %v9752_v12 = vadd.f32 %v9720_v15, %v9595_v20  ;;  %v9401_v11 = vpop.f32.mrf.mxu3  ;;  %v9723_v54 = vpop.f32.mrf.mxu1  ;;  %v9843_v16 = vsel %vm9807_vm3, %v9791_v51, %v9827_v53 }
 0x74f   : > { %v9243_v18 = vpop.f32.mrf.mxu2  ;;  %9859 = vxpose.xlu2.b32.cont [8/16] (narrow) %v9843_v16, 8  ;;  %v3475_v20 = vpop.trf.xlu1 }
 0x750   : > { %v9566_v30 = vpop.f32.mrf.mxu0  ;;  %v9273_v22 = vadd.f32 %v9243_v18, %v16860_v5  ;;  %v9772_v45 = vmul.f32 %v16903_v34, %v9752_v12  ;;  %v1888_v53 = vpop.trf.xlu0  ;;  %3491 = vst [vmem:[%s16972_s20 + $0x8] sm:$0xff] %v3475_v20 }
 0x751   : > { %1904 = vst [vmem:[%s16972_s20] sm:$0xff] %v1888_v53 }
 0x752   : > { %v9431_v56 = vadd.f32 %v9401_v11, %v9273_v22  ;;  %v9792_v42 = vadd.f32 %v16908_v38, %v9772_v45 }
 0x754   : > { %v9596_v47 = vadd.f32 %v9566_v30, %v9431_v56  ;;  %vm9808_vm4 = vcmp.gt.f32.partialorder %v9792_v42, 0.0  ;;  %v9828_v60 = vmul.f32 %v16915_v44, %v9792_v42 }
 0x756   : > { %v9753_v35 = vadd.f32 %v9723_v54, %v9596_v47  ;;  %v9404_v29 = vpop.f32.mrf.mxu3  ;;  %v9726_v36 = vpop.f32.mrf.mxu1  ;;  %v9844_v7 = vsel %vm9808_vm4, %v9792_v42, %v9828_v60 }
 0x757   : > { %v9246_v58 = vpop.f32.mrf.mxu2  ;;  %9860 = vxpose.xlu2.b32.cont [9/16] (narrow) %v9844_v7, 8 }
 0x758   : > { %v9569_v50 = vpop.f32.mrf.mxu0  ;;  %v9274_v32 = vadd.f32 %v9246_v58, %v16872_v17  ;;  %v9773_v5 = vmul.f32 %v16903_v34, %v9753_v35 }
 0x75a   : > { %v9432_v57 = vadd.f32 %v9404_v29, %v9274_v32  ;;  %v9793_v27 = vadd.f32 %v16908_v38, %v9773_v5 }
 0x75c   : > { %v9597_v9 = vadd.f32 %v9569_v50, %v9432_v57  ;;  %vm9809_vm5 = vcmp.gt.f32.partialorder %v9793_v27, 0.0  ;;  %v9829_v10 = vmul.f32 %v16915_v44, %v9793_v27 }
 0x75e   : > { %v9754_v48 = vadd.f32 %v9726_v36, %v9597_v9  ;;  %v9407_v0 = vpop.f32.mrf.mxu3  ;;  %v9729_v8 = vpop.f32.mrf.mxu1  ;;  %v9845_v1 = vsel %vm9809_vm5, %v9793_v27, %v9829_v10 }
 0x75f   : > { %v9249_v49 = vpop.f32.mrf.mxu2  ;;  %9861 = vxpose.xlu2.b32.cont [10/16] (narrow) %v9845_v1, 8 }
 0x760   : > { %v9572_v28 = vpop.f32.mrf.mxu0  ;;  %v9275_v19 = vadd.f32 %v9249_v49, %v16885_v14  ;;  %v9774_v17 = vmul.f32 %v16903_v34, %v9754_v48 }
 0x762   : > { %v9433_v25 = vadd.f32 %v9407_v0, %v9275_v19  ;;  %v9794_v3 = vadd.f32 %v16908_v38, %v9774_v17 }
 0x764   : > { %v9598_v63 = vadd.f32 %v9572_v28, %v9433_v25  ;;  %vm9810_vm6 = vcmp.gt.f32.partialorder %v9794_v3, 0.0  ;;  %v9830_v13 = vmul.f32 %v16915_v44, %v9794_v3  ;;  %v8333_v25 = vpop.trf.xlu1 }
 0x766   : > { %v9755_v2 = vadd.f32 %v9729_v8, %v9598_v63  ;;  %v9410_v33 = vpop.f32.mrf.mxu3  ;;  %v9846_v43 = vsel %vm9810_vm6, %v9794_v3, %v9830_v13  ;;  %v9732_v37 = vpop.f32.mrf.mxu1  ;;  %v8350_v63 = vrot.slane %v8333_v25, 4 }
 0x767   : > { %v9252_v26 = vpop.f32.mrf.mxu2  ;;  %9862 = vxpose.xlu2.b32.cont [11/16] (narrow) %v9846_v43, 8  ;;  %v6711_v3 = vpop.trf.xlu0 }
 0x768   : > { %v9575_v61 = vpop.f32.mrf.mxu0  ;;  %v9276_v14 = vadd.f32 %v9252_v26, %v16895_v55  ;;  %v9775_v46 = vmul.f32 %v16903_v34, %v9755_v2  ;;  %6727 = vst [vmem:[%s16972_s20 + $0x18] sm:$0xf] %v6711_v3 }
 0x769   : > { %8352 = vst [vmem:[%s16972_s20 + $0x10] sm:$0xf0] %v8350_v63 }
 0x76a   : > { %v9434_v24 = vadd.f32 %v9410_v33, %v9276_v14  ;;  %v9795_v21 = vadd.f32 %v16908_v38, %v9775_v46 }
 0x76c   : > { %v9599_v40 = vadd.f32 %v9575_v61, %v9434_v24  ;;  %vm9811_vm7 = vcmp.gt.f32.partialorder %v9795_v21, 0.0  ;;  %v9831_v59 = vmul.f32 %v16915_v44, %v9795_v21 }
 0x76e   : > { %v9756_v15 = vadd.f32 %v9732_v37, %v9599_v40  ;;  %v9413_v4 = vpop.f32.mrf.mxu3  ;;  %v9847_v52 = vsel %vm9811_vm7, %v9795_v21, %v9831_v59  ;;  %v9735_v30 = vpop.f32.mrf.mxu1 }
 0x76f   : > { %v9255_v41 = vpop.f32.mrf.mxu2  ;;  %9863 = vxpose.xlu2.b32.cont [12/16] (narrow) %v9847_v52, 8 }
 0x770   : > { %v9578_v23 = vpop.f32.mrf.mxu0  ;;  %v9277_v55 = vadd.f32 %v9255_v41, %v16898_v39  ;;  %v9776_v51 = vmul.f32 %v16903_v34, %v9756_v15 }
 0x772   : > { %v9435_v12 = vadd.f32 %v9413_v4, %v9277_v55  ;;  %v9796_v11 = vadd.f32 %v16908_v38, %v9776_v51 }
 0x774   : > { %v9600_v54 = vadd.f32 %v9578_v23, %v9435_v12  ;;  %vm9812_vm8 = vcmp.gt.f32.partialorder %v9796_v11, 0.0  ;;  %v9832_v39 = vmul.f32 %v16915_v44, %v9796_v11 }
 0x776   : > { %v9757_v16 = vadd.f32 %v9735_v30, %v9600_v54  ;;  %v9848_v18 = vsel %vm9812_vm8, %v9796_v11, %v9832_v39  ;;  %v9416_v22 = vpop.f32.mrf.mxu3  ;;  %v9738_v60 = vpop.f32.mrf.mxu1 }
 0x777   : > { %v9258_v45 = vpop.f32.mrf.mxu2  ;;  %9864 = vxpose.xlu2.b32.cont [13/16] (narrow) %v9848_v18, 8 }
 0x778   : > { %v9581_v56 = vpop.f32.mrf.mxu0  ;;  %v9278_v42 = vadd.f32 %v9258_v45, %v16918_v31  ;;  %v9777_v47 = vmul.f32 %v16903_v34, %v9757_v16 }
 0x77a   : > { %v9436_v50 = vadd.f32 %v9416_v22, %v9278_v42  ;;  %v9797_v35 = vadd.f32 %v16908_v38, %v9777_v47 }
 0x77c   : > { %v9601_v29 = vadd.f32 %v9581_v56, %v9436_v50  ;;  %vm9813_vm14 = vcmp.gt.f32.partialorder %v9797_v35, 0.0  ;;  %v9833_v36 = vmul.f32 %v16915_v44, %v9797_v35 }
 0x77e   : > { %v9758_v7 = vadd.f32 %v9738_v60, %v9601_v29  ;;  %v9849_v58 = vsel %vm9813_vm14, %v9797_v35, %v9833_v36  ;;  %v9419_v5 = vpop.f32.mrf.mxu3  ;;  %v9741_v28 = vpop.f32.mrf.mxu1 }
 0x77f   : > { %v9261_v32 = vpop.f32.mrf.mxu2  ;;  %9865 = vxpose.xlu2.b32.cont [14/16] (narrow) %v9849_v58, 8 }
 0x780   : > { %v9778_v57 = vmul.f32 %v16903_v34, %v9758_v7  ;;  %v9279_v27 = vadd.f32 %v9261_v32, %v16924_v62  ;;  %v9584_v31 = vpop.f32.mrf.mxu0 }
 0x782   : > { %v9798_v9 = vadd.f32 %v16908_v38, %v9778_v57  ;;  %v9437_v10 = vadd.f32 %v9419_v5, %v9279_v27 }
 0x784   : > { %v9602_v48 = vadd.f32 %v9584_v31, %v9437_v10  ;;  %vm9814_vm0 = vcmp.gt.f32.partialorder %v9798_v9, 0.0  ;;  %v9834_v0 = vmul.f32 %v16915_v44, %v9798_v9 }
 0x786   : > { %v9759_v8 = vadd.f32 %v9741_v28, %v9602_v48  ;;  %v9850_v1 = vsel %vm9814_vm0, %v9798_v9, %v9834_v0 }
 0x787   : > { %9866 = vxpose.xlu2.b32.cont [15/16] (narrow) %v9850_v1, 8 }
 0x788   : > { %v9779_v49 = vmul.f32 %v16903_v34, %v9759_v8 }
 0x78a   : > { %v9799_v62 = vadd.f32 %v16908_v38, %v9779_v49 }
 0x78c   : > { %vm9815_vm9 = vcmp.gt.f32.partialorder %v9799_v62, 0.0  ;;  %v9835_v19 = vmul.f32 %v16915_v44, %v9799_v62 }
 0x78e   : > { %v9851_v17 = vsel %vm9815_vm9, %v9799_v62, %v9835_v19 }
 0x78f   : > { %9867 = vxpose.xlu2.b32.end [16/16] (narrow) %v9851_v17, 8 }
 0x7b0   : > { %v9868_v34 = vpop.trf.xlu2 }
 0x7b1   : > { %v9885_v38 = vrot.slane %v9868_v34, 4 }
 0x7b3   : > { %9887 = vst [vmem:[%s16972_s20 + $0x18] sm:$0xf0] %v9885_v38 }
 0x7b4   : > { %11184 = shalt.err (!%p11181_p3)
}
 0x7b5   : > { %s11224_s18 = smov 256   ;;  %s11225_s20 = smov 16  }
 0x7b6   : > { %11061 = dma.vmem_to_hbm [thread:$0]  (%p11304_p5), %s9902_s13, 512, %s9904_s22, %s9889_s15, %s11224_s18, %s11224_s18, %s11225_s20  }
 0x7b7 PF: > { %p11067_p4 = scmp.ge.s32.totalorder %s11219_s27, 2  ;;  %s9918_s29 = sand.u32 1, %s11207_s24  }
 0x7b8   : > { %s9919_s8 = scalar_lea.sflag [#allocation5], %s9918_s29 }
 0x7b9   : > { %p11064_p7 = pnand %p11067_p4, %p11308_p6 }
 0x7bb   : > { %p11065_p8 = pneg %p11064_p7 }
 0x7bd   : > { %11202 = dma.done.wait (%p11065_p8), %s9919_s8, 512  }
 0x7be   : > { %11204 = vsyncadd (%p11065_p8), %s9919_s8, 4294966784  ;;  %p17_p9 = scmp.ge.s32.totalorder %s11291_s30, 4   ;;  %s17658_s24 = smov %s11211_s25 }
 0x7bf   : > { %s17659_s25 = smov %s11215_s26  ;;  %s17660_s26 = smov %s11302_s10 }
 0x7c0   : > { %s17661_s27 = smov %s11291_s30  ;;  %19 = sbr.rel (!%p17_p9) target bundleno = 3 (0x3), region = 128 }
 0x7c5   :  { %9925 = vsyncpa [#allocation5], 1 }
 0x7c6   :  { %9927 = vsyncpa [#allocation5 + $0x1], 1 }

</bundles_post_ra>
